<compile_context>
chip_gen: v7x
topology: tpu7x:2x2x1
jax: 0.10.0
libtpu: 0.0.40
codegen_flags: <defaults>
</compile_context>

<pallas_src>
import functools

import jax
import jax.numpy as jnp
from jax.experimental import pallas as pl
from jax.experimental.pallas import tpu as pltpu


# ----------------------------------------------------------------------------
# Kernel 1: fused bidirectional GRU (one direction per grid step)
# ----------------------------------------------------------------------------
def bigru_kernel(x_ref, wi_ref, wh_ref, bi_ref, bh_ref, out_ref,
                 *, seq_len, batch, hidden):
    """One GRU direction over the whole sequence.

    x_ref:  (S*Bp, E)  time-major, batch padded to Bp (already reversed for bwd)
    wi_ref: (E, 3H)    wh_ref: (H, 3H)    bi_ref/bh_ref: (1, 3H)
    out_ref:(S*Bp, H)  hidden states in iteration order
    """
    S, Bp, H = seq_len, batch, hidden

    # Hoisted input projection: one (S*Bp, E) x (E, 3H) matmul.
    gi = jnp.dot(x_ref[...], wi_ref[...],
                 preferred_element_type=jnp.float32) + bi_ref[...]

    wh = wh_ref[...]
    bh = bh_ref[...]
    h = jnp.zeros((Bp, H), jnp.float32)

    for s in range(S):                       # static unroll (S is small)
        gi_t = gi[s * Bp:(s + 1) * Bp]       # aligned 8-row slice
        gh = jnp.dot(h, wh, preferred_element_type=jnp.float32) + bh
        r = jax.nn.sigmoid(gi_t[:, :H] + gh[:, :H])
        z = jax.nn.sigmoid(gi_t[:, H:2 * H] + gh[:, H:2 * H])
        n = jnp.tanh(gi_t[:, 2 * H:] + r * gh[:, 2 * H:])
        h = (1.0 - z) * n + z * h
        out_ref[s * Bp:(s + 1) * Bp, :] = h


def bigru(x_bse, gp):
    """Bidirectional GRU with batch_first semantics (nn.GRU bidirectional=True)."""
    B, S, E = x_bse.shape
    H = gp['wh'].shape[1]
    Bp = ((B + 7) // 8) * 8                                   # pad batch to sublanes

    x = jnp.transpose(x_bse, (1, 0, 2))                       # (S, B, E) time-major
    x = jnp.pad(x, ((0, 0), (0, Bp - B), (0, 0)))             # (S, Bp, E)
    x_fwd = x.reshape(S * Bp, E)
    x_bwd = x[::-1].reshape(S * Bp, E)
    x2 = jnp.stack([x_fwd, x_bwd], axis=0)                    # (2, S*Bp, E)

    out = pl.pallas_call(
        functools.partial(bigru_kernel, seq_len=S, batch=Bp, hidden=H),
        out_shape=jax.ShapeDtypeStruct((2, S * Bp, H), jnp.float32),
        grid=(2,),
        in_specs=[
            pl.BlockSpec((None, S * Bp, E), lambda d: (d, 0, 0)),
            pl.BlockSpec((None, E, 3 * H), lambda d: (d, 0, 0)),
            pl.BlockSpec((None, H, 3 * H), lambda d: (d, 0, 0)),
            pl.BlockSpec((None, 1, 3 * H), lambda d: (d, 0, 0)),
            pl.BlockSpec((None, 1, 3 * H), lambda d: (d, 0, 0)),
        ],
        out_specs=pl.BlockSpec((None, S * Bp, H), lambda d: (d, 0, 0)),
        compiler_params=pltpu.CompilerParams(dimension_semantics=("parallel",)),
    )(x2, gp['wi'], gp['wh'], gp['bi'], gp['bh'])

    out = out.reshape(2, S, Bp, H)[:, :, :B, :]               # drop batch padding
    hf = out[0]                                               # (S, B, H) forward
    hb = out[1][::-1]                                         # backward, back to time order
    y = jnp.concatenate([hf, hb], axis=-1)                    # (S, B, 2H)
    return jnp.transpose(y, (1, 0, 2))                        # (B, S, 2H)


# ----------------------------------------------------------------------------
# Kernel 2: fused attention pools + all W_A_* / W_B_* / V_* projections
# ----------------------------------------------------------------------------
def phn_pool_proj_kernel(a3_ref, q_ref, t_ref, a2_ref, q2_ref, t2_ref,
                         v_ref, w_ref, b_ref,
                         a_pool_ref, st_ref, u_a_ref, u_q_ref,
                         tk_ref, qm_ref, an_ref, wmq_ref, wna_ref):
    """a3: (B3,A,D2)  q: (B,Q,D2)  t: (B,T,D2)  (a2/q2/t2 are row-flattened copies)
    v_ref: (5,1,D2)  [a_attention, V_t, V_h, V_q, V_a]
    w_ref: (5,D2,H)  b_ref: (5,1,H)  [W_A_t, W_A_h, W_B_t, W_B_q, W_B_a]
    """
    a3 = a3_ref[...]
    q = q_ref[...]
    t = t_ref[...]

    def leaky(x):
        return jnp.where(x >= 0.0, x, 0.01 * x)

    def vscore(x, v):                       # (N,S,D) x (1,D) -> (N,S)
        return jnp.sum(x * v.reshape(1, 1, -1), axis=-1)

    def pool(x, s):                         # (N,S,D),(N,S) -> (N,D)
        return jnp.sum(s[:, :, None] * x, axis=1)

    # answer attention pooling (softmax over answer tokens)
    s_a = jax.nn.softmax(vscore(a3, v_ref[0]), axis=1)
    a_pool_ref[...] = pool(a3, s_a)

    # passage summary -> st
    t_sum = pool(t, vscore(t, v_ref[1]))
    st_ref[...] = leaky(jnp.dot(t_sum, w_ref[0],
                                preferred_element_type=jnp.float32) + b_ref[0])

    # [q ; a] summary, split into q part and a part (W_A_h is linear)
    q_part = pool(q, vscore(q, v_ref[2]))            # (B, D2)
    a_part = pool(a3, vscore(a3, v_ref[2]))          # (B3, D2)
    u_q_ref[...] = jnp.dot(q_part, w_ref[1],
                           preferred_element_type=jnp.float32) + b_ref[1]
    u_a_ref[...] = jnp.dot(a_part, w_ref[1],
                           preferred_element_type=jnp.float32)

    # word-level projections (computed once; NOT repeated per answer)
    tk_ref[...] = leaky(jnp.dot(t2_ref[...], w_ref[2],
                                preferred_element_type=jnp.float32) + b_ref[2])
    qm_ref[...] = leaky(jnp.dot(q2_ref[...], w_ref[3],
                                preferred_element_type=jnp.float32) + b_ref[3])
    an_ref[...] = leaky(jnp.dot(a2_ref[...], w_ref[4],
                                preferred_element_type=jnp.float32) + b_ref[4])

    # V_q / V_a token scores
    wmq_ref[...] = vscore(q, v_ref[3])               # (B, Q)
    wna_ref[...] = vscore(a3, v_ref[4])              # (B3, A)


# ----------------------------------------------------------------------------
# Kernel 3: fused matching (3 positional variants share cosine sims) + score
# ----------------------------------------------------------------------------
def phn_match_score_kernel(tk3_ref, qm3_ref, an_ref, wmq_ref, wna_ref, pos_ref,
                           st_ref, shp_ref, aemb_ref, wa_ref, mlp_ref,
                           P_ref, E_ref, score_ref):
    """tk3/qm3/an: (B3,T,H)/(B3,Q,H)/(B3,A,H);  wmq/wna: (B3,Q)/(B3,A)
    pos_ref: (3,B3,T) positional weights (ones / position_t / dep-permuted pos_t2)
    st: (B,H)  shp: (B,3,H) pre-activation  aemb: (B,3,D2)
    wa_ref: (9,3,3)  mlp_ref: (4,3,D2)  P: (B,B3)  E: (B3,3)
    """
    eps = 1e-8

    def leaky(x):
        return jnp.where(x >= 0.0, x, 0.01 * x)

    tk = tk3_ref[...]
    qm = qm3_ref[...]
    an = an_ref[...]
    wmq = wmq_ref[...]
    wna = wna_ref[...]
    P = P_ref[...]                                    # (B, B3) group selector
    E = E_ref[...]                                    # (B3, 3) answer selector

    # ---- semantic-level cosine similarity ----
    st = st_ref[...]                                  # (B, H)
    sh = leaky(shp_ref[...])                          # (B, 3, H)
    st_n = jnp.sqrt(jnp.sum(st * st, axis=-1, keepdims=True))        # (B, 1)
    sh_n = jnp.sqrt(jnp.sum(sh * sh, axis=-1))                       # (B, 3)
    M_sem = jnp.sum(st[:, None, :] * sh, axis=-1) / jnp.maximum(st_n * sh_n, eps)

    # ---- word-level cosine sims, shared across the three variants ----
    nt = jnp.sqrt(jnp.sum(tk * tk, axis=-1))          # (B3, T)
    nq = jnp.sqrt(jnp.sum(qm * qm, axis=-1))          # (B3, Q)
    na = jnp.sqrt(jnp.sum(an * an, axis=-1))          # (B3, A)
    dq = jnp.einsum('nth,nqh->ntq', tk, qm, preferred_element_type=jnp.float32)
    da = jnp.einsum('nth,nah->nta', tk, an, preferred_element_type=jnp.float32)
    cq = dq / jnp.maximum(nt[:, :, None] * nq[:, None, :], eps)      # (B3,T,Q)
    ca = da / jnp.maximum(nt[:, :, None] * na[:, None, :], eps)      # (B3,T,A)

    def regroup(v):                                   # (B3,1) -> (B,3)
        tmp = v * E                                   # (B3, 3)
        return jnp.sum(P[:, :, None] * tmp[None, :, :], axis=1)

    def lin3(x, w):                                   # (B,3)x(3,3) -> (B,3)
        return jnp.sum(x[:, :, None] * w[None, :, :], axis=1)

    def proj3(x, w):                                  # (B,3)x(3,D2) -> (B,D2)
        return jnp.sum(x[:, :, None] * w[None, :, :], axis=1)

    def match(k):
        pos = pos_ref[k]                              # (B3, T)
        wq_ = cq * pos[:, :, None]
        wa_ = ca * pos[:, :, None]
        mq = jnp.sum(jnp.max(wq_, axis=1) * wmq, axis=1, keepdims=True)   # (B3,1)
        ma = jnp.sum(jnp.max(wa_, axis=1) * wna, axis=1, keepdims=True)   # (B3,1)
        Mq = regroup(mq)                              # (B, 3)
        Ma = jax.nn.softmax(regroup(ma), axis=1)      # (B, 3)
        return Mq, Ma

    Mq, Ma = match(0)
    M_word = lin3(Ma, wa_ref[0]) + lin3(Mq, wa_ref[1]) + lin3(Mq * Ma, wa_ref[2])
    Mq, Ma = match(1)
    M_sws = lin3(Ma, wa_ref[3]) + lin3(Mq, wa_ref[4]) + lin3(Mq * Ma, wa_ref[5])
    Mq, Ma = match(2)
    M_swd = lin3(Ma, wa_ref[6]) + lin3(Mq, wa_ref[7]) + lin3(Ma * Mq, wa_ref[8])

    # aggregation @ MLP (weight pre-split into 4 row groups -> no concat needed)
    enc = leaky(proj3(M_sem, mlp_ref[0]) + proj3(M_word, mlp_ref[1])
                + proj3(M_sws, mlp_ref[2]) + proj3(M_swd, mlp_ref[3]))    # (B, D2)

    logits = jnp.sum(aemb_ref[...] * enc[:, None, :], axis=-1)            # (B, 3)
    score_ref[...] = jax.nn.softmax(logits, axis=1)


# ----------------------------------------------------------------------------
# Forward pass (embeddings and cheap layout plumbing stay in plain JAX)
# ----------------------------------------------------------------------------
def phn_forward(params, query, passage, answer, dep_perm):
    B, Q = query.shape
    _, T = passage.shape
    _, n_ans, A = answer.shape
    H = params['W_A_t_w'].shape[1]
    D2 = 2 * H
    B3 = B * n_ans

    emb = params['embedding']
    q_emb = emb[query]                                        # (B, Q, E)
    p_emb = emb[passage]                                      # (B, T, E)
    a_emb_in = emb[answer].reshape(B3, A, -1)                 # (B3, A, E)

    # --- encoders (fused BiGRU kernels) ---
    a = bigru(a_emb_in, params['a_gru'])                      # (B3, A, 2H)
    q = bigru(q_emb, params['q_gru'])                         # (B, Q, 2H)
    t = bigru(p_emb, params['p_gru'])                         # (B, T, 2H)

    # --- stacked small weights for the fused tail kernels ---
    v_stack = jnp.stack([params['a_attention'], params['V_t'], params['V_h'],
                         params['V_q'], params['V_a']]).reshape(5, 1, D2)
    w_stack = jnp.stack([params['W_A_t_w'], params['W_A_h_w'], params['W_B_t_w'],
                         params['W_B_q_w'], params['W_B_a_w']])            # (5,D2,H)
    b_stack = jnp.stack([params['W_A_t_b'], params['W_A_h_b'], params['W_B_t_b'],
                         params['W_B_q_b'], params['W_B_a_b']]).reshape(5, 1, H)
    wa_stack = jnp.stack([params['W_a1'], params['W_a2'], params['W_a3'],
                          params['W_a4'], params['W_a5'], params['W_a6'],
                          params['W_a7'], params['W_a8'], params['W_a9']])  # (9,3,3)
    mlp4 = params['MLP_w'].reshape(4, 3, D2)

    # --- fused pool / projection kernel ---
    (a_pool, st, u_a, u_q, tk2, qm2, an2, w_m_q, w_n_a) = pl.pallas_call(
        phn_pool_proj_kernel,
        out_shape=(jax.ShapeDtypeStruct((B3, D2), jnp.float32),
                   jax.ShapeDtypeStruct((B, H), jnp.float32),
                   jax.ShapeDtypeStruct((B3, H), jnp.float32),
                   jax.ShapeDtypeStruct((B, H), jnp.float32),
                   jax.ShapeDtypeStruct((B * T, H), jnp.float32),
                   jax.ShapeDtypeStruct((B * Q, H), jnp.float32),
                   jax.ShapeDtypeStruct((B3 * A, H), jnp.float32),
                   jax.ShapeDtypeStruct((B, Q), jnp.float32),
                   jax.ShapeDtypeStruct((B3, A), jnp.float32)),
    )(a, q, t,
      a.reshape(B3 * A, D2), q.reshape(B * Q, D2), t.reshape(B * T, D2),
      v_stack, w_stack, b_stack)

    # --- free (XLA) layout plumbing between the two tail kernels ---
    a_emb3 = a_pool.reshape(B, n_ans, D2)
    sh_pre = u_a.reshape(B, n_ans, H) + u_q[:, None, :]
    tk = tk2.reshape(B, T, H)
    qm = qm2.reshape(B, Q, H)
    an = an2.reshape(B3, A, H)
    tk3 = jnp.broadcast_to(tk[:, None], (B, n_ans, T, H)).reshape(B3, T, H)
    qm3 = jnp.broadcast_to(qm[:, None], (B, n_ans, Q, H)).reshape(B3, Q, H)
    wmq3 = jnp.broadcast_to(w_m_q[:, None], (B, n_ans, Q)).reshape(B3, Q)

    # Positional weights for the three match variants.  The dep-sorted branch
    # is equivalent to weighting with the inverse-permuted position vector,
    # so the gather over tk is eliminated.
    inv_perm = jnp.argsort(dep_perm, axis=1)
    pos_dep = params['position_t2'][inv_perm]                 # (B, T)
    pos0 = jnp.ones((B, T), jnp.float32)
    pos1 = jnp.broadcast_to(params['position_t'][None, :], (B, T))
    pos_stack = jnp.stack([pos0, pos1, pos_dep])              # (3, B, T)
    pos_stack = jnp.broadcast_to(pos_stack[:, :, None, :],
                                 (3, B, n_ans, T)).reshape(3, B3, T)

    # selection matrices for the in-kernel (B*3,) -> (B,3) regroup
    Pmat = (jnp.arange(B3)[None, :] // n_ans
            == jnp.arange(B)[:, None]).astype(jnp.float32)    # (B, B3)
    Emat = (jnp.arange(B3)[:, None] % n_ans
            == jnp.arange(n_ans)[None, :]).astype(jnp.float32)  # (B3, 3)

    # --- fused match + aggregation + score kernel ---
    score = pl.pallas_call(
        phn_match_score_kernel,
        out_shape=jax.ShapeDtypeStruct((B, n_ans), jnp.float32),
    )(tk3, qm3, an, wmq3, w_n_a, pos_stack,
      st, sh_pre, a_emb3, wa_stack, mlp4, Pmat, Emat)
    return score


# ----------------------------------------------------------------------------
# Deterministic parameter init (synthetic; shapes follow PHN.__init__)
# ----------------------------------------------------------------------------
def init_params(key, vocab, E, H, T):
    D2 = 2 * H
    keys = iter(jax.random.split(key, 64))

    def u(shape, s=0.1):
        return jax.random.uniform(next(keys), shape, jnp.float32, -s, s)

    def gru_params():
        return dict(
            wi=u((2, E, 3 * H)),
            wh=u((2, H, 3 * H)),
            bi=u((2, 1, 3 * H)),
            bh=u((2, 1, 3 * H)),
        )

    params = dict(
        embedding=u((vocab + 1, E)),
        q_gru=gru_params(), p_gru=gru_params(), a_gru=gru_params(),
        a_attention=u((D2,)), V_t=u((D2,)), V_h=u((D2,)), V_q=u((D2,)), V_a=u((D2,)),
        W_A_t_w=u((D2, H)), W_A_t_b=u((H,)),
        W_A_h_w=u((D2, H)), W_A_h_b=u((H,)),
        W_B_t_w=u((D2, H)), W_B_t_b=u((H,)),
        W_B_q_w=u((D2, H)), W_B_q_b=u((H,)),
        W_B_a_w=u((D2, H)), W_B_a_b=u((H,)),
        W_a1=u((3, 3)), W_a2=u((3, 3)), W_a3=u((3, 3)),
        W_a4=u((3, 3)), W_a5=u((3, 3)), W_a6=u((3, 3)),
        W_a7=u((3, 3)), W_a8=u((3, 3)), W_a9=u((3, 3)),
        MLP_w=u((12, D2)),
        position_t=jax.random.uniform(next(keys), (T,), jnp.float32),
        position_t2=jax.random.uniform(next(keys), (T,), jnp.float32),
    )
    return params


if __name__ == "__main__":
    B, Q, T, A, n_ans = 2, 8, 16, 8, 3
    vocab, E, H = 50, 16, 16

    key = jax.random.PRNGKey(0)
    k_q, k_p, k_a, k_perm, k_params = jax.random.split(key, 5)

    query = jax.random.randint(k_q, (B, Q), 0, vocab + 1)
    passage = jax.random.randint(k_p, (B, T), 0, vocab + 1)
    answer = jax.random.randint(k_a, (B, n_ans, A), 0, vocab + 1)
    dep_perm = jnp.stack(
        [jax.random.permutation(k, T) for k in jax.random.split(k_perm, B)]
    ).astype(jnp.int32)

    params = init_params(k_params, vocab, E, H, T)

    score = jax.jit(phn_forward)(params, query, passage, answer, dep_perm)
    score = jax.block_until_ready(score)
    assert score.shape == (B, n_ans)
    assert bool(jnp.all(jnp.isfinite(score)))
    print("KERNEL_OK")
</pallas_src>

<mosaic_0001>
module attributes {stable_mosaic.version = 11 : i64} {
  func.func @bigru_kernel(%arg0: i32, %arg1: memref<1x128x16xf32, #tpu.memory_space<vmem>>, %arg2: memref<1x16x48xf32, #tpu.memory_space<vmem>>, %arg3: memref<1x16x48xf32, #tpu.memory_space<vmem>>, %arg4: memref<1x1x48xf32, #tpu.memory_space<vmem>>, %arg5: memref<1x1x48xf32, #tpu.memory_space<vmem>>, %arg6: memref<1x128x16xf32, #tpu.memory_space<vmem>>) attributes {dimension_semantics = [#tpu.dimension_semantics<parallel>], iteration_bounds = array<i64: 2>, scalar_prefetch = 0 : i64, scratch_operands = 0 : i64, tpu.core_type = #tpu.core_type<tc>, window_params = [{transform_indices = @transform_0, window_bounds = array<i64: 1, 128, 16>}, {transform_indices = @transform_1, window_bounds = array<i64: 1, 16, 48>}, {transform_indices = @transform_2, window_bounds = array<i64: 1, 16, 48>}, {transform_indices = @transform_3, window_bounds = array<i64: 1, 1, 48>}, {transform_indices = @transform_4, window_bounds = array<i64: 1, 1, 48>}, {transform_indices = @transform_5, window_bounds = array<i64: 1, 128, 16>}]} {
    %c0 = arith.constant 0 : index
    %c0_0 = arith.constant 0 : index
    %c0_1 = arith.constant 0 : index
    %0 = vector.load %arg1[%c0, %c0_0, %c0_1] : memref<1x128x16xf32, #tpu.memory_space<vmem>>, vector<1x128x16xf32>
    %1 = vector.shape_cast %0 : vector<1x128x16xf32> to vector<128x16xf32>
    %c0_2 = arith.constant 0 : index
    %c0_3 = arith.constant 0 : index
    %c0_4 = arith.constant 0 : index
    %2 = vector.load %arg2[%c0_2, %c0_3, %c0_4] : memref<1x16x48xf32, #tpu.memory_space<vmem>>, vector<1x16x48xf32>
    %3 = vector.shape_cast %2 : vector<1x16x48xf32> to vector<16x48xf32>
    %cst = arith.constant dense<0.000000e+00> : vector<128x48xf32>
    %4 = tpu.matmul %1, %3, %cst {dimension_numbers = #tpu.dot_dimension_numbers<[1], [0], [0], [1], [0, 0, 1, 1], [], []>} : vector<128x16xf32>, vector<16x48xf32>, vector<128x48xf32> -> vector<128x48xf32>
    %c0_5 = arith.constant 0 : index
    %c0_6 = arith.constant 0 : index
    %c0_7 = arith.constant 0 : index
    %5 = vector.load %arg4[%c0_5, %c0_6, %c0_7] : memref<1x1x48xf32, #tpu.memory_space<vmem>>, vector<1x1x48xf32>
    %6 = vector.shape_cast %5 : vector<1x1x48xf32> to vector<1x48xf32>
    %7 = vector.broadcast %6 : vector<1x48xf32> to vector<128x48xf32>
    %8 = arith.addf %4, %7 : vector<128x48xf32>
    %c0_8 = arith.constant 0 : index
    %c0_9 = arith.constant 0 : index
    %c0_10 = arith.constant 0 : index
    %9 = vector.load %arg3[%c0_8, %c0_9, %c0_10] : memref<1x16x48xf32, #tpu.memory_space<vmem>>, vector<1x16x48xf32>
    %10 = vector.shape_cast %9 : vector<1x16x48xf32> to vector<16x48xf32>
    %c0_11 = arith.constant 0 : index
    %c0_12 = arith.constant 0 : index
    %c0_13 = arith.constant 0 : index
    %11 = vector.load %arg5[%c0_11, %c0_12, %c0_13] : memref<1x1x48xf32, #tpu.memory_space<vmem>>, vector<1x1x48xf32>
    %12 = vector.shape_cast %11 : vector<1x1x48xf32> to vector<1x48xf32>
    %cst_14 = arith.constant 0.000000e+00 : f32
    %13 = vector.broadcast %cst_14 : f32 to vector<8x16xf32>
    %14 = vector.extract_strided_slice %8 {offsets = [0, 0], sizes = [8, 48], strides = [1, 1]} : vector<128x48xf32> to vector<8x48xf32>
    %cst_15 = arith.constant dense<0.000000e+00> : vector<8x48xf32>
    %15 = tpu.matmul %13, %10, %cst_15 {dimension_numbers = #tpu.dot_dimension_numbers<[1], [0], [0], [1], [0, 0, 1, 1], [], []>} : vector<8x16xf32>, vector<16x48xf32>, vector<8x48xf32> -> vector<8x48xf32>
    %16 = vector.broadcast %12 : vector<1x48xf32> to vector<8x48xf32>
    %17 = arith.addf %15, %16 : vector<8x48xf32>
    %18 = vector.extract_strided_slice %14 {offsets = [0, 0], sizes = [8, 16], strides = [1, 1]} : vector<8x48xf32> to vector<8x16xf32>
    %19 = vector.extract_strided_slice %17 {offsets = [0, 0], sizes = [8, 16], strides = [1, 1]} : vector<8x48xf32> to vector<8x16xf32>
    %20 = arith.addf %18, %19 : vector<8x16xf32>
    %21 = arith.negf %20 : vector<8x16xf32>
    %22 = math.exp %21 : vector<8x16xf32>
    %cst_16 = arith.constant 1.000000e+00 : f32
    %23 = vector.broadcast %cst_16 : f32 to vector<8x16xf32>
    %24 = arith.addf %23, %22 : vector<8x16xf32>
    %25 = arith.divf %23, %24 : vector<8x16xf32>
    %26 = vector.extract_strided_slice %14 {offsets = [0, 16], sizes = [8, 16], strides = [1, 1]} : vector<8x48xf32> to vector<8x16xf32>
    %27 = vector.extract_strided_slice %17 {offsets = [0, 16], sizes = [8, 16], strides = [1, 1]} : vector<8x48xf32> to vector<8x16xf32>
    %28 = arith.addf %26, %27 : vector<8x16xf32>
    %29 = arith.negf %28 : vector<8x16xf32>
    %30 = math.exp %29 : vector<8x16xf32>
    %cst_17 = arith.constant 1.000000e+00 : f32
    %31 = vector.broadcast %cst_17 : f32 to vector<8x16xf32>
    %32 = arith.addf %31, %30 : vector<8x16xf32>
    %33 = arith.divf %31, %32 : vector<8x16xf32>
    %34 = vector.extract_strided_slice %14 {offsets = [0, 32], sizes = [8, 16], strides = [1, 1]} : vector<8x48xf32> to vector<8x16xf32>
    %35 = vector.extract_strided_slice %17 {offsets = [0, 32], sizes = [8, 16], strides = [1, 1]} : vector<8x48xf32> to vector<8x16xf32>
    %36 = arith.mulf %25, %35 : vector<8x16xf32>
    %37 = arith.addf %34, %36 : vector<8x16xf32>
    %38 = math.tanh %37 : vector<8x16xf32>
    %cst_18 = arith.constant 1.000000e+00 : f32
    %39 = vector.broadcast %cst_18 : f32 to vector<8x16xf32>
    %40 = arith.subf %39, %33 : vector<8x16xf32>
    %41 = arith.mulf %40, %38 : vector<8x16xf32>
    %42 = arith.mulf %33, %13 : vector<8x16xf32>
    %43 = arith.addf %41, %42 : vector<8x16xf32>
    %c0_19 = arith.constant 0 : index
    %c0_20 = arith.constant 0 : index
    %c0_21 = arith.constant 0 : index
    %44 = vector.load %arg6[%c0_19, %c0_20, %c0_21] : memref<1x128x16xf32, #tpu.memory_space<vmem>>, vector<1x8x16xf32>
    %45 = vector.shape_cast %44 : vector<1x8x16xf32> to vector<8x16xf32>
    %46 = vector.shape_cast %43 : vector<8x16xf32> to vector<1x8x16xf32>
    tpu.vector_store %arg6[%c0_19, %c0_20, %c0_21], %46 {strides = array<i32>} : memref<1x128x16xf32, #tpu.memory_space<vmem>>, vector<1x8x16xf32>,
    %47 = vector.extract_strided_slice %8 {offsets = [8, 0], sizes = [8, 48], strides = [1, 1]} : vector<128x48xf32> to vector<8x48xf32>
    %cst_22 = arith.constant dense<0.000000e+00> : vector<8x48xf32>
    %48 = tpu.matmul %43, %10, %cst_22 {dimension_numbers = #tpu.dot_dimension_numbers<[1], [0], [0], [1], [0, 0, 1, 1], [], []>} : vector<8x16xf32>, vector<16x48xf32>, vector<8x48xf32> -> vector<8x48xf32>
    %49 = vector.broadcast %12 : vector<1x48xf32> to vector<8x48xf32>
    %50 = arith.addf %48, %49 : vector<8x48xf32>
    %51 = vector.extract_strided_slice %47 {offsets = [0, 0], sizes = [8, 16], strides = [1, 1]} : vector<8x48xf32> to vector<8x16xf32>
    %52 = vector.extract_strided_slice %50 {offsets = [0, 0], sizes = [8, 16], strides = [1, 1]} : vector<8x48xf32> to vector<8x16xf32>
    %53 = arith.addf %51, %52 : vector<8x16xf32>
    %54 = arith.negf %53 : vector<8x16xf32>
    %55 = math.exp %54 : vector<8x16xf32>
    %cst_23 = arith.constant 1.000000e+00 : f32
    %56 = vector.broadcast %cst_23 : f32 to vector<8x16xf32>
    %57 = arith.addf %56, %55 : vector<8x16xf32>
    %58 = arith.divf %56, %57 : vector<8x16xf32>
    %59 = vector.extract_strided_slice %47 {offsets = [0, 16], sizes = [8, 16], strides = [1, 1]} : vector<8x48xf32> to vector<8x16xf32>
    %60 = vector.extract_strided_slice %50 {offsets = [0, 16], sizes = [8, 16], strides = [1, 1]} : vector<8x48xf32> to vector<8x16xf32>
    %61 = arith.addf %59, %60 : vector<8x16xf32>
    %62 = arith.negf %61 : vector<8x16xf32>
    %63 = math.exp %62 : vector<8x16xf32>
    %cst_24 = arith.constant 1.000000e+00 : f32
    %64 = vector.broadcast %cst_24 : f32 to vector<8x16xf32>
    %65 = arith.addf %64, %63 : vector<8x16xf32>
    %66 = arith.divf %64, %65 : vector<8x16xf32>
    %67 = vector.extract_strided_slice %47 {offsets = [0, 32], sizes = [8, 16], strides = [1, 1]} : vector<8x48xf32> to vector<8x16xf32>
    %68 = vector.extract_strided_slice %50 {offsets = [0, 32], sizes = [8, 16], strides = [1, 1]} : vector<8x48xf32> to vector<8x16xf32>
    %69 = arith.mulf %58, %68 : vector<8x16xf32>
    %70 = arith.addf %67, %69 : vector<8x16xf32>
    %71 = math.tanh %70 : vector<8x16xf32>
    %cst_25 = arith.constant 1.000000e+00 : f32
    %72 = vector.broadcast %cst_25 : f32 to vector<8x16xf32>
    %73 = arith.subf %72, %66 : vector<8x16xf32>
    %74 = arith.mulf %73, %71 : vector<8x16xf32>
    %75 = arith.mulf %66, %43 : vector<8x16xf32>
    %76 = arith.addf %74, %75 : vector<8x16xf32>
    %c0_26 = arith.constant 0 : index
    %c8 = arith.constant 8 : index
    %c0_27 = arith.constant 0 : index
    %77 = vector.load %arg6[%c0_26, %c8, %c0_27] : memref<1x128x16xf32, #tpu.memory_space<vmem>>, vector<1x8x16xf32>
    %78 = vector.shape_cast %77 : vector<1x8x16xf32> to vector<8x16xf32>
    %79 = vector.shape_cast %76 : vector<8x16xf32> to vector<1x8x16xf32>
    tpu.vector_store %arg6[%c0_26, %c8, %c0_27], %79 {strides = array<i32>} : memref<1x128x16xf32, #tpu.memory_space<vmem>>, vector<1x8x16xf32>,
    %80 = vector.extract_strided_slice %8 {offsets = [16, 0], sizes = [8, 48], strides = [1, 1]} : vector<128x48xf32> to vector<8x48xf32>
    %cst_28 = arith.constant dense<0.000000e+00> : vector<8x48xf32>
    %81 = tpu.matmul %76, %10, %cst_28 {dimension_numbers = #tpu.dot_dimension_numbers<[1], [0], [0], [1], [0, 0, 1, 1], [], []>} : vector<8x16xf32>, vector<16x48xf32>, vector<8x48xf32> -> vector<8x48xf32>
    %82 = vector.broadcast %12 : vector<1x48xf32> to vector<8x48xf32>
    %83 = arith.addf %81, %82 : vector<8x48xf32>
    %84 = vector.extract_strided_slice %80 {offsets = [0, 0], sizes = [8, 16], strides = [1, 1]} : vector<8x48xf32> to vector<8x16xf32>
    %85 = vector.extract_strided_slice %83 {offsets = [0, 0], sizes = [8, 16], strides = [1, 1]} : vector<8x48xf32> to vector<8x16xf32>
    %86 = arith.addf %84, %85 : vector<8x16xf32>
    %87 = arith.negf %86 : vector<8x16xf32>
    %88 = math.exp %87 : vector<8x16xf32>
    %cst_29 = arith.constant 1.000000e+00 : f32
    %89 = vector.broadcast %cst_29 : f32 to vector<8x16xf32>
    %90 = arith.addf %89, %88 : vector<8x16xf32>
    %91 = arith.divf %89, %90 : vector<8x16xf32>
    %92 = vector.extract_strided_slice %80 {offsets = [0, 16], sizes = [8, 16], strides = [1, 1]} : vector<8x48xf32> to vector<8x16xf32>
    %93 = vector.extract_strided_slice %83 {offsets = [0, 16], sizes = [8, 16], strides = [1, 1]} : vector<8x48xf32> to vector<8x16xf32>
    %94 = arith.addf %92, %93 : vector<8x16xf32>
    %95 = arith.negf %94 : vector<8x16xf32>
    %96 = math.exp %95 : vector<8x16xf32>
    %cst_30 = arith.constant 1.000000e+00 : f32
    %97 = vector.broadcast %cst_30 : f32 to vector<8x16xf32>
    %98 = arith.addf %97, %96 : vector<8x16xf32>
    %99 = arith.divf %97, %98 : vector<8x16xf32>
    %100 = vector.extract_strided_slice %80 {offsets = [0, 32], sizes = [8, 16], strides = [1, 1]} : vector<8x48xf32> to vector<8x16xf32>
    %101 = vector.extract_strided_slice %83 {offsets = [0, 32], sizes = [8, 16], strides = [1, 1]} : vector<8x48xf32> to vector<8x16xf32>
    %102 = arith.mulf %91, %101 : vector<8x16xf32>
    %103 = arith.addf %100, %102 : vector<8x16xf32>
    %104 = math.tanh %103 : vector<8x16xf32>
    %cst_31 = arith.constant 1.000000e+00 : f32
    %105 = vector.broadcast %cst_31 : f32 to vector<8x16xf32>
    %106 = arith.subf %105, %99 : vector<8x16xf32>
    %107 = arith.mulf %106, %104 : vector<8x16xf32>
    %108 = arith.mulf %99, %76 : vector<8x16xf32>
    %109 = arith.addf %107, %108 : vector<8x16xf32>
    %c0_32 = arith.constant 0 : index
    %c16 = arith.constant 16 : index
    %c0_33 = arith.constant 0 : index
    %110 = vector.load %arg6[%c0_32, %c16, %c0_33] : memref<1x128x16xf32, #tpu.memory_space<vmem>>, vector<1x8x16xf32>
    %111 = vector.shape_cast %110 : vector<1x8x16xf32> to vector<8x16xf32>
    %112 = vector.shape_cast %109 : vector<8x16xf32> to vector<1x8x16xf32>
    tpu.vector_store %arg6[%c0_32, %c16, %c0_33], %112 {strides = array<i32>} : memref<1x128x16xf32, #tpu.memory_space<vmem>>, vector<1x8x16xf32>,
    %113 = vector.extract_strided_slice %8 {offsets = [24, 0], sizes = [8, 48], strides = [1, 1]} : vector<128x48xf32> to vector<8x48xf32>
    %cst_34 = arith.constant dense<0.000000e+00> : vector<8x48xf32>
    %114 = tpu.matmul %109, %10, %cst_34 {dimension_numbers = #tpu.dot_dimension_numbers<[1], [0], [0], [1], [0, 0, 1, 1], [], []>} : vector<8x16xf32>, vector<16x48xf32>, vector<8x48xf32> -> vector<8x48xf32>
    %115 = vector.broadcast %12 : vector<1x48xf32> to vector<8x48xf32>
    %116 = arith.addf %114, %115 : vector<8x48xf32>
    %117 = vector.extract_strided_slice %113 {offsets = [0, 0], sizes = [8, 16], strides = [1, 1]} : vector<8x48xf32> to vector<8x16xf32>
    %118 = vector.extract_strided_slice %116 {offsets = [0, 0], sizes = [8, 16], strides = [1, 1]} : vector<8x48xf32> to vector<8x16xf32>
    %119 = arith.addf %117, %118 : vector<8x16xf32>
    %120 = arith.negf %119 : vector<8x16xf32>
    %121 = math.exp %120 : vector<8x16xf32>
    %cst_35 = arith.constant 1.000000e+00 : f32
    %122 = vector.broadcast %cst_35 : f32 to vector<8x16xf32>
    %123 = arith.addf %122, %121 : vector<8x16xf32>
    %124 = arith.divf %122, %123 : vector<8x16xf32>
    %125 = vector.extract_strided_slice %113 {offsets = [0, 16], sizes = [8, 16], strides = [1, 1]} : vector<8x48xf32> to vector<8x16xf32>
    %126 = vector.extract_strided_slice %116 {offsets = [0, 16], sizes = [8, 16], strides = [1, 1]} : vector<8x48xf32> to vector<8x16xf32>
    %127 = arith.addf %125, %126 : vector<8x16xf32>
    %128 = arith.negf %127 : vector<8x16xf32>
    %129 = math.exp %128 : vector<8x16xf32>
    %cst_36 = arith.constant 1.000000e+00 : f32
    %130 = vector.broadcast %cst_36 : f32 to vector<8x16xf32>
    %131 = arith.addf %130, %129 : vector<8x16xf32>
    %132 = arith.divf %130, %131 : vector<8x16xf32>
    %133 = vector.extract_strided_slice %113 {offsets = [0, 32], sizes = [8, 16], strides = [1, 1]} : vector<8x48xf32> to vector<8x16xf32>
    %134 = vector.extract_strided_slice %116 {offsets = [0, 32], sizes = [8, 16], strides = [1, 1]} : vector<8x48xf32> to vector<8x16xf32>
    %135 = arith.mulf %124, %134 : vector<8x16xf32>
    %136 = arith.addf %133, %135 : vector<8x16xf32>
    %137 = math.tanh %136 : vector<8x16xf32>
    %cst_37 = arith.constant 1.000000e+00 : f32
    %138 = vector.broadcast %cst_37 : f32 to vector<8x16xf32>
    %139 = arith.subf %138, %132 : vector<8x16xf32>
    %140 = arith.mulf %139, %137 : vector<8x16xf32>
    %141 = arith.mulf %132, %109 : vector<8x16xf32>
    %142 = arith.addf %140, %141 : vector<8x16xf32>
    %c0_38 = arith.constant 0 : index
    %c24 = arith.constant 24 : index
    %c0_39 = arith.constant 0 : index
    %143 = vector.load %arg6[%c0_38, %c24, %c0_39] : memref<1x128x16xf32, #tpu.memory_space<vmem>>, vector<1x8x16xf32>
    %144 = vector.shape_cast %143 : vector<1x8x16xf32> to vector<8x16xf32>
    %145 = vector.shape_cast %142 : vector<8x16xf32> to vector<1x8x16xf32>
    tpu.vector_store %arg6[%c0_38, %c24, %c0_39], %145 {strides = array<i32>} : memref<1x128x16xf32, #tpu.memory_space<vmem>>, vector<1x8x16xf32>,
    %146 = vector.extract_strided_slice %8 {offsets = [32, 0], sizes = [8, 48], strides = [1, 1]} : vector<128x48xf32> to vector<8x48xf32>
    %cst_40 = arith.constant dense<0.000000e+00> : vector<8x48xf32>
    %147 = tpu.matmul %142, %10, %cst_40 {dimension_numbers = #tpu.dot_dimension_numbers<[1], [0], [0], [1], [0, 0, 1, 1], [], []>} : vector<8x16xf32>, vector<16x48xf32>, vector<8x48xf32> -> vector<8x48xf32>
    %148 = vector.broadcast %12 : vector<1x48xf32> to vector<8x48xf32>
    %149 = arith.addf %147, %148 : vector<8x48xf32>
    %150 = vector.extract_strided_slice %146 {offsets = [0, 0], sizes = [8, 16], strides = [1, 1]} : vector<8x48xf32> to vector<8x16xf32>
    %151 = vector.extract_strided_slice %149 {offsets = [0, 0], sizes = [8, 16], strides = [1, 1]} : vector<8x48xf32> to vector<8x16xf32>
    %152 = arith.addf %150, %151 : vector<8x16xf32>
    %153 = arith.negf %152 : vector<8x16xf32>
    %154 = math.exp %153 : vector<8x16xf32>
    %cst_41 = arith.constant 1.000000e+00 : f32
    %155 = vector.broadcast %cst_41 : f32 to vector<8x16xf32>
    %156 = arith.addf %155, %154 : vector<8x16xf32>
    %157 = arith.divf %155, %156 : vector<8x16xf32>
    %158 = vector.extract_strided_slice %146 {offsets = [0, 16], sizes = [8, 16], strides = [1, 1]} : vector<8x48xf32> to vector<8x16xf32>
    %159 = vector.extract_strided_slice %149 {offsets = [0, 16], sizes = [8, 16], strides = [1, 1]} : vector<8x48xf32> to vector<8x16xf32>
    %160 = arith.addf %158, %159 : vector<8x16xf32>
    %161 = arith.negf %160 : vector<8x16xf32>
    %162 = math.exp %161 : vector<8x16xf32>
    %cst_42 = arith.constant 1.000000e+00 : f32
    %163 = vector.broadcast %cst_42 : f32 to vector<8x16xf32>
    %164 = arith.addf %163, %162 : vector<8x16xf32>
    %165 = arith.divf %163, %164 : vector<8x16xf32>
    %166 = vector.extract_strided_slice %146 {offsets = [0, 32], sizes = [8, 16], strides = [1, 1]} : vector<8x48xf32> to vector<8x16xf32>
    %167 = vector.extract_strided_slice %149 {offsets = [0, 32], sizes = [8, 16], strides = [1, 1]} : vector<8x48xf32> to vector<8x16xf32>
    %168 = arith.mulf %157, %167 : vector<8x16xf32>
    %169 = arith.addf %166, %168 : vector<8x16xf32>
    %170 = math.tanh %169 : vector<8x16xf32>
    %cst_43 = arith.constant 1.000000e+00 : f32
    %171 = vector.broadcast %cst_43 : f32 to vector<8x16xf32>
    %172 = arith.subf %171, %165 : vector<8x16xf32>
    %173 = arith.mulf %172, %170 : vector<8x16xf32>
    %174 = arith.mulf %165, %142 : vector<8x16xf32>
    %175 = arith.addf %173, %174 : vector<8x16xf32>
    %c0_44 = arith.constant 0 : index
    %c32 = arith.constant 32 : index
    %c0_45 = arith.constant 0 : index
    %176 = vector.load %arg6[%c0_44, %c32, %c0_45] : memref<1x128x16xf32, #tpu.memory_space<vmem>>, vector<1x8x16xf32>
    %177 = vector.shape_cast %176 : vector<1x8x16xf32> to vector<8x16xf32>
    %178 = vector.shape_cast %175 : vector<8x16xf32> to vector<1x8x16xf32>
    tpu.vector_store %arg6[%c0_44, %c32, %c0_45], %178 {strides = array<i32>} : memref<1x128x16xf32, #tpu.memory_space<vmem>>, vector<1x8x16xf32>,
    %179 = vector.extract_strided_slice %8 {offsets = [40, 0], sizes = [8, 48], strides = [1, 1]} : vector<128x48xf32> to vector<8x48xf32>
    %cst_46 = arith.constant dense<0.000000e+00> : vector<8x48xf32>
    %180 = tpu.matmul %175, %10, %cst_46 {dimension_numbers = #tpu.dot_dimension_numbers<[1], [0], [0], [1], [0, 0, 1, 1], [], []>} : vector<8x16xf32>, vector<16x48xf32>, vector<8x48xf32> -> vector<8x48xf32>
    %181 = vector.broadcast %12 : vector<1x48xf32> to vector<8x48xf32>
    %182 = arith.addf %180, %181 : vector<8x48xf32>
    %183 = vector.extract_strided_slice %179 {offsets = [0, 0], sizes = [8, 16], strides = [1, 1]} : vector<8x48xf32> to vector<8x16xf32>
    %184 = vector.extract_strided_slice %182 {offsets = [0, 0], sizes = [8, 16], strides = [1, 1]} : vector<8x48xf32> to vector<8x16xf32>
    %185 = arith.addf %183, %184 : vector<8x16xf32>
    %186 = arith.negf %185 : vector<8x16xf32>
    %187 = math.exp %186 : vector<8x16xf32>
    %cst_47 = arith.constant 1.000000e+00 : f32
    %188 = vector.broadcast %cst_47 : f32 to vector<8x16xf32>
    %189 = arith.addf %188, %187 : vector<8x16xf32>
    %190 = arith.divf %188, %189 : vector<8x16xf32>
    %191 = vector.extract_strided_slice %179 {offsets = [0, 16], sizes = [8, 16], strides = [1, 1]} : vector<8x48xf32> to vector<8x16xf32>
    %192 = vector.extract_strided_slice %182 {offsets = [0, 16], sizes = [8, 16], strides = [1, 1]} : vector<8x48xf32> to vector<8x16xf32>
    %193 = arith.addf %191, %192 : vector<8x16xf32>
    %194 = arith.negf %193 : vector<8x16xf32>
    %195 = math.exp %194 : vector<8x16xf32>
    %cst_48 = arith.constant 1.000000e+00 : f32
    %196 = vector.broadcast %cst_48 : f32 to vector<8x16xf32>
    %197 = arith.addf %196, %195 : vector<8x16xf32>
    %198 = arith.divf %196, %197 : vector<8x16xf32>
    %199 = vector.extract_strided_slice %179 {offsets = [0, 32], sizes = [8, 16], strides = [1, 1]} : vector<8x48xf32> to vector<8x16xf32>
    %200 = vector.extract_strided_slice %182 {offsets = [0, 32], sizes = [8, 16], strides = [1, 1]} : vector<8x48xf32> to vector<8x16xf32>
    %201 = arith.mulf %190, %200 : vector<8x16xf32>
    %202 = arith.addf %199, %201 : vector<8x16xf32>
    %203 = math.tanh %202 : vector<8x16xf32>
    %cst_49 = arith.constant 1.000000e+00 : f32
    %204 = vector.broadcast %cst_49 : f32 to vector<8x16xf32>
    %205 = arith.subf %204, %198 : vector<8x16xf32>
    %206 = arith.mulf %205, %203 : vector<8x16xf32>
    %207 = arith.mulf %198, %175 : vector<8x16xf32>
    %208 = arith.addf %206, %207 : vector<8x16xf32>
    %c0_50 = arith.constant 0 : index
    %c40 = arith.constant 40 : index
    %c0_51 = arith.constant 0 : index
    %209 = vector.load %arg6[%c0_50, %c40, %c0_51] : memref<1x128x16xf32, #tpu.memory_space<vmem>>, vector<1x8x16xf32>
    %210 = vector.shape_cast %209 : vector<1x8x16xf32> to vector<8x16xf32>
    %211 = vector.shape_cast %208 : vector<8x16xf32> to vector<1x8x16xf32>
    tpu.vector_store %arg6[%c0_50, %c40, %c0_51], %211 {strides = array<i32>} : memref<1x128x16xf32, #tpu.memory_space<vmem>>, vector<1x8x16xf32>,
    %212 = vector.extract_strided_slice %8 {offsets = [48, 0], sizes = [8, 48], strides = [1, 1]} : vector<128x48xf32> to vector<8x48xf32>
    %cst_52 = arith.constant dense<0.000000e+00> : vector<8x48xf32>
    %213 = tpu.matmul %208, %10, %cst_52 {dimension_numbers = #tpu.dot_dimension_numbers<[1], [0], [0], [1], [0, 0, 1, 1], [], []>} : vector<8x16xf32>, vector<16x48xf32>, vector<8x48xf32> -> vector<8x48xf32>
    %214 = vector.broadcast %12 : vector<1x48xf32> to vector<8x48xf32>
    %215 = arith.addf %213, %214 : vector<8x48xf32>
    %216 = vector.extract_strided_slice %212 {offsets = [0, 0], sizes = [8, 16], strides = [1, 1]} : vector<8x48xf32> to vector<8x16xf32>
    %217 = vector.extract_strided_slice %215 {offsets = [0, 0], sizes = [8, 16], strides = [1, 1]} : vector<8x48xf32> to vector<8x16xf32>
    %218 = arith.addf %216, %217 : vector<8x16xf32>
    %219 = arith.negf %218 : vector<8x16xf32>
    %220 = math.exp %219 : vector<8x16xf32>
    %cst_53 = arith.constant 1.000000e+00 : f32
    %221 = vector.broadcast %cst_53 : f32 to vector<8x16xf32>
    %222 = arith.addf %221, %220 : vector<8x16xf32>
    %223 = arith.divf %221, %222 : vector<8x16xf32>
    %224 = vector.extract_strided_slice %212 {offsets = [0, 16], sizes = [8, 16], strides = [1, 1]} : vector<8x48xf32> to vector<8x16xf32>
    %225 = vector.extract_strided_slice %215 {offsets = [0, 16], sizes = [8, 16], strides = [1, 1]} : vector<8x48xf32> to vector<8x16xf32>
    %226 = arith.addf %224, %225 : vector<8x16xf32>
    %227 = arith.negf %226 : vector<8x16xf32>
    %228 = math.exp %227 : vector<8x16xf32>
    %cst_54 = arith.constant 1.000000e+00 : f32
    %229 = vector.broadcast %cst_54 : f32 to vector<8x16xf32>
    %230 = arith.addf %229, %228 : vector<8x16xf32>
    %231 = arith.divf %229, %230 : vector<8x16xf32>
    %232 = vector.extract_strided_slice %212 {offsets = [0, 32], sizes = [8, 16], strides = [1, 1]} : vector<8x48xf32> to vector<8x16xf32>
    %233 = vector.extract_strided_slice %215 {offsets = [0, 32], sizes = [8, 16], strides = [1, 1]} : vector<8x48xf32> to vector<8x16xf32>
    %234 = arith.mulf %223, %233 : vector<8x16xf32>
    %235 = arith.addf %232, %234 : vector<8x16xf32>
    %236 = math.tanh %235 : vector<8x16xf32>
    %cst_55 = arith.constant 1.000000e+00 : f32
    %237 = vector.broadcast %cst_55 : f32 to vector<8x16xf32>
    %238 = arith.subf %237, %231 : vector<8x16xf32>
    %239 = arith.mulf %238, %236 : vector<8x16xf32>
    %240 = arith.mulf %231, %208 : vector<8x16xf32>
    %241 = arith.addf %239, %240 : vector<8x16xf32>
    %c0_56 = arith.constant 0 : index
    %c48 = arith.constant 48 : index
    %c0_57 = arith.constant 0 : index
    %242 = vector.load %arg6[%c0_56, %c48, %c0_57] : memref<1x128x16xf32, #tpu.memory_space<vmem>>, vector<1x8x16xf32>
    %243 = vector.shape_cast %242 : vector<1x8x16xf32> to vector<8x16xf32>
    %244 = vector.shape_cast %241 : vector<8x16xf32> to vector<1x8x16xf32>
    tpu.vector_store %arg6[%c0_56, %c48, %c0_57], %244 {strides = array<i32>} : memref<1x128x16xf32, #tpu.memory_space<vmem>>, vector<1x8x16xf32>,
    %245 = vector.extract_strided_slice %8 {offsets = [56, 0], sizes = [8, 48], strides = [1, 1]} : vector<128x48xf32> to vector<8x48xf32>
    %cst_58 = arith.constant dense<0.000000e+00> : vector<8x48xf32>
    %246 = tpu.matmul %241, %10, %cst_58 {dimension_numbers = #tpu.dot_dimension_numbers<[1], [0], [0], [1], [0, 0, 1, 1], [], []>} : vector<8x16xf32>, vector<16x48xf32>, vector<8x48xf32> -> vector<8x48xf32>
    %247 = vector.broadcast %12 : vector<1x48xf32> to vector<8x48xf32>
    %248 = arith.addf %246, %247 : vector<8x48xf32>
    %249 = vector.extract_strided_slice %245 {offsets = [0, 0], sizes = [8, 16], strides = [1, 1]} : vector<8x48xf32> to vector<8x16xf32>
    %250 = vector.extract_strided_slice %248 {offsets = [0, 0], sizes = [8, 16], strides = [1, 1]} : vector<8x48xf32> to vector<8x16xf32>
    %251 = arith.addf %249, %250 : vector<8x16xf32>
    %252 = arith.negf %251 : vector<8x16xf32>
    %253 = math.exp %252 : vector<8x16xf32>
    %cst_59 = arith.constant 1.000000e+00 : f32
    %254 = vector.broadcast %cst_59 : f32 to vector<8x16xf32>
    %255 = arith.addf %254, %253 : vector<8x16xf32>
    %256 = arith.divf %254, %255 : vector<8x16xf32>
    %257 = vector.extract_strided_slice %245 {offsets = [0, 16], sizes = [8, 16], strides = [1, 1]} : vector<8x48xf32> to vector<8x16xf32>
    %258 = vector.extract_strided_slice %248 {offsets = [0, 16], sizes = [8, 16], strides = [1, 1]} : vector<8x48xf32> to vector<8x16xf32>
    %259 = arith.addf %257, %258 : vector<8x16xf32>
    %260 = arith.negf %259 : vector<8x16xf32>
    %261 = math.exp %260 : vector<8x16xf32>
    %cst_60 = arith.constant 1.000000e+00 : f32
    %262 = vector.broadcast %cst_60 : f32 to vector<8x16xf32>
    %263 = arith.addf %262, %261 : vector<8x16xf32>
    %264 = arith.divf %262, %263 : vector<8x16xf32>
    %265 = vector.extract_strided_slice %245 {offsets = [0, 32], sizes = [8, 16], strides = [1, 1]} : vector<8x48xf32> to vector<8x16xf32>
    %266 = vector.extract_strided_slice %248 {offsets = [0, 32], sizes = [8, 16], strides = [1, 1]} : vector<8x48xf32> to vector<8x16xf32>
    %267 = arith.mulf %256, %266 : vector<8x16xf32>
    %268 = arith.addf %265, %267 : vector<8x16xf32>
    %269 = math.tanh %268 : vector<8x16xf32>
    %cst_61 = arith.constant 1.000000e+00 : f32
    %270 = vector.broadcast %cst_61 : f32 to vector<8x16xf32>
    %271 = arith.subf %270, %264 : vector<8x16xf32>
    %272 = arith.mulf %271, %269 : vector<8x16xf32>
    %273 = arith.mulf %264, %241 : vector<8x16xf32>
    %274 = arith.addf %272, %273 : vector<8x16xf32>
    %c0_62 = arith.constant 0 : index
    %c56 = arith.constant 56 : index
    %c0_63 = arith.constant 0 : index
    %275 = vector.load %arg6[%c0_62, %c56, %c0_63] : memref<1x128x16xf32, #tpu.memory_space<vmem>>, vector<1x8x16xf32>
    %276 = vector.shape_cast %275 : vector<1x8x16xf32> to vector<8x16xf32>
    %277 = vector.shape_cast %274 : vector<8x16xf32> to vector<1x8x16xf32>
    tpu.vector_store %arg6[%c0_62, %c56, %c0_63], %277 {strides = array<i32>} : memref<1x128x16xf32, #tpu.memory_space<vmem>>, vector<1x8x16xf32>,
    %278 = vector.extract_strided_slice %8 {offsets = [64, 0], sizes = [8, 48], strides = [1, 1]} : vector<128x48xf32> to vector<8x48xf32>
    %cst_64 = arith.constant dense<0.000000e+00> : vector<8x48xf32>
    %279 = tpu.matmul %274, %10, %cst_64 {dimension_numbers = #tpu.dot_dimension_numbers<[1], [0], [0], [1], [0, 0, 1, 1], [], []>} : vector<8x16xf32>, vector<16x48xf32>, vector<8x48xf32> -> vector<8x48xf32>
    %280 = vector.broadcast %12 : vector<1x48xf32> to vector<8x48xf32>
    %281 = arith.addf %279, %280 : vector<8x48xf32>
    %282 = vector.extract_strided_slice %278 {offsets = [0, 0], sizes = [8, 16], strides = [1, 1]} : vector<8x48xf32> to vector<8x16xf32>
    %283 = vector.extract_strided_slice %281 {offsets = [0, 0], sizes = [8, 16], strides = [1, 1]} : vector<8x48xf32> to vector<8x16xf32>
    %284 = arith.addf %282, %283 : vector<8x16xf32>
    %285 = arith.negf %284 : vector<8x16xf32>
    %286 = math.exp %285 : vector<8x16xf32>
    %cst_65 = arith.constant 1.000000e+00 : f32
    %287 = vector.broadcast %cst_65 : f32 to vector<8x16xf32>
    %288 = arith.addf %287, %286 : vector<8x16xf32>
    %289 = arith.divf %287, %288 : vector<8x16xf32>
    %290 = vector.extract_strided_slice %278 {offsets = [0, 16], sizes = [8, 16], strides = [1, 1]} : vector<8x48xf32> to vector<8x16xf32>
    %291 = vector.extract_strided_slice %281 {offsets = [0, 16], sizes = [8, 16], strides = [1, 1]} : vector<8x48xf32> to vector<8x16xf32>
    %292 = arith.addf %290, %291 : vector<8x16xf32>
    %293 = arith.negf %292 : vector<8x16xf32>
    %294 = math.exp %293 : vector<8x16xf32>
    %cst_66 = arith.constant 1.000000e+00 : f32
    %295 = vector.broadcast %cst_66 : f32 to vector<8x16xf32>
    %296 = arith.addf %295, %294 : vector<8x16xf32>
    %297 = arith.divf %295, %296 : vector<8x16xf32>
    %298 = vector.extract_strided_slice %278 {offsets = [0, 32], sizes = [8, 16], strides = [1, 1]} : vector<8x48xf32> to vector<8x16xf32>
    %299 = vector.extract_strided_slice %281 {offsets = [0, 32], sizes = [8, 16], strides = [1, 1]} : vector<8x48xf32> to vector<8x16xf32>
    %300 = arith.mulf %289, %299 : vector<8x16xf32>
    %301 = arith.addf %298, %300 : vector<8x16xf32>
    %302 = math.tanh %301 : vector<8x16xf32>
    %cst_67 = arith.constant 1.000000e+00 : f32
    %303 = vector.broadcast %cst_67 : f32 to vector<8x16xf32>
    %304 = arith.subf %303, %297 : vector<8x16xf32>
    %305 = arith.mulf %304, %302 : vector<8x16xf32>
    %306 = arith.mulf %297, %274 : vector<8x16xf32>
    %307 = arith.addf %305, %306 : vector<8x16xf32>
    %c0_68 = arith.constant 0 : index
    %c64 = arith.constant 64 : index
    %c0_69 = arith.constant 0 : index
    %308 = vector.load %arg6[%c0_68, %c64, %c0_69] : memref<1x128x16xf32, #tpu.memory_space<vmem>>, vector<1x8x16xf32>
    %309 = vector.shape_cast %308 : vector<1x8x16xf32> to vector<8x16xf32>
    %310 = vector.shape_cast %307 : vector<8x16xf32> to vector<1x8x16xf32>
    tpu.vector_store %arg6[%c0_68, %c64, %c0_69], %310 {strides = array<i32>} : memref<1x128x16xf32, #tpu.memory_space<vmem>>, vector<1x8x16xf32>,
    %311 = vector.extract_strided_slice %8 {offsets = [72, 0], sizes = [8, 48], strides = [1, 1]} : vector<128x48xf32> to vector<8x48xf32>
    %cst_70 = arith.constant dense<0.000000e+00> : vector<8x48xf32>
    %312 = tpu.matmul %307, %10, %cst_70 {dimension_numbers = #tpu.dot_dimension_numbers<[1], [0], [0], [1], [0, 0, 1, 1], [], []>} : vector<8x16xf32>, vector<16x48xf32>, vector<8x48xf32> -> vector<8x48xf32>
    %313 = vector.broadcast %12 : vector<1x48xf32> to vector<8x48xf32>
    %314 = arith.addf %312, %313 : vector<8x48xf32>
    %315 = vector.extract_strided_slice %311 {offsets = [0, 0], sizes = [8, 16], strides = [1, 1]} : vector<8x48xf32> to vector<8x16xf32>
    %316 = vector.extract_strided_slice %314 {offsets = [0, 0], sizes = [8, 16], strides = [1, 1]} : vector<8x48xf32> to vector<8x16xf32>
    %317 = arith.addf %315, %316 : vector<8x16xf32>
    %318 = arith.negf %317 : vector<8x16xf32>
    %319 = math.exp %318 : vector<8x16xf32>
    %cst_71 = arith.constant 1.000000e+00 : f32
    %320 = vector.broadcast %cst_71 : f32 to vector<8x16xf32>
    %321 = arith.addf %320, %319 : vector<8x16xf32>
    %322 = arith.divf %320, %321 : vector<8x16xf32>
    %323 = vector.extract_strided_slice %311 {offsets = [0, 16], sizes = [8, 16], strides = [1, 1]} : vector<8x48xf32> to vector<8x16xf32>
    %324 = vector.extract_strided_slice %314 {offsets = [0, 16], sizes = [8, 16], strides = [1, 1]} : vector<8x48xf32> to vector<8x16xf32>
    %325 = arith.addf %323, %324 : vector<8x16xf32>
    %326 = arith.negf %325 : vector<8x16xf32>
    %327 = math.exp %326 : vector<8x16xf32>
    %cst_72 = arith.constant 1.000000e+00 : f32
    %328 = vector.broadcast %cst_72 : f32 to vector<8x16xf32>
    %329 = arith.addf %328, %327 : vector<8x16xf32>
    %330 = arith.divf %328, %329 : vector<8x16xf32>
    %331 = vector.extract_strided_slice %311 {offsets = [0, 32], sizes = [8, 16], strides = [1, 1]} : vector<8x48xf32> to vector<8x16xf32>
    %332 = vector.extract_strided_slice %314 {offsets = [0, 32], sizes = [8, 16], strides = [1, 1]} : vector<8x48xf32> to vector<8x16xf32>
    %333 = arith.mulf %322, %332 : vector<8x16xf32>
    %334 = arith.addf %331, %333 : vector<8x16xf32>
    %335 = math.tanh %334 : vector<8x16xf32>
    %cst_73 = arith.constant 1.000000e+00 : f32
    %336 = vector.broadcast %cst_73 : f32 to vector<8x16xf32>
    %337 = arith.subf %336, %330 : vector<8x16xf32>
    %338 = arith.mulf %337, %335 : vector<8x16xf32>
    %339 = arith.mulf %330, %307 : vector<8x16xf32>
    %340 = arith.addf %338, %339 : vector<8x16xf32>
    %c0_74 = arith.constant 0 : index
    %c72 = arith.constant 72 : index
    %c0_75 = arith.constant 0 : index
    %341 = vector.load %arg6[%c0_74, %c72, %c0_75] : memref<1x128x16xf32, #tpu.memory_space<vmem>>, vector<1x8x16xf32>
    %342 = vector.shape_cast %341 : vector<1x8x16xf32> to vector<8x16xf32>
    %343 = vector.shape_cast %340 : vector<8x16xf32> to vector<1x8x16xf32>
    tpu.vector_store %arg6[%c0_74, %c72, %c0_75], %343 {strides = array<i32>} : memref<1x128x16xf32, #tpu.memory_space<vmem>>, vector<1x8x16xf32>,
    %344 = vector.extract_strided_slice %8 {offsets = [80, 0], sizes = [8, 48], strides = [1, 1]} : vector<128x48xf32> to vector<8x48xf32>
    %cst_76 = arith.constant dense<0.000000e+00> : vector<8x48xf32>
    %345 = tpu.matmul %340, %10, %cst_76 {dimension_numbers = #tpu.dot_dimension_numbers<[1], [0], [0], [1], [0, 0, 1, 1], [], []>} : vector<8x16xf32>, vector<16x48xf32>, vector<8x48xf32> -> vector<8x48xf32>
    %346 = vector.broadcast %12 : vector<1x48xf32> to vector<8x48xf32>
    %347 = arith.addf %345, %346 : vector<8x48xf32>
    %348 = vector.extract_strided_slice %344 {offsets = [0, 0], sizes = [8, 16], strides = [1, 1]} : vector<8x48xf32> to vector<8x16xf32>
    %349 = vector.extract_strided_slice %347 {offsets = [0, 0], sizes = [8, 16], strides = [1, 1]} : vector<8x48xf32> to vector<8x16xf32>
    %350 = arith.addf %348, %349 : vector<8x16xf32>
    %351 = arith.negf %350 : vector<8x16xf32>
    %352 = math.exp %351 : vector<8x16xf32>
    %cst_77 = arith.constant 1.000000e+00 : f32
    %353 = vector.broadcast %cst_77 : f32 to vector<8x16xf32>
    %354 = arith.addf %353, %352 : vector<8x16xf32>
    %355 = arith.divf %353, %354 : vector<8x16xf32>
    %356 = vector.extract_strided_slice %344 {offsets = [0, 16], sizes = [8, 16], strides = [1, 1]} : vector<8x48xf32> to vector<8x16xf32>
    %357 = vector.extract_strided_slice %347 {offsets = [0, 16], sizes = [8, 16], strides = [1, 1]} : vector<8x48xf32> to vector<8x16xf32>
    %358 = arith.addf %356, %357 : vector<8x16xf32>
    %359 = arith.negf %358 : vector<8x16xf32>
    %360 = math.exp %359 : vector<8x16xf32>
    %cst_78 = arith.constant 1.000000e+00 : f32
    %361 = vector.broadcast %cst_78 : f32 to vector<8x16xf32>
    %362 = arith.addf %361, %360 : vector<8x16xf32>
    %363 = arith.divf %361, %362 : vector<8x16xf32>
    %364 = vector.extract_strided_slice %344 {offsets = [0, 32], sizes = [8, 16], strides = [1, 1]} : vector<8x48xf32> to vector<8x16xf32>
    %365 = vector.extract_strided_slice %347 {offsets = [0, 32], sizes = [8, 16], strides = [1, 1]} : vector<8x48xf32> to vector<8x16xf32>
    %366 = arith.mulf %355, %365 : vector<8x16xf32>
    %367 = arith.addf %364, %366 : vector<8x16xf32>
    %368 = math.tanh %367 : vector<8x16xf32>
    %cst_79 = arith.constant 1.000000e+00 : f32
    %369 = vector.broadcast %cst_79 : f32 to vector<8x16xf32>
    %370 = arith.subf %369, %363 : vector<8x16xf32>
    %371 = arith.mulf %370, %368 : vector<8x16xf32>
    %372 = arith.mulf %363, %340 : vector<8x16xf32>
    %373 = arith.addf %371, %372 : vector<8x16xf32>
    %c0_80 = arith.constant 0 : index
    %c80 = arith.constant 80 : index
    %c0_81 = arith.constant 0 : index
    %374 = vector.load %arg6[%c0_80, %c80, %c0_81] : memref<1x128x16xf32, #tpu.memory_space<vmem>>, vector<1x8x16xf32>
    %375 = vector.shape_cast %374 : vector<1x8x16xf32> to vector<8x16xf32>
    %376 = vector.shape_cast %373 : vector<8x16xf32> to vector<1x8x16xf32>
    tpu.vector_store %arg6[%c0_80, %c80, %c0_81], %376 {strides = array<i32>} : memref<1x128x16xf32, #tpu.memory_space<vmem>>, vector<1x8x16xf32>,
    %377 = vector.extract_strided_slice %8 {offsets = [88, 0], sizes = [8, 48], strides = [1, 1]} : vector<128x48xf32> to vector<8x48xf32>
    %cst_82 = arith.constant dense<0.000000e+00> : vector<8x48xf32>
    %378 = tpu.matmul %373, %10, %cst_82 {dimension_numbers = #tpu.dot_dimension_numbers<[1], [0], [0], [1], [0, 0, 1, 1], [], []>} : vector<8x16xf32>, vector<16x48xf32>, vector<8x48xf32> -> vector<8x48xf32>
    %379 = vector.broadcast %12 : vector<1x48xf32> to vector<8x48xf32>
    %380 = arith.addf %378, %379 : vector<8x48xf32>
    %381 = vector.extract_strided_slice %377 {offsets = [0, 0], sizes = [8, 16], strides = [1, 1]} : vector<8x48xf32> to vector<8x16xf32>
    %382 = vector.extract_strided_slice %380 {offsets = [0, 0], sizes = [8, 16], strides = [1, 1]} : vector<8x48xf32> to vector<8x16xf32>
    %383 = arith.addf %381, %382 : vector<8x16xf32>
    %384 = arith.negf %383 : vector<8x16xf32>
    %385 = math.exp %384 : vector<8x16xf32>
    %cst_83 = arith.constant 1.000000e+00 : f32
    %386 = vector.broadcast %cst_83 : f32 to vector<8x16xf32>
    %387 = arith.addf %386, %385 : vector<8x16xf32>
    %388 = arith.divf %386, %387 : vector<8x16xf32>
    %389 = vector.extract_strided_slice %377 {offsets = [0, 16], sizes = [8, 16], strides = [1, 1]} : vector<8x48xf32> to vector<8x16xf32>
    %390 = vector.extract_strided_slice %380 {offsets = [0, 16], sizes = [8, 16], strides = [1, 1]} : vector<8x48xf32> to vector<8x16xf32>
    %391 = arith.addf %389, %390 : vector<8x16xf32>
    %392 = arith.negf %391 : vector<8x16xf32>
    %393 = math.exp %392 : vector<8x16xf32>
    %cst_84 = arith.constant 1.000000e+00 : f32
    %394 = vector.broadcast %cst_84 : f32 to vector<8x16xf32>
    %395 = arith.addf %394, %393 : vector<8x16xf32>
    %396 = arith.divf %394, %395 : vector<8x16xf32>
    %397 = vector.extract_strided_slice %377 {offsets = [0, 32], sizes = [8, 16], strides = [1, 1]} : vector<8x48xf32> to vector<8x16xf32>
    %398 = vector.extract_strided_slice %380 {offsets = [0, 32], sizes = [8, 16], strides = [1, 1]} : vector<8x48xf32> to vector<8x16xf32>
    %399 = arith.mulf %388, %398 : vector<8x16xf32>
    %400 = arith.addf %397, %399 : vector<8x16xf32>
    %401 = math.tanh %400 : vector<8x16xf32>
    %cst_85 = arith.constant 1.000000e+00 : f32
    %402 = vector.broadcast %cst_85 : f32 to vector<8x16xf32>
    %403 = arith.subf %402, %396 : vector<8x16xf32>
    %404 = arith.mulf %403, %401 : vector<8x16xf32>
    %405 = arith.mulf %396, %373 : vector<8x16xf32>
    %406 = arith.addf %404, %405 : vector<8x16xf32>
    %c0_86 = arith.constant 0 : index
    %c88 = arith.constant 88 : index
    %c0_87 = arith.constant 0 : index
    %407 = vector.load %arg6[%c0_86, %c88, %c0_87] : memref<1x128x16xf32, #tpu.memory_space<vmem>>, vector<1x8x16xf32>
    %408 = vector.shape_cast %407 : vector<1x8x16xf32> to vector<8x16xf32>
    %409 = vector.shape_cast %406 : vector<8x16xf32> to vector<1x8x16xf32>
    tpu.vector_store %arg6[%c0_86, %c88, %c0_87], %409 {strides = array<i32>} : memref<1x128x16xf32, #tpu.memory_space<vmem>>, vector<1x8x16xf32>,
    %410 = vector.extract_strided_slice %8 {offsets = [96, 0], sizes = [8, 48], strides = [1, 1]} : vector<128x48xf32> to vector<8x48xf32>
    %cst_88 = arith.constant dense<0.000000e+00> : vector<8x48xf32>
    %411 = tpu.matmul %406, %10, %cst_88 {dimension_numbers = #tpu.dot_dimension_numbers<[1], [0], [0], [1], [0, 0, 1, 1], [], []>} : vector<8x16xf32>, vector<16x48xf32>, vector<8x48xf32> -> vector<8x48xf32>
    %412 = vector.broadcast %12 : vector<1x48xf32> to vector<8x48xf32>
    %413 = arith.addf %411, %412 : vector<8x48xf32>
    %414 = vector.extract_strided_slice %410 {offsets = [0, 0], sizes = [8, 16], strides = [1, 1]} : vector<8x48xf32> to vector<8x16xf32>
    %415 = vector.extract_strided_slice %413 {offsets = [0, 0], sizes = [8, 16], strides = [1, 1]} : vector<8x48xf32> to vector<8x16xf32>
    %416 = arith.addf %414, %415 : vector<8x16xf32>
    %417 = arith.negf %416 : vector<8x16xf32>
    %418 = math.exp %417 : vector<8x16xf32>
    %cst_89 = arith.constant 1.000000e+00 : f32
    %419 = vector.broadcast %cst_89 : f32 to vector<8x16xf32>
    %420 = arith.addf %419, %418 : vector<8x16xf32>
    %421 = arith.divf %419, %420 : vector<8x16xf32>
    %422 = vector.extract_strided_slice %410 {offsets = [0, 16], sizes = [8, 16], strides = [1, 1]} : vector<8x48xf32> to vector<8x16xf32>
    %423 = vector.extract_strided_slice %413 {offsets = [0, 16], sizes = [8, 16], strides = [1, 1]} : vector<8x48xf32> to vector<8x16xf32>
    %424 = arith.addf %422, %423 : vector<8x16xf32>
    %425 = arith.negf %424 : vector<8x16xf32>
    %426 = math.exp %425 : vector<8x16xf32>
    %cst_90 = arith.constant 1.000000e+00 : f32
    %427 = vector.broadcast %cst_90 : f32 to vector<8x16xf32>
    %428 = arith.addf %427, %426 : vector<8x16xf32>
    %429 = arith.divf %427, %428 : vector<8x16xf32>
    %430 = vector.extract_strided_slice %410 {offsets = [0, 32], sizes = [8, 16], strides = [1, 1]} : vector<8x48xf32> to vector<8x16xf32>
    %431 = vector.extract_strided_slice %413 {offsets = [0, 32], sizes = [8, 16], strides = [1, 1]} : vector<8x48xf32> to vector<8x16xf32>
    %432 = arith.mulf %421, %431 : vector<8x16xf32>
    %433 = arith.addf %430, %432 : vector<8x16xf32>
    %434 = math.tanh %433 : vector<8x16xf32>
    %cst_91 = arith.constant 1.000000e+00 : f32
    %435 = vector.broadcast %cst_91 : f32 to vector<8x16xf32>
    %436 = arith.subf %435, %429 : vector<8x16xf32>
    %437 = arith.mulf %436, %434 : vector<8x16xf32>
    %438 = arith.mulf %429, %406 : vector<8x16xf32>
    %439 = arith.addf %437, %438 : vector<8x16xf32>
    %c0_92 = arith.constant 0 : index
    %c96 = arith.constant 96 : index
    %c0_93 = arith.constant 0 : index
    %440 = vector.load %arg6[%c0_92, %c96, %c0_93] : memref<1x128x16xf32, #tpu.memory_space<vmem>>, vector<1x8x16xf32>
    %441 = vector.shape_cast %440 : vector<1x8x16xf32> to vector<8x16xf32>
    %442 = vector.shape_cast %439 : vector<8x16xf32> to vector<1x8x16xf32>
    tpu.vector_store %arg6[%c0_92, %c96, %c0_93], %442 {strides = array<i32>} : memref<1x128x16xf32, #tpu.memory_space<vmem>>, vector<1x8x16xf32>,
    %443 = vector.extract_strided_slice %8 {offsets = [104, 0], sizes = [8, 48], strides = [1, 1]} : vector<128x48xf32> to vector<8x48xf32>
    %cst_94 = arith.constant dense<0.000000e+00> : vector<8x48xf32>
    %444 = tpu.matmul %439, %10, %cst_94 {dimension_numbers = #tpu.dot_dimension_numbers<[1], [0], [0], [1], [0, 0, 1, 1], [], []>} : vector<8x16xf32>, vector<16x48xf32>, vector<8x48xf32> -> vector<8x48xf32>
    %445 = vector.broadcast %12 : vector<1x48xf32> to vector<8x48xf32>
    %446 = arith.addf %444, %445 : vector<8x48xf32>
    %447 = vector.extract_strided_slice %443 {offsets = [0, 0], sizes = [8, 16], strides = [1, 1]} : vector<8x48xf32> to vector<8x16xf32>
    %448 = vector.extract_strided_slice %446 {offsets = [0, 0], sizes = [8, 16], strides = [1, 1]} : vector<8x48xf32> to vector<8x16xf32>
    %449 = arith.addf %447, %448 : vector<8x16xf32>
    %450 = arith.negf %449 : vector<8x16xf32>
    %451 = math.exp %450 : vector<8x16xf32>
    %cst_95 = arith.constant 1.000000e+00 : f32
    %452 = vector.broadcast %cst_95 : f32 to vector<8x16xf32>
    %453 = arith.addf %452, %451 : vector<8x16xf32>
    %454 = arith.divf %452, %453 : vector<8x16xf32>
    %455 = vector.extract_strided_slice %443 {offsets = [0, 16], sizes = [8, 16], strides = [1, 1]} : vector<8x48xf32> to vector<8x16xf32>
    %456 = vector.extract_strided_slice %446 {offsets = [0, 16], sizes = [8, 16], strides = [1, 1]} : vector<8x48xf32> to vector<8x16xf32>
    %457 = arith.addf %455, %456 : vector<8x16xf32>
    %458 = arith.negf %457 : vector<8x16xf32>
    %459 = math.exp %458 : vector<8x16xf32>
    %cst_96 = arith.constant 1.000000e+00 : f32
    %460 = vector.broadcast %cst_96 : f32 to vector<8x16xf32>
    %461 = arith.addf %460, %459 : vector<8x16xf32>
    %462 = arith.divf %460, %461 : vector<8x16xf32>
    %463 = vector.extract_strided_slice %443 {offsets = [0, 32], sizes = [8, 16], strides = [1, 1]} : vector<8x48xf32> to vector<8x16xf32>
    %464 = vector.extract_strided_slice %446 {offsets = [0, 32], sizes = [8, 16], strides = [1, 1]} : vector<8x48xf32> to vector<8x16xf32>
    %465 = arith.mulf %454, %464 : vector<8x16xf32>
    %466 = arith.addf %463, %465 : vector<8x16xf32>
    %467 = math.tanh %466 : vector<8x16xf32>
    %cst_97 = arith.constant 1.000000e+00 : f32
    %468 = vector.broadcast %cst_97 : f32 to vector<8x16xf32>
    %469 = arith.subf %468, %462 : vector<8x16xf32>
    %470 = arith.mulf %469, %467 : vector<8x16xf32>
    %471 = arith.mulf %462, %439 : vector<8x16xf32>
    %472 = arith.addf %470, %471 : vector<8x16xf32>
    %c0_98 = arith.constant 0 : index
    %c104 = arith.constant 104 : index
    %c0_99 = arith.constant 0 : index
    %473 = vector.load %arg6[%c0_98, %c104, %c0_99] : memref<1x128x16xf32, #tpu.memory_space<vmem>>, vector<1x8x16xf32>
    %474 = vector.shape_cast %473 : vector<1x8x16xf32> to vector<8x16xf32>
    %475 = vector.shape_cast %472 : vector<8x16xf32> to vector<1x8x16xf32>
    tpu.vector_store %arg6[%c0_98, %c104, %c0_99], %475 {strides = array<i32>} : memref<1x128x16xf32, #tpu.memory_space<vmem>>, vector<1x8x16xf32>,
    %476 = vector.extract_strided_slice %8 {offsets = [112, 0], sizes = [8, 48], strides = [1, 1]} : vector<128x48xf32> to vector<8x48xf32>
    %cst_100 = arith.constant dense<0.000000e+00> : vector<8x48xf32>
    %477 = tpu.matmul %472, %10, %cst_100 {dimension_numbers = #tpu.dot_dimension_numbers<[1], [0], [0], [1], [0, 0, 1, 1], [], []>} : vector<8x16xf32>, vector<16x48xf32>, vector<8x48xf32> -> vector<8x48xf32>
    %478 = vector.broadcast %12 : vector<1x48xf32> to vector<8x48xf32>
    %479 = arith.addf %477, %478 : vector<8x48xf32>
    %480 = vector.extract_strided_slice %476 {offsets = [0, 0], sizes = [8, 16], strides = [1, 1]} : vector<8x48xf32> to vector<8x16xf32>
    %481 = vector.extract_strided_slice %479 {offsets = [0, 0], sizes = [8, 16], strides = [1, 1]} : vector<8x48xf32> to vector<8x16xf32>
    %482 = arith.addf %480, %481 : vector<8x16xf32>
    %483 = arith.negf %482 : vector<8x16xf32>
    %484 = math.exp %483 : vector<8x16xf32>
    %cst_101 = arith.constant 1.000000e+00 : f32
    %485 = vector.broadcast %cst_101 : f32 to vector<8x16xf32>
    %486 = arith.addf %485, %484 : vector<8x16xf32>
    %487 = arith.divf %485, %486 : vector<8x16xf32>
    %488 = vector.extract_strided_slice %476 {offsets = [0, 16], sizes = [8, 16], strides = [1, 1]} : vector<8x48xf32> to vector<8x16xf32>
    %489 = vector.extract_strided_slice %479 {offsets = [0, 16], sizes = [8, 16], strides = [1, 1]} : vector<8x48xf32> to vector<8x16xf32>
    %490 = arith.addf %488, %489 : vector<8x16xf32>
    %491 = arith.negf %490 : vector<8x16xf32>
    %492 = math.exp %491 : vector<8x16xf32>
    %cst_102 = arith.constant 1.000000e+00 : f32
    %493 = vector.broadcast %cst_102 : f32 to vector<8x16xf32>
    %494 = arith.addf %493, %492 : vector<8x16xf32>
    %495 = arith.divf %493, %494 : vector<8x16xf32>
    %496 = vector.extract_strided_slice %476 {offsets = [0, 32], sizes = [8, 16], strides = [1, 1]} : vector<8x48xf32> to vector<8x16xf32>
    %497 = vector.extract_strided_slice %479 {offsets = [0, 32], sizes = [8, 16], strides = [1, 1]} : vector<8x48xf32> to vector<8x16xf32>
    %498 = arith.mulf %487, %497 : vector<8x16xf32>
    %499 = arith.addf %496, %498 : vector<8x16xf32>
    %500 = math.tanh %499 : vector<8x16xf32>
    %cst_103 = arith.constant 1.000000e+00 : f32
    %501 = vector.broadcast %cst_103 : f32 to vector<8x16xf32>
    %502 = arith.subf %501, %495 : vector<8x16xf32>
    %503 = arith.mulf %502, %500 : vector<8x16xf32>
    %504 = arith.mulf %495, %472 : vector<8x16xf32>
    %505 = arith.addf %503, %504 : vector<8x16xf32>
    %c0_104 = arith.constant 0 : index
    %c112 = arith.constant 112 : index
    %c0_105 = arith.constant 0 : index
    %506 = vector.load %arg6[%c0_104, %c112, %c0_105] : memref<1x128x16xf32, #tpu.memory_space<vmem>>, vector<1x8x16xf32>
    %507 = vector.shape_cast %506 : vector<1x8x16xf32> to vector<8x16xf32>
    %508 = vector.shape_cast %505 : vector<8x16xf32> to vector<1x8x16xf32>
    tpu.vector_store %arg6[%c0_104, %c112, %c0_105], %508 {strides = array<i32>} : memref<1x128x16xf32, #tpu.memory_space<vmem>>, vector<1x8x16xf32>,
    %509 = vector.extract_strided_slice %8 {offsets = [120, 0], sizes = [8, 48], strides = [1, 1]} : vector<128x48xf32> to vector<8x48xf32>
    %cst_106 = arith.constant dense<0.000000e+00> : vector<8x48xf32>
    %510 = tpu.matmul %505, %10, %cst_106 {dimension_numbers = #tpu.dot_dimension_numbers<[1], [0], [0], [1], [0, 0, 1, 1], [], []>} : vector<8x16xf32>, vector<16x48xf32>, vector<8x48xf32> -> vector<8x48xf32>
    %511 = vector.broadcast %12 : vector<1x48xf32> to vector<8x48xf32>
    %512 = arith.addf %510, %511 : vector<8x48xf32>
    %513 = vector.extract_strided_slice %509 {offsets = [0, 0], sizes = [8, 16], strides = [1, 1]} : vector<8x48xf32> to vector<8x16xf32>
    %514 = vector.extract_strided_slice %512 {offsets = [0, 0], sizes = [8, 16], strides = [1, 1]} : vector<8x48xf32> to vector<8x16xf32>
    %515 = arith.addf %513, %514 : vector<8x16xf32>
    %516 = arith.negf %515 : vector<8x16xf32>
    %517 = math.exp %516 : vector<8x16xf32>
    %cst_107 = arith.constant 1.000000e+00 : f32
    %518 = vector.broadcast %cst_107 : f32 to vector<8x16xf32>
    %519 = arith.addf %518, %517 : vector<8x16xf32>
    %520 = arith.divf %518, %519 : vector<8x16xf32>
    %521 = vector.extract_strided_slice %509 {offsets = [0, 16], sizes = [8, 16], strides = [1, 1]} : vector<8x48xf32> to vector<8x16xf32>
    %522 = vector.extract_strided_slice %512 {offsets = [0, 16], sizes = [8, 16], strides = [1, 1]} : vector<8x48xf32> to vector<8x16xf32>
    %523 = arith.addf %521, %522 : vector<8x16xf32>
    %524 = arith.negf %523 : vector<8x16xf32>
    %525 = math.exp %524 : vector<8x16xf32>
    %cst_108 = arith.constant 1.000000e+00 : f32
    %526 = vector.broadcast %cst_108 : f32 to vector<8x16xf32>
    %527 = arith.addf %526, %525 : vector<8x16xf32>
    %528 = arith.divf %526, %527 : vector<8x16xf32>
    %529 = vector.extract_strided_slice %509 {offsets = [0, 32], sizes = [8, 16], strides = [1, 1]} : vector<8x48xf32> to vector<8x16xf32>
    %530 = vector.extract_strided_slice %512 {offsets = [0, 32], sizes = [8, 16], strides = [1, 1]} : vector<8x48xf32> to vector<8x16xf32>
    %531 = arith.mulf %520, %530 : vector<8x16xf32>
    %532 = arith.addf %529, %531 : vector<8x16xf32>
    %533 = math.tanh %532 : vector<8x16xf32>
    %cst_109 = arith.constant 1.000000e+00 : f32
    %534 = vector.broadcast %cst_109 : f32 to vector<8x16xf32>
    %535 = arith.subf %534, %528 : vector<8x16xf32>
    %536 = arith.mulf %535, %533 : vector<8x16xf32>
    %537 = arith.mulf %528, %505 : vector<8x16xf32>
    %538 = arith.addf %536, %537 : vector<8x16xf32>
    %c0_110 = arith.constant 0 : index
    %c120 = arith.constant 120 : index
    %c0_111 = arith.constant 0 : index
    %539 = vector.load %arg6[%c0_110, %c120, %c0_111] : memref<1x128x16xf32, #tpu.memory_space<vmem>>, vector<1x8x16xf32>
    %540 = vector.shape_cast %539 : vector<1x8x16xf32> to vector<8x16xf32>
    %541 = vector.shape_cast %538 : vector<8x16xf32> to vector<1x8x16xf32>
    tpu.vector_store %arg6[%c0_110, %c120, %c0_111], %541 {strides = array<i32>} : memref<1x128x16xf32, #tpu.memory_space<vmem>>, vector<1x8x16xf32>,
    return
  }
  func.func @transform_0(%arg0: i32) -> (i32, i32, i32) {
    %c0_i32 = arith.constant 0 : i32
    %c0_i32_0 = arith.constant 0 : i32
    %c0_i32_1 = arith.constant 0 : i32
    return %arg0, %c0_i32, %c0_i32_0 : i32, i32, i32
  }
  func.func @transform_1(%arg0: i32) -> (i32, i32, i32) {
    %c0_i32 = arith.constant 0 : i32
    %c0_i32_0 = arith.constant 0 : i32
    %c0_i32_1 = arith.constant 0 : i32
    return %arg0, %c0_i32, %c0_i32_0 : i32, i32, i32
  }
  func.func @transform_2(%arg0: i32) -> (i32, i32, i32) {
    %c0_i32 = arith.constant 0 : i32
    %c0_i32_0 = arith.constant 0 : i32
    %c0_i32_1 = arith.constant 0 : i32
    return %arg0, %c0_i32, %c0_i32_0 : i32, i32, i32
  }
  func.func @transform_3(%arg0: i32) -> (i32, i32, i32) {
    %c0_i32 = arith.constant 0 : i32
    %c0_i32_0 = arith.constant 0 : i32
    %c0_i32_1 = arith.constant 0 : i32
    return %arg0, %c0_i32, %c0_i32_0 : i32, i32, i32
  }
  func.func @transform_4(%arg0: i32) -> (i32, i32, i32) {
    %c0_i32 = arith.constant 0 : i32
    %c0_i32_0 = arith.constant 0 : i32
    %c0_i32_1 = arith.constant 0 : i32
    return %arg0, %c0_i32, %c0_i32_0 : i32, i32, i32
  }
  func.func @transform_5(%arg0: i32) -> (i32, i32, i32) {
    %c0_i32 = arith.constant 0 : i32
    %c0_i32_0 = arith.constant 0 : i32
    %c0_i32_1 = arith.constant 0 : i32
    return %arg0, %c0_i32, %c0_i32_0 : i32, i32, i32
  }
}

module attributes {stable_mosaic.version = 11 : i64} {
  func.func @bigru_kernel(%arg0: i32, %arg1: memref<1x64x16xf32, #tpu.memory_space<vmem>>, %arg2: memref<1x16x48xf32, #tpu.memory_space<vmem>>, %arg3: memref<1x16x48xf32, #tpu.memory_space<vmem>>, %arg4: memref<1x1x48xf32, #tpu.memory_space<vmem>>, %arg5: memref<1x1x48xf32, #tpu.memory_space<vmem>>, %arg6: memref<1x64x16xf32, #tpu.memory_space<vmem>>) attributes {dimension_semantics = [#tpu.dimension_semantics<parallel>], iteration_bounds = array<i64: 2>, scalar_prefetch = 0 : i64, scratch_operands = 0 : i64, tpu.core_type = #tpu.core_type<tc>, window_params = [{transform_indices = @transform_0, window_bounds = array<i64: 1, 64, 16>}, {transform_indices = @transform_1, window_bounds = array<i64: 1, 16, 48>}, {transform_indices = @transform_2, window_bounds = array<i64: 1, 16, 48>}, {transform_indices = @transform_3, window_bounds = array<i64: 1, 1, 48>}, {transform_indices = @transform_4, window_bounds = array<i64: 1, 1, 48>}, {transform_indices = @transform_5, window_bounds = array<i64: 1, 64, 16>}]} {
    %c0 = arith.constant 0 : index
    %c0_0 = arith.constant 0 : index
    %c0_1 = arith.constant 0 : index
    %0 = vector.load %arg1[%c0, %c0_0, %c0_1] : memref<1x64x16xf32, #tpu.memory_space<vmem>>, vector<1x64x16xf32>
    %1 = vector.shape_cast %0 : vector<1x64x16xf32> to vector<64x16xf32>
    %c0_2 = arith.constant 0 : index
    %c0_3 = arith.constant 0 : index
    %c0_4 = arith.constant 0 : index
    %2 = vector.load %arg2[%c0_2, %c0_3, %c0_4] : memref<1x16x48xf32, #tpu.memory_space<vmem>>, vector<1x16x48xf32>
    %3 = vector.shape_cast %2 : vector<1x16x48xf32> to vector<16x48xf32>
    %cst = arith.constant dense<0.000000e+00> : vector<64x48xf32>
    %4 = tpu.matmul %1, %3, %cst {dimension_numbers = #tpu.dot_dimension_numbers<[1], [0], [0], [1], [0, 0, 1, 1], [], []>} : vector<64x16xf32>, vector<16x48xf32>, vector<64x48xf32> -> vector<64x48xf32>
    %c0_5 = arith.constant 0 : index
    %c0_6 = arith.constant 0 : index
    %c0_7 = arith.constant 0 : index
    %5 = vector.load %arg4[%c0_5, %c0_6, %c0_7] : memref<1x1x48xf32, #tpu.memory_space<vmem>>, vector<1x1x48xf32>
    %6 = vector.shape_cast %5 : vector<1x1x48xf32> to vector<1x48xf32>
    %7 = vector.broadcast %6 : vector<1x48xf32> to vector<64x48xf32>
    %8 = arith.addf %4, %7 : vector<64x48xf32>
    %c0_8 = arith.constant 0 : index
    %c0_9 = arith.constant 0 : index
    %c0_10 = arith.constant 0 : index
    %9 = vector.load %arg3[%c0_8, %c0_9, %c0_10] : memref<1x16x48xf32, #tpu.memory_space<vmem>>, vector<1x16x48xf32>
    %10 = vector.shape_cast %9 : vector<1x16x48xf32> to vector<16x48xf32>
    %c0_11 = arith.constant 0 : index
    %c0_12 = arith.constant 0 : index
    %c0_13 = arith.constant 0 : index
    %11 = vector.load %arg5[%c0_11, %c0_12, %c0_13] : memref<1x1x48xf32, #tpu.memory_space<vmem>>, vector<1x1x48xf32>
    %12 = vector.shape_cast %11 : vector<1x1x48xf32> to vector<1x48xf32>
    %cst_14 = arith.constant 0.000000e+00 : f32
    %13 = vector.broadcast %cst_14 : f32 to vector<8x16xf32>
    %14 = vector.extract_strided_slice %8 {offsets = [0, 0], sizes = [8, 48], strides = [1, 1]} : vector<64x48xf32> to vector<8x48xf32>
    %cst_15 = arith.constant dense<0.000000e+00> : vector<8x48xf32>
    %15 = tpu.matmul %13, %10, %cst_15 {dimension_numbers = #tpu.dot_dimension_numbers<[1], [0], [0], [1], [0, 0, 1, 1], [], []>} : vector<8x16xf32>, vector<16x48xf32>, vector<8x48xf32> -> vector<8x48xf32>
    %16 = vector.broadcast %12 : vector<1x48xf32> to vector<8x48xf32>
    %17 = arith.addf %15, %16 : vector<8x48xf32>
    %18 = vector.extract_strided_slice %14 {offsets = [0, 0], sizes = [8, 16], strides = [1, 1]} : vector<8x48xf32> to vector<8x16xf32>
    %19 = vector.extract_strided_slice %17 {offsets = [0, 0], sizes = [8, 16], strides = [1, 1]} : vector<8x48xf32> to vector<8x16xf32>
    %20 = arith.addf %18, %19 : vector<8x16xf32>
    %21 = arith.negf %20 : vector<8x16xf32>
    %22 = math.exp %21 : vector<8x16xf32>
    %cst_16 = arith.constant 1.000000e+00 : f32
    %23 = vector.broadcast %cst_16 : f32 to vector<8x16xf32>
    %24 = arith.addf %23, %22 : vector<8x16xf32>
    %25 = arith.divf %23, %24 : vector<8x16xf32>
    %26 = vector.extract_strided_slice %14 {offsets = [0, 16], sizes = [8, 16], strides = [1, 1]} : vector<8x48xf32> to vector<8x16xf32>
    %27 = vector.extract_strided_slice %17 {offsets = [0, 16], sizes = [8, 16], strides = [1, 1]} : vector<8x48xf32> to vector<8x16xf32>
    %28 = arith.addf %26, %27 : vector<8x16xf32>
    %29 = arith.negf %28 : vector<8x16xf32>
    %30 = math.exp %29 : vector<8x16xf32>
    %cst_17 = arith.constant 1.000000e+00 : f32
    %31 = vector.broadcast %cst_17 : f32 to vector<8x16xf32>
    %32 = arith.addf %31, %30 : vector<8x16xf32>
    %33 = arith.divf %31, %32 : vector<8x16xf32>
    %34 = vector.extract_strided_slice %14 {offsets = [0, 32], sizes = [8, 16], strides = [1, 1]} : vector<8x48xf32> to vector<8x16xf32>
    %35 = vector.extract_strided_slice %17 {offsets = [0, 32], sizes = [8, 16], strides = [1, 1]} : vector<8x48xf32> to vector<8x16xf32>
    %36 = arith.mulf %25, %35 : vector<8x16xf32>
    %37 = arith.addf %34, %36 : vector<8x16xf32>
    %38 = math.tanh %37 : vector<8x16xf32>
    %cst_18 = arith.constant 1.000000e+00 : f32
    %39 = vector.broadcast %cst_18 : f32 to vector<8x16xf32>
    %40 = arith.subf %39, %33 : vector<8x16xf32>
    %41 = arith.mulf %40, %38 : vector<8x16xf32>
    %42 = arith.mulf %33, %13 : vector<8x16xf32>
    %43 = arith.addf %41, %42 : vector<8x16xf32>
    %c0_19 = arith.constant 0 : index
    %c0_20 = arith.constant 0 : index
    %c0_21 = arith.constant 0 : index
    %44 = vector.load %arg6[%c0_19, %c0_20, %c0_21] : memref<1x64x16xf32, #tpu.memory_space<vmem>>, vector<1x8x16xf32>
    %45 = vector.shape_cast %44 : vector<1x8x16xf32> to vector<8x16xf32>
    %46 = vector.shape_cast %43 : vector<8x16xf32> to vector<1x8x16xf32>
    tpu.vector_store %arg6[%c0_19, %c0_20, %c0_21], %46 {strides = array<i32>} : memref<1x64x16xf32, #tpu.memory_space<vmem>>, vector<1x8x16xf32>,
    %47 = vector.extract_strided_slice %8 {offsets = [8, 0], sizes = [8, 48], strides = [1, 1]} : vector<64x48xf32> to vector<8x48xf32>
    %cst_22 = arith.constant dense<0.000000e+00> : vector<8x48xf32>
    %48 = tpu.matmul %43, %10, %cst_22 {dimension_numbers = #tpu.dot_dimension_numbers<[1], [0], [0], [1], [0, 0, 1, 1], [], []>} : vector<8x16xf32>, vector<16x48xf32>, vector<8x48xf32> -> vector<8x48xf32>
    %49 = vector.broadcast %12 : vector<1x48xf32> to vector<8x48xf32>
    %50 = arith.addf %48, %49 : vector<8x48xf32>
    %51 = vector.extract_strided_slice %47 {offsets = [0, 0], sizes = [8, 16], strides = [1, 1]} : vector<8x48xf32> to vector<8x16xf32>
    %52 = vector.extract_strided_slice %50 {offsets = [0, 0], sizes = [8, 16], strides = [1, 1]} : vector<8x48xf32> to vector<8x16xf32>
    %53 = arith.addf %51, %52 : vector<8x16xf32>
    %54 = arith.negf %53 : vector<8x16xf32>
    %55 = math.exp %54 : vector<8x16xf32>
    %cst_23 = arith.constant 1.000000e+00 : f32
    %56 = vector.broadcast %cst_23 : f32 to vector<8x16xf32>
    %57 = arith.addf %56, %55 : vector<8x16xf32>
    %58 = arith.divf %56, %57 : vector<8x16xf32>
    %59 = vector.extract_strided_slice %47 {offsets = [0, 16], sizes = [8, 16], strides = [1, 1]} : vector<8x48xf32> to vector<8x16xf32>
    %60 = vector.extract_strided_slice %50 {offsets = [0, 16], sizes = [8, 16], strides = [1, 1]} : vector<8x48xf32> to vector<8x16xf32>
    %61 = arith.addf %59, %60 : vector<8x16xf32>
    %62 = arith.negf %61 : vector<8x16xf32>
    %63 = math.exp %62 : vector<8x16xf32>
    %cst_24 = arith.constant 1.000000e+00 : f32
    %64 = vector.broadcast %cst_24 : f32 to vector<8x16xf32>
    %65 = arith.addf %64, %63 : vector<8x16xf32>
    %66 = arith.divf %64, %65 : vector<8x16xf32>
    %67 = vector.extract_strided_slice %47 {offsets = [0, 32], sizes = [8, 16], strides = [1, 1]} : vector<8x48xf32> to vector<8x16xf32>
    %68 = vector.extract_strided_slice %50 {offsets = [0, 32], sizes = [8, 16], strides = [1, 1]} : vector<8x48xf32> to vector<8x16xf32>
    %69 = arith.mulf %58, %68 : vector<8x16xf32>
    %70 = arith.addf %67, %69 : vector<8x16xf32>
    %71 = math.tanh %70 : vector<8x16xf32>
    %cst_25 = arith.constant 1.000000e+00 : f32
    %72 = vector.broadcast %cst_25 : f32 to vector<8x16xf32>
    %73 = arith.subf %72, %66 : vector<8x16xf32>
    %74 = arith.mulf %73, %71 : vector<8x16xf32>
    %75 = arith.mulf %66, %43 : vector<8x16xf32>
    %76 = arith.addf %74, %75 : vector<8x16xf32>
    %c0_26 = arith.constant 0 : index
    %c8 = arith.constant 8 : index
    %c0_27 = arith.constant 0 : index
    %77 = vector.load %arg6[%c0_26, %c8, %c0_27] : memref<1x64x16xf32, #tpu.memory_space<vmem>>, vector<1x8x16xf32>
    %78 = vector.shape_cast %77 : vector<1x8x16xf32> to vector<8x16xf32>
    %79 = vector.shape_cast %76 : vector<8x16xf32> to vector<1x8x16xf32>
    tpu.vector_store %arg6[%c0_26, %c8, %c0_27], %79 {strides = array<i32>} : memref<1x64x16xf32, #tpu.memory_space<vmem>>, vector<1x8x16xf32>,
    %80 = vector.extract_strided_slice %8 {offsets = [16, 0], sizes = [8, 48], strides = [1, 1]} : vector<64x48xf32> to vector<8x48xf32>
    %cst_28 = arith.constant dense<0.000000e+00> : vector<8x48xf32>
    %81 = tpu.matmul %76, %10, %cst_28 {dimension_numbers = #tpu.dot_dimension_numbers<[1], [0], [0], [1], [0, 0, 1, 1], [], []>} : vector<8x16xf32>, vector<16x48xf32>, vector<8x48xf32> -> vector<8x48xf32>
    %82 = vector.broadcast %12 : vector<1x48xf32> to vector<8x48xf32>
    %83 = arith.addf %81, %82 : vector<8x48xf32>
    %84 = vector.extract_strided_slice %80 {offsets = [0, 0], sizes = [8, 16], strides = [1, 1]} : vector<8x48xf32> to vector<8x16xf32>
    %85 = vector.extract_strided_slice %83 {offsets = [0, 0], sizes = [8, 16], strides = [1, 1]} : vector<8x48xf32> to vector<8x16xf32>
    %86 = arith.addf %84, %85 : vector<8x16xf32>
    %87 = arith.negf %86 : vector<8x16xf32>
    %88 = math.exp %87 : vector<8x16xf32>
    %cst_29 = arith.constant 1.000000e+00 : f32
    %89 = vector.broadcast %cst_29 : f32 to vector<8x16xf32>
    %90 = arith.addf %89, %88 : vector<8x16xf32>
    %91 = arith.divf %89, %90 : vector<8x16xf32>
    %92 = vector.extract_strided_slice %80 {offsets = [0, 16], sizes = [8, 16], strides = [1, 1]} : vector<8x48xf32> to vector<8x16xf32>
    %93 = vector.extract_strided_slice %83 {offsets = [0, 16], sizes = [8, 16], strides = [1, 1]} : vector<8x48xf32> to vector<8x16xf32>
    %94 = arith.addf %92, %93 : vector<8x16xf32>
    %95 = arith.negf %94 : vector<8x16xf32>
    %96 = math.exp %95 : vector<8x16xf32>
    %cst_30 = arith.constant 1.000000e+00 : f32
    %97 = vector.broadcast %cst_30 : f32 to vector<8x16xf32>
    %98 = arith.addf %97, %96 : vector<8x16xf32>
    %99 = arith.divf %97, %98 : vector<8x16xf32>
    %100 = vector.extract_strided_slice %80 {offsets = [0, 32], sizes = [8, 16], strides = [1, 1]} : vector<8x48xf32> to vector<8x16xf32>
    %101 = vector.extract_strided_slice %83 {offsets = [0, 32], sizes = [8, 16], strides = [1, 1]} : vector<8x48xf32> to vector<8x16xf32>
    %102 = arith.mulf %91, %101 : vector<8x16xf32>
    %103 = arith.addf %100, %102 : vector<8x16xf32>
    %104 = math.tanh %103 : vector<8x16xf32>
    %cst_31 = arith.constant 1.000000e+00 : f32
    %105 = vector.broadcast %cst_31 : f32 to vector<8x16xf32>
    %106 = arith.subf %105, %99 : vector<8x16xf32>
    %107 = arith.mulf %106, %104 : vector<8x16xf32>
    %108 = arith.mulf %99, %76 : vector<8x16xf32>
    %109 = arith.addf %107, %108 : vector<8x16xf32>
    %c0_32 = arith.constant 0 : index
    %c16 = arith.constant 16 : index
    %c0_33 = arith.constant 0 : index
    %110 = vector.load %arg6[%c0_32, %c16, %c0_33] : memref<1x64x16xf32, #tpu.memory_space<vmem>>, vector<1x8x16xf32>
    %111 = vector.shape_cast %110 : vector<1x8x16xf32> to vector<8x16xf32>
    %112 = vector.shape_cast %109 : vector<8x16xf32> to vector<1x8x16xf32>
    tpu.vector_store %arg6[%c0_32, %c16, %c0_33], %112 {strides = array<i32>} : memref<1x64x16xf32, #tpu.memory_space<vmem>>, vector<1x8x16xf32>,
    %113 = vector.extract_strided_slice %8 {offsets = [24, 0], sizes = [8, 48], strides = [1, 1]} : vector<64x48xf32> to vector<8x48xf32>
    %cst_34 = arith.constant dense<0.000000e+00> : vector<8x48xf32>
    %114 = tpu.matmul %109, %10, %cst_34 {dimension_numbers = #tpu.dot_dimension_numbers<[1], [0], [0], [1], [0, 0, 1, 1], [], []>} : vector<8x16xf32>, vector<16x48xf32>, vector<8x48xf32> -> vector<8x48xf32>
    %115 = vector.broadcast %12 : vector<1x48xf32> to vector<8x48xf32>
    %116 = arith.addf %114, %115 : vector<8x48xf32>
    %117 = vector.extract_strided_slice %113 {offsets = [0, 0], sizes = [8, 16], strides = [1, 1]} : vector<8x48xf32> to vector<8x16xf32>
    %118 = vector.extract_strided_slice %116 {offsets = [0, 0], sizes = [8, 16], strides = [1, 1]} : vector<8x48xf32> to vector<8x16xf32>
    %119 = arith.addf %117, %118 : vector<8x16xf32>
    %120 = arith.negf %119 : vector<8x16xf32>
    %121 = math.exp %120 : vector<8x16xf32>
    %cst_35 = arith.constant 1.000000e+00 : f32
    %122 = vector.broadcast %cst_35 : f32 to vector<8x16xf32>
    %123 = arith.addf %122, %121 : vector<8x16xf32>
    %124 = arith.divf %122, %123 : vector<8x16xf32>
    %125 = vector.extract_strided_slice %113 {offsets = [0, 16], sizes = [8, 16], strides = [1, 1]} : vector<8x48xf32> to vector<8x16xf32>
    %126 = vector.extract_strided_slice %116 {offsets = [0, 16], sizes = [8, 16], strides = [1, 1]} : vector<8x48xf32> to vector<8x16xf32>
    %127 = arith.addf %125, %126 : vector<8x16xf32>
    %128 = arith.negf %127 : vector<8x16xf32>
    %129 = math.exp %128 : vector<8x16xf32>
    %cst_36 = arith.constant 1.000000e+00 : f32
    %130 = vector.broadcast %cst_36 : f32 to vector<8x16xf32>
    %131 = arith.addf %130, %129 : vector<8x16xf32>
    %132 = arith.divf %130, %131 : vector<8x16xf32>
    %133 = vector.extract_strided_slice %113 {offsets = [0, 32], sizes = [8, 16], strides = [1, 1]} : vector<8x48xf32> to vector<8x16xf32>
    %134 = vector.extract_strided_slice %116 {offsets = [0, 32], sizes = [8, 16], strides = [1, 1]} : vector<8x48xf32> to vector<8x16xf32>
    %135 = arith.mulf %124, %134 : vector<8x16xf32>
    %136 = arith.addf %133, %135 : vector<8x16xf32>
    %137 = math.tanh %136 : vector<8x16xf32>
    %cst_37 = arith.constant 1.000000e+00 : f32
    %138 = vector.broadcast %cst_37 : f32 to vector<8x16xf32>
    %139 = arith.subf %138, %132 : vector<8x16xf32>
    %140 = arith.mulf %139, %137 : vector<8x16xf32>
    %141 = arith.mulf %132, %109 : vector<8x16xf32>
    %142 = arith.addf %140, %141 : vector<8x16xf32>
    %c0_38 = arith.constant 0 : index
    %c24 = arith.constant 24 : index
    %c0_39 = arith.constant 0 : index
    %143 = vector.load %arg6[%c0_38, %c24, %c0_39] : memref<1x64x16xf32, #tpu.memory_space<vmem>>, vector<1x8x16xf32>
    %144 = vector.shape_cast %143 : vector<1x8x16xf32> to vector<8x16xf32>
    %145 = vector.shape_cast %142 : vector<8x16xf32> to vector<1x8x16xf32>
    tpu.vector_store %arg6[%c0_38, %c24, %c0_39], %145 {strides = array<i32>} : memref<1x64x16xf32, #tpu.memory_space<vmem>>, vector<1x8x16xf32>,
    %146 = vector.extract_strided_slice %8 {offsets = [32, 0], sizes = [8, 48], strides = [1, 1]} : vector<64x48xf32> to vector<8x48xf32>
    %cst_40 = arith.constant dense<0.000000e+00> : vector<8x48xf32>
    %147 = tpu.matmul %142, %10, %cst_40 {dimension_numbers = #tpu.dot_dimension_numbers<[1], [0], [0], [1], [0, 0, 1, 1], [], []>} : vector<8x16xf32>, vector<16x48xf32>, vector<8x48xf32> -> vector<8x48xf32>
    %148 = vector.broadcast %12 : vector<1x48xf32> to vector<8x48xf32>
    %149 = arith.addf %147, %148 : vector<8x48xf32>
    %150 = vector.extract_strided_slice %146 {offsets = [0, 0], sizes = [8, 16], strides = [1, 1]} : vector<8x48xf32> to vector<8x16xf32>
    %151 = vector.extract_strided_slice %149 {offsets = [0, 0], sizes = [8, 16], strides = [1, 1]} : vector<8x48xf32> to vector<8x16xf32>
    %152 = arith.addf %150, %151 : vector<8x16xf32>
    %153 = arith.negf %152 : vector<8x16xf32>
    %154 = math.exp %153 : vector<8x16xf32>
    %cst_41 = arith.constant 1.000000e+00 : f32
    %155 = vector.broadcast %cst_41 : f32 to vector<8x16xf32>
    %156 = arith.addf %155, %154 : vector<8x16xf32>
    %157 = arith.divf %155, %156 : vector<8x16xf32>
    %158 = vector.extract_strided_slice %146 {offsets = [0, 16], sizes = [8, 16], strides = [1, 1]} : vector<8x48xf32> to vector<8x16xf32>
    %159 = vector.extract_strided_slice %149 {offsets = [0, 16], sizes = [8, 16], strides = [1, 1]} : vector<8x48xf32> to vector<8x16xf32>
    %160 = arith.addf %158, %159 : vector<8x16xf32>
    %161 = arith.negf %160 : vector<8x16xf32>
    %162 = math.exp %161 : vector<8x16xf32>
    %cst_42 = arith.constant 1.000000e+00 : f32
    %163 = vector.broadcast %cst_42 : f32 to vector<8x16xf32>
    %164 = arith.addf %163, %162 : vector<8x16xf32>
    %165 = arith.divf %163, %164 : vector<8x16xf32>
    %166 = vector.extract_strided_slice %146 {offsets = [0, 32], sizes = [8, 16], strides = [1, 1]} : vector<8x48xf32> to vector<8x16xf32>
    %167 = vector.extract_strided_slice %149 {offsets = [0, 32], sizes = [8, 16], strides = [1, 1]} : vector<8x48xf32> to vector<8x16xf32>
    %168 = arith.mulf %157, %167 : vector<8x16xf32>
    %169 = arith.addf %166, %168 : vector<8x16xf32>
    %170 = math.tanh %169 : vector<8x16xf32>
    %cst_43 = arith.constant 1.000000e+00 : f32
    %171 = vector.broadcast %cst_43 : f32 to vector<8x16xf32>
    %172 = arith.subf %171, %165 : vector<8x16xf32>
    %173 = arith.mulf %172, %170 : vector<8x16xf32>
    %174 = arith.mulf %165, %142 : vector<8x16xf32>
    %175 = arith.addf %173, %174 : vector<8x16xf32>
    %c0_44 = arith.constant 0 : index
    %c32 = arith.constant 32 : index
    %c0_45 = arith.constant 0 : index
    %176 = vector.load %arg6[%c0_44, %c32, %c0_45] : memref<1x64x16xf32, #tpu.memory_space<vmem>>, vector<1x8x16xf32>
    %177 = vector.shape_cast %176 : vector<1x8x16xf32> to vector<8x16xf32>
    %178 = vector.shape_cast %175 : vector<8x16xf32> to vector<1x8x16xf32>
    tpu.vector_store %arg6[%c0_44, %c32, %c0_45], %178 {strides = array<i32>} : memref<1x64x16xf32, #tpu.memory_space<vmem>>, vector<1x8x16xf32>,
    %179 = vector.extract_strided_slice %8 {offsets = [40, 0], sizes = [8, 48], strides = [1, 1]} : vector<64x48xf32> to vector<8x48xf32>
    %cst_46 = arith.constant dense<0.000000e+00> : vector<8x48xf32>
    %180 = tpu.matmul %175, %10, %cst_46 {dimension_numbers = #tpu.dot_dimension_numbers<[1], [0], [0], [1], [0, 0, 1, 1], [], []>} : vector<8x16xf32>, vector<16x48xf32>, vector<8x48xf32> -> vector<8x48xf32>
    %181 = vector.broadcast %12 : vector<1x48xf32> to vector<8x48xf32>
    %182 = arith.addf %180, %181 : vector<8x48xf32>
    %183 = vector.extract_strided_slice %179 {offsets = [0, 0], sizes = [8, 16], strides = [1, 1]} : vector<8x48xf32> to vector<8x16xf32>
    %184 = vector.extract_strided_slice %182 {offsets = [0, 0], sizes = [8, 16], strides = [1, 1]} : vector<8x48xf32> to vector<8x16xf32>
    %185 = arith.addf %183, %184 : vector<8x16xf32>
    %186 = arith.negf %185 : vector<8x16xf32>
    %187 = math.exp %186 : vector<8x16xf32>
    %cst_47 = arith.constant 1.000000e+00 : f32
    %188 = vector.broadcast %cst_47 : f32 to vector<8x16xf32>
    %189 = arith.addf %188, %187 : vector<8x16xf32>
    %190 = arith.divf %188, %189 : vector<8x16xf32>
    %191 = vector.extract_strided_slice %179 {offsets = [0, 16], sizes = [8, 16], strides = [1, 1]} : vector<8x48xf32> to vector<8x16xf32>
    %192 = vector.extract_strided_slice %182 {offsets = [0, 16], sizes = [8, 16], strides = [1, 1]} : vector<8x48xf32> to vector<8x16xf32>
    %193 = arith.addf %191, %192 : vector<8x16xf32>
    %194 = arith.negf %193 : vector<8x16xf32>
    %195 = math.exp %194 : vector<8x16xf32>
    %cst_48 = arith.constant 1.000000e+00 : f32
    %196 = vector.broadcast %cst_48 : f32 to vector<8x16xf32>
    %197 = arith.addf %196, %195 : vector<8x16xf32>
    %198 = arith.divf %196, %197 : vector<8x16xf32>
    %199 = vector.extract_strided_slice %179 {offsets = [0, 32], sizes = [8, 16], strides = [1, 1]} : vector<8x48xf32> to vector<8x16xf32>
    %200 = vector.extract_strided_slice %182 {offsets = [0, 32], sizes = [8, 16], strides = [1, 1]} : vector<8x48xf32> to vector<8x16xf32>
    %201 = arith.mulf %190, %200 : vector<8x16xf32>
    %202 = arith.addf %199, %201 : vector<8x16xf32>
    %203 = math.tanh %202 : vector<8x16xf32>
    %cst_49 = arith.constant 1.000000e+00 : f32
    %204 = vector.broadcast %cst_49 : f32 to vector<8x16xf32>
    %205 = arith.subf %204, %198 : vector<8x16xf32>
    %206 = arith.mulf %205, %203 : vector<8x16xf32>
    %207 = arith.mulf %198, %175 : vector<8x16xf32>
    %208 = arith.addf %206, %207 : vector<8x16xf32>
    %c0_50 = arith.constant 0 : index
    %c40 = arith.constant 40 : index
    %c0_51 = arith.constant 0 : index
    %209 = vector.load %arg6[%c0_50, %c40, %c0_51] : memref<1x64x16xf32, #tpu.memory_space<vmem>>, vector<1x8x16xf32>
    %210 = vector.shape_cast %209 : vector<1x8x16xf32> to vector<8x16xf32>
    %211 = vector.shape_cast %208 : vector<8x16xf32> to vector<1x8x16xf32>
    tpu.vector_store %arg6[%c0_50, %c40, %c0_51], %211 {strides = array<i32>} : memref<1x64x16xf32, #tpu.memory_space<vmem>>, vector<1x8x16xf32>,
    %212 = vector.extract_strided_slice %8 {offsets = [48, 0], sizes = [8, 48], strides = [1, 1]} : vector<64x48xf32> to vector<8x48xf32>
    %cst_52 = arith.constant dense<0.000000e+00> : vector<8x48xf32>
    %213 = tpu.matmul %208, %10, %cst_52 {dimension_numbers = #tpu.dot_dimension_numbers<[1], [0], [0], [1], [0, 0, 1, 1], [], []>} : vector<8x16xf32>, vector<16x48xf32>, vector<8x48xf32> -> vector<8x48xf32>
    %214 = vector.broadcast %12 : vector<1x48xf32> to vector<8x48xf32>
    %215 = arith.addf %213, %214 : vector<8x48xf32>
    %216 = vector.extract_strided_slice %212 {offsets = [0, 0], sizes = [8, 16], strides = [1, 1]} : vector<8x48xf32> to vector<8x16xf32>
    %217 = vector.extract_strided_slice %215 {offsets = [0, 0], sizes = [8, 16], strides = [1, 1]} : vector<8x48xf32> to vector<8x16xf32>
    %218 = arith.addf %216, %217 : vector<8x16xf32>
    %219 = arith.negf %218 : vector<8x16xf32>
    %220 = math.exp %219 : vector<8x16xf32>
    %cst_53 = arith.constant 1.000000e+00 : f32
    %221 = vector.broadcast %cst_53 : f32 to vector<8x16xf32>
    %222 = arith.addf %221, %220 : vector<8x16xf32>
    %223 = arith.divf %221, %222 : vector<8x16xf32>
    %224 = vector.extract_strided_slice %212 {offsets = [0, 16], sizes = [8, 16], strides = [1, 1]} : vector<8x48xf32> to vector<8x16xf32>
    %225 = vector.extract_strided_slice %215 {offsets = [0, 16], sizes = [8, 16], strides = [1, 1]} : vector<8x48xf32> to vector<8x16xf32>
    %226 = arith.addf %224, %225 : vector<8x16xf32>
    %227 = arith.negf %226 : vector<8x16xf32>
    %228 = math.exp %227 : vector<8x16xf32>
    %cst_54 = arith.constant 1.000000e+00 : f32
    %229 = vector.broadcast %cst_54 : f32 to vector<8x16xf32>
    %230 = arith.addf %229, %228 : vector<8x16xf32>
    %231 = arith.divf %229, %230 : vector<8x16xf32>
    %232 = vector.extract_strided_slice %212 {offsets = [0, 32], sizes = [8, 16], strides = [1, 1]} : vector<8x48xf32> to vector<8x16xf32>
    %233 = vector.extract_strided_slice %215 {offsets = [0, 32], sizes = [8, 16], strides = [1, 1]} : vector<8x48xf32> to vector<8x16xf32>
    %234 = arith.mulf %223, %233 : vector<8x16xf32>
    %235 = arith.addf %232, %234 : vector<8x16xf32>
    %236 = math.tanh %235 : vector<8x16xf32>
    %cst_55 = arith.constant 1.000000e+00 : f32
    %237 = vector.broadcast %cst_55 : f32 to vector<8x16xf32>
    %238 = arith.subf %237, %231 : vector<8x16xf32>
    %239 = arith.mulf %238, %236 : vector<8x16xf32>
    %240 = arith.mulf %231, %208 : vector<8x16xf32>
    %241 = arith.addf %239, %240 : vector<8x16xf32>
    %c0_56 = arith.constant 0 : index
    %c48 = arith.constant 48 : index
    %c0_57 = arith.constant 0 : index
    %242 = vector.load %arg6[%c0_56, %c48, %c0_57] : memref<1x64x16xf32, #tpu.memory_space<vmem>>, vector<1x8x16xf32>
    %243 = vector.shape_cast %242 : vector<1x8x16xf32> to vector<8x16xf32>
    %244 = vector.shape_cast %241 : vector<8x16xf32> to vector<1x8x16xf32>
    tpu.vector_store %arg6[%c0_56, %c48, %c0_57], %244 {strides = array<i32>} : memref<1x64x16xf32, #tpu.memory_space<vmem>>, vector<1x8x16xf32>,
    %245 = vector.extract_strided_slice %8 {offsets = [56, 0], sizes = [8, 48], strides = [1, 1]} : vector<64x48xf32> to vector<8x48xf32>
    %cst_58 = arith.constant dense<0.000000e+00> : vector<8x48xf32>
    %246 = tpu.matmul %241, %10, %cst_58 {dimension_numbers = #tpu.dot_dimension_numbers<[1], [0], [0], [1], [0, 0, 1, 1], [], []>} : vector<8x16xf32>, vector<16x48xf32>, vector<8x48xf32> -> vector<8x48xf32>
    %247 = vector.broadcast %12 : vector<1x48xf32> to vector<8x48xf32>
    %248 = arith.addf %246, %247 : vector<8x48xf32>
    %249 = vector.extract_strided_slice %245 {offsets = [0, 0], sizes = [8, 16], strides = [1, 1]} : vector<8x48xf32> to vector<8x16xf32>
    %250 = vector.extract_strided_slice %248 {offsets = [0, 0], sizes = [8, 16], strides = [1, 1]} : vector<8x48xf32> to vector<8x16xf32>
    %251 = arith.addf %249, %250 : vector<8x16xf32>
    %252 = arith.negf %251 : vector<8x16xf32>
    %253 = math.exp %252 : vector<8x16xf32>
    %cst_59 = arith.constant 1.000000e+00 : f32
    %254 = vector.broadcast %cst_59 : f32 to vector<8x16xf32>
    %255 = arith.addf %254, %253 : vector<8x16xf32>
    %256 = arith.divf %254, %255 : vector<8x16xf32>
    %257 = vector.extract_strided_slice %245 {offsets = [0, 16], sizes = [8, 16], strides = [1, 1]} : vector<8x48xf32> to vector<8x16xf32>
    %258 = vector.extract_strided_slice %248 {offsets = [0, 16], sizes = [8, 16], strides = [1, 1]} : vector<8x48xf32> to vector<8x16xf32>
    %259 = arith.addf %257, %258 : vector<8x16xf32>
    %260 = arith.negf %259 : vector<8x16xf32>
    %261 = math.exp %260 : vector<8x16xf32>
    %cst_60 = arith.constant 1.000000e+00 : f32
    %262 = vector.broadcast %cst_60 : f32 to vector<8x16xf32>
    %263 = arith.addf %262, %261 : vector<8x16xf32>
    %264 = arith.divf %262, %263 : vector<8x16xf32>
    %265 = vector.extract_strided_slice %245 {offsets = [0, 32], sizes = [8, 16], strides = [1, 1]} : vector<8x48xf32> to vector<8x16xf32>
    %266 = vector.extract_strided_slice %248 {offsets = [0, 32], sizes = [8, 16], strides = [1, 1]} : vector<8x48xf32> to vector<8x16xf32>
    %267 = arith.mulf %256, %266 : vector<8x16xf32>
    %268 = arith.addf %265, %267 : vector<8x16xf32>
    %269 = math.tanh %268 : vector<8x16xf32>
    %cst_61 = arith.constant 1.000000e+00 : f32
    %270 = vector.broadcast %cst_61 : f32 to vector<8x16xf32>
    %271 = arith.subf %270, %264 : vector<8x16xf32>
    %272 = arith.mulf %271, %269 : vector<8x16xf32>
    %273 = arith.mulf %264, %241 : vector<8x16xf32>
    %274 = arith.addf %272, %273 : vector<8x16xf32>
    %c0_62 = arith.constant 0 : index
    %c56 = arith.constant 56 : index
    %c0_63 = arith.constant 0 : index
    %275 = vector.load %arg6[%c0_62, %c56, %c0_63] : memref<1x64x16xf32, #tpu.memory_space<vmem>>, vector<1x8x16xf32>
    %276 = vector.shape_cast %275 : vector<1x8x16xf32> to vector<8x16xf32>
    %277 = vector.shape_cast %274 : vector<8x16xf32> to vector<1x8x16xf32>
    tpu.vector_store %arg6[%c0_62, %c56, %c0_63], %277 {strides = array<i32>} : memref<1x64x16xf32, #tpu.memory_space<vmem>>, vector<1x8x16xf32>,
    return
  }
  func.func @transform_0(%arg0: i32) -> (i32, i32, i32) {
    %c0_i32 = arith.constant 0 : i32
    %c0_i32_0 = arith.constant 0 : i32
    %c0_i32_1 = arith.constant 0 : i32
    return %arg0, %c0_i32, %c0_i32_0 : i32, i32, i32
  }
  func.func @transform_1(%arg0: i32) -> (i32, i32, i32) {
    %c0_i32 = arith.constant 0 : i32
    %c0_i32_0 = arith.constant 0 : i32
    %c0_i32_1 = arith.constant 0 : i32
    return %arg0, %c0_i32, %c0_i32_0 : i32, i32, i32
  }
  func.func @transform_2(%arg0: i32) -> (i32, i32, i32) {
    %c0_i32 = arith.constant 0 : i32
    %c0_i32_0 = arith.constant 0 : i32
    %c0_i32_1 = arith.constant 0 : i32
    return %arg0, %c0_i32, %c0_i32_0 : i32, i32, i32
  }
  func.func @transform_3(%arg0: i32) -> (i32, i32, i32) {
    %c0_i32 = arith.constant 0 : i32
    %c0_i32_0 = arith.constant 0 : i32
    %c0_i32_1 = arith.constant 0 : i32
    return %arg0, %c0_i32, %c0_i32_0 : i32, i32, i32
  }
  func.func @transform_4(%arg0: i32) -> (i32, i32, i32) {
    %c0_i32 = arith.constant 0 : i32
    %c0_i32_0 = arith.constant 0 : i32
    %c0_i32_1 = arith.constant 0 : i32
    return %arg0, %c0_i32, %c0_i32_0 : i32, i32, i32
  }
  func.func @transform_5(%arg0: i32) -> (i32, i32, i32) {
    %c0_i32 = arith.constant 0 : i32
    %c0_i32_0 = arith.constant 0 : i32
    %c0_i32_1 = arith.constant 0 : i32
    return %arg0, %c0_i32, %c0_i32_0 : i32, i32, i32
  }
}

module attributes {stable_mosaic.version = 11 : i64} {
  func.func @phn_pool_proj_kernel(%arg0: memref<6x8x32xf32, #tpu.memory_space<vmem>>, %arg1: memref<2x8x32xf32, #tpu.memory_space<vmem>>, %arg2: memref<2x16x32xf32, #tpu.memory_space<vmem>>, %arg3: memref<48x32xf32, #tpu.memory_space<vmem>>, %arg4: memref<16x32xf32, #tpu.memory_space<vmem>>, %arg5: memref<32x32xf32, #tpu.memory_space<vmem>>, %arg6: memref<5x1x32xf32, #tpu.memory_space<vmem>>, %arg7: memref<5x32x16xf32, #tpu.memory_space<vmem>>, %arg8: memref<5x1x16xf32, #tpu.memory_space<vmem>>, %arg9: memref<6x32xf32, #tpu.memory_space<vmem>>, %arg10: memref<2x16xf32, #tpu.memory_space<vmem>>, %arg11: memref<6x16xf32, #tpu.memory_space<vmem>>, %arg12: memref<2x16xf32, #tpu.memory_space<vmem>>, %arg13: memref<32x16xf32, #tpu.memory_space<vmem>>, %arg14: memref<16x16xf32, #tpu.memory_space<vmem>>, %arg15: memref<48x16xf32, #tpu.memory_space<vmem>>, %arg16: memref<2x8xf32, #tpu.memory_space<vmem>>, %arg17: memref<6x8xf32, #tpu.memory_space<vmem>>) attributes {dimension_semantics = [], scalar_prefetch = 0 : i64, scratch_operands = 0 : i64, tpu.core_type = #tpu.core_type<tc>} {
    %c0 = arith.constant 0 : index
    %c0_0 = arith.constant 0 : index
    %c0_1 = arith.constant 0 : index
    %0 = vector.load %arg0[%c0, %c0_0, %c0_1] : memref<6x8x32xf32, #tpu.memory_space<vmem>>, vector<6x8x32xf32>
    %c0_2 = arith.constant 0 : index
    %c0_3 = arith.constant 0 : index
    %c0_4 = arith.constant 0 : index
    %1 = vector.load %arg1[%c0_2, %c0_3, %c0_4] : memref<2x8x32xf32, #tpu.memory_space<vmem>>, vector<2x8x32xf32>
    %c0_5 = arith.constant 0 : index
    %c0_6 = arith.constant 0 : index
    %c0_7 = arith.constant 0 : index
    %2 = vector.load %arg2[%c0_5, %c0_6, %c0_7] : memref<2x16x32xf32, #tpu.memory_space<vmem>>, vector<2x16x32xf32>
    %c0_8 = arith.constant 0 : index
    %c0_9 = arith.constant 0 : index
    %c0_10 = arith.constant 0 : index
    %3 = vector.load %arg6[%c0_8, %c0_9, %c0_10] : memref<5x1x32xf32, #tpu.memory_space<vmem>>, vector<1x1x32xf32>
    %4 = vector.shape_cast %3 : vector<1x1x32xf32> to vector<1x32xf32>
    %5 = vector.shape_cast %4 : vector<1x32xf32> to vector<1x1x32xf32>
    %6 = vector.broadcast %5 : vector<1x1x32xf32> to vector<6x8x32xf32>
    %7 = arith.mulf %0, %6 : vector<6x8x32xf32>
    %cst = arith.constant dense<0.000000e+00> : vector<6x8xf32>
    %8 = vector.multi_reduction <add>, %7, %cst [2] : vector<6x8x32xf32> to vector<6x8xf32>
    %cst_11 = arith.constant dense<0xFF800000> : vector<6xf32>
    %9 = vector.multi_reduction <maximumf>, %8, %cst_11 [1] : vector<6x8xf32> to vector<6xf32>
    %cst_12 = arith.constant 0xFF800000 : f32
    %10 = vector.broadcast %cst_12 : f32 to vector<6xf32>
    %11 = arith.maximumf %10, %9 : vector<6xf32>
    %12 = vector.shape_cast %11 : vector<6xf32> to vector<6x1xf32>
    %13 = vector.broadcast %12 : vector<6x1xf32> to vector<6x8xf32>
    %14 = arith.subf %8, %13 : vector<6x8xf32>
    %15 = math.exp %14 : vector<6x8xf32>
    %cst_13 = arith.constant dense<0.000000e+00> : vector<6xf32>
    %16 = vector.multi_reduction <add>, %15, %cst_13 [1] : vector<6x8xf32> to vector<6xf32>
    %17 = vector.shape_cast %16 : vector<6xf32> to vector<6x1xf32>
    %18 = vector.broadcast %17 : vector<6x1xf32> to vector<6x8xf32>
    %19 = arith.divf %15, %18 : vector<6x8xf32>
    %20 = vector.shape_cast %19 : vector<6x8xf32> to vector<6x8x1xf32>
    %21 = vector.broadcast %20 : vector<6x8x1xf32> to vector<6x8x32xf32>
    %22 = arith.mulf %21, %0 : vector<6x8x32xf32>
    %cst_14 = arith.constant dense<0.000000e+00> : vector<6x32xf32>
    %23 = vector.multi_reduction <add>, %22, %cst_14 [1] : vector<6x8x32xf32> to vector<6x32xf32>
    %c0_15 = arith.constant 0 : index
    %c0_16 = arith.constant 0 : index
    %24 = vector.load %arg9[%c0_15, %c0_16] : memref<6x32xf32, #tpu.memory_space<vmem>>, vector<6x32xf32>
    tpu.vector_store %arg9[%c0_15, %c0_16], %23 {strides = array<i32>} : memref<6x32xf32, #tpu.memory_space<vmem>>, vector<6x32xf32>,
    %c1 = arith.constant 1 : index
    %c0_17 = arith.constant 0 : index
    %c0_18 = arith.constant 0 : index
    %25 = vector.load %arg6[%c1, %c0_17, %c0_18] : memref<5x1x32xf32, #tpu.memory_space<vmem>>, vector<1x1x32xf32>
    %26 = vector.shape_cast %25 : vector<1x1x32xf32> to vector<1x32xf32>
    %27 = vector.shape_cast %26 : vector<1x32xf32> to vector<1x1x32xf32>
    %28 = vector.broadcast %27 : vector<1x1x32xf32> to vector<2x16x32xf32>
    %29 = arith.mulf %2, %28 : vector<2x16x32xf32>
    %cst_19 = arith.constant dense<0.000000e+00> : vector<2x16xf32>
    %30 = vector.multi_reduction <add>, %29, %cst_19 [2] : vector<2x16x32xf32> to vector<2x16xf32>
    %31 = vector.shape_cast %30 : vector<2x16xf32> to vector<2x16x1xf32>
    %32 = vector.broadcast %31 : vector<2x16x1xf32> to vector<2x16x32xf32>
    %33 = arith.mulf %32, %2 : vector<2x16x32xf32>
    %cst_20 = arith.constant dense<0.000000e+00> : vector<2x32xf32>
    %34 = vector.multi_reduction <add>, %33, %cst_20 [1] : vector<2x16x32xf32> to vector<2x32xf32>
    %c0_21 = arith.constant 0 : index
    %c0_22 = arith.constant 0 : index
    %c0_23 = arith.constant 0 : index
    %35 = vector.load %arg7[%c0_21, %c0_22, %c0_23] : memref<5x32x16xf32, #tpu.memory_space<vmem>>, vector<1x32x16xf32>
    %36 = vector.shape_cast %35 : vector<1x32x16xf32> to vector<32x16xf32>
    %cst_24 = arith.constant dense<0.000000e+00> : vector<2x16xf32>
    %37 = tpu.matmul %34, %36, %cst_24 {dimension_numbers = #tpu.dot_dimension_numbers<[1], [0], [0], [1], [0, 0, 1, 1], [], []>} : vector<2x32xf32>, vector<32x16xf32>, vector<2x16xf32> -> vector<2x16xf32>
    %c0_25 = arith.constant 0 : index
    %c0_26 = arith.constant 0 : index
    %c0_27 = arith.constant 0 : index
    %38 = vector.load %arg8[%c0_25, %c0_26, %c0_27] : memref<5x1x16xf32, #tpu.memory_space<vmem>>, vector<1x1x16xf32>
    %39 = vector.shape_cast %38 : vector<1x1x16xf32> to vector<1x16xf32>
    %40 = vector.broadcast %39 : vector<1x16xf32> to vector<2x16xf32>
    %41 = arith.addf %37, %40 : vector<2x16xf32>
    %cst_28 = arith.constant 0.000000e+00 : f32
    %42 = vector.broadcast %cst_28 : f32 to vector<2x16xf32>
    %43 = arith.cmpf oge, %41, %42 : vector<2x16xf32>
    %cst_29 = arith.constant 0.00999999977 : f32
    %44 = vector.broadcast %cst_29 : f32 to vector<2x16xf32>
    %45 = arith.mulf %44, %41 : vector<2x16xf32>
    %46 = arith.select %43, %41, %45 : vector<2x16xi1>, vector<2x16xf32>
    %c0_30 = arith.constant 0 : index
    %c0_31 = arith.constant 0 : index
    %47 = vector.load %arg10[%c0_30, %c0_31] : memref<2x16xf32, #tpu.memory_space<vmem>>, vector<2x16xf32>
    tpu.vector_store %arg10[%c0_30, %c0_31], %46 {strides = array<i32>} : memref<2x16xf32, #tpu.memory_space<vmem>>, vector<2x16xf32>,
    %c2 = arith.constant 2 : index
    %c0_32 = arith.constant 0 : index
    %c0_33 = arith.constant 0 : index
    %48 = vector.load %arg6[%c2, %c0_32, %c0_33] : memref<5x1x32xf32, #tpu.memory_space<vmem>>, vector<1x1x32xf32>
    %49 = vector.shape_cast %48 : vector<1x1x32xf32> to vector<1x32xf32>
    %50 = vector.shape_cast %49 : vector<1x32xf32> to vector<1x1x32xf32>
    %51 = vector.broadcast %50 : vector<1x1x32xf32> to vector<2x8x32xf32>
    %52 = arith.mulf %1, %51 : vector<2x8x32xf32>
    %cst_34 = arith.constant dense<0.000000e+00> : vector<2x8xf32>
    %53 = vector.multi_reduction <add>, %52, %cst_34 [2] : vector<2x8x32xf32> to vector<2x8xf32>
    %54 = vector.shape_cast %53 : vector<2x8xf32> to vector<2x8x1xf32>
    %55 = vector.broadcast %54 : vector<2x8x1xf32> to vector<2x8x32xf32>
    %56 = arith.mulf %55, %1 : vector<2x8x32xf32>
    %cst_35 = arith.constant dense<0.000000e+00> : vector<2x32xf32>
    %57 = vector.multi_reduction <add>, %56, %cst_35 [1] : vector<2x8x32xf32> to vector<2x32xf32>
    %c2_36 = arith.constant 2 : index
    %c0_37 = arith.constant 0 : index
    %c0_38 = arith.constant 0 : index
    %58 = vector.load %arg6[%c2_36, %c0_37, %c0_38] : memref<5x1x32xf32, #tpu.memory_space<vmem>>, vector<1x1x32xf32>
    %59 = vector.shape_cast %58 : vector<1x1x32xf32> to vector<1x32xf32>
    %60 = vector.shape_cast %59 : vector<1x32xf32> to vector<1x1x32xf32>
    %61 = vector.broadcast %60 : vector<1x1x32xf32> to vector<6x8x32xf32>
    %62 = arith.mulf %0, %61 : vector<6x8x32xf32>
    %cst_39 = arith.constant dense<0.000000e+00> : vector<6x8xf32>
    %63 = vector.multi_reduction <add>, %62, %cst_39 [2] : vector<6x8x32xf32> to vector<6x8xf32>
    %64 = vector.shape_cast %63 : vector<6x8xf32> to vector<6x8x1xf32>
    %65 = vector.broadcast %64 : vector<6x8x1xf32> to vector<6x8x32xf32>
    %66 = arith.mulf %65, %0 : vector<6x8x32xf32>
    %cst_40 = arith.constant dense<0.000000e+00> : vector<6x32xf32>
    %67 = vector.multi_reduction <add>, %66, %cst_40 [1] : vector<6x8x32xf32> to vector<6x32xf32>
    %c1_41 = arith.constant 1 : index
    %c0_42 = arith.constant 0 : index
    %c0_43 = arith.constant 0 : index
    %68 = vector.load %arg7[%c1_41, %c0_42, %c0_43] : memref<5x32x16xf32, #tpu.memory_space<vmem>>, vector<1x32x16xf32>
    %69 = vector.shape_cast %68 : vector<1x32x16xf32> to vector<32x16xf32>
    %cst_44 = arith.constant dense<0.000000e+00> : vector<2x16xf32>
    %70 = tpu.matmul %57, %69, %cst_44 {dimension_numbers = #tpu.dot_dimension_numbers<[1], [0], [0], [1], [0, 0, 1, 1], [], []>} : vector<2x32xf32>, vector<32x16xf32>, vector<2x16xf32> -> vector<2x16xf32>
    %c1_45 = arith.constant 1 : index
    %c0_46 = arith.constant 0 : index
    %c0_47 = arith.constant 0 : index
    %71 = vector.load %arg8[%c1_45, %c0_46, %c0_47] : memref<5x1x16xf32, #tpu.memory_space<vmem>>, vector<1x1x16xf32>
    %72 = vector.shape_cast %71 : vector<1x1x16xf32> to vector<1x16xf32>
    %73 = vector.broadcast %72 : vector<1x16xf32> to vector<2x16xf32>
    %74 = arith.addf %70, %73 : vector<2x16xf32>
    %c0_48 = arith.constant 0 : index
    %c0_49 = arith.constant 0 : index
    %75 = vector.load %arg12[%c0_48, %c0_49] : memref<2x16xf32, #tpu.memory_space<vmem>>, vector<2x16xf32>
    tpu.vector_store %arg12[%c0_48, %c0_49], %74 {strides = array<i32>} : memref<2x16xf32, #tpu.memory_space<vmem>>, vector<2x16xf32>,
    %c1_50 = arith.constant 1 : index
    %c0_51 = arith.constant 0 : index
    %c0_52 = arith.constant 0 : index
    %76 = vector.load %arg7[%c1_50, %c0_51, %c0_52] : memref<5x32x16xf32, #tpu.memory_space<vmem>>, vector<1x32x16xf32>
    %77 = vector.shape_cast %76 : vector<1x32x16xf32> to vector<32x16xf32>
    %cst_53 = arith.constant dense<0.000000e+00> : vector<6x16xf32>
    %78 = tpu.matmul %67, %77, %cst_53 {dimension_numbers = #tpu.dot_dimension_numbers<[1], [0], [0], [1], [0, 0, 1, 1], [], []>} : vector<6x32xf32>, vector<32x16xf32>, vector<6x16xf32> -> vector<6x16xf32>
    %c0_54 = arith.constant 0 : index
    %c0_55 = arith.constant 0 : index
    %79 = vector.load %arg11[%c0_54, %c0_55] : memref<6x16xf32, #tpu.memory_space<vmem>>, vector<6x16xf32>
    tpu.vector_store %arg11[%c0_54, %c0_55], %78 {strides = array<i32>} : memref<6x16xf32, #tpu.memory_space<vmem>>, vector<6x16xf32>,
    %c0_56 = arith.constant 0 : index
    %c0_57 = arith.constant 0 : index
    %80 = vector.load %arg5[%c0_56, %c0_57] : memref<32x32xf32, #tpu.memory_space<vmem>>, vector<32x32xf32>
    %c2_58 = arith.constant 2 : index
    %c0_59 = arith.constant 0 : index
    %c0_60 = arith.constant 0 : index
    %81 = vector.load %arg7[%c2_58, %c0_59, %c0_60] : memref<5x32x16xf32, #tpu.memory_space<vmem>>, vector<1x32x16xf32>
    %82 = vector.shape_cast %81 : vector<1x32x16xf32> to vector<32x16xf32>
    %cst_61 = arith.constant dense<0.000000e+00> : vector<32x16xf32>
    %83 = tpu.matmul %80, %82, %cst_61 {dimension_numbers = #tpu.dot_dimension_numbers<[1], [0], [0], [1], [0, 0, 1, 1], [], []>} : vector<32x32xf32>, vector<32x16xf32>, vector<32x16xf32> -> vector<32x16xf32>
    %c2_62 = arith.constant 2 : index
    %c0_63 = arith.constant 0 : index
    %c0_64 = arith.constant 0 : index
    %84 = vector.load %arg8[%c2_62, %c0_63, %c0_64] : memref<5x1x16xf32, #tpu.memory_space<vmem>>, vector<1x1x16xf32>
    %85 = vector.shape_cast %84 : vector<1x1x16xf32> to vector<1x16xf32>
    %86 = vector.broadcast %85 : vector<1x16xf32> to vector<32x16xf32>
    %87 = arith.addf %83, %86 : vector<32x16xf32>
    %cst_65 = arith.constant 0.000000e+00 : f32
    %88 = vector.broadcast %cst_65 : f32 to vector<32x16xf32>
    %89 = arith.cmpf oge, %87, %88 : vector<32x16xf32>
    %cst_66 = arith.constant 0.00999999977 : f32
    %90 = vector.broadcast %cst_66 : f32 to vector<32x16xf32>
    %91 = arith.mulf %90, %87 : vector<32x16xf32>
    %92 = arith.select %89, %87, %91 : vector<32x16xi1>, vector<32x16xf32>
    %c0_67 = arith.constant 0 : index
    %c0_68 = arith.constant 0 : index
    %93 = vector.load %arg13[%c0_67, %c0_68] : memref<32x16xf32, #tpu.memory_space<vmem>>, vector<32x16xf32>
    tpu.vector_store %arg13[%c0_67, %c0_68], %92 {strides = array<i32>} : memref<32x16xf32, #tpu.memory_space<vmem>>, vector<32x16xf32>,
    %c0_69 = arith.constant 0 : index
    %c0_70 = arith.constant 0 : index
    %94 = vector.load %arg4[%c0_69, %c0_70] : memref<16x32xf32, #tpu.memory_space<vmem>>, vector<16x32xf32>
    %c3 = arith.constant 3 : index
    %c0_71 = arith.constant 0 : index
    %c0_72 = arith.constant 0 : index
    %95 = vector.load %arg7[%c3, %c0_71, %c0_72] : memref<5x32x16xf32, #tpu.memory_space<vmem>>, vector<1x32x16xf32>
    %96 = vector.shape_cast %95 : vector<1x32x16xf32> to vector<32x16xf32>
    %cst_73 = arith.constant dense<0.000000e+00> : vector<16x16xf32>
    %97 = tpu.matmul %94, %96, %cst_73 {dimension_numbers = #tpu.dot_dimension_numbers<[1], [0], [0], [1], [0, 0, 1, 1], [], []>} : vector<16x32xf32>, vector<32x16xf32>, vector<16x16xf32> -> vector<16x16xf32>
    %c3_74 = arith.constant 3 : index
    %c0_75 = arith.constant 0 : index
    %c0_76 = arith.constant 0 : index
    %98 = vector.load %arg8[%c3_74, %c0_75, %c0_76] : memref<5x1x16xf32, #tpu.memory_space<vmem>>, vector<1x1x16xf32>
    %99 = vector.shape_cast %98 : vector<1x1x16xf32> to vector<1x16xf32>
    %100 = vector.broadcast %99 : vector<1x16xf32> to vector<16x16xf32>
    %101 = arith.addf %97, %100 : vector<16x16xf32>
    %cst_77 = arith.constant 0.000000e+00 : f32
    %102 = vector.broadcast %cst_77 : f32 to vector<16x16xf32>
    %103 = arith.cmpf oge, %101, %102 : vector<16x16xf32>
    %cst_78 = arith.constant 0.00999999977 : f32
    %104 = vector.broadcast %cst_78 : f32 to vector<16x16xf32>
    %105 = arith.mulf %104, %101 : vector<16x16xf32>
    %106 = arith.select %103, %101, %105 : vector<16x16xi1>, vector<16x16xf32>
    %c0_79 = arith.constant 0 : index
    %c0_80 = arith.constant 0 : index
    %107 = vector.load %arg14[%c0_79, %c0_80] : memref<16x16xf32, #tpu.memory_space<vmem>>, vector<16x16xf32>
    tpu.vector_store %arg14[%c0_79, %c0_80], %106 {strides = array<i32>} : memref<16x16xf32, #tpu.memory_space<vmem>>, vector<16x16xf32>,
    %c0_81 = arith.constant 0 : index
    %c0_82 = arith.constant 0 : index
    %108 = vector.load %arg3[%c0_81, %c0_82] : memref<48x32xf32, #tpu.memory_space<vmem>>, vector<48x32xf32>
    %c4 = arith.constant 4 : index
    %c0_83 = arith.constant 0 : index
    %c0_84 = arith.constant 0 : index
    %109 = vector.load %arg7[%c4, %c0_83, %c0_84] : memref<5x32x16xf32, #tpu.memory_space<vmem>>, vector<1x32x16xf32>
    %110 = vector.shape_cast %109 : vector<1x32x16xf32> to vector<32x16xf32>
    %cst_85 = arith.constant dense<0.000000e+00> : vector<48x16xf32>
    %111 = tpu.matmul %108, %110, %cst_85 {dimension_numbers = #tpu.dot_dimension_numbers<[1], [0], [0], [1], [0, 0, 1, 1], [], []>} : vector<48x32xf32>, vector<32x16xf32>, vector<48x16xf32> -> vector<48x16xf32>
    %c4_86 = arith.constant 4 : index
    %c0_87 = arith.constant 0 : index
    %c0_88 = arith.constant 0 : index
    %112 = vector.load %arg8[%c4_86, %c0_87, %c0_88] : memref<5x1x16xf32, #tpu.memory_space<vmem>>, vector<1x1x16xf32>
    %113 = vector.shape_cast %112 : vector<1x1x16xf32> to vector<1x16xf32>
    %114 = vector.broadcast %113 : vector<1x16xf32> to vector<48x16xf32>
    %115 = arith.addf %111, %114 : vector<48x16xf32>
    %cst_89 = arith.constant 0.000000e+00 : f32
    %116 = vector.broadcast %cst_89 : f32 to vector<48x16xf32>
    %117 = arith.cmpf oge, %115, %116 : vector<48x16xf32>
    %cst_90 = arith.constant 0.00999999977 : f32
    %118 = vector.broadcast %cst_90 : f32 to vector<48x16xf32>
    %119 = arith.mulf %118, %115 : vector<48x16xf32>
    %120 = arith.select %117, %115, %119 : vector<48x16xi1>, vector<48x16xf32>
    %c0_91 = arith.constant 0 : index
    %c0_92 = arith.constant 0 : index
    %121 = vector.load %arg15[%c0_91, %c0_92] : memref<48x16xf32, #tpu.memory_space<vmem>>, vector<48x16xf32>
    tpu.vector_store %arg15[%c0_91, %c0_92], %120 {strides = array<i32>} : memref<48x16xf32, #tpu.memory_space<vmem>>, vector<48x16xf32>,
    %c3_93 = arith.constant 3 : index
    %c0_94 = arith.constant 0 : index
    %c0_95 = arith.constant 0 : index
    %122 = vector.load %arg6[%c3_93, %c0_94, %c0_95] : memref<5x1x32xf32, #tpu.memory_space<vmem>>, vector<1x1x32xf32>
    %123 = vector.shape_cast %122 : vector<1x1x32xf32> to vector<1x32xf32>
    %124 = vector.shape_cast %123 : vector<1x32xf32> to vector<1x1x32xf32>
    %125 = vector.broadcast %124 : vector<1x1x32xf32> to vector<2x8x32xf32>
    %126 = arith.mulf %1, %125 : vector<2x8x32xf32>
    %cst_96 = arith.constant dense<0.000000e+00> : vector<2x8xf32>
    %127 = vector.multi_reduction <add>, %126, %cst_96 [2] : vector<2x8x32xf32> to vector<2x8xf32>
    %c0_97 = arith.constant 0 : index
    %c0_98 = arith.constant 0 : index
    %128 = vector.load %arg16[%c0_97, %c0_98] : memref<2x8xf32, #tpu.memory_space<vmem>>, vector<2x8xf32>
    tpu.vector_store %arg16[%c0_97, %c0_98], %127 {strides = array<i32>} : memref<2x8xf32, #tpu.memory_space<vmem>>, vector<2x8xf32>,
    %c4_99 = arith.constant 4 : index
    %c0_100 = arith.constant 0 : index
    %c0_101 = arith.constant 0 : index
    %129 = vector.load %arg6[%c4_99, %c0_100, %c0_101] : memref<5x1x32xf32, #tpu.memory_space<vmem>>, vector<1x1x32xf32>
    %130 = vector.shape_cast %129 : vector<1x1x32xf32> to vector<1x32xf32>
    %131 = vector.shape_cast %130 : vector<1x32xf32> to vector<1x1x32xf32>
    %132 = vector.broadcast %131 : vector<1x1x32xf32> to vector<6x8x32xf32>
    %133 = arith.mulf %0, %132 : vector<6x8x32xf32>
    %cst_102 = arith.constant dense<0.000000e+00> : vector<6x8xf32>
    %134 = vector.multi_reduction <add>, %133, %cst_102 [2] : vector<6x8x32xf32> to vector<6x8xf32>
    %c0_103 = arith.constant 0 : index
    %c0_104 = arith.constant 0 : index
    %135 = vector.load %arg17[%c0_103, %c0_104] : memref<6x8xf32, #tpu.memory_space<vmem>>, vector<6x8xf32>
    tpu.vector_store %arg17[%c0_103, %c0_104], %134 {strides = array<i32>} : memref<6x8xf32, #tpu.memory_space<vmem>>, vector<6x8xf32>,
    return
  }
}

module attributes {stable_mosaic.version = 11 : i64} {
  func.func @phn_match_score_kernel(%arg0: memref<6x16x16xf32, #tpu.memory_space<vmem>>, %arg1: memref<6x8x16xf32, #tpu.memory_space<vmem>>, %arg2: memref<6x8x16xf32, #tpu.memory_space<vmem>>, %arg3: memref<6x8xf32, #tpu.memory_space<vmem>>, %arg4: memref<6x8xf32, #tpu.memory_space<vmem>>, %arg5: memref<3x6x16xf32, #tpu.memory_space<vmem>>, %arg6: memref<2x16xf32, #tpu.memory_space<vmem>>, %arg7: memref<2x3x16xf32, #tpu.memory_space<vmem>>, %arg8: memref<2x3x32xf32, #tpu.memory_space<vmem>>, %arg9: memref<9x3x3xf32, #tpu.memory_space<vmem>>, %arg10: memref<4x3x32xf32, #tpu.memory_space<vmem>>, %arg11: memref<2x6xf32, #tpu.memory_space<vmem>>, %arg12: memref<6x3xf32, #tpu.memory_space<vmem>>, %arg13: memref<2x3xf32, #tpu.memory_space<vmem>>) attributes {dimension_semantics = [], scalar_prefetch = 0 : i64, scratch_operands = 0 : i64, tpu.core_type = #tpu.core_type<tc>} {
    %c0 = arith.constant 0 : index
    %c0_0 = arith.constant 0 : index
    %c0_1 = arith.constant 0 : index
    %0 = vector.load %arg0[%c0, %c0_0, %c0_1] : memref<6x16x16xf32, #tpu.memory_space<vmem>>, vector<6x16x16xf32>
    %c0_2 = arith.constant 0 : index
    %c0_3 = arith.constant 0 : index
    %c0_4 = arith.constant 0 : index
    %1 = vector.load %arg1[%c0_2, %c0_3, %c0_4] : memref<6x8x16xf32, #tpu.memory_space<vmem>>, vector<6x8x16xf32>
    %c0_5 = arith.constant 0 : index
    %c0_6 = arith.constant 0 : index
    %c0_7 = arith.constant 0 : index
    %2 = vector.load %arg2[%c0_5, %c0_6, %c0_7] : memref<6x8x16xf32, #tpu.memory_space<vmem>>, vector<6x8x16xf32>
    %c0_8 = arith.constant 0 : index
    %c0_9 = arith.constant 0 : index
    %3 = vector.load %arg3[%c0_8, %c0_9] : memref<6x8xf32, #tpu.memory_space<vmem>>, vector<6x8xf32>
    %c0_10 = arith.constant 0 : index
    %c0_11 = arith.constant 0 : index
    %4 = vector.load %arg4[%c0_10, %c0_11] : memref<6x8xf32, #tpu.memory_space<vmem>>, vector<6x8xf32>
    %c0_12 = arith.constant 0 : index
    %c0_13 = arith.constant 0 : index
    %5 = vector.load %arg11[%c0_12, %c0_13] : memref<2x6xf32, #tpu.memory_space<vmem>>, vector<2x6xf32>
    %c0_14 = arith.constant 0 : index
    %c0_15 = arith.constant 0 : index
    %6 = vector.load %arg12[%c0_14, %c0_15] : memref<6x3xf32, #tpu.memory_space<vmem>>, vector<6x3xf32>
    %c0_16 = arith.constant 0 : index
    %c0_17 = arith.constant 0 : index
    %7 = vector.load %arg6[%c0_16, %c0_17] : memref<2x16xf32, #tpu.memory_space<vmem>>, vector<2x16xf32>
    %c0_18 = arith.constant 0 : index
    %c0_19 = arith.constant 0 : index
    %c0_20 = arith.constant 0 : index
    %8 = vector.load %arg7[%c0_18, %c0_19, %c0_20] : memref<2x3x16xf32, #tpu.memory_space<vmem>>, vector<2x3x16xf32>
    %cst = arith.constant 0.000000e+00 : f32
    %9 = vector.broadcast %cst : f32 to vector<2x3x16xf32>
    %10 = arith.cmpf oge, %8, %9 : vector<2x3x16xf32>
    %cst_21 = arith.constant 0.00999999977 : f32
    %11 = vector.broadcast %cst_21 : f32 to vector<2x3x16xf32>
    %12 = arith.mulf %11, %8 : vector<2x3x16xf32>
    %13 = arith.select %10, %8, %12 : vector<2x3x16xi1>, vector<2x3x16xf32>
    %14 = arith.mulf %7, %7 : vector<2x16xf32>
    %cst_22 = arith.constant dense<0.000000e+00> : vector<2xf32>
    %15 = vector.multi_reduction <add>, %14, %cst_22 [1] : vector<2x16xf32> to vector<2xf32>
    %16 = vector.shape_cast %15 : vector<2xf32> to vector<2x1xf32>
    %17 = math.sqrt %16 : vector<2x1xf32>
    %18 = arith.mulf %13, %13 : vector<2x3x16xf32>
    %cst_23 = arith.constant dense<0.000000e+00> : vector<2x3xf32>
    %19 = vector.multi_reduction <add>, %18, %cst_23 [2] : vector<2x3x16xf32> to vector<2x3xf32>
    %20 = math.sqrt %19 : vector<2x3xf32>
    %21 = vector.shape_cast %7 : vector<2x16xf32> to vector<2x1x16xf32>
    %22 = vector.broadcast %21 : vector<2x1x16xf32> to vector<2x3x16xf32>
    %23 = arith.mulf %22, %13 : vector<2x3x16xf32>
    %cst_24 = arith.constant dense<0.000000e+00> : vector<2x3xf32>
    %24 = vector.multi_reduction <add>, %23, %cst_24 [2] : vector<2x3x16xf32> to vector<2x3xf32>
    %25 = vector.broadcast %17 : vector<2x1xf32> to vector<2x3xf32>
    %26 = arith.mulf %25, %20 : vector<2x3xf32>
    %cst_25 = arith.constant 9.99999993E-9 : f32
    %27 = vector.broadcast %cst_25 : f32 to vector<2x3xf32>
    %28 = arith.maximumf %26, %27 : vector<2x3xf32>
    %29 = arith.divf %24, %28 : vector<2x3xf32>
    %30 = arith.mulf %0, %0 : vector<6x16x16xf32>
    %cst_26 = arith.constant dense<0.000000e+00> : vector<6x16xf32>
    %31 = vector.multi_reduction <add>, %30, %cst_26 [2] : vector<6x16x16xf32> to vector<6x16xf32>
    %32 = math.sqrt %31 : vector<6x16xf32>
    %33 = arith.mulf %1, %1 : vector<6x8x16xf32>
    %cst_27 = arith.constant dense<0.000000e+00> : vector<6x8xf32>
    %34 = vector.multi_reduction <add>, %33, %cst_27 [2] : vector<6x8x16xf32> to vector<6x8xf32>
    %35 = math.sqrt %34 : vector<6x8xf32>
    %36 = arith.mulf %2, %2 : vector<6x8x16xf32>
    %cst_28 = arith.constant dense<0.000000e+00> : vector<6x8xf32>
    %37 = vector.multi_reduction <add>, %36, %cst_28 [2] : vector<6x8x16xf32> to vector<6x8xf32>
    %38 = math.sqrt %37 : vector<6x8xf32>
    "tpu.trace_start"() <{level = 10 : i32, message = "nth,nqh->ntq"}> : () -> ()
    %cst_29 = arith.constant dense<0.000000e+00> : vector<6x16x8xf32>
    %39 = tpu.matmul %0, %1, %cst_29 {dimension_numbers = #tpu.dot_dimension_numbers<[2], [2], [1], [1], [0, 0, 0, 1, 1, 1], [0], [0]>} : vector<6x16x16xf32>, vector<6x8x16xf32>, vector<6x16x8xf32> -> vector<6x16x8xf32>
    "tpu.trace_stop"() : () -> ()
    "tpu.trace_start"() <{level = 10 : i32, message = "nth,nah->nta"}> : () -> ()
    %cst_30 = arith.constant dense<0.000000e+00> : vector<6x16x8xf32>
    %40 = tpu.matmul %0, %2, %cst_30 {dimension_numbers = #tpu.dot_dimension_numbers<[2], [2], [1], [1], [0, 0, 0, 1, 1, 1], [0], [0]>} : vector<6x16x16xf32>, vector<6x8x16xf32>, vector<6x16x8xf32> -> vector<6x16x8xf32>
    "tpu.trace_stop"() : () -> ()
    %41 = vector.shape_cast %32 : vector<6x16xf32> to vector<6x16x1xf32>
    %42 = vector.shape_cast %35 : vector<6x8xf32> to vector<6x1x8xf32>
    %43 = vector.broadcast %41 : vector<6x16x1xf32> to vector<6x16x8xf32>
    %44 = vector.broadcast %42 : vector<6x1x8xf32> to vector<6x16x8xf32>
    %45 = arith.mulf %43, %44 : vector<6x16x8xf32>
    %cst_31 = arith.constant 9.99999993E-9 : f32
    %46 = vector.broadcast %cst_31 : f32 to vector<6x16x8xf32>
    %47 = arith.maximumf %45, %46 : vector<6x16x8xf32>
    %48 = arith.divf %39, %47 : vector<6x16x8xf32>
    %49 = vector.shape_cast %32 : vector<6x16xf32> to vector<6x16x1xf32>
    %50 = vector.shape_cast %38 : vector<6x8xf32> to vector<6x1x8xf32>
    %51 = vector.broadcast %49 : vector<6x16x1xf32> to vector<6x16x8xf32>
    %52 = vector.broadcast %50 : vector<6x1x8xf32> to vector<6x16x8xf32>
    %53 = arith.mulf %51, %52 : vector<6x16x8xf32>
    %cst_32 = arith.constant 9.99999993E-9 : f32
    %54 = vector.broadcast %cst_32 : f32 to vector<6x16x8xf32>
    %55 = arith.maximumf %53, %54 : vector<6x16x8xf32>
    %56 = arith.divf %40, %55 : vector<6x16x8xf32>
    %c0_33 = arith.constant 0 : index
    %c0_34 = arith.constant 0 : index
    %c0_35 = arith.constant 0 : index
    %57 = vector.load %arg5[%c0_33, %c0_34, %c0_35] : memref<3x6x16xf32, #tpu.memory_space<vmem>>, vector<1x6x16xf32>
    %58 = vector.shape_cast %57 : vector<1x6x16xf32> to vector<6x16xf32>
    %59 = vector.shape_cast %58 : vector<6x16xf32> to vector<6x16x1xf32>
    %60 = vector.broadcast %59 : vector<6x16x1xf32> to vector<6x16x8xf32>
    %61 = arith.mulf %48, %60 : vector<6x16x8xf32>
    %62 = vector.shape_cast %58 : vector<6x16xf32> to vector<6x16x1xf32>
    %63 = vector.broadcast %62 : vector<6x16x1xf32> to vector<6x16x8xf32>
    %64 = arith.mulf %56, %63 : vector<6x16x8xf32>
    %cst_36 = arith.constant dense<0xFF800000> : vector<6x8xf32>
    %65 = vector.multi_reduction <maximumf>, %61, %cst_36 [1] : vector<6x16x8xf32> to vector<6x8xf32>
    %66 = arith.mulf %65, %3 : vector<6x8xf32>
    %cst_37 = arith.constant dense<0.000000e+00> : vector<6xf32>
    %67 = vector.multi_reduction <add>, %66, %cst_37 [1] : vector<6x8xf32> to vector<6xf32>
    %68 = vector.shape_cast %67 : vector<6xf32> to vector<6x1xf32>
    %cst_38 = arith.constant dense<0xFF800000> : vector<6x8xf32>
    %69 = vector.multi_reduction <maximumf>, %64, %cst_38 [1] : vector<6x16x8xf32> to vector<6x8xf32>
    %70 = arith.mulf %69, %4 : vector<6x8xf32>
    %cst_39 = arith.constant dense<0.000000e+00> : vector<6xf32>
    %71 = vector.multi_reduction <add>, %70, %cst_39 [1] : vector<6x8xf32> to vector<6xf32>
    %72 = vector.shape_cast %71 : vector<6xf32> to vector<6x1xf32>
    %73 = vector.broadcast %68 : vector<6x1xf32> to vector<6x3xf32>
    %74 = arith.mulf %73, %6 : vector<6x3xf32>
    %75 = vector.shape_cast %5 : vector<2x6xf32> to vector<2x6x1xf32>
    %76 = vector.shape_cast %74 : vector<6x3xf32> to vector<1x6x3xf32>
    %77 = vector.broadcast %75 : vector<2x6x1xf32> to vector<2x6x3xf32>
    %78 = vector.broadcast %76 : vector<1x6x3xf32> to vector<2x6x3xf32>
    %79 = arith.mulf %77, %78 : vector<2x6x3xf32>
    %cst_40 = arith.constant dense<0.000000e+00> : vector<2x3xf32>
    %80 = vector.multi_reduction <add>, %79, %cst_40 [1] : vector<2x6x3xf32> to vector<2x3xf32>
    %81 = vector.broadcast %72 : vector<6x1xf32> to vector<6x3xf32>
    %82 = arith.mulf %81, %6 : vector<6x3xf32>
    %83 = vector.shape_cast %5 : vector<2x6xf32> to vector<2x6x1xf32>
    %84 = vector.shape_cast %82 : vector<6x3xf32> to vector<1x6x3xf32>
    %85 = vector.broadcast %83 : vector<2x6x1xf32> to vector<2x6x3xf32>
    %86 = vector.broadcast %84 : vector<1x6x3xf32> to vector<2x6x3xf32>
    %87 = arith.mulf %85, %86 : vector<2x6x3xf32>
    %cst_41 = arith.constant dense<0.000000e+00> : vector<2x3xf32>
    %88 = vector.multi_reduction <add>, %87, %cst_41 [1] : vector<2x6x3xf32> to vector<2x3xf32>
    %cst_42 = arith.constant dense<0xFF800000> : vector<2xf32>
    %89 = vector.multi_reduction <maximumf>, %88, %cst_42 [1] : vector<2x3xf32> to vector<2xf32>
    %cst_43 = arith.constant 0xFF800000 : f32
    %90 = vector.broadcast %cst_43 : f32 to vector<2xf32>
    %91 = arith.maximumf %90, %89 : vector<2xf32>
    %92 = vector.shape_cast %91 : vector<2xf32> to vector<2x1xf32>
    %93 = vector.broadcast %92 : vector<2x1xf32> to vector<2x3xf32>
    %94 = arith.subf %88, %93 : vector<2x3xf32>
    %95 = math.exp %94 : vector<2x3xf32>
    %cst_44 = arith.constant dense<0.000000e+00> : vector<2xf32>
    %96 = vector.multi_reduction <add>, %95, %cst_44 [1] : vector<2x3xf32> to vector<2xf32>
    %97 = vector.shape_cast %96 : vector<2xf32> to vector<2x1xf32>
    %98 = vector.broadcast %97 : vector<2x1xf32> to vector<2x3xf32>
    %99 = arith.divf %95, %98 : vector<2x3xf32>
    %c0_45 = arith.constant 0 : index
    %c0_46 = arith.constant 0 : index
    %c0_47 = arith.constant 0 : index
    %100 = vector.load %arg9[%c0_45, %c0_46, %c0_47] : memref<9x3x3xf32, #tpu.memory_space<vmem>>, vector<1x3x3xf32>
    %101 = vector.shape_cast %100 : vector<1x3x3xf32> to vector<3x3xf32>
    %102 = vector.shape_cast %99 : vector<2x3xf32> to vector<2x3x1xf32>
    %103 = vector.shape_cast %101 : vector<3x3xf32> to vector<1x3x3xf32>
    %104 = vector.broadcast %102 : vector<2x3x1xf32> to vector<2x3x3xf32>
    %105 = vector.broadcast %103 : vector<1x3x3xf32> to vector<2x3x3xf32>
    %106 = arith.mulf %104, %105 : vector<2x3x3xf32>
    %cst_48 = arith.constant dense<0.000000e+00> : vector<2x3xf32>
    %107 = vector.multi_reduction <add>, %106, %cst_48 [1] : vector<2x3x3xf32> to vector<2x3xf32>
    %c1 = arith.constant 1 : index
    %c0_49 = arith.constant 0 : index
    %c0_50 = arith.constant 0 : index
    %108 = vector.load %arg9[%c1, %c0_49, %c0_50] : memref<9x3x3xf32, #tpu.memory_space<vmem>>, vector<1x3x3xf32>
    %109 = vector.shape_cast %108 : vector<1x3x3xf32> to vector<3x3xf32>
    %110 = vector.shape_cast %80 : vector<2x3xf32> to vector<2x3x1xf32>
    %111 = vector.shape_cast %109 : vector<3x3xf32> to vector<1x3x3xf32>
    %112 = vector.broadcast %110 : vector<2x3x1xf32> to vector<2x3x3xf32>
    %113 = vector.broadcast %111 : vector<1x3x3xf32> to vector<2x3x3xf32>
    %114 = arith.mulf %112, %113 : vector<2x3x3xf32>
    %cst_51 = arith.constant dense<0.000000e+00> : vector<2x3xf32>
    %115 = vector.multi_reduction <add>, %114, %cst_51 [1] : vector<2x3x3xf32> to vector<2x3xf32>
    %116 = arith.addf %107, %115 : vector<2x3xf32>
    %117 = arith.mulf %80, %99 : vector<2x3xf32>
    %c2 = arith.constant 2 : index
    %c0_52 = arith.constant 0 : index
    %c0_53 = arith.constant 0 : index
    %118 = vector.load %arg9[%c2, %c0_52, %c0_53] : memref<9x3x3xf32, #tpu.memory_space<vmem>>, vector<1x3x3xf32>
    %119 = vector.shape_cast %118 : vector<1x3x3xf32> to vector<3x3xf32>
    %120 = vector.shape_cast %117 : vector<2x3xf32> to vector<2x3x1xf32>
    %121 = vector.shape_cast %119 : vector<3x3xf32> to vector<1x3x3xf32>
    %122 = vector.broadcast %120 : vector<2x3x1xf32> to vector<2x3x3xf32>
    %123 = vector.broadcast %121 : vector<1x3x3xf32> to vector<2x3x3xf32>
    %124 = arith.mulf %122, %123 : vector<2x3x3xf32>
    %cst_54 = arith.constant dense<0.000000e+00> : vector<2x3xf32>
    %125 = vector.multi_reduction <add>, %124, %cst_54 [1] : vector<2x3x3xf32> to vector<2x3xf32>
    %126 = arith.addf %116, %125 : vector<2x3xf32>
    %c1_55 = arith.constant 1 : index
    %c0_56 = arith.constant 0 : index
    %c0_57 = arith.constant 0 : index
    %127 = vector.load %arg5[%c1_55, %c0_56, %c0_57] : memref<3x6x16xf32, #tpu.memory_space<vmem>>, vector<1x6x16xf32>
    %128 = vector.shape_cast %127 : vector<1x6x16xf32> to vector<6x16xf32>
    %129 = vector.shape_cast %128 : vector<6x16xf32> to vector<6x16x1xf32>
    %130 = vector.broadcast %129 : vector<6x16x1xf32> to vector<6x16x8xf32>
    %131 = arith.mulf %48, %130 : vector<6x16x8xf32>
    %132 = vector.shape_cast %128 : vector<6x16xf32> to vector<6x16x1xf32>
    %133 = vector.broadcast %132 : vector<6x16x1xf32> to vector<6x16x8xf32>
    %134 = arith.mulf %56, %133 : vector<6x16x8xf32>
    %cst_58 = arith.constant dense<0xFF800000> : vector<6x8xf32>
    %135 = vector.multi_reduction <maximumf>, %131, %cst_58 [1] : vector<6x16x8xf32> to vector<6x8xf32>
    %136 = arith.mulf %135, %3 : vector<6x8xf32>
    %cst_59 = arith.constant dense<0.000000e+00> : vector<6xf32>
    %137 = vector.multi_reduction <add>, %136, %cst_59 [1] : vector<6x8xf32> to vector<6xf32>
    %138 = vector.shape_cast %137 : vector<6xf32> to vector<6x1xf32>
    %cst_60 = arith.constant dense<0xFF800000> : vector<6x8xf32>
    %139 = vector.multi_reduction <maximumf>, %134, %cst_60 [1] : vector<6x16x8xf32> to vector<6x8xf32>
    %140 = arith.mulf %139, %4 : vector<6x8xf32>
    %cst_61 = arith.constant dense<0.000000e+00> : vector<6xf32>
    %141 = vector.multi_reduction <add>, %140, %cst_61 [1] : vector<6x8xf32> to vector<6xf32>
    %142 = vector.shape_cast %141 : vector<6xf32> to vector<6x1xf32>
    %143 = vector.broadcast %138 : vector<6x1xf32> to vector<6x3xf32>
    %144 = arith.mulf %143, %6 : vector<6x3xf32>
    %145 = vector.shape_cast %5 : vector<2x6xf32> to vector<2x6x1xf32>
    %146 = vector.shape_cast %144 : vector<6x3xf32> to vector<1x6x3xf32>
    %147 = vector.broadcast %145 : vector<2x6x1xf32> to vector<2x6x3xf32>
    %148 = vector.broadcast %146 : vector<1x6x3xf32> to vector<2x6x3xf32>
    %149 = arith.mulf %147, %148 : vector<2x6x3xf32>
    %cst_62 = arith.constant dense<0.000000e+00> : vector<2x3xf32>
    %150 = vector.multi_reduction <add>, %149, %cst_62 [1] : vector<2x6x3xf32> to vector<2x3xf32>
    %151 = vector.broadcast %142 : vector<6x1xf32> to vector<6x3xf32>
    %152 = arith.mulf %151, %6 : vector<6x3xf32>
    %153 = vector.shape_cast %5 : vector<2x6xf32> to vector<2x6x1xf32>
    %154 = vector.shape_cast %152 : vector<6x3xf32> to vector<1x6x3xf32>
    %155 = vector.broadcast %153 : vector<2x6x1xf32> to vector<2x6x3xf32>
    %156 = vector.broadcast %154 : vector<1x6x3xf32> to vector<2x6x3xf32>
    %157 = arith.mulf %155, %156 : vector<2x6x3xf32>
    %cst_63 = arith.constant dense<0.000000e+00> : vector<2x3xf32>
    %158 = vector.multi_reduction <add>, %157, %cst_63 [1] : vector<2x6x3xf32> to vector<2x3xf32>
    %cst_64 = arith.constant dense<0xFF800000> : vector<2xf32>
    %159 = vector.multi_reduction <maximumf>, %158, %cst_64 [1] : vector<2x3xf32> to vector<2xf32>
    %cst_65 = arith.constant 0xFF800000 : f32
    %160 = vector.broadcast %cst_65 : f32 to vector<2xf32>
    %161 = arith.maximumf %160, %159 : vector<2xf32>
    %162 = vector.shape_cast %161 : vector<2xf32> to vector<2x1xf32>
    %163 = vector.broadcast %162 : vector<2x1xf32> to vector<2x3xf32>
    %164 = arith.subf %158, %163 : vector<2x3xf32>
    %165 = math.exp %164 : vector<2x3xf32>
    %cst_66 = arith.constant dense<0.000000e+00> : vector<2xf32>
    %166 = vector.multi_reduction <add>, %165, %cst_66 [1] : vector<2x3xf32> to vector<2xf32>
    %167 = vector.shape_cast %166 : vector<2xf32> to vector<2x1xf32>
    %168 = vector.broadcast %167 : vector<2x1xf32> to vector<2x3xf32>
    %169 = arith.divf %165, %168 : vector<2x3xf32>
    %c3 = arith.constant 3 : index
    %c0_67 = arith.constant 0 : index
    %c0_68 = arith.constant 0 : index
    %170 = vector.load %arg9[%c3, %c0_67, %c0_68] : memref<9x3x3xf32, #tpu.memory_space<vmem>>, vector<1x3x3xf32>
    %171 = vector.shape_cast %170 : vector<1x3x3xf32> to vector<3x3xf32>
    %172 = vector.shape_cast %169 : vector<2x3xf32> to vector<2x3x1xf32>
    %173 = vector.shape_cast %171 : vector<3x3xf32> to vector<1x3x3xf32>
    %174 = vector.broadcast %172 : vector<2x3x1xf32> to vector<2x3x3xf32>
    %175 = vector.broadcast %173 : vector<1x3x3xf32> to vector<2x3x3xf32>
    %176 = arith.mulf %174, %175 : vector<2x3x3xf32>
    %cst_69 = arith.constant dense<0.000000e+00> : vector<2x3xf32>
    %177 = vector.multi_reduction <add>, %176, %cst_69 [1] : vector<2x3x3xf32> to vector<2x3xf32>
    %c4 = arith.constant 4 : index
    %c0_70 = arith.constant 0 : index
    %c0_71 = arith.constant 0 : index
    %178 = vector.load %arg9[%c4, %c0_70, %c0_71] : memref<9x3x3xf32, #tpu.memory_space<vmem>>, vector<1x3x3xf32>
    %179 = vector.shape_cast %178 : vector<1x3x3xf32> to vector<3x3xf32>
    %180 = vector.shape_cast %150 : vector<2x3xf32> to vector<2x3x1xf32>
    %181 = vector.shape_cast %179 : vector<3x3xf32> to vector<1x3x3xf32>
    %182 = vector.broadcast %180 : vector<2x3x1xf32> to vector<2x3x3xf32>
    %183 = vector.broadcast %181 : vector<1x3x3xf32> to vector<2x3x3xf32>
    %184 = arith.mulf %182, %183 : vector<2x3x3xf32>
    %cst_72 = arith.constant dense<0.000000e+00> : vector<2x3xf32>
    %185 = vector.multi_reduction <add>, %184, %cst_72 [1] : vector<2x3x3xf32> to vector<2x3xf32>
    %186 = arith.addf %177, %185 : vector<2x3xf32>
    %187 = arith.mulf %150, %169 : vector<2x3xf32>
    %c5 = arith.constant 5 : index
    %c0_73 = arith.constant 0 : index
    %c0_74 = arith.constant 0 : index
    %188 = vector.load %arg9[%c5, %c0_73, %c0_74] : memref<9x3x3xf32, #tpu.memory_space<vmem>>, vector<1x3x3xf32>
    %189 = vector.shape_cast %188 : vector<1x3x3xf32> to vector<3x3xf32>
    %190 = vector.shape_cast %187 : vector<2x3xf32> to vector<2x3x1xf32>
    %191 = vector.shape_cast %189 : vector<3x3xf32> to vector<1x3x3xf32>
    %192 = vector.broadcast %190 : vector<2x3x1xf32> to vector<2x3x3xf32>
    %193 = vector.broadcast %191 : vector<1x3x3xf32> to vector<2x3x3xf32>
    %194 = arith.mulf %192, %193 : vector<2x3x3xf32>
    %cst_75 = arith.constant dense<0.000000e+00> : vector<2x3xf32>
    %195 = vector.multi_reduction <add>, %194, %cst_75 [1] : vector<2x3x3xf32> to vector<2x3xf32>
    %196 = arith.addf %186, %195 : vector<2x3xf32>
    %c2_76 = arith.constant 2 : index
    %c0_77 = arith.constant 0 : index
    %c0_78 = arith.constant 0 : index
    %197 = vector.load %arg5[%c2_76, %c0_77, %c0_78] : memref<3x6x16xf32, #tpu.memory_space<vmem>>, vector<1x6x16xf32>
    %198 = vector.shape_cast %197 : vector<1x6x16xf32> to vector<6x16xf32>
    %199 = vector.shape_cast %198 : vector<6x16xf32> to vector<6x16x1xf32>
    %200 = vector.broadcast %199 : vector<6x16x1xf32> to vector<6x16x8xf32>
    %201 = arith.mulf %48, %200 : vector<6x16x8xf32>
    %202 = vector.shape_cast %198 : vector<6x16xf32> to vector<6x16x1xf32>
    %203 = vector.broadcast %202 : vector<6x16x1xf32> to vector<6x16x8xf32>
    %204 = arith.mulf %56, %203 : vector<6x16x8xf32>
    %cst_79 = arith.constant dense<0xFF800000> : vector<6x8xf32>
    %205 = vector.multi_reduction <maximumf>, %201, %cst_79 [1] : vector<6x16x8xf32> to vector<6x8xf32>
    %206 = arith.mulf %205, %3 : vector<6x8xf32>
    %cst_80 = arith.constant dense<0.000000e+00> : vector<6xf32>
    %207 = vector.multi_reduction <add>, %206, %cst_80 [1] : vector<6x8xf32> to vector<6xf32>
    %208 = vector.shape_cast %207 : vector<6xf32> to vector<6x1xf32>
    %cst_81 = arith.constant dense<0xFF800000> : vector<6x8xf32>
    %209 = vector.multi_reduction <maximumf>, %204, %cst_81 [1] : vector<6x16x8xf32> to vector<6x8xf32>
    %210 = arith.mulf %209, %4 : vector<6x8xf32>
    %cst_82 = arith.constant dense<0.000000e+00> : vector<6xf32>
    %211 = vector.multi_reduction <add>, %210, %cst_82 [1] : vector<6x8xf32> to vector<6xf32>
    %212 = vector.shape_cast %211 : vector<6xf32> to vector<6x1xf32>
    %213 = vector.broadcast %208 : vector<6x1xf32> to vector<6x3xf32>
    %214 = arith.mulf %213, %6 : vector<6x3xf32>
    %215 = vector.shape_cast %5 : vector<2x6xf32> to vector<2x6x1xf32>
    %216 = vector.shape_cast %214 : vector<6x3xf32> to vector<1x6x3xf32>
    %217 = vector.broadcast %215 : vector<2x6x1xf32> to vector<2x6x3xf32>
    %218 = vector.broadcast %216 : vector<1x6x3xf32> to vector<2x6x3xf32>
    %219 = arith.mulf %217, %218 : vector<2x6x3xf32>
    %cst_83 = arith.constant dense<0.000000e+00> : vector<2x3xf32>
    %220 = vector.multi_reduction <add>, %219, %cst_83 [1] : vector<2x6x3xf32> to vector<2x3xf32>
    %221 = vector.broadcast %212 : vector<6x1xf32> to vector<6x3xf32>
    %222 = arith.mulf %221, %6 : vector<6x3xf32>
    %223 = vector.shape_cast %5 : vector<2x6xf32> to vector<2x6x1xf32>
    %224 = vector.shape_cast %222 : vector<6x3xf32> to vector<1x6x3xf32>
    %225 = vector.broadcast %223 : vector<2x6x1xf32> to vector<2x6x3xf32>
    %226 = vector.broadcast %224 : vector<1x6x3xf32> to vector<2x6x3xf32>
    %227 = arith.mulf %225, %226 : vector<2x6x3xf32>
    %cst_84 = arith.constant dense<0.000000e+00> : vector<2x3xf32>
    %228 = vector.multi_reduction <add>, %227, %cst_84 [1] : vector<2x6x3xf32> to vector<2x3xf32>
    %cst_85 = arith.constant dense<0xFF800000> : vector<2xf32>
    %229 = vector.multi_reduction <maximumf>, %228, %cst_85 [1] : vector<2x3xf32> to vector<2xf32>
    %cst_86 = arith.constant 0xFF800000 : f32
    %230 = vector.broadcast %cst_86 : f32 to vector<2xf32>
    %231 = arith.maximumf %230, %229 : vector<2xf32>
    %232 = vector.shape_cast %231 : vector<2xf32> to vector<2x1xf32>
    %233 = vector.broadcast %232 : vector<2x1xf32> to vector<2x3xf32>
    %234 = arith.subf %228, %233 : vector<2x3xf32>
    %235 = math.exp %234 : vector<2x3xf32>
    %cst_87 = arith.constant dense<0.000000e+00> : vector<2xf32>
    %236 = vector.multi_reduction <add>, %235, %cst_87 [1] : vector<2x3xf32> to vector<2xf32>
    %237 = vector.shape_cast %236 : vector<2xf32> to vector<2x1xf32>
    %238 = vector.broadcast %237 : vector<2x1xf32> to vector<2x3xf32>
    %239 = arith.divf %235, %238 : vector<2x3xf32>
    %c6 = arith.constant 6 : index
    %c0_88 = arith.constant 0 : index
    %c0_89 = arith.constant 0 : index
    %240 = vector.load %arg9[%c6, %c0_88, %c0_89] : memref<9x3x3xf32, #tpu.memory_space<vmem>>, vector<1x3x3xf32>
    %241 = vector.shape_cast %240 : vector<1x3x3xf32> to vector<3x3xf32>
    %242 = vector.shape_cast %239 : vector<2x3xf32> to vector<2x3x1xf32>
    %243 = vector.shape_cast %241 : vector<3x3xf32> to vector<1x3x3xf32>
    %244 = vector.broadcast %242 : vector<2x3x1xf32> to vector<2x3x3xf32>
    %245 = vector.broadcast %243 : vector<1x3x3xf32> to vector<2x3x3xf32>
    %246 = arith.mulf %244, %245 : vector<2x3x3xf32>
    %cst_90 = arith.constant dense<0.000000e+00> : vector<2x3xf32>
    %247 = vector.multi_reduction <add>, %246, %cst_90 [1] : vector<2x3x3xf32> to vector<2x3xf32>
    %c7 = arith.constant 7 : index
    %c0_91 = arith.constant 0 : index
    %c0_92 = arith.constant 0 : index
    %248 = vector.load %arg9[%c7, %c0_91, %c0_92] : memref<9x3x3xf32, #tpu.memory_space<vmem>>, vector<1x3x3xf32>
    %249 = vector.shape_cast %248 : vector<1x3x3xf32> to vector<3x3xf32>
    %250 = vector.shape_cast %220 : vector<2x3xf32> to vector<2x3x1xf32>
    %251 = vector.shape_cast %249 : vector<3x3xf32> to vector<1x3x3xf32>
    %252 = vector.broadcast %250 : vector<2x3x1xf32> to vector<2x3x3xf32>
    %253 = vector.broadcast %251 : vector<1x3x3xf32> to vector<2x3x3xf32>
    %254 = arith.mulf %252, %253 : vector<2x3x3xf32>
    %cst_93 = arith.constant dense<0.000000e+00> : vector<2x3xf32>
    %255 = vector.multi_reduction <add>, %254, %cst_93 [1] : vector<2x3x3xf32> to vector<2x3xf32>
    %256 = arith.addf %247, %255 : vector<2x3xf32>
    %257 = arith.mulf %239, %220 : vector<2x3xf32>
    %c8 = arith.constant 8 : index
    %c0_94 = arith.constant 0 : index
    %c0_95 = arith.constant 0 : index
    %258 = vector.load %arg9[%c8, %c0_94, %c0_95] : memref<9x3x3xf32, #tpu.memory_space<vmem>>, vector<1x3x3xf32>
    %259 = vector.shape_cast %258 : vector<1x3x3xf32> to vector<3x3xf32>
    %260 = vector.shape_cast %257 : vector<2x3xf32> to vector<2x3x1xf32>
    %261 = vector.shape_cast %259 : vector<3x3xf32> to vector<1x3x3xf32>
    %262 = vector.broadcast %260 : vector<2x3x1xf32> to vector<2x3x3xf32>
    %263 = vector.broadcast %261 : vector<1x3x3xf32> to vector<2x3x3xf32>
    %264 = arith.mulf %262, %263 : vector<2x3x3xf32>
    %cst_96 = arith.constant dense<0.000000e+00> : vector<2x3xf32>
    %265 = vector.multi_reduction <add>, %264, %cst_96 [1] : vector<2x3x3xf32> to vector<2x3xf32>
    %266 = arith.addf %256, %265 : vector<2x3xf32>
    %c0_97 = arith.constant 0 : index
    %c0_98 = arith.constant 0 : index
    %c0_99 = arith.constant 0 : index
    %267 = vector.load %arg10[%c0_97, %c0_98, %c0_99] : memref<4x3x32xf32, #tpu.memory_space<vmem>>, vector<1x3x32xf32>
    %268 = vector.shape_cast %267 : vector<1x3x32xf32> to vector<3x32xf32>
    %269 = vector.shape_cast %29 : vector<2x3xf32> to vector<2x3x1xf32>
    %270 = vector.shape_cast %268 : vector<3x32xf32> to vector<1x3x32xf32>
    %271 = vector.broadcast %269 : vector<2x3x1xf32> to vector<2x3x32xf32>
    %272 = vector.broadcast %270 : vector<1x3x32xf32> to vector<2x3x32xf32>
    %273 = arith.mulf %271, %272 : vector<2x3x32xf32>
    %cst_100 = arith.constant dense<0.000000e+00> : vector<2x32xf32>
    %274 = vector.multi_reduction <add>, %273, %cst_100 [1] : vector<2x3x32xf32> to vector<2x32xf32>
    %c1_101 = arith.constant 1 : index
    %c0_102 = arith.constant 0 : index
    %c0_103 = arith.constant 0 : index
    %275 = vector.load %arg10[%c1_101, %c0_102, %c0_103] : memref<4x3x32xf32, #tpu.memory_space<vmem>>, vector<1x3x32xf32>
    %276 = vector.shape_cast %275 : vector<1x3x32xf32> to vector<3x32xf32>
    %277 = vector.shape_cast %126 : vector<2x3xf32> to vector<2x3x1xf32>
    %278 = vector.shape_cast %276 : vector<3x32xf32> to vector<1x3x32xf32>
    %279 = vector.broadcast %277 : vector<2x3x1xf32> to vector<2x3x32xf32>
    %280 = vector.broadcast %278 : vector<1x3x32xf32> to vector<2x3x32xf32>
    %281 = arith.mulf %279, %280 : vector<2x3x32xf32>
    %cst_104 = arith.constant dense<0.000000e+00> : vector<2x32xf32>
    %282 = vector.multi_reduction <add>, %281, %cst_104 [1] : vector<2x3x32xf32> to vector<2x32xf32>
    %283 = arith.addf %274, %282 : vector<2x32xf32>
    %c2_105 = arith.constant 2 : index
    %c0_106 = arith.constant 0 : index
    %c0_107 = arith.constant 0 : index
    %284 = vector.load %arg10[%c2_105, %c0_106, %c0_107] : memref<4x3x32xf32, #tpu.memory_space<vmem>>, vector<1x3x32xf32>
    %285 = vector.shape_cast %284 : vector<1x3x32xf32> to vector<3x32xf32>
    %286 = vector.shape_cast %196 : vector<2x3xf32> to vector<2x3x1xf32>
    %287 = vector.shape_cast %285 : vector<3x32xf32> to vector<1x3x32xf32>
    %288 = vector.broadcast %286 : vector<2x3x1xf32> to vector<2x3x32xf32>
    %289 = vector.broadcast %287 : vector<1x3x32xf32> to vector<2x3x32xf32>
    %290 = arith.mulf %288, %289 : vector<2x3x32xf32>
    %cst_108 = arith.constant dense<0.000000e+00> : vector<2x32xf32>
    %291 = vector.multi_reduction <add>, %290, %cst_108 [1] : vector<2x3x32xf32> to vector<2x32xf32>
    %292 = arith.addf %283, %291 : vector<2x32xf32>
    %c3_109 = arith.constant 3 : index
    %c0_110 = arith.constant 0 : index
    %c0_111 = arith.constant 0 : index
    %293 = vector.load %arg10[%c3_109, %c0_110, %c0_111] : memref<4x3x32xf32, #tpu.memory_space<vmem>>, vector<1x3x32xf32>
    %294 = vector.shape_cast %293 : vector<1x3x32xf32> to vector<3x32xf32>
    %295 = vector.shape_cast %266 : vector<2x3xf32> to vector<2x3x1xf32>
    %296 = vector.shape_cast %294 : vector<3x32xf32> to vector<1x3x32xf32>
    %297 = vector.broadcast %295 : vector<2x3x1xf32> to vector<2x3x32xf32>
    %298 = vector.broadcast %296 : vector<1x3x32xf32> to vector<2x3x32xf32>
    %299 = arith.mulf %297, %298 : vector<2x3x32xf32>
    %cst_112 = arith.constant dense<0.000000e+00> : vector<2x32xf32>
    %300 = vector.multi_reduction <add>, %299, %cst_112 [1] : vector<2x3x32xf32> to vector<2x32xf32>
    %301 = arith.addf %292, %300 : vector<2x32xf32>
    %cst_113 = arith.constant 0.000000e+00 : f32
    %302 = vector.broadcast %cst_113 : f32 to vector<2x32xf32>
    %303 = arith.cmpf oge, %301, %302 : vector<2x32xf32>
    %cst_114 = arith.constant 0.00999999977 : f32
    %304 = vector.broadcast %cst_114 : f32 to vector<2x32xf32>
    %305 = arith.mulf %304, %301 : vector<2x32xf32>
    %306 = arith.select %303, %301, %305 : vector<2x32xi1>, vector<2x32xf32>
    %c0_115 = arith.constant 0 : index
    %c0_116 = arith.constant 0 : index
    %c0_117 = arith.constant 0 : index
    %307 = vector.load %arg8[%c0_115, %c0_116, %c0_117] : memref<2x3x32xf32, #tpu.memory_space<vmem>>, vector<2x3x32xf32>
    %308 = vector.shape_cast %306 : vector<2x32xf32> to vector<2x1x32xf32>
    %309 = vector.broadcast %308 : vector<2x1x32xf32> to vector<2x3x32xf32>
    %310 = arith.mulf %307, %309 : vector<2x3x32xf32>
    %cst_118 = arith.constant dense<0.000000e+00> : vector<2x3xf32>
    %311 = vector.multi_reduction <add>, %310, %cst_118 [2] : vector<2x3x32xf32> to vector<2x3xf32>
    %cst_119 = arith.constant dense<0xFF800000> : vector<2xf32>
    %312 = vector.multi_reduction <maximumf>, %311, %cst_119 [1] : vector<2x3xf32> to vector<2xf32>
    %cst_120 = arith.constant 0xFF800000 : f32
    %313 = vector.broadcast %cst_120 : f32 to vector<2xf32>
    %314 = arith.maximumf %313, %312 : vector<2xf32>
    %315 = vector.shape_cast %314 : vector<2xf32> to vector<2x1xf32>
    %316 = vector.broadcast %315 : vector<2x1xf32> to vector<2x3xf32>
    %317 = arith.subf %311, %316 : vector<2x3xf32>
    %318 = math.exp %317 : vector<2x3xf32>
    %cst_121 = arith.constant dense<0.000000e+00> : vector<2xf32>
    %319 = vector.multi_reduction <add>, %318, %cst_121 [1] : vector<2x3xf32> to vector<2xf32>
    %320 = vector.shape_cast %319 : vector<2xf32> to vector<2x1xf32>
    %321 = vector.broadcast %320 : vector<2x1xf32> to vector<2x3xf32>
    %322 = arith.divf %318, %321 : vector<2x3xf32>
    %c0_122 = arith.constant 0 : index
    %c0_123 = arith.constant 0 : index
    %323 = vector.load %arg13[%c0_122, %c0_123] : memref<2x3xf32, #tpu.memory_space<vmem>>, vector<2x3xf32>
    tpu.vector_store %arg13[%c0_122, %c0_123], %322 {strides = array<i32>} : memref<2x3xf32, #tpu.memory_space<vmem>>, vector<2x3xf32>,
    return
  }
}

</mosaic_0001>

<bundles_post_ra>
// kernel: phn_forward.6
= control target key start
LH: loop header
LB: loop body
LE: loop exit
PB: predicated region body
PF: predicated region fallthrough
CT: control target
= control target key end

     0   :  { %s1655_s18 = smov 0   ;;  %s1830_s0 = inlined_call_operand.vmem [shape: f32[2,64,16], index: 0, kind: input, shape index: {}]   ;;  %s1831_s1 = inlined_call_operand.vmem [shape: f32[2,16,48], index: 1, kind: input, shape index: {}]   ;;  %s1832_s2 = inlined_call_operand.vmem [shape: f32[2,16,48], index: 2, kind: input, shape index: {}]   ;;  %s1833_s3 = inlined_call_operand.vmem [shape: f32[2,1,48], index: 3, kind: input, shape index: {}]   ;;  %s1834_s4 = inlined_call_operand.vmem [shape: f32[2,1,48], index: 4, kind: input, shape index: {}]   ;;  %s1835_s5 = inlined_call_operand.vmem [shape: f32[2,64,16], index: 5, kind: output, shape index: {}]  }
   0x1 LB: > { %s1371_s19 = sadd.s32 4294967295, %s1617_s18   ;;  %p1375_p0 = scmp.ge.s32.totalorder %s1617_s18, 1  ;;  %s1617_s18 = sphi %s1655_s18, %s15_s18  }
   0x2   : > { %p223_p1 = scmp.lt.s32.totalorder %s1617_s18, 3 }
   0x4   : > { %p224_p2 = pnand %p1375_p0, %p223_p1 }
   0x5   : > { %p267_p3 = scmp.lt.s32.totalorder (!%p224_p2), %s1371_s19, 1  ;;  %v1619_v0 = vmov (!%p224_p2), 0.0|0.0   ;;  %vm1620_vm0 = vmmov (!%p224_p2), 0   ;;  %v1621_v1 = vmov (!%p224_p2), 0.0   ;;  %vm310_vm1 = vcmask (!%p224_p2), 130048   ;;  %s1622_s9 = smov (!%p224_p2), 96  }
   0x6   : > { %227 = sbr.rel (%p224_p2) target bundleno = 5568 (0x15c0), region = 40  ;;  %1525 = vmatprep.subr.bf16.mxu1 (!%p224_p2), %v1619_v0  ;;  %1469 = vmatprep.mubr.msk.f32.mxu1 (!%p224_p2), %vm1620_vm0, %v1621_v1  ;;  %s1623_s13 = smov (!%p224_p2), 32  }
   0x7   : > { %s1624_s14 = smov (!%p224_p2), 112  }
   0xd   : > { %s1837_s19 = smov (!%p267_p3, %s1371_s19), 1 }
   0xe   : > { %s1412_s20 = sshll.u32 %s1837_s19, 4  ;;  %s1411_s21 = sshll.u32 %s1837_s19, 6 }
   0xf   : > { %s276_s24 = scalar_lea.vmem %s1831_s1, %s1412_s20  ;;  %s281_s27 = scalar_lea.vmem %s1832_s2, %s1412_s20 }
  0x10   : > { %v301_v2 = vld [vmem:[%s276_s24] sm:$0xff]  ;;  %v302_v3 = vld [vmem:[%s276_s24 + $0x8] sm:$0xff]  ;;  %s1681_s30 = scalar_lea.vmem %s1830_s0, %s1411_s21  ;;  %s287_s8 = scalar_lea.vmem %s1834_s4, %s1837_s19 }
  0x11   : > { %v440_v4 = vld [vmem:[%s281_s27] sm:$0xff]  ;;  %v1521_v5 = vpack.c.bf16 %v302_v3, %v301_v2  ;;  %v441_v6 = vld [vmem:[%s281_s27 + $0x8] sm:$0xff]  ;;  %s284_s12 = scalar_lea.vmem %s1833_s3, %s1837_s19  ;;  %s1722_s17 = scalar_lea.vmem %s1835_s5, %s1411_s21  ;;  %v295_v47 = vld [vmem:[%s1681_s30 + $0x10] sm:$0xff] }
  0x12   : > { %v293_v7 = vld [vmem:[%s1681_s30] sm:$0xff]  ;;  %v1684_v8 = vpack.c.bf16 %v441_v6, %v440_v4  ;;  %v294_v9 = vld [vmem:[%s1681_s30 + $0x8] sm:$0xff]  ;;  %v296_v48 = vld [vmem:[%s1681_s30 + $0x18] sm:$0xff] }
  0x13   : > { %1453 = vmatprep.mubr.msk.f32.mxu0 %vm310_vm1, %v293_v7  ;;  %1522 = vmatprep.subr.bf16.mxu0 %v1521_v5  ;;  %v1703_v10 = vld [vmem:[%s287_s8] ss:$0 sm:$0xff] }
  0x14   : > { %1527 = vmatpush3.bf16.msra.mxu1 %v1684_v8  ;;  %1524 = vmatpush3.bf16.msra.mxu0 %v1521_v5  ;;  %v1711_v16 = vld [vmem:[%s284_s12] ss:$0 sm:$0xff] }
  0x15   : > { %1528 = vmatprep.subr.bf16.mxu1 %v1619_v0  ;;  %1537 = vmatprep.subr.bf16.mxu0 %v1619_v0 }
  0x17   : > { %1470 = vmatmul.mubr.f32.vlgmr.msra.gmra.mrb[0].mxu1 %v1621_v1  ;;  %1454 = vmatmul.mubr.msk.f32.vlgmr.msra.gmra.mrb[0].mxu0 %vm310_vm1, %v294_v9 }
  0x18   : > { %1530 = vmatpush3.bf16.msra.mxu1 %v1684_v8  ;;  %1476 = vmatprep.mubr.msk.f32.mxu1 %vm1620_vm0, %v1621_v1 }
  0x19   : > { %1531 = vmatprep.subr.bf16.mxu1 %v1619_v0  ;;  %1539 = vmatpush3.bf16.msra.mxu0 %v1684_v8 }
  0x1a   : > { %1543 = vmatprep.subr.bf16.mxu0 %v1619_v0  ;;  %1456 = vmatprep.mubr.msk.f32.mxu0 %vm310_vm1, %v295_v47 }
  0x1b   : > { %1457 = vmatmul.mubr.msk.f32.gmra.mrb[2].mxu0 %vm310_vm1, %v296_v48 }
  0xea   : > { %v518_v11 = vpop.f32.mrb[0].mxu1  ;;  %v1455_v12 = vpop.f32.mrb[0].mxu0 }
  0xeb   : > { %v519_v13 = vadd.f32 %v1703_v10, %v518_v11  ;;  %v1471_v14 = vpop.f32.mrb[1].mxu1  ;;  %v401_v15 = vpop.f32.mrb[1].mxu0  ;;  %v407_v37 = vadd.f32 %v1455_v12, %v1711_v16 }
  0xec   : > { %v402_v17 = vadd.f32 %v1711_v16, %v401_v15 }
  0xed   : > { %530 = vrot.lane.b32.xlu0 %v519_v13, %s1622_s9 }
  0xee   : > { %v522_v18 = vadd.f32 %v519_v13, %v402_v17  ;;  %v1458_v55 = vpop.f32.mrb[2].mxu0 }
  0xef   : > { %v411_v56 = vpop.f32.mrb[3].mxu0 }
  0xf0   : > { %v1394_v19 = vmul.f32 -1.442695, %v522_v18  ;;  %v412_v61 = vadd.f32 %v1711_v16, %v411_v56 }
  0xf2   : > { %1563 = vpow2.f32 %v1394_v19 }
  0xfc   : > { %v1564_v20 = vpop.eup %1563 }
  0xfd   : > { %v526_v21 = vadd.f32 1.0, %v1564_v20 }
  0xff   : > { %1565 = vrcp.f32 %v526_v21 }
 0x109   : > { %v1566_v22 = vpop.eup %1565 }
 0x10a   : > { %v540_v28 = vsub.f32 1.0, %v1566_v22  ;;  %v546_v30 = vmul.f32 0.0, %v1566_v22 }
 0x15f   : > { %v531_v23 = vpop.permute.xlu0 %530 }
 0x160   : > { %v533_v24 = vmul.f32 %v1566_v22, %v531_v23  ;;  %v417_v22 = vadd.f32 %v1458_v55, %v1711_v16 }
 0x162   : > { %535 = vrot.lane.b32.xlu0 %v533_v24, %s1623_s13 }
 0x1d4   : > { %v536_v25 = vpop.permute.xlu0 %535 }
 0x1d5   : > { %v538_v26 = vadd.f32 %v536_v25, %v402_v17 }
 0x1d7   : > { %1567 = vtanh.f32 %v538_v26 }
 0x1e1   : > { %v1568_v27 = vpop.eup %1567 }
 0x1e2   : > { %542 = vrot.lane.b32.xlu1 %v1568_v27, %s1624_s14 }
 0x254   : > { %v543_v29 = vpop.permute.xlu1 %542 }
 0x255   : > { %v545_v31 = vmul.f32 %v543_v29, %v540_v28 }
 0x257   : > { %v547_v32 = vadd.f32 %v546_v30, %v545_v31  ;;  %v297_v31 = vld [vmem:[%s1681_s30 + $0x20] sm:$0xff] }
 0x258   : > { %1459 = vmatprep.mubr.msk.f32.mxu0 %vm310_vm1, %v297_v31 }
 0x259   : > { %549 = vrot.lane.b32.xlu1 %v547_v32, %s1624_s14 }
 0x2cb   : > { %v550_v33 = vpop.permute.xlu1 %549 }
 0x2cc   : > { %552 = vst.msk [vmem:[%s1722_s17] sm:$0xff] %vm310_vm1, %v550_v33  ;;  %1477 = vmatmul.mubr.msk.f32.vlgmr.msra.gmra.mrb[2].mxu1 %vm310_vm1, %v550_v33  ;;  %v299_v33 = vld [vmem:[%s1681_s30 + $0x30] sm:$0xff] }
 0x2cd   : > { %1533 = vmatpush3.bf16.msra.mxu1 %v1684_v8  ;;  %1483 = vmatprep.mubr.msk.f32.mxu1 %vm1620_vm0, %v1621_v1 }
 0x2ce   : > { %1534 = vmatprep.subr.bf16.mxu1 %v1619_v0 }
 0x39f   : > { %v621_v34 = vpop.f32.mrb[2].mxu1 }
 0x3a0   : > { %v622_v35 = vadd.f32 %v1703_v10, %v621_v34  ;;  %v1478_v36 = vpop.f32.mrb[3].mxu1  ;;  %v300_v34 = vld [vmem:[%s1681_s30 + $0x38] sm:$0xff] }
 0x3a2   : > { %633 = vrot.lane.b32.xlu0 %v622_v35, %s1622_s9  ;;  %v625_v38 = vadd.f32 %v622_v35, %v407_v37 }
 0x3a4   : > { %v1396_v39 = vmul.f32 -1.442695, %v625_v38 }
 0x3a6   : > { %1569 = vpow2.f32 %v1396_v39 }
 0x3b0   : > { %v1570_v40 = vpop.eup %1569 }
 0x3b1   : > { %v629_v41 = vadd.f32 1.0, %v1570_v40 }
 0x3b3   : > { %1571 = vrcp.f32 %v629_v41 }
 0x3bd   : > { %v1572_v42 = vpop.eup %1571 }
 0x3be   : > { %v643_v50 = vsub.f32 1.0, %v1572_v42  ;;  %v649_v52 = vmul.f32 %v1572_v42, %v547_v32  ;;  %v298_v32 = vld [vmem:[%s1681_s30 + $0x28] sm:$0xff] }
 0x3bf   : > { %1460 = vmatmul.mubr.msk.f32.gmra.mrb[4].mxu0 %vm310_vm1, %v298_v32 }
 0x3c0   : > { %1462 = vmatprep.mubr.msk.f32.mxu0 %vm310_vm1, %v299_v33 }
 0x3c3   : > { %1463 = vmatmul.mubr.msk.f32.gmra.mrb[6].mxu0 %vm310_vm1, %v300_v34 }
 0x3c4   : > { %1497 = vmatprep.mubr.msk.f32.mxu0 %vm1620_vm0, %v1621_v1 }
 0x414   : > { %v634_v43 = vpop.permute.xlu0 %633 }
 0x415   : > { %v636_v44 = vmul.f32 %v1572_v42, %v634_v43 }
 0x417   : > { %638 = vrot.lane.b32.xlu1 %v636_v44, %s1623_s13 }
 0x489   : > { %v639_v45 = vpop.permute.xlu1 %638 }
 0x48a   : > { %v641_v46 = vadd.f32 %v639_v45, %v407_v37 }
 0x48c   : > { %1573 = vtanh.f32 %v641_v46 }
 0x492   : > { %v1461_v41 = vpop.f32.mrb[4].mxu0 }
 0x493   : > { %v421_v42 = vpop.f32.mrb[5].mxu0 }
 0x496   : > { %v1574_v49 = vpop.eup %1573  ;;  %v1777_v43 = vpop.f32.mrb[6].mxu0 }
 0x497   : > { %645 = vrot.lane.b32.xlu0 %v1574_v49, %s1624_s14  ;;  %v1779_v44 = vpop.f32.mrb[7].mxu0  ;;  %v422_v49 = vadd.f32 %v1711_v16, %v421_v42 }
 0x509   : > { %v646_v51 = vpop.permute.xlu0 %645 }
 0x50a   : > { %v648_v53 = vmul.f32 %v646_v51, %v643_v50 }
 0x50c   : > { %v650_v54 = vadd.f32 %v649_v52, %v648_v53 }
 0x50e   : > { %652 = vrot.lane.b32.xlu1 %v650_v54, %s1624_s14 }
 0x580   : > { %v653_v57 = vpop.permute.xlu1 %652 }
 0x581   : > { %655 = vst.msk [vmem:[%s1722_s17 + $0x8] sm:$0xff] %vm310_vm1, %v653_v57  ;;  %1484 = vmatmul.mubr.msk.f32.vlgmr.msra.gmra.mrb[4].mxu1 %vm310_vm1, %v653_v57 }
 0x582   : > { %1536 = vmatpush3.bf16.msra.mxu1 %v1684_v8  ;;  %1490 = vmatprep.mubr.msk.f32.mxu1 %vm1620_vm0, %v1621_v1 }
 0x583   : > { %1540 = vmatprep.subr.bf16.mxu1 %v1619_v0 }
 0x654   : > { %v724_v58 = vpop.f32.mrb[4].mxu1 }
 0x655   : > { %v725_v59 = vadd.f32 %v1703_v10, %v724_v58  ;;  %v1485_v60 = vpop.f32.mrb[5].mxu1 }
 0x657   : > { %736 = vrot.lane.b32.xlu0 %v725_v59, %s1622_s9  ;;  %v728_v62 = vadd.f32 %v725_v59, %v412_v61 }
 0x659   : > { %v1398_v63 = vmul.f32 -1.442695, %v728_v62 }
 0x65b   : > { %1575 = vpow2.f32 %v1398_v63 }
 0x665   : > { %v1576_v2 = vpop.eup %1575 }
 0x666   : > { %v732_v3 = vadd.f32 1.0, %v1576_v2 }
 0x668   : > { %1577 = vrcp.f32 %v732_v3 }
 0x672   : > { %v1578_v4 = vpop.eup %1577 }
 0x673   : > { %v746_v12 = vsub.f32 1.0, %v1578_v4  ;;  %v752_v14 = vmul.f32 %v1578_v4, %v650_v54 }
 0x6c9   : > { %v737_v5 = vpop.permute.xlu0 %736 }
 0x6ca   : > { %v739_v6 = vmul.f32 %v1578_v4, %v737_v5 }
 0x6cc   : > { %741 = vrot.lane.b32.xlu1 %v739_v6, %s1623_s13 }
 0x73e   : > { %v742_v7 = vpop.permute.xlu1 %741 }
 0x73f   : > { %v744_v9 = vadd.f32 %v742_v7, %v412_v61  ;;  %v427_v7 = vadd.f32 %v1461_v41, %v1711_v16 }
 0x741   : > { %1579 = vtanh.f32 %v744_v9 }
 0x74b   : > { %v1580_v11 = vpop.eup %1579 }
 0x74c   : > { %748 = vrot.lane.b32.xlu0 %v1580_v11, %s1624_s14 }
 0x7be   : > { %v749_v13 = vpop.permute.xlu0 %748 }
 0x7bf   : > { %v751_v15 = vmul.f32 %v749_v13, %v746_v12 }
 0x7c1   : > { %v753_v17 = vadd.f32 %v752_v14, %v751_v15 }
 0x7c3   : > { %755 = vrot.lane.b32.xlu1 %v753_v17, %s1624_s14 }
 0x835   : > { %v756_v18 = vpop.permute.xlu1 %755 }
 0x836   : > { %758 = vst.msk [vmem:[%s1722_s17 + $0x10] sm:$0xff] %vm310_vm1, %v756_v18  ;;  %1491 = vmatmul.mubr.msk.f32.vlgmr.msra.gmra.mrb[6].mxu1 %vm310_vm1, %v756_v18 }
 0x837   : > { %1542 = vmatpush3.bf16.msra.mxu1 %v1684_v8  ;;  %1504 = vmatprep.mubr.msk.f32.mxu1 %vm1620_vm0, %v1621_v1 }
 0x838   : > { %1546 = vmatprep.subr.bf16.mxu1 %v1619_v0 }
 0x909   : > { %v827_v19 = vpop.f32.mrb[6].mxu1 }
 0x90a   : > { %v828_v20 = vadd.f32 %v1703_v10, %v827_v19  ;;  %v1492_v21 = vpop.f32.mrb[7].mxu1 }
 0x90c   : > { %839 = vrot.lane.b32.xlu0 %v828_v20, %s1622_s9  ;;  %v831_v23 = vadd.f32 %v828_v20, %v417_v22 }
 0x90e   : > { %v1400_v24 = vmul.f32 -1.442695, %v831_v23 }
 0x910   : > { %1581 = vpow2.f32 %v1400_v24 }
 0x91a   : > { %v1582_v25 = vpop.eup %1581 }
 0x91b   : > { %v835_v26 = vadd.f32 1.0, %v1582_v25 }
 0x91d   : > { %1583 = vrcp.f32 %v835_v26 }
 0x927   : > { %v1584_v27 = vpop.eup %1583 }
 0x928   : > { %v849_v36 = vsub.f32 1.0, %v1584_v27  ;;  %v855_v38 = vmul.f32 %v1584_v27, %v753_v17 }
 0x97e   : > { %v840_v0 = vpop.permute.xlu0 %839 }
 0x97f   : > { %v842_v28 = vmul.f32 %v1584_v27, %v840_v0  ;;  %v432_v0 = vadd.f32 %v1711_v16, %v1779_v44 }
 0x981   : > { %844 = vrot.lane.b32.xlu1 %v842_v28, %s1623_s13 }
 0x9f3   : > { %v845_v29 = vpop.permute.xlu1 %844 }
 0x9f4   : > { %v847_v30 = vadd.f32 %v845_v29, %v417_v22 }
 0x9f6   : > { %1585 = vtanh.f32 %v847_v30 }
 0xa00   : > { %v1586_v35 = vpop.eup %1585 }
 0xa01   : > { %851 = vrot.lane.b32.xlu0 %v1586_v35, %s1624_s14 }
 0xa73   : > { %v852_v37 = vpop.permute.xlu0 %851 }
 0xa74   : > { %v854_v39 = vmul.f32 %v852_v37, %v849_v36 }
 0xa76   : > { %v856_v40 = vadd.f32 %v855_v38, %v854_v39 }
 0xa78   : > { %858 = vrot.lane.b32.xlu1 %v856_v40, %s1624_s14 }
 0xaea   : > { %v859_v45 = vpop.permute.xlu1 %858 }
 0xaeb   : > { %861 = vst.msk [vmem:[%s1722_s17 + $0x18] sm:$0xff] %vm310_vm1, %v859_v45  ;;  %1498 = vmatmul.mubr.msk.f32.vlgmr.msra.gmra.mrb[8].mxu0 %vm310_vm1, %v859_v45 }
 0xaec   : > { %1545 = vmatpush3.bf16.msra.mxu0 %v1684_v8  ;;  %1511 = vmatprep.mubr.msk.f32.mxu0 %vm1620_vm0, %v1621_v1 }
 0xbbe   : > { %v930_v46 = vpop.f32.mrb[8].mxu0 }
 0xbbf   : > { %v931_v47 = vadd.f32 %v1703_v10, %v930_v46  ;;  %v1499_v48 = vpop.f32.mrb[9].mxu0 }
 0xbc0   : > { %v437_v48 = vadd.f32 %v1777_v43, %v1711_v16 }
 0xbc1   : > { %942 = vrot.lane.b32.xlu0 %v931_v47, %s1622_s9  ;;  %v934_v50 = vadd.f32 %v931_v47, %v422_v49 }
 0xbc3   : > { %v1402_v51 = vmul.f32 -1.442695, %v934_v50 }
 0xbc5   : > { %1587 = vpow2.f32 %v1402_v51 }
 0xbcf   : > { %v1588_v52 = vpop.eup %1587 }
 0xbd0   : > { %v938_v53 = vadd.f32 1.0, %v1588_v52 }
 0xbd2   : > { %1589 = vrcp.f32 %v938_v53 }
 0xbdc   : > { %v1590_v54 = vpop.eup %1589 }
 0xbdd   : > { %v952_v60 = vsub.f32 1.0, %v1590_v54  ;;  %v958_v62 = vmul.f32 %v1590_v54, %v856_v40 }
 0xc33   : > { %v943_v55 = vpop.permute.xlu0 %942 }
 0xc34   : > { %v945_v56 = vmul.f32 %v1590_v54, %v943_v55 }
 0xc36   : > { %947 = vrot.lane.b32.xlu1 %v945_v56, %s1623_s13 }
 0xca8   : > { %v948_v57 = vpop.permute.xlu1 %947 }
 0xca9   : > { %v950_v58 = vadd.f32 %v948_v57, %v422_v49 }
 0xcab   : > { %1591 = vtanh.f32 %v950_v58 }
 0xcb5   : > { %v1592_v59 = vpop.eup %1591 }
 0xcb6   : > { %954 = vrot.lane.b32.xlu0 %v1592_v59, %s1624_s14 }
 0xd28   : > { %v955_v61 = vpop.permute.xlu0 %954 }
 0xd29   : > { %v957_v63 = vmul.f32 %v955_v61, %v952_v60 }
 0xd2b   : > { %v959_v2 = vadd.f32 %v958_v62, %v957_v63 }
 0xd2d   : > { %961 = vrot.lane.b32.xlu1 %v959_v2, %s1624_s14 }
 0xd9f   : > { %v962_v3 = vpop.permute.xlu1 %961 }
 0xda0   : > { %964 = vst.msk [vmem:[%s1722_s17 + $0x20] sm:$0xff] %vm310_vm1, %v962_v3  ;;  %1505 = vmatmul.mubr.msk.f32.vlgmr.msra.gmra.mrb[8].mxu1 %vm310_vm1, %v962_v3 }
 0xda1   : > { %1548 = vmatpush3.bf16.msra.mxu1 %v1684_v8  ;;  %1518 = vmatprep.mubr.msk.f32.mxu1 %vm1620_vm0, %v1621_v1 }
 0xe73   : > { %v1033_v4 = vpop.f32.mrb[8].mxu1 }
 0xe74   : > { %v1034_v5 = vadd.f32 %v1703_v10, %v1033_v4  ;;  %v1506_v6 = vpop.f32.mrb[9].mxu1 }
 0xe76   : > { %1045 = vrot.lane.b32.xlu0 %v1034_v5, %s1622_s9  ;;  %v1037_v9 = vadd.f32 %v1034_v5, %v427_v7 }
 0xe78   : > { %v1404_v11 = vmul.f32 -1.442695, %v1037_v9 }
 0xe7a   : > { %1593 = vpow2.f32 %v1404_v11 }
 0xe84   : > { %v1594_v12 = vpop.eup %1593 }
 0xe85   : > { %v1041_v13 = vadd.f32 1.0, %v1594_v12 }
 0xe87   : > { %1595 = vrcp.f32 %v1041_v13 }
 0xe91   : > { %v1596_v14 = vpop.eup %1595 }
 0xe92   : > { %v1055_v19 = vsub.f32 1.0, %v1596_v14  ;;  %v1061_v21 = vmul.f32 %v1596_v14, %v959_v2 }
 0xee8   : > { %v1046_v8 = vpop.permute.xlu0 %1045 }
 0xee9   : > { %v1048_v15 = vmul.f32 %v1596_v14, %v1046_v8 }
 0xeeb   : > { %1050 = vrot.lane.b32.xlu1 %v1048_v15, %s1623_s13 }
 0xf5d   : > { %v1051_v1 = vpop.permute.xlu1 %1050 }
 0xf5e   : > { %v1053_v17 = vadd.f32 %v1051_v1, %v427_v7 }
 0xf60   : > { %1597 = vtanh.f32 %v1053_v17 }
 0xf6a   : > { %v1598_v18 = vpop.eup %1597 }
 0xf6b   : > { %1057 = vrot.lane.b32.xlu0 %v1598_v18, %s1624_s14 }
 0xfdd   : > { %v1058_v20 = vpop.permute.xlu0 %1057 }
 0xfde   : > { %v1060_v22 = vmul.f32 %v1058_v20, %v1055_v19 }
 0xfe0   : > { %v1062_v23 = vadd.f32 %v1061_v21, %v1060_v22 }
 0xfe2   : > { %1064 = vrot.lane.b32.xlu1 %v1062_v23, %s1624_s14 }
0x1054   : > { %v1065_v24 = vpop.permute.xlu1 %1064 }
0x1055   : > { %1067 = vst.msk [vmem:[%s1722_s17 + $0x28] sm:$0xff] %vm310_vm1, %v1065_v24  ;;  %1512 = vmatmul.mubr.msk.f32.vlgmr.msra.gmra.mrb[10].mxu0 %vm310_vm1, %v1065_v24 }
0x1128   : > { %v1136_v25 = vpop.f32.mrb[10].mxu0 }
0x1129   : > { %v1137_v26 = vadd.f32 %v1703_v10, %v1136_v25  ;;  %v1513_v27 = vpop.f32.mrb[11].mxu0 }
0x112b   : > { %1148 = vrot.lane.b32.xlu0 %v1137_v26, %s1622_s9  ;;  %v1140_v28 = vadd.f32 %v1137_v26, %v432_v0 }
0x112d   : > { %v1406_v29 = vmul.f32 -1.442695, %v1140_v28 }
0x112f   : > { %1599 = vpow2.f32 %v1406_v29 }
0x1139   : > { %v1600_v30 = vpop.eup %1599 }
0x113a   : > { %v1144_v31 = vadd.f32 1.0, %v1600_v30 }
0x113c   : > { %1601 = vrcp.f32 %v1144_v31 }
0x1146   : > { %v1602_v32 = vpop.eup %1601 }
0x1147   : > { %v1158_v38 = vsub.f32 1.0, %v1602_v32  ;;  %v1164_v40 = vmul.f32 %v1602_v32, %v1062_v23 }
0x119d   : > { %v1149_v33 = vpop.permute.xlu0 %1148 }
0x119e   : > { %v1151_v34 = vmul.f32 %v1602_v32, %v1149_v33 }
0x11a0   : > { %1153 = vrot.lane.b32.xlu1 %v1151_v34, %s1623_s13 }
0x1212   : > { %v1154_v35 = vpop.permute.xlu1 %1153 }
0x1213   : > { %v1156_v36 = vadd.f32 %v1154_v35, %v432_v0 }
0x1215   : > { %1603 = vtanh.f32 %v1156_v36 }
0x121f   : > { %v1604_v37 = vpop.eup %1603 }
0x1220   : > { %1160 = vrot.lane.b32.xlu0 %v1604_v37, %s1624_s14 }
0x1292   : > { %v1161_v39 = vpop.permute.xlu0 %1160 }
0x1293   : > { %v1163_v41 = vmul.f32 %v1161_v39, %v1158_v38 }
0x1295   : > { %v1165_v42 = vadd.f32 %v1164_v40, %v1163_v41 }
0x1297   : > { %1167 = vrot.lane.b32.xlu1 %v1165_v42, %s1624_s14 }
0x1309   : > { %v1168_v44 = vpop.permute.xlu1 %1167 }
0x130a   : > { %1170 = vst.msk [vmem:[%s1722_s17 + $0x30] sm:$0xff] %vm310_vm1, %v1168_v44  ;;  %1519 = vmatmul.mubr.msk.f32.vlgmr.msra.gmra.mrb[10].mxu1 %vm310_vm1, %v1168_v44 }
0x13dd   : > { %v1239_v45 = vpop.f32.mrb[10].mxu1 }
0x13de   : > { %v1240_v46 = vadd.f32 %v1703_v10, %v1239_v45  ;;  %v1520_v47 = vpop.f32.mrb[11].mxu1 }
0x13e0   : > { %1251 = vrot.lane.b32.xlu0 %v1240_v46, %s1622_s9  ;;  %v1243_v49 = vadd.f32 %v1240_v46, %v437_v48 }
0x13e2   : > { %v1408_v50 = vmul.f32 -1.442695, %v1243_v49 }
0x13e4   : > { %1605 = vpow2.f32 %v1408_v50 }
0x13ee   : > { %v1606_v51 = vpop.eup %1605 }
0x13ef   : > { %v1247_v52 = vadd.f32 1.0, %v1606_v51 }
0x13f1   : > { %1607 = vrcp.f32 %v1247_v52 }
0x13fb   : > { %v1608_v53 = vpop.eup %1607 }
0x13fc   : > { %v1261_v58 = vsub.f32 1.0, %v1608_v53  ;;  %v1267_v43 = vmul.f32 %v1608_v53, %v1165_v42 }
0x1452   : > { %v1252_v54 = vpop.permute.xlu0 %1251 }
0x1453   : > { %v1254_v55 = vmul.f32 %v1608_v53, %v1252_v54 }
0x1455   : > { %1256 = vrot.lane.b32.xlu1 %v1254_v55, %s1623_s13 }
0x14c7   : > { %v1257_v56 = vpop.permute.xlu1 %1256 }
0x14c8   : > { %v1259_v10 = vadd.f32 %v1257_v56, %v437_v48 }
0x14ca   : > { %1609 = vtanh.f32 %v1259_v10 }
0x14d4   : > { %v1610_v57 = vpop.eup %1609 }
0x14d5   : > { %1263 = vrot.lane.b32.xlu0 %v1610_v57, %s1624_s14 }
0x1547   : > { %v1264_v16 = vpop.permute.xlu0 %1263 }
0x1548   : > { %v1266_v59 = vmul.f32 %v1264_v16, %v1261_v58 }
0x154a   : > { %v1268_v60 = vadd.f32 %v1267_v43, %v1266_v59 }
0x154c   : > { %1270 = vrot.lane.b32.xlu1 %v1268_v60, %s1624_s14 }
0x15be   : > { %v1271_v61 = vpop.permute.xlu1 %1270 }
0x15bf   : > { %1273 = vst.msk [vmem:[%s1722_s17 + $0x38] sm:$0xff] %vm310_vm1, %v1271_v61 }
0x15c0 PF: > { %s15_s18 = sadd.s32 1, %s1617_s18  }
0x15c1   : > { %p12_p4 = scmp.ge.s32.totalorder %s15_s18, 4  }
0x15c3   :  { %14 = sbr.rel (!%p12_p4) target bundleno = 1 (0x1), region = 82 }

// kernel: phn_forward.7
= control target key start
LH: loop header
LB: loop body
LE: loop exit
PB: predicated region body
PF: predicated region fallthrough
CT: control target
= control target key end

     0   :  { %s2749_s18 = smov 0   ;;  %s3062_s0 = inlined_call_operand.vmem [shape: f32[2,128,16], index: 0, kind: input, shape index: {}]   ;;  %s3063_s1 = inlined_call_operand.vmem [shape: f32[2,16,48], index: 1, kind: input, shape index: {}]   ;;  %s3064_s2 = inlined_call_operand.vmem [shape: f32[2,16,48], index: 2, kind: input, shape index: {}]   ;;  %s3065_s3 = inlined_call_operand.vmem [shape: f32[2,1,48], index: 3, kind: input, shape index: {}]   ;;  %s3066_s4 = inlined_call_operand.vmem [shape: f32[2,1,48], index: 4, kind: input, shape index: {}]   ;;  %s3067_s5 = inlined_call_operand.vmem [shape: f32[2,128,16], index: 5, kind: output, shape index: {}]  }
   0x1 LB: > { %s2267_s19 = sadd.s32 4294967295, %s2711_s18   ;;  %p2271_p0 = scmp.ge.s32.totalorder %s2711_s18, 1  ;;  %s2711_s18 = sphi %s2749_s18, %s15_s18  }
   0x2   : > { %p223_p1 = scmp.lt.s32.totalorder %s2711_s18, 3 }
   0x4   : > { %p224_p2 = pnand %p2271_p0, %p223_p1 }
   0x5   : > { %p267_p3 = scmp.lt.s32.totalorder (!%p224_p2), %s2267_s19, 1  ;;  %v2713_v0 = vmov (!%p224_p2), 0.0|0.0   ;;  %vm2714_vm0 = vmmov (!%p224_p2), 0   ;;  %v2715_v1 = vmov (!%p224_p2), 0.0   ;;  %vm318_vm1 = vcmask (!%p224_p2), 130048   ;;  %s2716_s9 = smov (!%p224_p2), 96  }
   0x6   : > { %227 = sbr.rel (%p224_p2) target bundleno = 11113 (0x2b69), region = 40  ;;  %2545 = vmatprep.subr.bf16.mxu1 (!%p224_p2), %v2713_v0  ;;  %2433 = vmatprep.mubr.msk.f32.mxu1 (!%p224_p2), %vm2714_vm0, %v2715_v1  ;;  %s2717_s13 = smov (!%p224_p2), 32  }
   0x7   : > { %s2718_s14 = smov (!%p224_p2), 112  }
   0xd   : > { %s3069_s19 = smov (!%p267_p3, %s2267_s19), 1 }
   0xe   : > { %s2331_s20 = sshll.u32 %s3069_s19, 7  ;;  %s2332_s21 = sshll.u32 %s3069_s19, 4 }
   0xf   : > { %s2769_s24 = scalar_lea.vmem %s3062_s0, %s2331_s20  ;;  %s276_s27 = scalar_lea.vmem %s3063_s1, %s2332_s21 }
  0x10   : > { %s281_s30 = scalar_lea.vmem %s3064_s2, %s2332_s21  ;;  %v309_v2 = vld [vmem:[%s276_s27] sm:$0xff]  ;;  %v310_v3 = vld [vmem:[%s276_s27 + $0x8] sm:$0xff]  ;;  %s2797_s8 = scalar_lea.vmem %s3066_s4, %s3069_s19  ;;  %v295_v47 = vld [vmem:[%s2769_s24 + $0x10] sm:$0xff] }
  0x11   : > { %v293_v4 = vld [vmem:[%s2769_s24] sm:$0xff]  ;;  %v2541_v5 = vpack.c.bf16 %v310_v3, %v309_v2  ;;  %v513_v7 = vld [vmem:[%s281_s30 + $0x8] sm:$0xff]  ;;  %s2808_s12 = scalar_lea.vmem %s3065_s3, %s3069_s19  ;;  %s2822_s17 = scalar_lea.vmem %s3067_s5, %s2331_s20  ;;  %v296_v48 = vld [vmem:[%s2769_s24 + $0x18] sm:$0xff] }
  0x12   : > { %v512_v6 = vld [vmem:[%s281_s30] sm:$0xff]  ;;  %2405 = vmatprep.mubr.msk.f32.mxu0 %vm318_vm1, %v293_v4  ;;  %v294_v9 = vld [vmem:[%s2769_s24 + $0x8] sm:$0xff] }
  0x13   : > { %v2779_v8 = vpack.c.bf16 %v513_v7, %v512_v6  ;;  %2542 = vmatprep.subr.bf16.mxu0 %v2541_v5  ;;  %v2800_v10 = vld [vmem:[%s2797_s8] ss:$0 sm:$0xff] }
  0x14   : > { %2544 = vmatpush3.bf16.msra.mxu0 %v2541_v5  ;;  %v2811_v16 = vld [vmem:[%s2808_s12] ss:$0 sm:$0xff] }
  0x15   : > { %2547 = vmatpush3.bf16.msra.mxu1 %v2779_v8  ;;  %2569 = vmatprep.subr.bf16.mxu0 %v2713_v0 }
  0x16   : > { %2548 = vmatprep.subr.bf16.mxu1 %v2713_v0 }
  0x17   : > { %2406 = vmatmul.mubr.msk.f32.vlgmr.msra.gmra.mrb[0].mxu0 %vm318_vm1, %v294_v9 }
  0x18   : > { %2434 = vmatmul.mubr.f32.vlgmr.msra.gmra.mrb[0].mxu1 %v2715_v1  ;;  %2571 = vmatpush3.bf16.msra.mxu0 %v2779_v8 }
  0x19   : > { %2550 = vmatpush3.bf16.msra.mxu1 %v2779_v8  ;;  %2440 = vmatprep.mubr.msk.f32.mxu1 %vm2714_vm0, %v2715_v1 }
  0x1a   : > { %2551 = vmatprep.subr.bf16.mxu1 %v2713_v0  ;;  %2575 = vmatprep.subr.bf16.mxu0 %v2713_v0 }
  0x1b   : > { %2408 = vmatprep.mubr.msk.f32.mxu0 %vm318_vm1, %v295_v47 }
  0x1c   : > { %2409 = vmatmul.mubr.msk.f32.gmra.mrb[2].mxu0 %vm318_vm1, %v296_v48 }
  0xea   : > { %v2407_v12 = vpop.f32.mrb[0].mxu0 }
  0xeb   : > { %v590_v11 = vpop.f32.mrb[0].mxu1  ;;  %v433_v15 = vpop.f32.mrb[1].mxu0  ;;  %v439_v37 = vadd.f32 %v2407_v12, %v2811_v16 }
  0xec   : > { %v591_v13 = vadd.f32 %v2800_v10, %v590_v11  ;;  %v2435_v14 = vpop.f32.mrb[1].mxu1  ;;  %v434_v17 = vadd.f32 %v2811_v16, %v433_v15 }
  0xee   : > { %602 = vrot.lane.b32.xlu0 %v591_v13, %s2716_s9  ;;  %v594_v18 = vadd.f32 %v591_v13, %v434_v17 }
  0xef   : > { %v2410_v55 = vpop.f32.mrb[2].mxu0 }
  0xf0   : > { %v2298_v19 = vmul.f32 -1.442695, %v594_v18  ;;  %v443_v56 = vpop.f32.mrb[3].mxu0 }
  0xf1   : > { %v444_v61 = vadd.f32 %v2811_v16, %v443_v56 }
  0xf2   : > { %2607 = vpow2.f32 %v2298_v19 }
  0xfc   : > { %v2608_v20 = vpop.eup %2607 }
  0xfd   : > { %v598_v21 = vadd.f32 1.0, %v2608_v20 }
  0xff   : > { %2609 = vrcp.f32 %v598_v21 }
 0x109   : > { %v2610_v22 = vpop.eup %2609 }
 0x10a   : > { %v612_v28 = vsub.f32 1.0, %v2610_v22  ;;  %v618_v30 = vmul.f32 0.0, %v2610_v22 }
 0x160   : > { %v603_v23 = vpop.permute.xlu0 %602 }
 0x161   : > { %v605_v24 = vmul.f32 %v2610_v22, %v603_v23  ;;  %v449_v22 = vadd.f32 %v2410_v55, %v2811_v16 }
 0x163   : > { %607 = vrot.lane.b32.xlu0 %v605_v24, %s2717_s13 }
 0x1d5   : > { %v608_v25 = vpop.permute.xlu0 %607 }
 0x1d6   : > { %v610_v26 = vadd.f32 %v608_v25, %v434_v17 }
 0x1d8   : > { %2611 = vtanh.f32 %v610_v26 }
 0x1e2   : > { %v2612_v27 = vpop.eup %2611 }
 0x1e3   : > { %614 = vrot.lane.b32.xlu1 %v2612_v27, %s2718_s14 }
 0x255   : > { %v615_v29 = vpop.permute.xlu1 %614 }
 0x256   : > { %v617_v31 = vmul.f32 %v615_v29, %v612_v28 }
 0x258   : > { %v619_v32 = vadd.f32 %v618_v30, %v617_v31 }
 0x25a   : > { %621 = vrot.lane.b32.xlu1 %v619_v32, %s2718_s14 }
 0x2cc   : > { %v622_v33 = vpop.permute.xlu1 %621 }
 0x2cd   : > { %624 = vst.msk [vmem:[%s2822_s17] sm:$0xff] %vm318_vm1, %v622_v33  ;;  %2441 = vmatmul.mubr.msk.f32.vlgmr.msra.gmra.mrb[2].mxu1 %vm318_vm1, %v622_v33  ;;  %v298_v33 = vld [vmem:[%s2769_s24 + $0x28] sm:$0xff] }
 0x2ce   : > { %2553 = vmatpush3.bf16.msra.mxu1 %v2779_v8  ;;  %2447 = vmatprep.mubr.msk.f32.mxu1 %vm2714_vm0, %v2715_v1 }
 0x2cf   : > { %2554 = vmatprep.subr.bf16.mxu1 %v2713_v0 }
 0x3a0   : > { %v693_v34 = vpop.f32.mrb[2].mxu1 }
 0x3a1   : > { %v694_v35 = vadd.f32 %v2800_v10, %v693_v34  ;;  %v2442_v36 = vpop.f32.mrb[3].mxu1 }
 0x3a3   : > { %705 = vrot.lane.b32.xlu0 %v694_v35, %s2716_s9  ;;  %v697_v38 = vadd.f32 %v694_v35, %v439_v37 }
 0x3a5   : > { %v2300_v39 = vmul.f32 -1.442695, %v697_v38 }
 0x3a7   : > { %2613 = vpow2.f32 %v2300_v39 }
 0x3b1   : > { %v2614_v40 = vpop.eup %2613 }
 0x3b2   : > { %v701_v41 = vadd.f32 1.0, %v2614_v40 }
 0x3b4   : > { %2615 = vrcp.f32 %v701_v41 }
 0x3be   : > { %v2616_v42 = vpop.eup %2615 }
 0x3bf   : > { %v715_v50 = vsub.f32 1.0, %v2616_v42  ;;  %v721_v52 = vmul.f32 %v2616_v42, %v619_v32  ;;  %v297_v32 = vld [vmem:[%s2769_s24 + $0x20] sm:$0xff] }
 0x3c0   : > { %2411 = vmatprep.mubr.msk.f32.mxu0 %vm318_vm1, %v297_v32 }
 0x3c1   : > { %2412 = vmatmul.mubr.msk.f32.gmra.mrb[4].mxu0 %vm318_vm1, %v298_v33 }
 0x415   : > { %v706_v43 = vpop.permute.xlu0 %705 }
 0x416   : > { %v708_v44 = vmul.f32 %v2616_v42, %v706_v43 }
 0x418   : > { %710 = vrot.lane.b32.xlu1 %v708_v44, %s2717_s13 }
 0x48a   : > { %v711_v45 = vpop.permute.xlu1 %710 }
 0x48b   : > { %v713_v46 = vadd.f32 %v711_v45, %v439_v37 }
 0x48d   : > { %2617 = vtanh.f32 %v713_v46 }
 0x494   : > { %v2413_v40 = vpop.f32.mrb[4].mxu0 }
 0x495   : > { %v453_v41 = vpop.f32.mrb[5].mxu0 }
 0x496   : > { %v454_v46 = vadd.f32 %v2811_v16, %v453_v41 }
 0x497   : > { %v2618_v49 = vpop.eup %2617 }
 0x498   : > { %717 = vrot.lane.b32.xlu0 %v2618_v49, %s2718_s14 }
 0x50a   : > { %v718_v51 = vpop.permute.xlu0 %717 }
 0x50b   : > { %v720_v53 = vmul.f32 %v718_v51, %v715_v50 }
 0x50d   : > { %v722_v54 = vadd.f32 %v721_v52, %v720_v53 }
 0x50f   : > { %724 = vrot.lane.b32.xlu1 %v722_v54, %s2718_s14 }
 0x581   : > { %v725_v57 = vpop.permute.xlu1 %724 }
 0x582   : > { %727 = vst.msk [vmem:[%s2822_s17 + $0x8] sm:$0xff] %vm318_vm1, %v725_v57  ;;  %2448 = vmatmul.mubr.msk.f32.vlgmr.msra.gmra.mrb[4].mxu1 %vm318_vm1, %v725_v57 }
 0x583   : > { %2556 = vmatpush3.bf16.msra.mxu1 %v2779_v8  ;;  %2454 = vmatprep.mubr.msk.f32.mxu1 %vm2714_vm0, %v2715_v1 }
 0x584   : > { %2557 = vmatprep.subr.bf16.mxu1 %v2713_v0 }
 0x655   : > { %v796_v58 = vpop.f32.mrb[4].mxu1 }
 0x656   : > { %v797_v59 = vadd.f32 %v2800_v10, %v796_v58  ;;  %v2449_v60 = vpop.f32.mrb[5].mxu1 }
 0x658   : > { %808 = vrot.lane.b32.xlu0 %v797_v59, %s2716_s9  ;;  %v800_v62 = vadd.f32 %v797_v59, %v444_v61 }
 0x65a   : > { %v2302_v63 = vmul.f32 -1.442695, %v800_v62 }
 0x65c   : > { %2619 = vpow2.f32 %v2302_v63 }
 0x666   : > { %v2620_v2 = vpop.eup %2619 }
 0x667   : > { %v804_v3 = vadd.f32 1.0, %v2620_v2 }
 0x669   : > { %2621 = vrcp.f32 %v804_v3 }
 0x673   : > { %v2622_v4 = vpop.eup %2621 }
 0x674   : > { %v818_v12 = vsub.f32 1.0, %v2622_v4  ;;  %v824_v14 = vmul.f32 %v2622_v4, %v722_v54 }
 0x6ca   : > { %v809_v5 = vpop.permute.xlu0 %808 }
 0x6cb   : > { %v811_v6 = vmul.f32 %v2622_v4, %v809_v5  ;;  %v459_v4 = vadd.f32 %v2413_v40, %v2811_v16 }
 0x6cd   : > { %813 = vrot.lane.b32.xlu1 %v811_v6, %s2717_s13 }
 0x73f   : > { %v814_v7 = vpop.permute.xlu1 %813 }
 0x740   : > { %v816_v9 = vadd.f32 %v814_v7, %v444_v61 }
 0x742   : > { %2623 = vtanh.f32 %v816_v9 }
 0x74c   : > { %v2624_v11 = vpop.eup %2623 }
 0x74d   : > { %820 = vrot.lane.b32.xlu0 %v2624_v11, %s2718_s14 }
 0x7bf   : > { %v821_v13 = vpop.permute.xlu0 %820 }
 0x7c0   : > { %v823_v15 = vmul.f32 %v821_v13, %v818_v12 }
 0x7c2   : > { %v825_v17 = vadd.f32 %v824_v14, %v823_v15 }
 0x7c4   : > { %827 = vrot.lane.b32.xlu1 %v825_v17, %s2718_s14 }
 0x836   : > { %v828_v18 = vpop.permute.xlu1 %827 }
 0x837   : > { %830 = vst.msk [vmem:[%s2822_s17 + $0x10] sm:$0xff] %vm318_vm1, %v828_v18  ;;  %2455 = vmatmul.mubr.msk.f32.vlgmr.msra.gmra.mrb[6].mxu1 %vm318_vm1, %v828_v18  ;;  %v300_v18 = vld [vmem:[%s2769_s24 + $0x38] sm:$0xff] }
 0x838   : > { %2559 = vmatpush3.bf16.msra.mxu1 %v2779_v8  ;;  %2461 = vmatprep.mubr.msk.f32.mxu1 %vm2714_vm0, %v2715_v1 }
 0x839   : > { %2560 = vmatprep.subr.bf16.mxu1 %v2713_v0 }
 0x90a   : > { %v899_v19 = vpop.f32.mrb[6].mxu1 }
 0x90b   : > { %v900_v20 = vadd.f32 %v2800_v10, %v899_v19  ;;  %v2456_v21 = vpop.f32.mrb[7].mxu1 }
 0x90d   : > { %911 = vrot.lane.b32.xlu0 %v900_v20, %s2716_s9  ;;  %v903_v23 = vadd.f32 %v900_v20, %v449_v22 }
 0x90f   : > { %v2304_v24 = vmul.f32 -1.442695, %v903_v23 }
 0x911   : > { %2625 = vpow2.f32 %v2304_v24 }
 0x91b   : > { %v2626_v25 = vpop.eup %2625 }
 0x91c   : > { %v907_v26 = vadd.f32 1.0, %v2626_v25 }
 0x91e   : > { %2627 = vrcp.f32 %v907_v26 }
 0x928   : > { %v2628_v27 = vpop.eup %2627 }
 0x929   : > { %v921_v35 = vsub.f32 1.0, %v2628_v27  ;;  %v927_v37 = vmul.f32 %v2628_v27, %v825_v17  ;;  %v299_v17 = vld [vmem:[%s2769_s24 + $0x30] sm:$0xff] }
 0x92a   : > { %2414 = vmatprep.mubr.msk.f32.mxu0 %vm318_vm1, %v299_v17 }
 0x92b   : > { %2415 = vmatmul.mubr.msk.f32.gmra.mrb[6].mxu0 %vm318_vm1, %v300_v18 }
 0x97f   : > { %v912_v28 = vpop.permute.xlu0 %911 }
 0x980   : > { %v914_v29 = vmul.f32 %v2628_v27, %v912_v28 }
 0x982   : > { %916 = vrot.lane.b32.xlu1 %v914_v29, %s2717_s13 }
 0x9f4   : > { %v917_v30 = vpop.permute.xlu1 %916 }
 0x9f5   : > { %v919_v31 = vadd.f32 %v917_v30, %v449_v22 }
 0x9f7   : > { %2629 = vtanh.f32 %v919_v31 }
 0x9fe   : > { %v2416_v25 = vpop.f32.mrb[6].mxu0 }
 0x9ff   : > { %v463_v26 = vpop.f32.mrb[7].mxu0 }
 0xa00   : > { %v464_v31 = vadd.f32 %v2811_v16, %v463_v26 }
 0xa01   : > { %v2630_v34 = vpop.eup %2629 }
 0xa02   : > { %923 = vrot.lane.b32.xlu0 %v2630_v34, %s2718_s14 }
 0xa74   : > { %v924_v36 = vpop.permute.xlu0 %923 }
 0xa75   : > { %v926_v38 = vmul.f32 %v924_v36, %v921_v35 }
 0xa77   : > { %v928_v39 = vadd.f32 %v927_v37, %v926_v38 }
 0xa79   : > { %930 = vrot.lane.b32.xlu1 %v928_v39, %s2718_s14 }
 0xaeb   : > { %v931_v42 = vpop.permute.xlu1 %930 }
 0xaec   : > { %933 = vst.msk [vmem:[%s2822_s17 + $0x18] sm:$0xff] %vm318_vm1, %v931_v42  ;;  %2462 = vmatmul.mubr.msk.f32.vlgmr.msra.gmra.mrb[8].mxu1 %vm318_vm1, %v931_v42 }
 0xaed   : > { %2562 = vmatpush3.bf16.msra.mxu1 %v2779_v8  ;;  %2468 = vmatprep.mubr.msk.f32.mxu1 %vm2714_vm0, %v2715_v1 }
 0xaee   : > { %2563 = vmatprep.subr.bf16.mxu1 %v2713_v0 }
 0xbbf   : > { %v1002_v43 = vpop.f32.mrb[8].mxu1 }
 0xbc0   : > { %v1003_v44 = vadd.f32 %v2800_v10, %v1002_v43  ;;  %v2463_v45 = vpop.f32.mrb[9].mxu1 }
 0xbc2   : > { %1014 = vrot.lane.b32.xlu0 %v1003_v44, %s2716_s9  ;;  %v1006_v47 = vadd.f32 %v1003_v44, %v454_v46 }
 0xbc4   : > { %v2306_v48 = vmul.f32 -1.442695, %v1006_v47 }
 0xbc6   : > { %2631 = vpow2.f32 %v2306_v48 }
 0xbd0   : > { %v2632_v49 = vpop.eup %2631 }
 0xbd1   : > { %v1010_v50 = vadd.f32 1.0, %v2632_v49 }
 0xbd3   : > { %2633 = vrcp.f32 %v1010_v50 }
 0xbdd   : > { %v2634_v51 = vpop.eup %2633 }
 0xbde   : > { %v1024_v57 = vsub.f32 1.0, %v2634_v51  ;;  %v1030_v59 = vmul.f32 %v2634_v51, %v928_v39 }
 0xc34   : > { %v1015_v52 = vpop.permute.xlu0 %1014 }
 0xc35   : > { %v1017_v53 = vmul.f32 %v2634_v51, %v1015_v52  ;;  %v469_v51 = vadd.f32 %v2416_v25, %v2811_v16 }
 0xc37   : > { %1019 = vrot.lane.b32.xlu1 %v1017_v53, %s2717_s13 }
 0xca9   : > { %v1020_v54 = vpop.permute.xlu1 %1019 }
 0xcaa   : > { %v1022_v55 = vadd.f32 %v1020_v54, %v454_v46 }
 0xcac   : > { %2635 = vtanh.f32 %v1022_v55 }
 0xcb6   : > { %v2636_v56 = vpop.eup %2635 }
 0xcb7   : > { %1026 = vrot.lane.b32.xlu0 %v2636_v56, %s2718_s14 }
 0xd29   : > { %v1027_v58 = vpop.permute.xlu0 %1026 }
 0xd2a   : > { %v1029_v60 = vmul.f32 %v1027_v58, %v1024_v57 }
 0xd2c   : > { %v1031_v61 = vadd.f32 %v1030_v59, %v1029_v60 }
 0xd2e   : > { %1033 = vrot.lane.b32.xlu1 %v1031_v61, %s2718_s14 }
 0xda0   : > { %v1034_v62 = vpop.permute.xlu1 %1033 }
 0xda1   : > { %1036 = vst.msk [vmem:[%s2822_s17 + $0x20] sm:$0xff] %vm318_vm1, %v1034_v62  ;;  %2469 = vmatmul.mubr.msk.f32.vlgmr.msra.gmra.mrb[10].mxu1 %vm318_vm1, %v1034_v62  ;;  %v302_v62 = vld [vmem:[%s2769_s24 + $0x48] sm:$0xff] }
 0xda2   : > { %2565 = vmatpush3.bf16.msra.mxu1 %v2779_v8  ;;  %2475 = vmatprep.mubr.msk.f32.mxu1 %vm2714_vm0, %v2715_v1 }
 0xda3   : > { %2566 = vmatprep.subr.bf16.mxu1 %v2713_v0 }
 0xe74   : > { %v1105_v63 = vpop.f32.mrb[10].mxu1 }
 0xe75   : > { %v1106_v2 = vadd.f32 %v2800_v10, %v1105_v63  ;;  %v2470_v3 = vpop.f32.mrb[11].mxu1  ;;  %v303_v63 = vld [vmem:[%s2769_s24 + $0x50] sm:$0xff] }
 0xe76   : > { %v305_v3 = vld [vmem:[%s2769_s24 + $0x60] sm:$0xff] }
 0xe77   : > { %1117 = vrot.lane.b32.xlu0 %v1106_v2, %s2716_s9  ;;  %v1109_v5 = vadd.f32 %v1106_v2, %v459_v4  ;;  %v304_v2 = vld [vmem:[%s2769_s24 + $0x58] sm:$0xff] }
 0xe79   : > { %v2308_v6 = vmul.f32 -1.442695, %v1109_v5 }
 0xe7b   : > { %2637 = vpow2.f32 %v2308_v6  ;;  %v307_v6 = vld [vmem:[%s2769_s24 + $0x70] sm:$0xff] }
 0xe85   : > { %v2638_v7 = vpop.eup %2637 }
 0xe86   : > { %v1113_v9 = vadd.f32 1.0, %v2638_v7  ;;  %v308_v7 = vld [vmem:[%s2769_s24 + $0x78] sm:$0xff] }
 0xe88   : > { %2639 = vrcp.f32 %v1113_v9 }
 0xe92   : > { %v2640_v11 = vpop.eup %2639 }
 0xe93   : > { %v1127_v20 = vsub.f32 1.0, %v2640_v11  ;;  %v1133_v22 = vmul.f32 %v2640_v11, %v1031_v61  ;;  %v301_v61 = vld [vmem:[%s2769_s24 + $0x40] sm:$0xff] }
 0xe94   : > { %2417 = vmatprep.mubr.msk.f32.mxu0 %vm318_vm1, %v301_v61 }
 0xe95   : > { %2418 = vmatmul.mubr.msk.f32.gmra.mrb[8].mxu0 %vm318_vm1, %v302_v62 }
 0xe96   : > { %2420 = vmatprep.mubr.msk.f32.mxu0 %vm318_vm1, %v303_v63 }
 0xe99   : > { %2421 = vmatmul.mubr.msk.f32.gmra.mrb[10].mxu0 %vm318_vm1, %v304_v2 }
 0xe9a   : > { %2423 = vmatprep.mubr.msk.f32.mxu0 %vm318_vm1, %v305_v3 }
 0xee9   : > { %v1118_v12 = vpop.permute.xlu0 %1117 }
 0xeea   : > { %v1120_v13 = vmul.f32 %v2640_v11, %v1118_v12 }
 0xeec   : > { %1122 = vrot.lane.b32.xlu1 %v1120_v13, %s2717_s13 }
 0xf5e   : > { %v1123_v14 = vpop.permute.xlu1 %1122 }
 0xf5f   : > { %v1125_v15 = vadd.f32 %v1123_v14, %v459_v4  ;;  %v306_v4 = vld [vmem:[%s2769_s24 + $0x68] sm:$0xff] }
 0xf60   : > { %2424 = vmatmul.mubr.msk.f32.gmra.mrb[12].mxu0 %vm318_vm1, %v306_v4 }
 0xf61   : > { %2641 = vtanh.f32 %v1125_v15  ;;  %2426 = vmatprep.mubr.msk.f32.mxu0 %vm318_vm1, %v307_v6 }
 0xf64   : > { %2427 = vmatmul.mubr.msk.f32.gmra.mrb[14].mxu0 %vm318_vm1, %v308_v7 }
 0xf65   : > { %2489 = vmatprep.mubr.msk.f32.mxu0 %vm2714_vm0, %v2715_v1 }
 0xf68   : > { %v2419_v15 = vpop.f32.mrb[8].mxu0 }
 0xf69   : > { %v473_v17 = vpop.f32.mrb[9].mxu0 }
 0xf6b   : > { %v2642_v19 = vpop.eup %2641 }
 0xf6c   : > { %1129 = vrot.lane.b32.xlu0 %v2642_v19, %s2718_s14  ;;  %v2945_v18 = vpop.f32.mrb[10].mxu0 }
 0xf6d   : > { %v2947_v19 = vpop.f32.mrb[11].mxu0 }
 0xf6e   : > { %v484_v6 = vadd.f32 %v2811_v16, %v2947_v19 }
 0xfde   : > { %v1130_v21 = vpop.permute.xlu0 %1129 }
 0xfdf   : > { %v1132_v23 = vmul.f32 %v1130_v21, %v1127_v20 }
 0xfe1   : > { %v1134_v24 = vadd.f32 %v1133_v22, %v1132_v23 }
 0xfe3   : > { %1136 = vrot.lane.b32.xlu1 %v1134_v24, %s2718_s14 }
0x1033   : > { %v2949_v20 = vpop.f32.mrb[12].mxu0 }
0x1034   : > { %v2951_v21 = vpop.f32.mrb[13].mxu0 }
0x1037   : > { %v2953_v22 = vpop.f32.mrb[14].mxu0 }
0x1038   : > { %v2955_v23 = vpop.f32.mrb[15].mxu0 }
0x1055   : > { %v1137_v27 = vpop.permute.xlu1 %1136 }
0x1056   : > { %1139 = vst.msk [vmem:[%s2822_s17 + $0x28] sm:$0xff] %vm318_vm1, %v1137_v27  ;;  %2476 = vmatmul.mubr.msk.f32.vlgmr.msra.gmra.mrb[12].mxu1 %vm318_vm1, %v1137_v27 }
0x1057   : > { %2568 = vmatpush3.bf16.msra.mxu1 %v2779_v8  ;;  %2482 = vmatprep.mubr.msk.f32.mxu1 %vm2714_vm0, %v2715_v1 }
0x1058   : > { %2572 = vmatprep.subr.bf16.mxu1 %v2713_v0 }
0x1129   : > { %v1208_v28 = vpop.f32.mrb[12].mxu1 }
0x112a   : > { %v1209_v29 = vadd.f32 %v2800_v10, %v1208_v28  ;;  %v2477_v30 = vpop.f32.mrb[13].mxu1  ;;  %v474_v28 = vadd.f32 %v2811_v16, %v473_v17 }
0x112c   : > { %1220 = vrot.lane.b32.xlu0 %v1209_v29, %s2716_s9  ;;  %v1212_v32 = vadd.f32 %v1209_v29, %v464_v31 }
0x112e   : > { %v2310_v33 = vmul.f32 -1.442695, %v1212_v32 }
0x1130   : > { %2643 = vpow2.f32 %v2310_v33 }
0x113a   : > { %v2644_v34 = vpop.eup %2643 }
0x113b   : > { %v1216_v35 = vadd.f32 1.0, %v2644_v34 }
0x113d   : > { %2645 = vrcp.f32 %v1216_v35 }
0x1147   : > { %v2646_v36 = vpop.eup %2645 }
0x1148   : > { %v1230_v42 = vsub.f32 1.0, %v2646_v36  ;;  %v1236_v44 = vmul.f32 %v2646_v36, %v1134_v24 }
0x119e   : > { %v1221_v37 = vpop.permute.xlu0 %1220 }
0x119f   : > { %v1223_v38 = vmul.f32 %v2646_v36, %v1221_v37 }
0x11a1   : > { %1225 = vrot.lane.b32.xlu1 %v1223_v38, %s2717_s13 }
0x1213   : > { %v1226_v39 = vpop.permute.xlu1 %1225 }
0x1214   : > { %v1228_v40 = vadd.f32 %v1226_v39, %v464_v31 }
0x1216   : > { %2647 = vtanh.f32 %v1228_v40 }
0x1220   : > { %v2648_v41 = vpop.eup %2647 }
0x1221   : > { %1232 = vrot.lane.b32.xlu0 %v2648_v41, %s2718_s14 }
0x1293   : > { %v1233_v43 = vpop.permute.xlu0 %1232 }
0x1294   : > { %v1235_v45 = vmul.f32 %v1233_v43, %v1230_v42 }
0x1296   : > { %v1237_v46 = vadd.f32 %v1236_v44, %v1235_v45 }
0x1298   : > { %1239 = vrot.lane.b32.xlu1 %v1237_v46, %s2718_s14 }
0x130a   : > { %v1240_v47 = vpop.permute.xlu1 %1239 }
0x130b   : > { %1242 = vst.msk [vmem:[%s2822_s17 + $0x30] sm:$0xff] %vm318_vm1, %v1240_v47  ;;  %2483 = vmatmul.mubr.msk.f32.vlgmr.msra.gmra.mrb[14].mxu1 %vm318_vm1, %v1240_v47 }
0x130c   : > { %2574 = vmatpush3.bf16.msra.mxu1 %v2779_v8  ;;  %2496 = vmatprep.mubr.msk.f32.mxu1 %vm2714_vm0, %v2715_v1 }
0x130d   : > { %2578 = vmatprep.subr.bf16.mxu1 %v2713_v0 }
0x13de   : > { %v1311_v48 = vpop.f32.mrb[14].mxu1 }
0x13df   : > { %v1312_v49 = vadd.f32 %v2800_v10, %v1311_v48  ;;  %v2484_v50 = vpop.f32.mrb[15].mxu1  ;;  %v479_v48 = vadd.f32 %v2419_v15, %v2811_v16 }
0x13e1   : > { %1323 = vrot.lane.b32.xlu0 %v1312_v49, %s2716_s9  ;;  %v1315_v52 = vadd.f32 %v1312_v49, %v469_v51 }
0x13e3   : > { %v2312_v53 = vmul.f32 -1.442695, %v1315_v52 }
0x13e5   : > { %2649 = vpow2.f32 %v2312_v53 }
0x13ef   : > { %v2650_v54 = vpop.eup %2649 }
0x13f0   : > { %v1319_v55 = vadd.f32 1.0, %v2650_v54 }
0x13f2   : > { %2651 = vrcp.f32 %v1319_v55 }
0x13fc   : > { %v2652_v56 = vpop.eup %2651 }
0x13fd   : > { %v1333_v9 = vsub.f32 1.0, %v2652_v56  ;;  %v1339_v12 = vmul.f32 %v2652_v56, %v1237_v46 }
0x1453   : > { %v1324_v57 = vpop.permute.xlu0 %1323 }
0x1454   : > { %v1326_v58 = vmul.f32 %v2652_v56, %v1324_v57 }
0x1456   : > { %1328 = vrot.lane.b32.xlu1 %v1326_v58, %s2717_s13 }
0x14c8   : > { %v1329_v59 = vpop.permute.xlu1 %1328 }
0x14c9   : > { %v1331_v60 = vadd.f32 %v1329_v59, %v469_v51 }
0x14cb   : > { %2653 = vtanh.f32 %v1331_v60 }
0x14d5   : > { %v2654_v5 = vpop.eup %2653 }
0x14d6   : > { %1335 = vrot.lane.b32.xlu0 %v2654_v5, %s2718_s14 }
0x1548   : > { %v1336_v11 = vpop.permute.xlu0 %1335 }
0x1549   : > { %v1338_v13 = vmul.f32 %v1336_v11, %v1333_v9 }
0x154b   : > { %v1340_v14 = vadd.f32 %v1339_v12, %v1338_v13 }
0x154d   : > { %1342 = vrot.lane.b32.xlu1 %v1340_v14, %s2718_s14 }
0x15bf   : > { %v1343_v24 = vpop.permute.xlu1 %1342 }
0x15c0   : > { %1345 = vst.msk [vmem:[%s2822_s17 + $0x38] sm:$0xff] %vm318_vm1, %v1343_v24  ;;  %2490 = vmatmul.mubr.msk.f32.vlgmr.msra.gmra.mrb[16].mxu0 %vm318_vm1, %v1343_v24 }
0x15c1   : > { %2577 = vmatpush3.bf16.msra.mxu0 %v2779_v8  ;;  %2503 = vmatprep.mubr.msk.f32.mxu0 %vm2714_vm0, %v2715_v1 }
0x15c2   : > { %2581 = vmatprep.subr.bf16.mxu0 %v2713_v0 }
0x1693   : > { %v1414_v25 = vpop.f32.mrb[16].mxu0 }
0x1694   : > { %v1415_v26 = vadd.f32 %v2800_v10, %v1414_v25  ;;  %v2491_v27 = vpop.f32.mrb[17].mxu0 }
0x1696   : > { %1426 = vrot.lane.b32.xlu0 %v1415_v26, %s2716_s9  ;;  %v1418_v29 = vadd.f32 %v1415_v26, %v474_v28 }
0x1698   : > { %v2314_v30 = vmul.f32 -1.442695, %v1418_v29 }
0x169a   : > { %2655 = vpow2.f32 %v2314_v30 }
0x16a4   : > { %v2656_v31 = vpop.eup %2655 }
0x16a5   : > { %v1422_v32 = vadd.f32 1.0, %v2656_v31 }
0x16a7   : > { %2657 = vrcp.f32 %v1422_v32 }
0x16b1   : > { %v2658_v33 = vpop.eup %2657 }
0x16b2   : > { %v1436_v39 = vsub.f32 1.0, %v2658_v33  ;;  %v1442_v41 = vmul.f32 %v2658_v33, %v1340_v14 }
0x1708   : > { %v1427_v34 = vpop.permute.xlu0 %1426 }
0x1709   : > { %v1429_v35 = vmul.f32 %v2658_v33, %v1427_v34  ;;  %v489_v34 = vadd.f32 %v2945_v18, %v2811_v16 }
0x170b   : > { %1431 = vrot.lane.b32.xlu1 %v1429_v35, %s2717_s13 }
0x177d   : > { %v1432_v36 = vpop.permute.xlu1 %1431 }
0x177e   : > { %v1434_v37 = vadd.f32 %v1432_v36, %v474_v28 }
0x1780   : > { %2659 = vtanh.f32 %v1434_v37 }
0x178a   : > { %v2660_v38 = vpop.eup %2659 }
0x178b   : > { %1438 = vrot.lane.b32.xlu0 %v2660_v38, %s2718_s14 }
0x17fd   : > { %v1439_v40 = vpop.permute.xlu0 %1438 }
0x17fe   : > { %v1441_v42 = vmul.f32 %v1439_v40, %v1436_v39 }
0x1800   : > { %v1443_v43 = vadd.f32 %v1442_v41, %v1441_v42 }
0x1802   : > { %1445 = vrot.lane.b32.xlu1 %v1443_v43, %s2718_s14 }
0x1874   : > { %v1446_v44 = vpop.permute.xlu1 %1445 }
0x1875   : > { %1448 = vst.msk [vmem:[%s2822_s17 + $0x40] sm:$0xff] %vm318_vm1, %v1446_v44  ;;  %2497 = vmatmul.mubr.msk.f32.vlgmr.msra.gmra.mrb[16].mxu1 %vm318_vm1, %v1446_v44 }
0x1876   : > { %2580 = vmatpush3.bf16.msra.mxu1 %v2779_v8  ;;  %2510 = vmatprep.mubr.msk.f32.mxu1 %vm2714_vm0, %v2715_v1 }
0x1877   : > { %2584 = vmatprep.subr.bf16.mxu1 %v2713_v0 }
0x1948   : > { %v1517_v45 = vpop.f32.mrb[16].mxu1 }
0x1949   : > { %v1518_v46 = vadd.f32 %v2800_v10, %v1517_v45  ;;  %v2498_v47 = vpop.f32.mrb[17].mxu1 }
0x194b   : > { %1529 = vrot.lane.b32.xlu0 %v1518_v46, %s2716_s9  ;;  %v1521_v49 = vadd.f32 %v1518_v46, %v479_v48 }
0x194d   : > { %v2316_v50 = vmul.f32 -1.442695, %v1521_v49 }
0x194f   : > { %2661 = vpow2.f32 %v2316_v50 }
0x1959   : > { %v2662_v51 = vpop.eup %2661 }
0x195a   : > { %v1525_v52 = vadd.f32 1.0, %v2662_v51 }
0x195c   : > { %2663 = vrcp.f32 %v1525_v52  ;;  %v494_v52 = vadd.f32 %v2811_v16, %v2951_v21 }
0x1966   : > { %v2664_v53 = vpop.eup %2663 }
0x1967   : > { %v1539_v59 = vsub.f32 1.0, %v2664_v53  ;;  %v1545_v61 = vmul.f32 %v2664_v53, %v1443_v43 }
0x19bd   : > { %v1530_v54 = vpop.permute.xlu0 %1529 }
0x19be   : > { %v1532_v55 = vmul.f32 %v2664_v53, %v1530_v54 }
0x19c0   : > { %1534 = vrot.lane.b32.xlu1 %v1532_v55, %s2717_s13 }
0x1a32   : > { %v1535_v56 = vpop.permute.xlu1 %1534 }
0x1a33   : > { %v1537_v57 = vadd.f32 %v1535_v56, %v479_v48 }
0x1a35   : > { %2665 = vtanh.f32 %v1537_v57 }
0x1a3f   : > { %v2666_v58 = vpop.eup %2665 }
0x1a40   : > { %1541 = vrot.lane.b32.xlu0 %v2666_v58, %s2718_s14 }
0x1ab2   : > { %v1542_v60 = vpop.permute.xlu0 %1541 }
0x1ab3   : > { %v1544_v62 = vmul.f32 %v1542_v60, %v1539_v59 }
0x1ab5   : > { %v1546_v63 = vadd.f32 %v1545_v61, %v1544_v62 }
0x1ab7   : > { %1548 = vrot.lane.b32.xlu1 %v1546_v63, %s2718_s14 }
0x1b29   : > { %v1549_v2 = vpop.permute.xlu1 %1548 }
0x1b2a   : > { %1551 = vst.msk [vmem:[%s2822_s17 + $0x48] sm:$0xff] %vm318_vm1, %v1549_v2  ;;  %2504 = vmatmul.mubr.msk.f32.vlgmr.msra.gmra.mrb[18].mxu0 %vm318_vm1, %v1549_v2 }
0x1b2b   : > { %2583 = vmatpush3.bf16.msra.mxu0 %v2779_v8  ;;  %2517 = vmatprep.mubr.msk.f32.mxu0 %vm2714_vm0, %v2715_v1 }
0x1b2c   : > { %2587 = vmatprep.subr.bf16.mxu0 %v2713_v0 }
0x1bfd   : > { %v1620_v3 = vpop.f32.mrb[18].mxu0 }
0x1bfe   : > { %v1621_v4 = vadd.f32 %v2800_v10, %v1620_v3  ;;  %v2505_v5 = vpop.f32.mrb[19].mxu0 }
0x1c00   : > { %1632 = vrot.lane.b32.xlu0 %v1621_v4, %s2716_s9  ;;  %v1624_v7 = vadd.f32 %v1621_v4, %v484_v6 }
0x1c02   : > { %v2318_v9 = vmul.f32 -1.442695, %v1624_v7 }
0x1c04   : > { %2667 = vpow2.f32 %v2318_v9 }
0x1c0e   : > { %v2668_v11 = vpop.eup %2667 }
0x1c0f   : > { %v1628_v12 = vadd.f32 1.0, %v2668_v11  ;;  %v499_v11 = vadd.f32 %v2949_v20, %v2811_v16 }
0x1c11   : > { %2669 = vrcp.f32 %v1628_v12 }
0x1c1b   : > { %v2670_v13 = vpop.eup %2669 }
0x1c1c   : > { %v1642_v26 = vsub.f32 1.0, %v2670_v13  ;;  %v1648_v27 = vmul.f32 %v2670_v13, %v1546_v63 }
0x1c72   : > { %v1633_v14 = vpop.permute.xlu0 %1632 }
0x1c73   : > { %v1635_v15 = vmul.f32 %v2670_v13, %v1633_v14 }
0x1c75   : > { %1637 = vrot.lane.b32.xlu1 %v1635_v15, %s2717_s13 }
0x1ce7   : > { %v1638_v17 = vpop.permute.xlu1 %1637 }
0x1ce8   : > { %v1640_v24 = vadd.f32 %v1638_v17, %v484_v6 }
0x1cea   : > { %2671 = vtanh.f32 %v1640_v24 }
0x1cf4   : > { %v2672_v25 = vpop.eup %2671 }
0x1cf5   : > { %1644 = vrot.lane.b32.xlu0 %v2672_v25, %s2718_s14 }
0x1d67   : > { %v1645_v19 = vpop.permute.xlu0 %1644 }
0x1d68   : > { %v1647_v28 = vmul.f32 %v1645_v19, %v1642_v26 }
0x1d6a   : > { %v1649_v29 = vadd.f32 %v1648_v27, %v1647_v28 }
0x1d6c   : > { %1651 = vrot.lane.b32.xlu1 %v1649_v29, %s2718_s14 }
0x1dde   : > { %v1652_v30 = vpop.permute.xlu1 %1651 }
0x1ddf   : > { %1654 = vst.msk [vmem:[%s2822_s17 + $0x50] sm:$0xff] %vm318_vm1, %v1652_v30  ;;  %2511 = vmatmul.mubr.msk.f32.vlgmr.msra.gmra.mrb[18].mxu1 %vm318_vm1, %v1652_v30 }
0x1de0   : > { %2586 = vmatpush3.bf16.msra.mxu1 %v2779_v8  ;;  %2524 = vmatprep.mubr.msk.f32.mxu1 %vm2714_vm0, %v2715_v1 }
0x1de1   : > { %2590 = vmatprep.subr.bf16.mxu1 %v2713_v0 }
0x1eb2   : > { %v1723_v31 = vpop.f32.mrb[18].mxu1 }
0x1eb3   : > { %v1724_v32 = vadd.f32 %v2800_v10, %v1723_v31  ;;  %v2512_v33 = vpop.f32.mrb[19].mxu1 }
0x1eb5   : > { %1735 = vrot.lane.b32.xlu0 %v1724_v32, %s2716_s9  ;;  %v1727_v35 = vadd.f32 %v1724_v32, %v489_v34 }
0x1eb7   : > { %v2320_v36 = vmul.f32 -1.442695, %v1727_v35 }
0x1eb9   : > { %2673 = vpow2.f32 %v2320_v36 }
0x1ec3   : > { %v2674_v37 = vpop.eup %2673 }
0x1ec4   : > { %v1731_v38 = vadd.f32 1.0, %v2674_v37 }
0x1ec6   : > { %2675 = vrcp.f32 %v1731_v38 }
0x1ed0   : > { %v2676_v39 = vpop.eup %2675 }
0x1ed1   : > { %v1745_v44 = vsub.f32 1.0, %v2676_v39  ;;  %v1751_v45 = vmul.f32 %v2676_v39, %v1649_v29 }
0x1f27   : > { %v1736_v40 = vpop.permute.xlu0 %1735 }
0x1f28   : > { %v1738_v41 = vmul.f32 %v2676_v39, %v1736_v40 }
0x1f2a   : > { %1740 = vrot.lane.b32.xlu1 %v1738_v41, %s2717_s13 }
0x1f9c   : > { %v1741_v0 = vpop.permute.xlu1 %1740 }
0x1f9d   : > { %v1743_v42 = vadd.f32 %v1741_v0, %v489_v34  ;;  %v504_v34 = vadd.f32 %v2811_v16, %v2955_v23 }
0x1f9f   : > { %2677 = vtanh.f32 %v1743_v42 }
0x1fa9   : > { %v2678_v43 = vpop.eup %2677 }
0x1faa   : > { %1747 = vrot.lane.b32.xlu0 %v2678_v43, %s2718_s14 }
0x201c   : > { %v1748_v18 = vpop.permute.xlu0 %1747 }
0x201d   : > { %v1750_v46 = vmul.f32 %v1748_v18, %v1745_v44 }
0x201f   : > { %v1752_v47 = vadd.f32 %v1751_v45, %v1750_v46 }
0x2021   : > { %1754 = vrot.lane.b32.xlu1 %v1752_v47, %s2718_s14 }
0x2093   : > { %v1755_v48 = vpop.permute.xlu1 %1754 }
0x2094   : > { %1757 = vst.msk [vmem:[%s2822_s17 + $0x58] sm:$0xff] %vm318_vm1, %v1755_v48  ;;  %2518 = vmatmul.mubr.msk.f32.vlgmr.msra.gmra.mrb[20].mxu0 %vm318_vm1, %v1755_v48 }
0x2095   : > { %2589 = vmatpush3.bf16.msra.mxu0 %v2779_v8  ;;  %2531 = vmatprep.mubr.msk.f32.mxu0 %vm2714_vm0, %v2715_v1 }
0x2167   : > { %v1826_v49 = vpop.f32.mrb[20].mxu0 }
0x2168   : > { %v1827_v50 = vadd.f32 %v2800_v10, %v1826_v49  ;;  %v2519_v51 = vpop.f32.mrb[21].mxu0 }
0x216a   : > { %1838 = vrot.lane.b32.xlu0 %v1827_v50, %s2716_s9  ;;  %v1830_v53 = vadd.f32 %v1827_v50, %v494_v52  ;;  %v2704_v50 = vld [vmem:[%s2808_s12] ss:$0 sm:$0xff] }
0x216b   : > { %v509_v51 = vadd.f32 %v2704_v50, %v2953_v22 }
0x216c   : > { %v2322_v54 = vmul.f32 -1.442695, %v1830_v53 }
0x216e   : > { %2679 = vpow2.f32 %v2322_v54 }
0x2178   : > { %v2680_v55 = vpop.eup %2679 }
0x2179   : > { %v1834_v56 = vadd.f32 1.0, %v2680_v55 }
0x217b   : > { %2681 = vrcp.f32 %v1834_v56 }
0x2185   : > { %v2682_v57 = vpop.eup %2681 }
0x2186   : > { %v1848_v63 = vsub.f32 1.0, %v2682_v57  ;;  %v1854_v2 = vmul.f32 %v2682_v57, %v1752_v47  ;;  %v2703_v47 = vld [vmem:[%s2797_s8] ss:$0 sm:$0xff] }
0x21dc   : > { %v1839_v58 = vpop.permute.xlu0 %1838 }
0x21dd   : > { %v1841_v59 = vmul.f32 %v2682_v57, %v1839_v58 }
0x21df   : > { %1843 = vrot.lane.b32.xlu1 %v1841_v59, %s2717_s13 }
0x2251   : > { %v1844_v60 = vpop.permute.xlu1 %1843 }
0x2252   : > { %v1846_v61 = vadd.f32 %v1844_v60, %v494_v52 }
0x2254   : > { %2683 = vtanh.f32 %v1846_v61 }
0x225e   : > { %v2684_v62 = vpop.eup %2683 }
0x225f   : > { %1850 = vrot.lane.b32.xlu0 %v2684_v62, %s2718_s14 }
0x22d1   : > { %v1851_v21 = vpop.permute.xlu0 %1850 }
0x22d2   : > { %v1853_v3 = vmul.f32 %v1851_v21, %v1848_v63 }
0x22d4   : > { %v1855_v4 = vadd.f32 %v1854_v2, %v1853_v3 }
0x22d6   : > { %1857 = vrot.lane.b32.xlu1 %v1855_v4, %s2718_s14 }
0x2348   : > { %v1858_v5 = vpop.permute.xlu1 %1857 }
0x2349   : > { %1860 = vst.msk [vmem:[%s2822_s17 + $0x60] sm:$0xff] %vm318_vm1, %v1858_v5  ;;  %2525 = vmatmul.mubr.msk.f32.vlgmr.msra.gmra.mrb[20].mxu1 %vm318_vm1, %v1858_v5 }
0x234a   : > { %2592 = vmatpush3.bf16.msra.mxu1 %v2779_v8  ;;  %2538 = vmatprep.mubr.msk.f32.mxu1 %vm2714_vm0, %v2715_v1 }
0x241c   : > { %v1929_v6 = vpop.f32.mrb[20].mxu1 }
0x241d   : > { %v1930_v7 = vadd.f32 %v2800_v10, %v1929_v6  ;;  %v2526_v9 = vpop.f32.mrb[21].mxu1 }
0x241f   : > { %1941 = vrot.lane.b32.xlu0 %v1930_v7, %s2716_s9  ;;  %v1933_v12 = vadd.f32 %v1930_v7, %v499_v11 }
0x2421   : > { %v2324_v13 = vmul.f32 -1.442695, %v1933_v12 }
0x2423   : > { %2685 = vpow2.f32 %v2324_v13 }
0x242d   : > { %v2686_v14 = vpop.eup %2685 }
0x242e   : > { %v1937_v15 = vadd.f32 1.0, %v2686_v14 }
0x2430   : > { %2687 = vrcp.f32 %v1937_v15 }
0x243a   : > { %v2688_v17 = vpop.eup %2687 }
0x243b   : > { %v1951_v19 = vsub.f32 1.0, %v2688_v17  ;;  %v1957_v27 = vmul.f32 %v2688_v17, %v1855_v4 }
0x2491   : > { %v1942_v8 = vpop.permute.xlu0 %1941 }
0x2492   : > { %v1944_v24 = vmul.f32 %v2688_v17, %v1942_v8 }
0x2494   : > { %1946 = vrot.lane.b32.xlu1 %v1944_v24, %s2717_s13 }
0x2506   : > { %v1947_v1 = vpop.permute.xlu1 %1946 }
0x2507   : > { %v1949_v25 = vadd.f32 %v1947_v1, %v499_v11 }
0x2509   : > { %2689 = vtanh.f32 %v1949_v25 }
0x2513   : > { %v2690_v26 = vpop.eup %2689 }
0x2514   : > { %1953 = vrot.lane.b32.xlu0 %v2690_v26, %s2718_s14 }
0x2586   : > { %v1954_v20 = vpop.permute.xlu0 %1953 }
0x2587   : > { %v1956_v28 = vmul.f32 %v1954_v20, %v1951_v19 }
0x2589   : > { %v1958_v29 = vadd.f32 %v1957_v27, %v1956_v28 }
0x258b   : > { %1960 = vrot.lane.b32.xlu1 %v1958_v29, %s2718_s14 }
0x25fd   : > { %v1961_v30 = vpop.permute.xlu1 %1960 }
0x25fe   : > { %1963 = vst.msk [vmem:[%s2822_s17 + $0x68] sm:$0xff] %vm318_vm1, %v1961_v30  ;;  %2532 = vmatmul.mubr.msk.f32.vlgmr.msra.gmra.mrb[22].mxu0 %vm318_vm1, %v1961_v30 }
0x26d1   : > { %v2032_v31 = vpop.f32.mrb[22].mxu0 }
0x26d2   : > { %v2033_v32 = vadd.f32 %v2800_v10, %v2032_v31  ;;  %v2533_v33 = vpop.f32.mrb[23].mxu0 }
0x26d4   : > { %2044 = vrot.lane.b32.xlu0 %v2033_v32, %s2716_s9  ;;  %v2036_v35 = vadd.f32 %v2033_v32, %v504_v34 }
0x26d6   : > { %v2326_v36 = vmul.f32 -1.442695, %v2036_v35 }
0x26d8   : > { %2691 = vpow2.f32 %v2326_v36 }
0x26e2   : > { %v2692_v37 = vpop.eup %2691 }
0x26e3   : > { %v2040_v38 = vadd.f32 1.0, %v2692_v37 }
0x26e5   : > { %2693 = vrcp.f32 %v2040_v38 }
0x26ef   : > { %v2694_v39 = vpop.eup %2693 }
0x26f0   : > { %v2054_v16 = vsub.f32 1.0, %v2694_v39  ;;  %v2060_v43 = vmul.f32 %v2694_v39, %v1958_v29 }
0x2746   : > { %v2045_v40 = vpop.permute.xlu0 %2044 }
0x2747   : > { %v2047_v41 = vmul.f32 %v2694_v39, %v2045_v40 }
0x2749   : > { %2049 = vrot.lane.b32.xlu1 %v2047_v41, %s2717_s13 }
0x27bb   : > { %v2050_v10 = vpop.permute.xlu1 %2049 }
0x27bc   : > { %v2052_v0 = vadd.f32 %v2050_v10, %v504_v34 }
0x27be   : > { %2695 = vtanh.f32 %v2052_v0 }
0x27c8   : > { %v2696_v42 = vpop.eup %2695 }
0x27c9   : > { %2056 = vrot.lane.b32.xlu0 %v2696_v42, %s2718_s14 }
0x283b   : > { %v2057_v23 = vpop.permute.xlu0 %2056 }
0x283c   : > { %v2059_v44 = vmul.f32 %v2057_v23, %v2054_v16 }
0x283e   : > { %v2061_v18 = vadd.f32 %v2060_v43, %v2059_v44 }
0x2840   : > { %2063 = vrot.lane.b32.xlu1 %v2061_v18, %s2718_s14 }
0x28b2   : > { %v2064_v45 = vpop.permute.xlu1 %2063 }
0x28b3   : > { %2066 = vst.msk [vmem:[%s2822_s17 + $0x70] sm:$0xff] %vm318_vm1, %v2064_v45  ;;  %2539 = vmatmul.mubr.msk.f32.vlgmr.msra.gmra.mrb[22].mxu1 %vm318_vm1, %v2064_v45 }
0x2986   : > { %v2135_v46 = vpop.f32.mrb[22].mxu1 }
0x2987   : > { %v2136_v48 = vadd.f32 %v2703_v47, %v2135_v46  ;;  %v2540_v49 = vpop.f32.mrb[23].mxu1 }
0x2989   : > { %2147 = vrot.lane.b32.xlu0 %v2136_v48, %s2716_s9  ;;  %v2139_v52 = vadd.f32 %v2136_v48, %v509_v51 }
0x298b   : > { %v2328_v53 = vmul.f32 -1.442695, %v2139_v52 }
0x298d   : > { %2697 = vpow2.f32 %v2328_v53 }
0x2997   : > { %v2698_v54 = vpop.eup %2697 }
0x2998   : > { %v2143_v55 = vadd.f32 1.0, %v2698_v54 }
0x299a   : > { %2699 = vrcp.f32 %v2143_v55 }
0x29a4   : > { %v2700_v56 = vpop.eup %2699 }
0x29a5   : > { %v2157_v62 = vsub.f32 1.0, %v2700_v56  ;;  %v2163_v63 = vmul.f32 %v2700_v56, %v2061_v18 }
0x29fb   : > { %v2148_v57 = vpop.permute.xlu0 %2147 }
0x29fc   : > { %v2150_v58 = vmul.f32 %v2700_v56, %v2148_v57 }
0x29fe   : > { %2152 = vrot.lane.b32.xlu1 %v2150_v58, %s2717_s13 }
0x2a70   : > { %v2153_v59 = vpop.permute.xlu1 %2152 }
0x2a71   : > { %v2155_v60 = vadd.f32 %v2153_v59, %v509_v51 }
0x2a73   : > { %2701 = vtanh.f32 %v2155_v60 }
0x2a7d   : > { %v2702_v61 = vpop.eup %2701 }
0x2a7e   : > { %2159 = vrot.lane.b32.xlu0 %v2702_v61, %s2718_s14 }
0x2af0   : > { %v2160_v22 = vpop.permute.xlu0 %2159 }
0x2af1   : > { %v2162_v21 = vmul.f32 %v2160_v22, %v2157_v62 }
0x2af3   : > { %v2164_v2 = vadd.f32 %v2163_v63, %v2162_v21 }
0x2af5   : > { %2166 = vrot.lane.b32.xlu1 %v2164_v2, %s2718_s14 }
0x2b67   : > { %v2167_v3 = vpop.permute.xlu1 %2166 }
0x2b68   : > { %2169 = vst.msk [vmem:[%s2822_s17 + $0x78] sm:$0xff] %vm318_vm1, %v2167_v3 }
0x2b69 PF: > { %s15_s18 = sadd.s32 1, %s2711_s18  }
0x2b6a   : > { %p12_p4 = scmp.ge.s32.totalorder %s15_s18, 4  }
0x2b6c   :  { %14 = sbr.rel (!%p12_p4) target bundleno = 1 (0x1), region = 82 }

// kernel: phn_forward.8
= control target key start
LH: loop header
LB: loop body
LE: loop exit
PB: predicated region body
PF: predicated region fallthrough
CT: control target
= control target key end

     0   :  { %vm66_vm0 = vcmask 261120   ;;  %v91_v36 = vlaneseq  ;;  %vm117_vm1 = vcmask 1041409   ;;  %vm119_vm2 = vcmask 1042434   ;;  %s2211_s0 = inlined_call_operand.vmem [shape: f32[6,8,32], index: 0, kind: input, shape index: {}]   ;;  %s2212_s6 = inlined_call_operand.vmem [shape: f32[5,1,32], index: 6, kind: input, shape index: {}]   ;;  %s2213_s1 = inlined_call_operand.vmem [shape: f32[2,8,32], index: 1, kind: input, shape index: {}]   ;;  %s2214_s2 = inlined_call_operand.vmem [shape: f32[2,16,32], index: 2, kind: input, shape index: {}]   ;;  %s2215_s7 = inlined_call_operand.vmem [shape: f32[5,32,16], index: 7, kind: input, shape index: {}]   ;;  %s2216_s5 = inlined_call_operand.vmem [shape: f32[32,32], index: 5, kind: input, shape index: {}]   ;;  %s2217_s4 = inlined_call_operand.vmem [shape: f32[16,32], index: 4, kind: input, shape index: {}]   ;;  %s2218_s3 = inlined_call_operand.vmem [shape: f32[48,32], index: 3, kind: input, shape index: {}]   ;;  %s2219_s8 = inlined_call_operand.vmem [shape: f32[5,1,16], index: 8, kind: input, shape index: {}]   ;;  %s2220_s12 = inlined_call_operand.vmem [shape: f32[2,16], index: 12, kind: output, shape index: {3}]   ;;  %s2221_s10 = inlined_call_operand.vmem [shape: f32[2,16], index: 10, kind: output, shape index: {1}]   ;;  %s2222_s11 = inlined_call_operand.vmem [shape: f32[6,16], index: 11, kind: output, shape index: {2}]   ;;  %s2223_s13 = inlined_call_operand.vmem [shape: f32[32,16], index: 13, kind: output, shape index: {4}]   ;;  %s2224_s15 = inlined_call_operand.vmem [shape: f32[48,16], index: 15, kind: output, shape index: {6}]   ;;  %s2225_s14 = inlined_call_operand.vmem [shape: f32[16,16], index: 14, kind: output, shape index: {5}]   ;;  %s2226_s16 = inlined_call_operand.vmem [shape: f32[2,8], index: 16, kind: output, shape index: {7}]   ;;  %s2227_s9 = inlined_call_operand.vmem [shape: f32[6,32], index: 9, kind: output, shape index: {0}]   ;;  %s2228_s17 = inlined_call_operand.vmem [shape: f32[6,8], index: 17, kind: output, shape index: {8}]  }
   0x1   :  { %2231 = sst [smem:[#allocation2_spill]] %s2211_s0  ;;  %v1710_v20 = vld [vmem:[%s2213_s1] sm:$0xff]  ;;  %v1728_v27 = vld [vmem:[%s2214_s2 + $0x10] sm:$0xff]  ;;  %vm121_vm3 = vcmask 1043459   ;;  %vm123_vm4 = vcmask 1044484   ;;  %v1771_v52 = vld [vmem:[%s2213_s1 + $0x8] sm:$0xff] }
   0x2   :  { %2232 = sst [smem:[#allocation3_spill]] %s2212_s6  ;;  %s2233_s26 = sld [smem:[#allocation2_spill]]  ;;  %v1721_v24 = vld [vmem:[%s2214_s2] sm:$0xff]  ;;  %v92_v37 = vand.u32 127, %v91_v36  ;;  %v1741_v38 = vshrl.u32 %v91_v36, 7  ;;  %vm125_vm5 = vcmask 1045509  }
   0x3   :  { %s2234_s29 = sld [smem:[#allocation3_spill]]  ;;  %vm128_vm6 = vcmask 62464   ;;  %v1785_v59 = vld [vmem:[%s2214_s2 + $0x8] sm:$0xff]  ;;  %v1793_v63 = vld [vmem:[%s2214_s2 + $0x18] sm:$0xff]  ;;  %vm1565_vm7 = vmmov 0   ;;  %vm508_vm8 = vcmask 123904  }
   0x4   :  { %v1748_v41 = vsub.s32 %v92_v37, %v1741_v38  ;;  %vm790_vm10 = vcmask 128000   ;;  %vm918_vm12 = vcmask 130048  }
   0x8   :  { %v1660_v0 = vld [vmem:[%s2233_s26] sm:$0xff]  ;;  %v1668_v2 = vld [vmem:[%s2233_s26 + $0x10] sm:$0xff]  ;;  %v1675_v5 = vld [vmem:[%s2233_s26 + $0x8] sm:$0xff] }
   0x9   :  { %v1318_v1 = vld [vmem:[%s2234_s29] ss:$0 sm:$0xff]  ;;  %v1680_v6 = vld [vmem:[%s2233_s26 + $0x18] sm:$0xff]  ;;  %v1692_v10 = vld [vmem:[%s2233_s26 + $0x28] sm:$0xff] }
   0xa   :  { %v60_v3 = vmul.f32 %v1318_v1, %v1660_v0  ;;  %v62_v4 = vmul.f32 %v1318_v1, %v1668_v2  ;;  %v61_v7 = vmul.f32 %v1318_v1, %v1675_v5  ;;  %v63_v8 = vmul.f32 %v1318_v1, %v1680_v6  ;;  %v1687_v9 = vld [vmem:[%s2233_s26 + $0x20] sm:$0xff] }
   0xb   :  { %v64_v15 = vmul.f32 %v1318_v1, %v1687_v9  ;;  %v65_v16 = vmul.f32 %v1318_v1, %v1692_v10  ;;  %v1705_v19 = vld [vmem:[%s2234_s29 + $0x2] ss:$0 sm:$0xff]  ;;  %v1320_v23 = vld [vmem:[%s2234_s29 + $0x1] ss:$0 sm:$0xff] }
   0xc   :  { %v67_v11 = vsel %vm66_vm0, %v60_v3, 0.0  ;;  %v73_v12 = vsel %vm66_vm0, %v62_v4, 0.0  ;;  %v70_v13 = vsel %vm66_vm0, %v61_v7, 0.0  ;;  %v76_v14 = vsel %vm66_vm0, %v63_v8, 0.0 }
   0xd   :  { %68 = vadd.xlane.f32.xlu0 %v67_v11  ;;  %74 = vadd.xlane.f32.xlu1 %v73_v12  ;;  %v79_v17 = vsel %vm66_vm0, %v64_v15, 0.0  ;;  %v82_v18 = vsel %vm66_vm0, %v65_v16, 0.0  ;;  %v518_v21 = vmul.f32 %v1705_v19, %v1710_v20  ;;  %v381_v25 = vmul.f32 %v1320_v23, %v1721_v24 }
   0xe   :  { %v383_v28 = vmul.f32 %v1320_v23, %v1728_v27  ;;  %v542_v30 = vmul.f32 %v1705_v19, %v1660_v0  ;;  %v544_v32 = vmul.f32 %v1705_v19, %v1668_v2  ;;  %v546_v34 = vmul.f32 %v1705_v19, %v1687_v9 }
   0xf   :  { %v520_v22 = vsel %vm66_vm0, %v518_v21, 0.0  ;;  %v385_v26 = vsel %vm66_vm0, %v381_v25, 0.0  ;;  %v519_v57 = vmul.f32 %v1705_v19, %v1771_v52  ;;  %v382_v62 = vmul.f32 %v1320_v23, %v1785_v59  ;;  %v420_v25 = vld [vmem:[%s2215_s7 + $0x8] sm:$0xff] }
  0x10   :  { %v391_v29 = vsel %vm66_vm0, %v383_v28, 0.0  ;;  %v548_v31 = vsel %vm66_vm0, %v542_v30, 0.0  ;;  %v554_v33 = vsel %vm66_vm0, %v544_v32, 0.0  ;;  %v560_v35 = vsel %vm66_vm0, %v546_v34, 0.0  ;;  %v421_v30 = vld [vmem:[%s2215_s7 + $0x10] sm:$0xff] }
  0x11   :  { %71 = vadd.xlane.f32.xlu0 %v70_v13  ;;  %77 = vadd.xlane.f32.xlu1 %v76_v14  ;;  %v523_v61 = vsel %vm66_vm0, %v519_v57, 0.0  ;;  %v388_v1 = vsel %vm66_vm0, %v382_v62, 0.0  ;;  %v384_v3 = vmul.f32 %v1320_v23, %v1793_v63  ;;  %v543_v7 = vmul.f32 %v1705_v19, %v1675_v5  ;;  %v419_v23 = vld [vmem:[%s2215_s7] sm:$0xff] }
  0x12   :  { %v545_v11 = vmul.f32 %v1705_v19, %v1680_v6  ;;  %v547_v13 = vmul.f32 %v1705_v19, %v1692_v10  ;;  %v1563_v15 = vmov 0   ;;  %v1564_v16 = vmov 0.0|0.0   ;;  %v1327_v19 = vld [vmem:[%s2215_s7 + $0x30] sm:$0xff] }
  0x13   :  { %v394_v4 = vsel %vm66_vm0, %v384_v3, 0.0  ;;  %v551_v8 = vsel %vm66_vm0, %v543_v7, 0.0  ;;  %1532 = vset.pattern.permute.xlu0 %v1563_v15  ;;  %1531 = vset.pattern.permute.xlu1 %v1563_v15  ;;  %v1486_v28 = vpack.c.bf16 %v420_v25, %v419_v23 }
  0x14   :  { %v557_v12 = vsel %vm66_vm0, %v545_v11, 0.0  ;;  %v563_v14 = vsel %vm66_vm0, %v547_v13, 0.0  ;;  %1491 = vmatprep.subr.bf16.mxu1 %v1564_v16  ;;  %1485 = vmatprep.subr.bf16.mxu0 %v1564_v16 }
  0x15   :  { %80 = vadd.xlane.f32.xlu0 %v79_v17  ;;  %83 = vadd.xlane.f32.xlu1 %v82_v18  ;;  %v1325_v17 = vld [vmem:[%s2215_s7 + $0x20] sm:$0xff]  ;;  %v1326_v18 = vld [vmem:[%s2215_s7 + $0x28] sm:$0xff] }
  0x16   :  { %v1818_v21 = vpack.c.bf16 %v1326_v18, %v1325_v17  ;;  %1487 = vmatpush3.bf16.msra.mxu0 %v1486_v28 }
  0x17   :  { %1488 = vmatprep.subr.bf16.mxu0 %v1564_v16 }
  0x18   :  { %1493 = vmatpush3.bf16.msra.mxu1 %v1818_v21 }
  0x19   :  { %521 = vadd.xlane.f32.xlu1 %v520_v22  ;;  %v1328_v22 = vld [vmem:[%s2215_s7 + $0x38] sm:$0xff]  ;;  %1494 = vmatprep.subr.bf16.mxu1 %v1564_v16 }
  0x1d   :  { %386 = vadd.xlane.f32.xlu1 %v385_v26  ;;  %v1566_v26 = vmov 0.0  }
  0x1e   :  { %1429 = vmatprep.mubr.msk.f32.mxu1 %vm1565_vm7, %v1566_v26  ;;  %1418 = vmatprep.mubr.msk.f32.mxu0 %vm1565_vm7, %v1566_v26 }
  0x21   :  { %392 = vadd.xlane.f32.xlu1 %v391_v29  ;;  %v1834_v29 = vpack.c.bf16 %v1328_v22, %v1327_v19 }
  0x23   :  { %1496 = vmatpush3.bf16.msra.mxu1 %v1834_v29 }
  0x25   :  { %549 = vadd.xlane.f32.xlu1 %v548_v31  ;;  %v422_v31 = vld [vmem:[%s2215_s7 + $0x18] sm:$0xff] }
  0x26   :  { %v1489_v32 = vpack.c.bf16 %v422_v31, %v421_v30 }
  0x28   :  { %1490 = vmatpush3.bf16.msra.mxu0 %v1489_v32 }
  0x29   :  { %555 = vadd.xlane.f32.xlu1 %v554_v33  ;;  %1497 = vmatprep.subr.bf16.mxu0 %v1564_v16 }
  0x2d   :  { %561 = vadd.xlane.f32.xlu1 %v560_v35 }
  0x9a   :  { %v1743_v39 = vpop.xlane.xlu0 %68  ;;  %v1745_v40 = vpop.xlane.xlu1 %74 }
  0x9b   :  { %v96_v44 = vrot.slane %v1743_v39, %v1748_v41  ;;  %v104_v47 = vrot.slane %v1745_v40, %v1748_v41 }
  0x9e   :  { %v1750_v42 = vpop.xlane.xlu0 %71  ;;  %v1752_v43 = vpop.xlane.xlu1 %77 }
  0x9f   :  { %v100_v45 = vrot.slane %v1750_v42, %v1748_v41  ;;  %v108_v46 = vrot.slane %v1752_v43, %v1748_v41 }
  0xa1   :  { %v118_v48 = vsel %vm117_vm1, %v100_v45, %v96_v44 }
  0xa2   :  { %v1763_v49 = vpop.xlane.xlu0 %80  ;;  %v1765_v50 = vpop.xlane.xlu1 %83  ;;  %v120_v51 = vsel %vm119_vm2, %v104_v47, %v118_v48  ;;  %v139_v47 = vsub.s32 1, %v1741_v38  ;;  %v143_v48 = vsub.s32 2, %v1741_v38 }
  0xa3   :  { %v112_v53 = vrot.slane %v1763_v49, %v1748_v41  ;;  %v116_v54 = vrot.slane %v1765_v50, %v1748_v41  ;;  %v122_v55 = vsel %vm121_vm3, %v108_v46, %v120_v51  ;;  %v135_v46 = vsub.s32 0, %v1741_v38 }
  0xa5   :  { %v124_v56 = vsel %vm123_vm4, %v112_v53, %v122_v55 }
  0xa6   :  { %v126_v58 = vsel %vm125_vm5, %v116_v54, %v124_v56  ;;  %v522_v33 = vpop.xlane.xlu1 %521  ;;  %v147_v54 = vsub.s32 3, %v1741_v38 }
  0xa7   :  { %v129_v60 = vsel %vm128_vm6, %v126_v58, -inf  ;;  %v526_v36 = vmul.f32 %v522_v33, %v1710_v20 }
  0xa8   :  { %130 = vmax.xlane.f32.xlu0 %v129_v60 }
  0xa9   :  { %v528_v44 = vsel %vm66_vm0, %v526_v36, 0.0 }
  0xaa   :  { %v387_v34 = vpop.xlane.xlu1 %386  ;;  %v529_v45 = vrot.slane %v528_v44, 4 }
  0xab   :  { %v397_v19 = vmul.f32 %v387_v34, %v1721_v24 }
  0xac   :  { %524 = vadd.xlane.f32.xlu0 %v523_v61  ;;  %v530_v56 = vadd.f32 %v529_v45, %v528_v44  ;;  %v151_v61 = vsub.s32 4, %v1741_v38 }
  0xad   :  { %v401_v24 = vsel %vm66_vm0, %v397_v19, 0.0 }
  0xae   :  { %v393_v35 = vpop.xlane.xlu1 %392  ;;  %v531_v13 = vrot.slane %v530_v56, 2 }
  0xaf   :  { %v399_v34 = vmul.f32 %v393_v35, %v1728_v27 }
  0xb0   :  { %389 = vadd.xlane.f32.xlu0 %v388_v1  ;;  %v532_v30 = vadd.f32 %v531_v13, %v530_v56 }
  0xb1   :  { %v410_v27 = vsel %vm66_vm0, %v399_v34, 0.0 }
  0xb2   :  { %v550_v37 = vpop.xlane.xlu1 %549 }
  0xb3   :  { %v566_v53 = vmul.f32 %v550_v37, %v1660_v0 }
  0xb4   :  { %395 = vadd.xlane.f32.xlu0 %v394_v4 }
  0xb5   :  { %v572_v62 = vsel %vm66_vm0, %v566_v53, 0.0 }
  0xb6   :  { %v556_v51 = vpop.xlane.xlu1 %555  ;;  %v573_v23 = vrot.slane %v572_v62, 4 }
  0xb7   :  { %v568_v1 = vmul.f32 %v556_v51, %v1668_v2 }
  0xb8   :  { %552 = vadd.xlane.f32.xlu0 %v551_v8 }
  0xba   :  { %v562_v11 = vpop.xlane.xlu1 %561 }
  0xbc   :  { %558 = vadd.xlane.f32.xlu0 %v557_v12  ;;  %v155_v12 = vsub.s32 5, %v1741_v38 }
  0xc0   :  { %564 = vadd.xlane.f32.xlu0 %v563_v14 }
 0x135   :  { %v131_v55 = vpop.xlane.xlu0 %130 }
 0x136   :  { %v136_v57 = vrot.slane %v131_v55, %v135_v46  ;;  %v140_v58 = vrot.slane %v131_v55, %v139_v47  ;;  %v144_v60 = vrot.slane %v131_v55, %v143_v48  ;;  %v148_v3 = vrot.slane %v131_v55, %v147_v54 }
 0x137   :  { %v152_v22 = vrot.slane %v131_v55, %v151_v61  ;;  %v156_v37 = vrot.slane %v131_v55, %v155_v12 }
 0x138   :  { %v163_v4 = vsub.f32 %v1743_v39, %v136_v57  ;;  %v164_v7 = vsub.f32 %v1750_v42, %v140_v58  ;;  %v165_v8 = vsub.f32 %v1745_v40, %v144_v60  ;;  %v586_v39 = vsel %vm66_vm0, %v568_v1, 0.0 }
 0x139   :  { %v525_v14 = vpop.xlane.xlu0 %524  ;;  %v570_v42 = vmul.f32 %v562_v11, %v1687_v9  ;;  %v166_v40 = vsub.f32 %v1752_v43, %v148_v3  ;;  %v587_v36 = vrot.slane %v586_v39, 4  ;;  %v574_v43 = vadd.f32 %v573_v23, %v572_v62 }
 0x13a   :  { %v169_v15 = vmul.f32 1.442695, %v163_v4  ;;  %v171_v17 = vmul.f32 1.442695, %v164_v7  ;;  %v527_v18 = vmul.f32 %v525_v14, %v1771_v52  ;;  %v173_v25 = vmul.f32 1.442695, %v165_v8 }
 0x13b   :  { %v600_v45 = vsel %vm66_vm0, %v570_v42, 0.0  ;;  %v167_v51 = vsub.f32 %v1763_v49, %v152_v22  ;;  %v175_v53 = vmul.f32 1.442695, %v166_v40  ;;  %v533_v57 = vrot.slane %v532_v30, 1 }
 0x13c   :  { %1533 = vpow2.f32 %v169_v15  ;;  %v535_v28 = vsel %vm66_vm0, %v527_v18, 0.0  ;;  %v588_v1 = vadd.f32 %v587_v36, %v586_v39  ;;  %v601_v55 = vrot.slane %v600_v45, 4 }
 0x13d   :  { %1535 = vpow2.f32 %v171_v17  ;;  %v536_v31 = vrot.slane %v535_v28, 4  ;;  %v390_v32 = vpop.xlane.xlu0 %389  ;;  %v575_v4 = vrot.slane %v574_v43, 2  ;;  %v168_v7 = vsub.f32 %v1765_v50, %v156_v37 }
 0x13e   :  { %v398_v33 = vmul.f32 %v390_v32, %v1785_v59  ;;  %1537 = vpow2.f32 %v173_v25  ;;  %v177_v49 = vmul.f32 1.442695, %v167_v51  ;;  %v534_v11 = vadd.f32 %v533_v57, %v532_v30 }
 0x13f   :  { %v537_v44 = vadd.f32 %v536_v31, %v535_v28  ;;  %1539 = vpow2.f32 %v175_v53  ;;  %v589_v19 = vrot.slane %v588_v1, 2  ;;  %v602_v22 = vadd.f32 %v601_v55, %v600_v45 }
 0x140   :  { %v402_v56 = vsel %vm66_vm0, %v398_v33, 0.0  ;;  %1541 = vpow2.f32 %v177_v49  ;;  %v179_v40 = vmul.f32 1.442695, %v168_v7  ;;  %v576_v25 = vadd.f32 %v575_v4, %v574_v43 }
 0x141   :  { %v538_v58 = vrot.slane %v537_v44, 2  ;;  %v403_v60 = vadd.f32 %v402_v56, %v401_v24  ;;  %v396_v59 = vpop.xlane.xlu0 %395  ;;  %v590_v36 = vadd.f32 %v589_v19, %v588_v1 }
 0x142   :  { %v400_v35 = vmul.f32 %v396_v59, %v1793_v63  ;;  %1543 = vpow2.f32 %v179_v40  ;;  %v577_v53 = vrot.slane %v576_v25, 1 }
 0x143   :  { %v539_v3 = vadd.f32 %v538_v58, %v537_v44  ;;  %v404_v62 = vrot.slane %v403_v60, 4  ;;  %v603_v44 = vrot.slane %v602_v22, 2 }
 0x144   :  { %v411_v8 = vsel %vm66_vm0, %v400_v35, 0.0  ;;  %v591_v35 = vrot.slane %v590_v36, 1  ;;  %v578_v49 = vadd.f32 %v577_v53, %v576_v25 }
 0x145   :  { %v540_v13 = vrot.slane %v539_v3, 1  ;;  %v405_v14 = vadd.f32 %v404_v62, %v403_v60  ;;  %v412_v15 = vadd.f32 %v411_v8, %v410_v27  ;;  %v553_v17 = vpop.xlane.xlu0 %552  ;;  %v604_v1 = vadd.f32 %v603_v44, %v602_v22 }
 0x146   :  { %v1888_v18 = vpop.eup %1533  ;;  %v567_v63 = vmul.f32 %v553_v17, %v1675_v5 }
 0x147   :  { %v1891_v23 = vpop.eup %1535  ;;  %188 = vperm.xlu1 %1531, %v1888_v18   ;;  %v541_v50 = vadd.f32 %v540_v13, %v539_v3  ;;  %v406_v39 = vrot.slane %v405_v14, 2  ;;  %v413_v42 = vrot.slane %v412_v15, 4  ;;  %v605_v19 = vrot.slane %v604_v1, 1 }
 0x148   :  { %191 = vperm.xlu0 %1532, %v1891_v23   ;;  %v579_v28 = vsel %vm66_vm0, %v567_v63, 0.0  ;;  %v1897_v34 = vpop.eup %1537  ;;  %v592_v63 = vadd.f32 %v591_v35, %v590_v36 }
 0x149   :  { %v407_v30 = vadd.f32 %v406_v39, %v405_v14  ;;  %v414_v31 = vadd.f32 %v413_v42, %v412_v15  ;;  %v580_v32 = vrot.slane %v579_v28, 4  ;;  %v559_v24 = vpop.xlane.xlu0 %558  ;;  %v629_v33 = vsel %vm117_vm1, %v541_v50, %v534_v11  ;;  %v1903_v27 = vpop.eup %1539 }
 0x14a   :  { %v569_v37 = vmul.f32 %v559_v24, %v1680_v6  ;;  %1430 = vmatmul.mubr.msk.f32.vlgmr.msra.gmra.mrb[0].mxu1 %vm66_vm0, %v629_v33  ;;  %v1908_v17 = vpop.eup %1541 }
 0x14b   :  { %194 = vperm.xlu1 %1531, %v1897_v34   ;;  %v408_v45 = vrot.slane %v407_v30, 1  ;;  %v415_v43 = vrot.slane %v414_v31, 2  ;;  %v581_v51 = vadd.f32 %v580_v32, %v579_v28  ;;  %v606_v32 = vadd.f32 %v605_v19, %v604_v1  ;;  %v1357_v1 = vld [vmem:[%s2215_s7 + $0x90] sm:$0xff]  ;;  %v1028_v19 = vld [vmem:[%s2218_s3 + $0x8] sm:$0xff] }
 0x14c   :  { %v593_v56 = vsel %vm66_vm0, %v569_v37, 0.0 }
 0x14d   :  { %v416_v57 = vadd.f32 %v415_v43, %v414_v31  ;;  %v582_v58 = vrot.slane %v581_v51, 2  ;;  %v594_v60 = vrot.slane %v593_v56, 4  ;;  %v565_v59 = vpop.xlane.xlu0 %564  ;;  %v409_v7 = vadd.f32 %v408_v45, %v407_v30  ;;  %v1917_v30 = vpop.eup %1543  ;;  %v1339_v45 = vld [vmem:[%s2215_s7 + $0x50] sm:$0xff] }
 0x14e   :  { %v571_v55 = vmul.f32 %v565_v59, %v1692_v10  ;;  %v1348_v59 = vld [vmem:[%s2215_s7 + $0x68] sm:$0xff] }
 0x14f   :  { %197 = vperm.xlu1 %1531, %v1903_v27   ;;  %v417_v3 = vrot.slane %v416_v57, 1  ;;  %v583_v62 = vadd.f32 %v582_v58, %v581_v51  ;;  %v595_v4 = vadd.f32 %v594_v60, %v593_v56  ;;  %v792_v51 = vld [vmem:[%s2216_s5] sm:$0xff]  ;;  %v1356_v58 = vld [vmem:[%s2215_s7 + $0x88] sm:$0xff] }
 0x150   :  { %v607_v8 = vsel %vm66_vm0, %v571_v55, 0.0  ;;  %1451 = vmatprep.mubr.msk.f32.mxu1 %vm66_vm0, %v792_v51  ;;  %v1347_v60 = vld [vmem:[%s2215_s7 + $0x60] sm:$0xff] }
 0x151   :  { %v584_v11 = vrot.slane %v583_v62, 1  ;;  %v596_v13 = vrot.slane %v595_v4, 2  ;;  %v608_v14 = vrot.slane %v607_v8, 4  ;;  %v418_v15 = vadd.f32 %v417_v3, %v416_v57  ;;  %v1355_v57 = vld [vmem:[%s2215_s7 + $0x80] sm:$0xff]  ;;  %v1349_v3 = vld [vmem:[%s2215_s7 + $0x70] sm:$0xff] }
 0x152   :  { %v1519_v35 = vpack.c.bf16 %v1356_v58, %v1355_v57  ;;  %v1511_v55 = vpack.c.bf16 %v1348_v59, %v1347_v60 }
 0x153   :  { %200 = vperm.xlu1 %1531, %v1908_v17   ;;  %v585_v22 = vadd.f32 %v584_v11, %v583_v62  ;;  %v597_v50 = vadd.f32 %v596_v13, %v595_v4  ;;  %v609_v39 = vadd.f32 %v608_v14, %v607_v8  ;;  %v432_v42 = vsel %vm117_vm1, %v418_v15, %v409_v7  ;;  %v1358_v62 = vld [vmem:[%s2215_s7 + $0x98] sm:$0xff]  ;;  %v923_v7 = vld [vmem:[%s2217_s4] sm:$0xff]  ;;  %v793_v8 = vld [vmem:[%s2216_s5 + $0x8] sm:$0xff] }
 0x154   :  { %1419 = vmatmul.mubr.msk.f32.vlgmr.msra.gmra.mrb[0].mxu0 %vm66_vm0, %v432_v42  ;;  %v1350_v4 = vld [vmem:[%s2215_s7 + $0x78] sm:$0xff]  ;;  %v794_v11 = vld [vmem:[%s2216_s5 + $0x10] sm:$0xff]  ;;  %v1523_v13 = vpack.c.bf16 %v1358_v62, %v1357_v1  ;;  %v1027_v15 = vld [vmem:[%s2218_s3] sm:$0xff] }
 0x155   :  { %v713_v40 = vsel %vm117_vm1, %v585_v22, %v578_v49  ;;  %v598_v25 = vrot.slane %v597_v50, 1  ;;  %v610_v28 = vrot.slane %v609_v39, 2  ;;  %1499 = vmatpush3.bf16.msra.mxu0 %v1818_v21  ;;  %1440 = vmatprep.mubr.msk.f32.mxu0 %vm1565_vm7, %v1566_v26  ;;  %v1337_v26 = vld [vmem:[%s2215_s7 + $0x40] sm:$0xff]  ;;  %v1515_v49 = vpack.c.bf16 %v1350_v4, %v1349_v3  ;;  %v795_v14 = vld [vmem:[%s2216_s5 + $0x18] sm:$0xff]  ;;  %v1029_v22 = vld [vmem:[%s2218_s3 + $0x10] sm:$0xff] }
 0x156   :  { %v714_v31 = vsel %vm119_vm2, %v592_v63, %v713_v40  ;;  %1500 = vmatprep.subr.bf16.mxu0 %v1564_v16  ;;  %v1338_v16 = vld [vmem:[%s2215_s7 + $0x48] sm:$0xff]  ;;  %v1330_v62 = vld [vmem:[%s2219_s8 + $0x1] ss:$0 sm:$0xff] }
 0x157   :  { %203 = vperm.xlu1 %1531, %v1917_v30   ;;  %v599_v24 = vadd.f32 %v598_v25, %v597_v50  ;;  %v611_v33 = vadd.f32 %v610_v28, %v609_v39  ;;  %v1503_v43 = vpack.c.bf16 %v1338_v16, %v1337_v26  ;;  %v924_v63 = vld [vmem:[%s2217_s4 + $0x8] sm:$0xff]  ;;  %v1030_v50 = vld [vmem:[%s2218_s3 + $0x18] sm:$0xff]  ;;  %v1031_v39 = vld [vmem:[%s2218_s3 + $0x20] sm:$0xff] }
 0x158   :  { %v1032_v42 = vld [vmem:[%s2218_s3 + $0x28] sm:$0xff] }
 0x159   :  { %v612_v36 = vrot.slane %v611_v33, 1  ;;  %1502 = vmatpush3.bf16.msra.mxu0 %v1834_v29  ;;  %v715_v37 = vsel %vm121_vm3, %v599_v24, %v714_v31  ;;  %v1340_v29 = vld [vmem:[%s2215_s7 + $0x58] sm:$0xff]  ;;  %1504 = vmatprep.subr.bf16.mxu1 %v1503_v43 }
 0x15a   :  { %v716_v21 = vsel %vm123_vm4, %v606_v32, %v715_v37  ;;  %v1507_v56 = vpack.c.bf16 %v1340_v29, %v1339_v45  ;;  %1506 = vmatpush3.bf16.msra.mxu1 %v1503_v43  ;;  %1512 = vmatprep.subr.bf16.mxu0 %v1511_v55 }
 0x15b   :  { %v613_v44 = vadd.f32 %v612_v36, %v611_v33 }
 0x15c   :  { %1508 = vmatprep.subr.bf16.mxu1 %v1507_v56 }
 0x15d   :  { %v717_v53 = vsel %vm125_vm5, %v613_v44, %v716_v21 }
 0x15e   :  { %1441 = vmatmul.mubr.msk.f32.vlgmr.msra.gmra.mrb[2].mxu0 %vm66_vm0, %v717_v53  ;;  %1510 = vmatpush3.bf16.msra.mxu1 %v1507_v56  ;;  %v2026_v56 = vld [vmem:[%s2234_s29 + $0x4] ss:$0 sm:$0xff] }
 0x15f   :  { %1465 = vmatprep.mubr.msk.f32.mxu0 %vm66_vm0, %v923_v7  ;;  %1514 = vmatpush3.bf16.msra.mxu0 %v1511_v55  ;;  %v1221_v57 = vmul.f32 %v2026_v56, %v1660_v0  ;;  %v1223_v58 = vmul.f32 %v2026_v56, %v1668_v2  ;;  %v1225_v55 = vmul.f32 %v2026_v56, %v1687_v9  ;;  %v1368_v0 = vld [vmem:[%s2234_s29 + $0x3] ss:$0 sm:$0xff] }
 0x160   :  { %1520 = vmatprep.subr.bf16.mxu1 %v1519_v35  ;;  %1516 = vmatprep.subr.bf16.mxu0 %v1515_v49  ;;  %v1191_v3 = vmul.f32 %v1368_v0, %v1710_v20  ;;  %v1192_v9 = vmul.f32 %v1368_v0, %v1771_v52 }
 0x161   :  { %1452 = vmatmul.mubr.msk.f32.vlgmr.msra.gmra.mrb[2].mxu1 %vm66_vm0, %v793_v8  ;;  %v1227_v60 = vsel %vm66_vm0, %v1221_v57, 0.0  ;;  %v1233_v59 = vsel %vm66_vm0, %v1223_v58, 0.0  ;;  %v1239_v2 = vsel %vm66_vm0, %v1225_v55, 0.0  ;;  %v1321_v8 = vld [vmem:[%s2219_s8] ss:$0 sm:$0xff] }
 0x162   :  { %1522 = vmatpush3.bf16.msra.mxu1 %v1519_v35  ;;  %1454 = vmatprep.mubr.msk.f32.mxu1 %vm66_vm0, %v794_v11  ;;  %v1224_v35 = vmul.f32 %v2026_v56, %v1680_v6  ;;  %v1193_v4 = vsel %vm66_vm0, %v1191_v3, 0.0  ;;  %v1196_v20 = vsel %vm66_vm0, %v1192_v9, 0.0 }
 0x163   :  { %1524 = vmatprep.subr.bf16.mxu1 %v1523_v13  ;;  %1518 = vmatpush3.bf16.msra.mxu0 %v1515_v49 }
 0x164   :  { %v1236_v1 = vsel %vm66_vm0, %v1224_v35, 0.0 }
 0x165   :  { %1455 = vmatmul.mubr.msk.f32.gmra.mrb[4].mxu1 %vm66_vm0, %v795_v14 }
 0x166   :  { %1526 = vmatpush3.bf16.msra.mxu1 %v1523_v13  ;;  %1476 = vmatprep.mubr.msk.f32.mxu1 %vm66_vm0, %v1027_v15  ;;  %v1226_v15 = vmul.f32 %v2026_v56, %v1692_v10 }
 0x167   :  { %1466 = vmatmul.mubr.msk.f32.vlgmr.msra.gmra.mrb[4].mxu0 %vm66_vm0, %v924_v63 }
 0x169   :  { %1477 = vmatmul.mubr.msk.f32.vlgmr.msra.gmra.mrb[6].mxu1 %vm66_vm0, %v1028_v19  ;;  %v1242_v19 = vsel %vm66_vm0, %v1226_v15, 0.0 }
 0x16a   :  { %1479 = vmatprep.mubr.msk.f32.mxu1 %vm66_vm0, %v1029_v22 }
 0x16d   :  { %1480 = vmatmul.mubr.msk.f32.gmra.mrb[8].mxu1 %vm66_vm0, %v1030_v50 }
 0x16e   :  { %1482 = vmatprep.mubr.msk.f32.mxu1 %vm66_vm0, %v1031_v39 }
 0x171   :  { %1483 = vmatmul.mubr.msk.f32.gmra.mrb[10].mxu1 %vm66_vm0, %v1032_v42 }
 0x1c6   :  { %v189_v40 = vpop.permute.xlu1 %188 }
 0x1c7   :  { %v192_v28 = vpop.permute.xlu0 %191  ;;  %v208_v32 = vrot.slane %v189_v40, %v1748_v41 }
 0x1c8   :  { %v212_v24 = vrot.slane %v192_v28, %v1748_v41 }
 0x1ca   :  { %v195_v25 = vpop.permute.xlu1 %194  ;;  %v229_v44 = vsel %vm117_vm1, %v212_v24, %v208_v32 }
 0x1cb   :  { %v216_v33 = vrot.slane %v195_v25, %v1748_v41 }
 0x1cd   :  { %v230_v26 = vsel %vm119_vm2, %v216_v33, %v229_v44 }
 0x1ce   :  { %v198_v31 = vpop.permute.xlu1 %197 }
 0x1cf   :  { %v220_v37 = vrot.slane %v198_v31, %v1748_v41 }
 0x1d1   :  { %v231_v45 = vsel %vm121_vm3, %v220_v37, %v230_v26 }
 0x1d2   :  { %v201_v36 = vpop.permute.xlu1 %200 }
 0x1d3   :  { %v224_v21 = vrot.slane %v201_v36, %v1748_v41 }
 0x1d5   :  { %v232_v29 = vsel %vm123_vm4, %v224_v21, %v231_v45 }
 0x1d6   :  { %v204_v16 = vpop.permute.xlu1 %203 }
 0x1d7   :  { %v228_v43 = vrot.slane %v204_v16, %v1748_v41 }
 0x1d9   :  { %v233_v51 = vsel %vm125_vm5, %v228_v43, %v232_v29 }
 0x1da   :  { %v235_v53 = vsel %vm128_vm6, %v233_v51, 0.0 }
 0x1db   :  { %236 = vadd.xlane.f32.xlu1 %v235_v53 }
 0x1df   :  { %1228 = vadd.xlane.f32.xlu1 %v1227_v60 }
 0x1e3   :  { %1234 = vadd.xlane.f32.xlu1 %v1233_v59 }
 0x1e7   :  { %1237 = vadd.xlane.f32.xlu1 %v1236_v1 }
 0x1eb   :  { %1240 = vadd.xlane.f32.xlu1 %v1239_v2 }
 0x1ef   :  { %1194 = vadd.xlane.f32.xlu1 %v1193_v4 }
 0x1f3   :  { %1197 = vadd.xlane.f32.xlu1 %v1196_v20 }
 0x1f7   :  { %1243 = vadd.xlane.f32.xlu1 %v1242_v19 }
 0x21d   :  { %v698_v6 = vpop.f32.mrb[0].mxu1 }
 0x21e   :  { %v699_v7 = vadd.f32 %v1330_v62, %v698_v6  ;;  %v1431_v49 = vpop.f32.mrb[1].mxu1 }
 0x220   :  { %702 = vst.msk [vmem:[%s2220_s12] sm:$0x3] %vm508_vm8, %v699_v7 }
 0x227   :  { %v501_v11 = vpop.f32.mrb[0].mxu0 }
 0x228   :  { %v502_v13 = vadd.f32 %v1321_v8, %v501_v11  ;;  %v1420_v14 = vpop.f32.mrb[1].mxu0 }
 0x22a   :  { %vm505_vm9 = vcmp.ge.f32.partialorder %v502_v13, 0.0  ;;  %v506_v52 = vmul.f32 0.01, %v502_v13 }
 0x22c   :  { %v507_v63 = vsel %vm505_vm9, %v502_v13, %v506_v52 }
 0x22d   :  { %509 = vst.msk [vmem:[%s2221_s10] sm:$0x3] %vm508_vm8, %v507_v63 }
 0x231   :  { %v786_v22 = vpop.f32.mrb[2].mxu0 }
 0x232   :  { %791 = vst.msk [vmem:[%s2222_s11] sm:$0x3f] %vm790_vm10, %v786_v22  ;;  %v1442_v50 = vpop.f32.mrb[3].mxu0 }
 0x23a   :  { %v1467_v45 = vpop.f32.mrb[4].mxu0 }
 0x23b   :  { %v1010_v53 = vpop.f32.mrb[5].mxu0 }
 0x268   :  { %v237_v39 = vpop.xlane.xlu1 %236 }
 0x269   :  { %v242_v10 = vrot.slane %v237_v39, %v135_v46  ;;  %v246_v42 = vrot.slane %v237_v39, %v139_v47  ;;  %v250_v40 = vrot.slane %v237_v39, %v143_v48  ;;  %v254_v25 = vrot.slane %v237_v39, %v147_v54 }
 0x26a   :  { %v258_v31 = vrot.slane %v237_v39, %v151_v61  ;;  %v262_v47 = vrot.slane %v237_v39, %v155_v12  ;;  %v1453_v12 = vpop.f32.mrb[2].mxu1 }
 0x26b   :  { %1545 = vrcp.f32 %v242_v10  ;;  %v887_v44 = vpop.f32.mrb[3].mxu1 }
 0x26c   :  { %1547 = vrcp.f32 %v246_v42  ;;  %v2088_v21 = vpop.xlane.xlu1 %1228  ;;  %v1456_v16 = vpop.f32.mrb[4].mxu1 }
 0x26d   :  { %1549 = vrcp.f32 %v250_v40  ;;  %v897_v51 = vpop.f32.mrb[5].mxu1 }
 0x26e   :  { %1551 = vrcp.f32 %v254_v25  ;;  %v1478_v60 = vpop.f32.mrb[6].mxu1 }
 0x26f   :  { %1553 = vrcp.f32 %v258_v31  ;;  %v1130_v55 = vpop.f32.mrb[7].mxu1 }
 0x270   :  { %1555 = vrcp.f32 %v262_v47  ;;  %v2098_v35 = vpop.xlane.xlu1 %1234  ;;  %v1481_v3 = vpop.f32.mrb[8].mxu1 }
 0x271   :  { %v1140_v7 = vpop.f32.mrb[9].mxu1 }
 0x272   :  { %v1484_v11 = vpop.f32.mrb[10].mxu1 }
 0x273   :  { %v1150_v63 = vpop.f32.mrb[11].mxu1 }
 0x274   :  { %v2112_v13 = vpop.xlane.xlu1 %1237 }
 0x275   :  { %v1546_v28 = vpop.eup %1545 }
 0x276   :  { %v270_v32 = vmul.f32 %v1546_v28, %v1888_v18  ;;  %v1548_v46 = vpop.eup %1547 }
 0x277   :  { %v272_v48 = vmul.f32 %v1548_v46, %v1891_v23  ;;  %v1550_v24 = vpop.eup %1549  ;;  %v1342_v23 = vld [vmem:[%s2219_s8 + $0x2] ss:$0 sm:$0xff] }
 0x278   :  { %283 = vperm.xlu0 %1532, %v270_v32   ;;  %v274_v54 = vmul.f32 %v1550_v24, %v1897_v34  ;;  %v1552_v33 = vpop.eup %1551  ;;  %v893_v34 = vadd.f32 %v1453_v12, %v1342_v23  ;;  %v888_v26 = vadd.f32 %v1342_v23, %v887_v44  ;;  %v903_v29 = vadd.f32 %v1456_v16, %v1342_v23  ;;  %v2132_v31 = vpop.xlane.xlu1 %1240  ;;  %v1557_v12 = vld [vmem:[%s2233_s26] sm:$0xff]  ;;  %v1558_v44 = vld [vmem:[%s2233_s26 + $0x8] sm:$0xff] }
 0x279   :  { %v276_v61 = vmul.f32 %v1552_v33, %v1903_v27  ;;  %v1554_v36 = vpop.eup %1553  ;;  %v1352_v27 = vld [vmem:[%s2219_s8 + $0x3] ss:$0 sm:$0xff]  ;;  %v898_v58 = vadd.f32 %v1342_v23, %v897_v51 }
 0x27a   :  { %v278_v18 = vmul.f32 %v1554_v36, %v1908_v17  ;;  %v1556_v37 = vpop.eup %1555  ;;  %v1222_v17 = vmul.f32 %v2026_v56, %v1675_v5  ;;  %vm907_vm11 = vcmp.ge.f32.partialorder %v893_v34, 0.0  ;;  %v911_v43 = vmul.f32 0.01, %v893_v34 }
 0x27b   :  { %v280_v38 = vmul.f32 %v1556_v37, %v1917_v30  ;;  %v1360_v30 = vld [vmem:[%s2219_s8 + $0x4] ss:$0 sm:$0xff]  ;;  %vm906_vm13 = vcmp.ge.f32.partialorder %v888_v26, 0.0  ;;  %v910_v57 = vmul.f32 0.01, %v888_v26  ;;  %v1016_v59 = vadd.f32 %v1467_v45, %v1352_v27  ;;  %v1559_v45 = vld [vmem:[%s2233_s26 + $0x10] sm:$0xff] }
 0x27c   :  { %288 = vperm.xlu0 %1532, %v272_v48   ;;  %v915_v5 = vsel %vm907_vm11, %v893_v34, %v911_v43  ;;  %vm909_vm14 = vcmp.ge.f32.partialorder %v903_v29, 0.0  ;;  %v913_v56 = vmul.f32 0.01, %v903_v29  ;;  %v1136_v1 = vadd.f32 %v1478_v60, %v1360_v30  ;;  %v1195_v33 = vpop.xlane.xlu1 %1194  ;;  %v1560_v60 = vld [vmem:[%s2233_s26 + $0x18] sm:$0xff] }
 0x27d   :  { %920 = vst.msk [vmem:[%s2223_s13 + $0x8] sm:$0xff] %vm918_vm12, %v915_v5  ;;  %v914_v0 = vsel %vm906_vm13, %v888_v26, %v910_v57  ;;  %vm908_vm15 = vcmp.ge.f32.partialorder %v898_v58, 0.0  ;;  %v912_v2 = vmul.f32 0.01, %v898_v58  ;;  %v1011_v62 = vadd.f32 %v1352_v27, %v1010_v53 }
 0x27e   :  { %919 = vst.msk [vmem:[%s2223_s13] sm:$0xff] %vm918_vm12, %v914_v0  ;;  %v917_v6 = vsel %vm909_vm14, %v903_v29, %v913_v56  ;;  %vm1160_vm7 = vcmp.ge.f32.partialorder %v1136_v1, 0.0  ;;  %v1166_v4 = vmul.f32 0.01, %v1136_v1  ;;  %v1131_v9 = vadd.f32 %v1360_v30, %v1130_v55 }
 0x27f   :  { %922 = vst.msk [vmem:[%s2223_s13 + $0x18] sm:$0xff] %vm918_vm12, %v917_v6  ;;  %v916_v49 = vsel %vm908_vm15, %v898_v58, %v912_v2  ;;  %v1146_v20 = vadd.f32 %v1481_v3, %v1360_v30  ;;  %v1141_v8 = vadd.f32 %v1360_v30, %v1140_v7  ;;  %vm1020_vm8 = vcmp.ge.f32.partialorder %v1016_v59, 0.0 }
 0x280   :  { %293 = vperm.xlu0 %1532, %v274_v54   ;;  %921 = vst.msk [vmem:[%s2223_s13 + $0x10] sm:$0xff] %vm918_vm12, %v916_v49  ;;  %v1172_v14 = vsel %vm1160_vm7, %v1136_v1, %v1166_v4  ;;  %vm1159_vm9 = vcmp.ge.f32.partialorder %v1131_v9, 0.0  ;;  %v1165_v52 = vmul.f32 0.01, %v1131_v9  ;;  %v1022_v15 = vmul.f32 0.01, %v1016_v59  ;;  %v1198_v36 = vpop.xlane.xlu1 %1197 }
 0x281   :  { %v1230_v19 = vsel %vm66_vm0, %v1222_v17, 0.0  ;;  %1178 = vst.msk [vmem:[%s2224_s15 + $0x8] sm:$0xff] %vm918_vm12, %v1172_v14  ;;  %vm1162_vm10 = vcmp.ge.f32.partialorder %v1146_v20, 0.0  ;;  %v1168_v22 = vmul.f32 0.01, %v1146_v20  ;;  %vm1161_vm11 = vcmp.ge.f32.partialorder %v1141_v8, 0.0 }
 0x282   :  { %v1171_v50 = vsel %vm1159_vm9, %v1131_v9, %v1165_v52  ;;  %v1167_v39 = vmul.f32 0.01, %v1141_v8  ;;  %v1024_v10 = vsel %vm1020_vm8, %v1016_v59, %v1022_v15  ;;  %v1156_v42 = vadd.f32 %v1484_v11, %v1360_v30  ;;  %v1562_v52 = vld [vmem:[%s2233_s26 + $0x28] sm:$0xff] }
 0x283   :  { %1177 = vst.msk [vmem:[%s2224_s15] sm:$0xff] %vm918_vm12, %v1171_v50  ;;  %v1174_v40 = vsel %vm1162_vm10, %v1146_v20, %v1168_v22  ;;  %1026 = vst.msk [vmem:[%s2225_s14 + $0x8] sm:$0xff] %vm918_vm12, %v1024_v10  ;;  %vm1019_vm13 = vcmp.ge.f32.partialorder %v1011_v62, 0.0  ;;  %v1021_v25 = vmul.f32 0.01, %v1011_v62  ;;  %v1151_v28 = vadd.f32 %v1360_v30, %v1150_v63 }
 0x284   :  { %298 = vperm.xlu0 %1532, %v276_v61   ;;  %1180 = vst.msk [vmem:[%s2224_s15 + $0x18] sm:$0xff] %vm918_vm12, %v1174_v40  ;;  %v1173_v32 = vsel %vm1161_vm11, %v1141_v8, %v1167_v39  ;;  %vm1164_vm14 = vcmp.ge.f32.partialorder %v1156_v42, 0.0  ;;  %v1170_v46 = vmul.f32 0.01, %v1156_v42  ;;  %v1204_v61 = vrot.slane %v1195_v33, %v1748_v41 }
 0x285   :  { %1179 = vst.msk [vmem:[%s2224_s15 + $0x10] sm:$0xff] %vm918_vm12, %v1173_v32  ;;  %v1023_v47 = vsel %vm1019_vm13, %v1011_v62, %v1021_v25  ;;  %vm1163_vm15 = vcmp.ge.f32.partialorder %v1151_v28, 0.0  ;;  %v1169_v48 = vmul.f32 0.01, %v1151_v28  ;;  %vm1211_vm7 = vcmask 58368   ;;  %v1561_v62 = vld [vmem:[%s2233_s26 + $0x20] sm:$0xff] }
 0x286   :  { %v1176_v24 = vsel %vm1164_vm14, %v1156_v42, %v1170_v46  ;;  %1025 = vst.msk [vmem:[%s2225_s14] sm:$0xff] %vm918_vm12, %v1023_v47 }
 0x287   :  { %1182 = vst.msk [vmem:[%s2224_s15 + $0x28] sm:$0xff] %vm918_vm12, %v1176_v24  ;;  %v1175_v54 = vsel %vm1163_vm15, %v1151_v28, %v1169_v48 }
 0x288   :  { %303 = vperm.xlu0 %1532, %v278_v18   ;;  %1181 = vst.msk [vmem:[%s2224_s15 + $0x20] sm:$0xff] %vm918_vm12, %v1175_v54  ;;  %v1208_v18 = vrot.slane %v1198_v36, %v1748_v41 }
 0x28a   :  { %v1209_v37 = vsel %vm117_vm1, %v1208_v18, %v1204_v61 }
 0x28b   :  { %1212 = vst.msk [vmem:[%s2226_s16] sm:$0x3] %vm1211_vm7, %v1209_v37 }
 0x28c   :  { %308 = vperm.xlu0 %1532, %v280_v38  }
 0x2ab   :  { %1231 = vadd.xlane.f32.xlu0 %v1230_v19 }
 0x2f7   :  { %v284_v38 = vpop.permute.xlu0 %283 }
 0x2f8   :  { %v311_v23 = vmul.f32 %v1557_v12, %v284_v38 }
 0x2fa   :  { %v317_v17 = vsel %vm66_vm0, %v311_v23, 0.0 }
 0x2fb   :  { %v289_v34 = vpop.permute.xlu0 %288  ;;  %v318_v29 = vrot.slane %v317_v17, 4 }
 0x2fc   :  { %v312_v27 = vmul.f32 %v1558_v44, %v289_v34 }
 0x2fd   :  { %v319_v5 = vadd.f32 %v318_v29, %v317_v17 }
 0x2fe   :  { %v324_v26 = vsel %vm66_vm0, %v312_v27, 0.0 }
 0x2ff   :  { %v325_v16 = vrot.slane %v324_v26, 4  ;;  %v294_v30 = vpop.permute.xlu0 %293  ;;  %v320_v4 = vrot.slane %v319_v5, 2 }
 0x300   :  { %v313_v43 = vmul.f32 %v1559_v45, %v294_v30  ;;  %v1262_v45 = vrot.slane %v2098_v35, %v1748_v41 }
 0x301   :  { %v326_v53 = vadd.f32 %v325_v16, %v324_v26  ;;  %v321_v63 = vadd.f32 %v320_v4, %v319_v5  ;;  %v1244_v26 = vpop.xlane.xlu1 %1243  ;;  %v1254_v16 = vrot.slane %v2088_v21, %v1748_v41 }
 0x302   :  { %v331_v51 = vsel %vm66_vm0, %v313_v43, 0.0  ;;  %v1266_v43 = vrot.slane %v2112_v13, %v1748_v41 }
 0x303   :  { %v332_v57 = vrot.slane %v331_v51, 4  ;;  %v299_v58 = vpop.permute.xlu0 %298  ;;  %v327_v55 = vrot.slane %v326_v53, 2  ;;  %v322_v25 = vrot.slane %v321_v63, 1 }
 0x304   :  { %v314_v59 = vmul.f32 %v1560_v60, %v299_v58 }
 0x305   :  { %v333_v56 = vadd.f32 %v332_v57, %v331_v51  ;;  %v328_v49 = vadd.f32 %v327_v55, %v326_v53  ;;  %v323_v33 = vadd.f32 %v322_v25, %v321_v63  ;;  %v1274_v51 = vrot.slane %v1244_v26, %v1748_v41 }
 0x306   :  { %v338_v1 = vsel %vm66_vm0, %v314_v59, 0.0  ;;  %v1270_v53 = vrot.slane %v2132_v31, %v1748_v41 }
 0x307   :  { %v339_v0 = vrot.slane %v338_v1, 4  ;;  %v304_v2 = vpop.permute.xlu0 %303  ;;  %v334_v3 = vrot.slane %v333_v56, 2  ;;  %v329_v39 = vrot.slane %v328_v49, 1 }
 0x308   :  { %v315_v6 = vmul.f32 %v1561_v62, %v304_v2 }
 0x309   :  { %v340_v9 = vadd.f32 %v339_v0, %v338_v1  ;;  %v335_v14 = vadd.f32 %v334_v3, %v333_v56  ;;  %v330_v47 = vadd.f32 %v329_v39, %v328_v49 }
 0x30a   :  { %v345_v7 = vsel %vm66_vm0, %v315_v6, 0.0 }
 0x30b   :  { %v341_v20 = vrot.slane %v340_v9, 2  ;;  %v346_v8 = vrot.slane %v345_v7, 4  ;;  %v309_v11 = vpop.permute.xlu0 %308  ;;  %v336_v40 = vrot.slane %v335_v14, 1  ;;  %v365_v37 = vsel %vm117_vm1, %v330_v47, %v323_v33 }
 0x30c   :  { %v316_v15 = vmul.f32 %v1562_v52, %v309_v11 }
 0x30d   :  { %v342_v19 = vadd.f32 %v341_v20, %v340_v9  ;;  %v347_v22 = vadd.f32 %v346_v8, %v345_v7  ;;  %v337_v54 = vadd.f32 %v336_v40, %v335_v14 }
 0x30e   :  { %v352_v50 = vsel %vm66_vm0, %v316_v15, 0.0  ;;  %vm371_vm0 = vcmask 259072  }
 0x30f   :  { %v348_v10 = vrot.slane %v347_v22, 2  ;;  %v353_v42 = vrot.slane %v352_v50, 4  ;;  %v343_v28 = vrot.slane %v342_v19, 1  ;;  %v366_v12 = vsel %vm119_vm2, %v337_v54, %v365_v37 }
 0x311   :  { %v349_v32 = vadd.f32 %v348_v10, %v347_v22  ;;  %v354_v46 = vadd.f32 %v353_v42, %v352_v50  ;;  %v344_v61 = vadd.f32 %v343_v28, %v342_v19 }
 0x313   :  { %v350_v48 = vrot.slane %v349_v32, 1  ;;  %v355_v24 = vrot.slane %v354_v46, 2  ;;  %v367_v23 = vsel %vm121_vm3, %v344_v61, %v366_v12 }
 0x315   :  { %v356_v36 = vadd.f32 %v355_v24, %v354_v46  ;;  %v351_v18 = vadd.f32 %v350_v48, %v349_v32 }
 0x317   :  { %v357_v38 = vrot.slane %v356_v36, 1  ;;  %v368_v44 = vsel %vm123_vm4, %v351_v18, %v367_v23 }
 0x319   :  { %v358_v34 = vadd.f32 %v357_v38, %v356_v36 }
 0x31b   :  { %v369_v27 = vsel %vm125_vm5, %v358_v34, %v368_v44 }
 0x31c   :  { %372 = vst.msk [vmem:[%s2227_s9] sm:$0x3f] %vm371_vm0, %v369_v27 }
 0x338   :  { %v1232_v17 = vpop.xlane.xlu0 %1231 }
 0x339   :  { %v1258_v30 = vrot.slane %v1232_v17, %v1748_v41 }
 0x33b   :  { %v1275_v29 = vsel %vm117_vm1, %v1258_v30, %v1254_v16 }
 0x33c   :  { %v1276_v57 = vsel %vm119_vm2, %v1262_v45, %v1275_v29 }
 0x33d   :  { %v1277_v58 = vsel %vm121_vm3, %v1266_v43, %v1276_v57 }
 0x33e   :  { %v1278_v21 = vsel %vm123_vm4, %v1270_v53, %v1277_v58 }
 0x33f   :  { %v1279_v60 = vsel %vm125_vm5, %v1274_v51, %v1278_v21 }
 0x340   :  { %1281 = vst.msk [vmem:[%s2228_s17] sm:$0x3f] %vm128_vm6, %v1279_v60 }

// kernel: phn_forward.9
= control target key start
LH: loop header
LB: loop body
LE: loop exit
PB: predicated region body
PF: predicated region fallthrough
CT: control target
= control target key end

     0   :  { %vm208_vm0 = vcmask 130048   ;;  %s4949_s0 = inlined_call_operand.vmem [shape: f32[6,16,16], index: 0, kind: input, shape index: {}]   ;;  %s4950_s1 = inlined_call_operand.vmem [shape: f32[6,8,16], index: 1, kind: input, shape index: {}]   ;;  %s4951_s2 = inlined_call_operand.vmem [shape: f32[6,8,16], index: 2, kind: input, shape index: {}]   ;;  %s4952_s3 = inlined_call_operand.vmem [shape: f32[6,8], index: 3, kind: input, shape index: {}]   ;;  %s4953_s4 = inlined_call_operand.vmem [shape: f32[6,8], index: 4, kind: input, shape index: {}]   ;;  %s4954_s5 = inlined_call_operand.vmem [shape: f32[3,6,16], index: 5, kind: input, shape index: {}]   ;;  %s4955_s6 = inlined_call_operand.vmem [shape: f32[2,16], index: 6, kind: input, shape index: {}]   ;;  %s4956_s7 = inlined_call_operand.vmem [shape: f32[2,3,16], index: 7, kind: input, shape index: {}]   ;;  %s4957_s8 = inlined_call_operand.vmem [shape: f32[2,3,32], index: 8, kind: input, shape index: {}]   ;;  %s4958_s9 = inlined_call_operand.vmem [shape: f32[9,3,3], index: 9, kind: input, shape index: {}]   ;;  %s4959_s10 = inlined_call_operand.vmem [shape: f32[4,3,32], index: 10, kind: input, shape index: {}]   ;;  %s4960_s11 = inlined_call_operand.vmem [shape: f32[2,6], index: 11, kind: input, shape index: {}]   ;;  %s4961_s12 = inlined_call_operand.vmem [shape: f32[6,3], index: 12, kind: input, shape index: {}]   ;;  %s4962_s13 = inlined_call_operand.hbm [shape: f32[2,3], index: 13, kind: output, shape index: {}]  }
   0x1   :  { %v57_v0 = vld [vmem:[%s4950_s1] sm:$0xff]  ;;  %v58_v1 = vld [vmem:[%s4950_s1 + $0x8] sm:$0xff]  ;;  %v3592_v4 = vld [vmem:[%s4949_s0 + $0x10] sm:$0xff] }
   0x2   :  { %v3583_v2 = vld [vmem:[%s4951_s2 + $0x8] sm:$0xff]  ;;  %3267 = vmatprep.subr.msk.mxu0 %vm208_vm0, %v57_v0  ;;  %3272 = vmatprep.subr.msk.mxu1 %vm208_vm0, %v58_v1  ;;  %v3597_v5 = vld [vmem:[%s4949_s0] sm:$0xff]  ;;  %v198_v6 = vmul.f32 %v3592_v4, %v3592_v4  ;;  %v3611_v8 = vld [vmem:[%s4949_s0 + $0x18] sm:$0xff] }
   0x3   :  { %v396_v3 = vmul.f32 %v3583_v2, %v3583_v2  ;;  %3268 = vmatpush3.xpose.msk.msra.mxu0 %vm208_vm0, %v57_v0  ;;  %3273 = vmatpush3.xpose.msk.msra.mxu1 %vm208_vm0, %v58_v1  ;;  %v3606_v7 = vld [vmem:[%s4949_s0 + $0x8] sm:$0xff]  ;;  %v59_v9 = vld [vmem:[%s4950_s1 + $0x10] sm:$0xff]  ;;  %v60_v11 = vld [vmem:[%s4950_s1 + $0x18] sm:$0xff]  ;;  %v199_v13 = vmul.f32 %v3611_v8, %v3611_v8 }
   0x4   :  { %3274 = vmatprep.mubr.msk.f32.mxu1 %vm208_vm0, %v3592_v4  ;;  %3269 = vmatprep.mubr.msk.f32.mxu0 %vm208_vm0, %v3597_v5  ;;  %v3627_v12 = vld [vmem:[%s4951_s2 + $0x10] sm:$0xff]  ;;  %v215_v14 = vsel %vm208_vm0, %v198_v6, 0.0  ;;  %v63_v17 = vld [vmem:[%s4951_s2] sm:$0xff]  ;;  %v66_v22 = vld [vmem:[%s4951_s2 + $0x18] sm:$0xff] }
   0x5   :  { %v404_v10 = vsel %vm208_vm0, %v396_v3, 0.0  ;;  %3277 = vmatprep.subr.msk.mxu0 %vm208_vm0, %v59_v9  ;;  %v397_v15 = vmul.f32 %v3627_v12, %v3627_v12  ;;  %216 = vadd.xlane.f32.xlu1 %v215_v14  ;;  %v3640_v16 = vld [vmem:[%s4949_s0 + $0x30] sm:$0xff]  ;;  %v218_v19 = vsel %vm208_vm0, %v199_v13, 0.0  ;;  %v49_v20 = vld [vmem:[%s4949_s0 + $0x20] sm:$0xff]  ;;  %v395_v21 = vmul.f32 %v63_v17, %v63_v17  ;;  %v50_v23 = vld [vmem:[%s4949_s0 + $0x28] sm:$0xff] }
   0x6   :  { %405 = vadd.xlane.f32.xlu0 %v404_v10  ;;  %3270 = vmatmul.mubr.msk.f32.vlgmr.msra.gmra.mrb[0].mxu0 %vm208_vm0, %v3606_v7  ;;  %v52_v24 = vld [vmem:[%s4949_s0 + $0x38] sm:$0xff]  ;;  %v398_v25 = vmul.f32 %v66_v22, %v66_v22  ;;  %v61_v26 = vld [vmem:[%s4950_s1 + $0x20] sm:$0xff]  ;;  %v62_v27 = vld [vmem:[%s4950_s1 + $0x28] sm:$0xff] }
   0x7   :  { %3275 = vmatmul.mubr.msk.f32.vlgmr.msra.gmra.mrb[0].mxu1 %vm208_vm0, %v3611_v8  ;;  %3282 = vmatprep.subr.msk.mxu1 %vm208_vm0, %v60_v11  ;;  %v407_v18 = vsel %vm208_vm0, %v397_v15, 0.0 }
   0x8   :  { %3278 = vmatpush3.xpose.msk.msra.mxu0 %vm208_vm0, %v59_v9  ;;  %3283 = vmatpush3.xpose.msk.msra.mxu1 %vm208_vm0, %v60_v11 }
   0x9   :  { %3284 = vmatprep.mubr.msk.f32.mxu1 %vm208_vm0, %v3640_v16  ;;  %219 = vadd.xlane.f32.xlu1 %v218_v19 }
   0xa   :  { %408 = vadd.xlane.f32.xlu0 %v407_v18  ;;  %3279 = vmatprep.mubr.msk.f32.mxu0 %vm208_vm0, %v49_v20 }
   0xb   :  { %18 = vsyncpa [#allocation3], 0  ;;  %3280 = vmatmul.mubr.msk.f32.vlgmr.msra.gmra.mrb[2].mxu0 %vm208_vm0, %v50_v23  ;;  %3285 = vmatmul.mubr.msk.f32.vlgmr.msra.gmra.mrb[2].mxu1 %vm208_vm0, %v52_v24  ;;  %v401_v28 = vsel %vm208_vm0, %v395_v21, 0.0  ;;  %v3679_v29 = vld [vmem:[%s4949_s0 + $0x50] sm:$0xff]  ;;  %v410_v30 = vsel %vm208_vm0, %v398_v25, 0.0  ;;  %v53_v31 = vld [vmem:[%s4949_s0 + $0x40] sm:$0xff]  ;;  %v200_v32 = vmul.f32 %v49_v20, %v49_v20  ;;  %v201_v35 = vmul.f32 %v50_v23, %v50_v23 }
   0xc   :  { %3287 = vmatprep.subr.msk.mxu0 %vm208_vm0, %v61_v26  ;;  %3292 = vmatprep.subr.msk.mxu1 %vm208_vm0, %v62_v27  ;;  %v54_v33 = vld [vmem:[%s4949_s0 + $0x48] sm:$0xff]  ;;  %v56_v34 = vld [vmem:[%s4949_s0 + $0x58] sm:$0xff]  ;;  %v67_v36 = vld [vmem:[%s4951_s2 + $0x20] sm:$0xff]  ;;  %v196_v40 = vmul.f32 %v3597_v5, %v3597_v5  ;;  %v197_v43 = vmul.f32 %v3606_v7, %v3606_v7  ;;  %v202_v44 = vmul.f32 %v3640_v16, %v3640_v16  ;;  %v121_v60 = vlaneseq }
   0xd   :  { %3288 = vmatpush3.xpose.msk.msra.mxu0 %vm208_vm0, %v61_v26  ;;  %3293 = vmatpush3.xpose.msk.msra.mxu1 %vm208_vm0, %v62_v27  ;;  %v221_v37 = vsel %vm208_vm0, %v200_v32, 0.0  ;;  %v224_v38 = vsel %vm208_vm0, %v201_v35, 0.0  ;;  %v399_v39 = vmul.f32 %v67_v36, %v67_v36  ;;  %v68_v45 = vld [vmem:[%s4951_s2 + $0x28] sm:$0xff]  ;;  %v203_v47 = vmul.f32 %v52_v24, %v52_v24  ;;  %v1679_v63 = vld [vmem:[%s4954_s5] sm:$0x3f] }
   0xe   :  { %402 = vadd.xlane.f32.xlu0 %v401_v28  ;;  %3294 = vmatprep.mubr.msk.f32.mxu1 %vm208_vm0, %v3679_v29  ;;  %v209_v42 = vsel %vm208_vm0, %v196_v40, 0.0  ;;  %v212_v46 = vsel %vm208_vm0, %v197_v43, 0.0  ;;  %v227_v48 = vsel %vm208_vm0, %v202_v44, 0.0  ;;  %v400_v49 = vmul.f32 %v68_v45, %v68_v45 }
   0xf   :  { %411 = vadd.xlane.f32.xlu1 %v410_v30  ;;  %3289 = vmatprep.mubr.msk.f32.mxu0 %vm208_vm0, %v53_v31  ;;  %v413_v41 = vsel %vm208_vm0, %v399_v39, 0.0  ;;  %v230_v50 = vsel %vm208_vm0, %v203_v47, 0.0  ;;  %v204_v51 = vmul.f32 %v53_v31, %v53_v31  ;;  %v205_v53 = vmul.f32 %v54_v33, %v54_v33 }
  0x10   :  { %3290 = vmatmul.mubr.msk.f32.vlgmr.msra.gmra.mrb[4].mxu0 %vm208_vm0, %v54_v33  ;;  %3295 = vmatmul.mubr.msk.f32.vlgmr.msra.gmra.mrb[4].mxu1 %vm208_vm0, %v56_v34  ;;  %v416_v52 = vsel %vm208_vm0, %v400_v49, 0.0  ;;  %v206_v55 = vmul.f32 %v3679_v29, %v3679_v29  ;;  %v207_v57 = vmul.f32 %v56_v34, %v56_v34  ;;  %v3761_v61 = vshrl.u32 %v121_v60, 7 }
  0x11   :  { %3297 = vmatprep.subr.msk.mxu0 %vm208_vm0, %v63_v17  ;;  %3302 = vmatprep.subr.msk.mxu1 %vm208_vm0, %v3583_v2  ;;  %v233_v54 = vsel %vm208_vm0, %v204_v51, 0.0  ;;  %v236_v56 = vsel %vm208_vm0, %v205_v53, 0.0 }
  0x12   :  { %3298 = vmatpush3.xpose.msk.msra.mxu0 %vm208_vm0, %v63_v17  ;;  %3303 = vmatpush3.xpose.msk.msra.mxu1 %vm208_vm0, %v3583_v2  ;;  %v239_v58 = vsel %vm208_vm0, %v206_v55, 0.0  ;;  %v242_v59 = vsel %vm208_vm0, %v207_v57, 0.0  ;;  %5017 = vst [vmem:[#allocation5_spill] sm:$0xff] %v3761_v61  ;;  %v3764_v62 = vsub.s32 1, %v3761_v61  ;;  %v1704_v1 = vsub.s32 2, %v3761_v61 }
  0x13   :  { %222 = vadd.xlane.f32.xlu0 %v221_v37  ;;  %3304 = vmatprep.mubr.msk.f32.mxu1 %vm208_vm0, %v3592_v4  ;;  %v3772_v2 = vsub.s32 0, %v3761_v61  ;;  %v1726_v9 = vsub.s32 4, %v3761_v61 }
  0x14   :  { %225 = vadd.xlane.f32.xlu1 %v224_v38  ;;  %3299 = vmatprep.mubr.msk.f32.mxu0 %vm208_vm0, %v3597_v5  ;;  %5018 = vst [vmem:[#allocation6_spill] sm:$0xff] %v3764_v62  ;;  %v1694_v0 = vrot.slane %v1679_v63, %v3764_v62  ;;  %v1705_v3 = vrot.slane %v1679_v63, %v1704_v1  ;;  %v1715_v5 = vsub.s32 3, %v3761_v61 }
  0x15   :  { %3300 = vmatmul.mubr.msk.f32.vlgmr.msra.gmra.mrb[6].mxu0 %vm208_vm0, %v3606_v7  ;;  %3305 = vmatmul.mubr.msk.f32.vlgmr.msra.gmra.mrb[6].mxu1 %vm208_vm0, %v3611_v8  ;;  %v1683_v4 = vrot.slane %v1679_v63, %v3772_v2  ;;  %v3220_v7 = vld [vmem:[%s4954_s5 + $0x8] sm:$0x3f]  ;;  %v1727_v10 = vrot.slane %v1679_v63, %v1726_v9 }
  0x16   :  { %3307 = vmatprep.subr.msk.mxu0 %vm208_vm0, %v3627_v12  ;;  %3312 = vmatprep.subr.msk.mxu1 %vm208_vm0, %v66_v22  ;;  %v1716_v6 = vrot.slane %v1679_v63, %v1715_v5  ;;  %v2149_v8 = vrot.slane %v3220_v7, %v3764_v62  ;;  %v2160_v11 = vrot.slane %v3220_v7, %v1704_v1 }
  0x17   :  { %3308 = vmatpush3.xpose.msk.msra.mxu0 %vm208_vm0, %v3627_v12  ;;  %3313 = vmatpush3.xpose.msk.msra.mxu1 %vm208_vm0, %v66_v22  ;;  %v1737_v12 = vsub.s32 5, %v3761_v61  ;;  %v2138_v14 = vrot.slane %v3220_v7, %v3772_v2  ;;  %v2171_v15 = vrot.slane %v3220_v7, %v1715_v5  ;;  %v2182_v18 = vrot.slane %v3220_v7, %v1726_v9 }
  0x18   :  { %414 = vadd.xlane.f32.xlu0 %v413_v41  ;;  %3309 = vmatprep.mubr.msk.f32.mxu0 %vm208_vm0, %v49_v20 }
  0x19   :  { %3314 = vmatprep.mubr.msk.f32.mxu1 %vm208_vm0, %v3640_v16  ;;  %210 = vadd.xlane.f32.xlu1 %v209_v42  ;;  %v1738_v13 = vrot.slane %v1679_v63, %v1737_v12  ;;  %v3224_v16 = vld [vmem:[%s4954_s5 + $0x10] sm:$0x3f]  ;;  %v2193_v20 = vrot.slane %v3220_v7, %v1737_v12 }
  0x1a   :  { %3310 = vmatmul.mubr.msk.f32.vlgmr.msra.gmra.mrb[8].mxu0 %vm208_vm0, %v50_v23  ;;  %3315 = vmatmul.mubr.msk.f32.vlgmr.msra.gmra.mrb[8].mxu1 %vm208_vm0, %v52_v24  ;;  %v2562_v17 = vrot.slane %v3224_v16, %v3764_v62  ;;  %v2573_v19 = vrot.slane %v3224_v16, %v1704_v1  ;;  %v2551_v21 = vrot.slane %v3224_v16, %v3772_v2 }
  0x1b   :  { %3317 = vmatprep.subr.msk.mxu0 %vm208_vm0, %v67_v36  ;;  %3322 = vmatprep.subr.msk.mxu1 %vm208_vm0, %v68_v45  ;;  %v2584_v22 = vrot.slane %v3224_v16, %v1715_v5  ;;  %v2595_v23 = vrot.slane %v3224_v16, %v1726_v9  ;;  %v2606_v24 = vrot.slane %v3224_v16, %v1737_v12 }
  0x1c   :  { %3318 = vmatpush3.xpose.msk.msra.mxu0 %vm208_vm0, %v67_v36  ;;  %3323 = vmatpush3.xpose.msk.msra.mxu1 %vm208_vm0, %v68_v45  ;;  %v161_v45 = vand.u32 127, %v121_v60 }
  0x1d   :  { %3324 = vmatprep.mubr.msk.f32.mxu1 %vm208_vm0, %v3679_v29  ;;  %213 = vadd.xlane.f32.xlu0 %v212_v46 }
  0x1e   :  { %3319 = vmatprep.mubr.msk.f32.mxu0 %vm208_vm0, %v53_v31  ;;  %228 = vadd.xlane.f32.xlu1 %v227_v48 }
  0x1f   :  { %3320 = vmatmul.mubr.msk.f32.vlgmr.msra.gmra.mrb[10].mxu0 %vm208_vm0, %v54_v33  ;;  %3325 = vmatmul.mubr.msk.f32.vlgmr.msra.gmra.mrb[10].mxu1 %vm208_vm0, %v56_v34 }
  0x21   :  { %231 = vadd.xlane.f32.xlu0 %v230_v50 }
  0x22   :  { %417 = vadd.xlane.f32.xlu1 %v416_v52  ;;  %v3834_v52 = vsub.s32 %v161_v45, %v3761_v61 }
  0x24   :  { %5021 = vst [vmem:[#allocation9_spill] sm:$0xff] %v3834_v52 }
  0x25   :  { %234 = vadd.xlane.f32.xlu0 %v233_v54 }
  0x26   :  { %237 = vadd.xlane.f32.xlu1 %v236_v56 }
  0x29   :  { %240 = vadd.xlane.f32.xlu0 %v239_v58 }
  0x2a   :  { %243 = vadd.xlane.f32.xlu1 %v242_v59 }
  0x3b   :  { %1700 = vbcast.lane.b32.xlu1 %v1694_v0, 264 }
  0x3f   :  { %1696 = vbcast.lane.b32.xlu0 %v1694_v0, 256  ;;  %1707 = vbcast.lane.b32.xlu1 %v1705_v3, 256 }
  0x43   :  { %1685 = vbcast.lane.b32.xlu0 %v1683_v4, 256  ;;  %1711 = vbcast.lane.b32.xlu1 %v1705_v3, 264 }
  0x47   :  { %1718 = vbcast.lane.b32.xlu0 %v1716_v6, 256  ;;  %1689 = vbcast.lane.b32.xlu1 %v1683_v4, 264 }
  0x4b   :  { %2151 = vbcast.lane.b32.xlu0 %v2149_v8, 256  ;;  %1722 = vbcast.lane.b32.xlu1 %v1716_v6, 264 }
  0x4f   :  { %1729 = vbcast.lane.b32.xlu0 %v1727_v10, 256  ;;  %2155 = vbcast.lane.b32.xlu1 %v2149_v8, 264 }
  0x53   :  { %2162 = vbcast.lane.b32.xlu0 %v2160_v11, 256  ;;  %1733 = vbcast.lane.b32.xlu1 %v1727_v10, 264 }
  0x57   :  { %1740 = vbcast.lane.b32.xlu0 %v1738_v13, 256  ;;  %2166 = vbcast.lane.b32.xlu1 %v2160_v11, 264 }
  0x5b   :  { %2140 = vbcast.lane.b32.xlu0 %v2138_v14, 256  ;;  %1744 = vbcast.lane.b32.xlu1 %v1738_v13, 264 }
  0x5f   :  { %2173 = vbcast.lane.b32.xlu0 %v2171_v15, 256  ;;  %2144 = vbcast.lane.b32.xlu1 %v2138_v14, 264 }
  0x63   :  { %2564 = vbcast.lane.b32.xlu0 %v2562_v17, 256  ;;  %2177 = vbcast.lane.b32.xlu1 %v2171_v15, 264 }
  0x67   :  { %2184 = vbcast.lane.b32.xlu0 %v2182_v18, 256  ;;  %2568 = vbcast.lane.b32.xlu1 %v2562_v17, 264 }
  0x6b   :  { %2575 = vbcast.lane.b32.xlu0 %v2573_v19, 256  ;;  %2188 = vbcast.lane.b32.xlu1 %v2182_v18, 264 }
  0x6f   :  { %2195 = vbcast.lane.b32.xlu0 %v2193_v20, 256  ;;  %2579 = vbcast.lane.b32.xlu1 %v2573_v19, 264 }
  0x73   :  { %2553 = vbcast.lane.b32.xlu0 %v2551_v21, 256  ;;  %2199 = vbcast.lane.b32.xlu1 %v2193_v20, 264 }
  0x77   :  { %2586 = vbcast.lane.b32.xlu0 %v2584_v22, 256  ;;  %2557 = vbcast.lane.b32.xlu1 %v2551_v21, 264 }
  0x7b   :  { %2597 = vbcast.lane.b32.xlu0 %v2595_v23, 256  ;;  %2590 = vbcast.lane.b32.xlu1 %v2584_v22, 264 }
  0x7f   :  { %2608 = vbcast.lane.b32.xlu0 %v2606_v24, 256  ;;  %2601 = vbcast.lane.b32.xlu1 %v2595_v23, 264 }
  0x83   :  { %2612 = vbcast.lane.b32.xlu1 %v2606_v24, 264 }
  0x92   :  { %v3788_v26 = vpop.xlane.xlu1 %216 }
  0x93   :  { %v406_v25 = vpop.xlane.xlu0 %405  ;;  %vm261_vm3 = vcmp.eq.f32.partialorder %v3788_v26, inf  ;;  %vm263_vm4 = vcmp.eq.f32.partialorder %v3788_v26, 0.0  ;;  %v264_v59 = vand.u32 2147483648, %v3788_v26 }
  0x94   :  { %3332 = vrsqrt.f32 %v406_v25  ;;  %vm428_vm1 = vcmp.eq.f32.partialorder %v406_v25, inf  ;;  %v431_v53 = vand.u32 2147483648, %v406_v25  ;;  %vm430_vm2 = vcmp.eq.f32.partialorder %v406_v25, 0.0 }
  0x95   :  { %3334 = vrsqrt.f32 %v3788_v26 }
  0x96   :  { %v3792_v28 = vpop.xlane.xlu1 %219 }
  0x97   :  { %v3790_v27 = vpop.xlane.xlu0 %408  ;;  %3336 = vrsqrt.f32 %v3792_v28  ;;  %vm268_vm7 = vcmp.eq.f32.partialorder %v3792_v28, inf  ;;  %vm270_vm8 = vcmp.eq.f32.partialorder %v3792_v28, 0.0  ;;  %v271_v1 = vand.u32 2147483648, %v3792_v28 }
  0x98   :  { %3338 = vrsqrt.f32 %v3790_v27  ;;  %vm435_vm5 = vcmp.eq.f32.partialorder %v3790_v27, inf  ;;  %vm437_vm6 = vcmp.eq.f32.partialorder %v3790_v27, 0.0  ;;  %v438_v0 = vand.u32 2147483648, %v3790_v27 }
  0x9b   :  { %v3794_v29 = vpop.xlane.xlu0 %402 }
  0x9c   :  { %v3796_v30 = vpop.xlane.xlu1 %411  ;;  %3340 = vrsqrt.f32 %v3794_v29  ;;  %vm421_vm9 = vcmp.eq.f32.partialorder %v3794_v29, inf  ;;  %vm423_vm10 = vcmp.eq.f32.partialorder %v3794_v29, 0.0  ;;  %v424_v8 = vand.u32 2147483648, %v3794_v29 }
  0x9d   :  { %3342 = vrsqrt.f32 %v3796_v30  ;;  %vm442_vm11 = vcmp.eq.f32.partialorder %v3796_v30, inf  ;;  %v445_v12 = vand.u32 2147483648, %v3796_v30  ;;  %vm444_vm13 = vcmp.eq.f32.partialorder %v3796_v30, 0.0 }
  0x9e   :  { %v3333_v41 = vpop.eup %3332 }
  0x9f   :  { %v427_v44 = vmul.f32 %v3333_v41, %v406_v25  ;;  %v3335_v48 = vpop.eup %3334 }
  0xa0   :  { %v3798_v31 = vpop.xlane.xlu0 %222  ;;  %v260_v55 = vmul.f32 %v3335_v48, %v3788_v26 }
  0xa1   :  { %v3800_v32 = vpop.xlane.xlu1 %225  ;;  %v3337_v49 = vpop.eup %3336  ;;  %v429_v50 = vsel %vm428_vm1, %v406_v25, %v427_v44  ;;  %vm275_vm12 = vcmp.eq.f32.partialorder %v3798_v31, inf  ;;  %v278_v14 = vand.u32 2147483648, %v3798_v31 }
  0xa2   :  { %3344 = vrsqrt.f32 %v3800_v32  ;;  %v3339_v51 = vpop.eup %3338  ;;  %v267_v57 = vmul.f32 %v3337_v49, %v3792_v28  ;;  %v432_v58 = vsel %vm430_vm2, %v431_v53, %v429_v50  ;;  %v262_v4 = vsel %vm261_vm3, %v3788_v26, %v260_v55 }
  0xa3   :  { %3346 = vrsqrt.f32 %v3798_v31  ;;  %v434_v60 = vmul.f32 %v3339_v51, %v3790_v27  ;;  %v1572_v6 = vrot.slane %v432_v58, %v3834_v52  ;;  %v3882_v16 = vsel %vm263_vm4, %v264_v59, %v262_v4 }
  0xa4   :  { %v269_v7 = vsel %vm268_vm7, %v3792_v28, %v267_v57  ;;  %5026 = vst [vmem:[#allocation14_spill] sm:$0xff] %v3882_v16  ;;  %vm282_vm14 = vcmp.eq.f32.partialorder %v3800_v32, inf  ;;  %vm284_vm15 = vcmp.eq.f32.partialorder %v3800_v32, 0.0  ;;  %v285_v21 = vand.u32 2147483648, %v3800_v32 }
  0xa5   :  { %v3802_v33 = vpop.xlane.xlu0 %414  ;;  %v436_v10 = vsel %vm435_vm5, %v3790_v27, %v434_v60  ;;  %v3891_v18 = vsel %vm270_vm8, %v271_v1, %v269_v7  ;;  %v1633_v19 = vmul.f32 %v1572_v6, %v3882_v16  ;;  %vm277_vm2 = vcmp.eq.f32.partialorder %v3798_v31, 0.0 }
  0xa6   :  { %v3804_v34 = vpop.xlane.xlu1 %210  ;;  %v3341_v63 = vpop.eup %3340  ;;  %5028 = vst [vmem:[#allocation16_spill] sm:$0xff] %v3891_v18  ;;  %v439_v22 = vsel %vm437_vm6, %v438_v0, %v436_v10  ;;  %v452_v41 = vand.u32 2147483648, %v3802_v33  ;;  %v1634_v44 = vmul.f32 %v1572_v6, %v3891_v18  ;;  %vm449_vm3 = vcmp.eq.f32.partialorder %v3802_v33, inf }
  0xa7   :  { %v3343_v9 = vpop.eup %3342  ;;  %v420_v11 = vmul.f32 %v3341_v63, %v3794_v29  ;;  %vm247_vm1 = vcmp.eq.f32.partialorder %v3804_v34, inf  ;;  %vm249_vm4 = vcmp.eq.f32.partialorder %v3804_v34, 0.0  ;;  %v1645_v49 = vmax.f32 %v1633_v19, 1e-08 }
  0xa8   :  { %v441_v25 = vmul.f32 %v3343_v9, %v3796_v30  ;;  %v250_v50 = vand.u32 2147483648, %v3804_v34  ;;  %v3923_v55 = vrot.slane %v439_v22, %v3834_v52  ;;  %v1646_v0 = vmax.f32 %v1634_v44, 1e-08 }
  0xa9   :  { %v422_v24 = vsel %vm421_vm9, %v3794_v29, %v420_v11  ;;  %vm451_vm8 = vcmp.eq.f32.partialorder %v3802_v33, 0.0 }
  0xaa   :  { %v3806_v35 = vpop.xlane.xlu0 %213  ;;  %v425_v53 = vsel %vm423_vm10, %v424_v8, %v422_v24  ;;  %v443_v58 = vsel %vm442_vm11, %v3796_v30, %v441_v25 }
  0xab   :  { %v3808_v36 = vpop.xlane.xlu1 %228  ;;  %3348 = vrsqrt.f32 %v3806_v35  ;;  %vm254_vm5 = vcmp.eq.f32.partialorder %v3806_v35, inf  ;;  %vm256_vm6 = vcmp.eq.f32.partialorder %v3806_v35, 0.0  ;;  %v257_v29 = vand.u32 2147483648, %v3806_v35 }
  0xac   :  { %3350 = vrsqrt.f32 %v3804_v34  ;;  %v3345_v13 = vpop.eup %3344  ;;  %vm289_vm7 = vcmp.eq.f32.partialorder %v3808_v36, inf  ;;  %v292_v6 = vand.u32 2147483648, %v3808_v36  ;;  %v1568_v8 = vrot.slane %v425_v53, %v3834_v52 }
  0xad   :  { %3352 = vrsqrt.f32 %v3802_v33  ;;  %v3347_v20 = vpop.eup %3346  ;;  %v281_v26 = vmul.f32 %v3345_v13, %v3800_v32  ;;  %vm291_vm9 = vcmp.eq.f32.partialorder %v3808_v36, 0.0  ;;  %v446_v19 = vsel %vm444_vm13, %v445_v12, %v443_v58 }
  0xae   :  { %v3810_v37 = vpop.xlane.xlu0 %231  ;;  %3354 = vrsqrt.f32 %v3808_v36  ;;  %v274_v45 = vmul.f32 %v3347_v20, %v3798_v31 }
  0xaf   :  { %v3812_v38 = vpop.xlane.xlu1 %417  ;;  %3356 = vrsqrt.f32 %v3810_v37  ;;  %v283_v59 = vsel %vm282_vm14, %v3800_v32, %v281_v26  ;;  %vm296_vm10 = vcmp.eq.f32.partialorder %v3810_v37, inf  ;;  %vm298_vm11 = vcmp.eq.f32.partialorder %v3810_v37, 0.0 }
  0xb0   :  { %3358 = vrsqrt.f32 %v3812_v38  ;;  %v276_v4 = vsel %vm275_vm12, %v3798_v31, %v274_v45  ;;  %v3951_v13 = vsel %vm284_vm15, %v285_v21, %v283_v59  ;;  %vm456_vm12 = vcmp.eq.f32.partialorder %v3812_v38, inf }
  0xb1   :  { %5031 = vst [vmem:[#allocation19_spill] sm:$0xff] %v3951_v13  ;;  %v459_v21 = vand.u32 2147483648, %v3812_v38  ;;  %vm458_vm13 = vcmp.eq.f32.partialorder %v3812_v38, 0.0  ;;  %v3978_v44 = vmul.f32 %v3923_v55, %v3951_v13  ;;  %v1580_v45 = vrot.slane %v446_v19, %v3834_v52 }
  0xb2   :  { %v3815_v39 = vpop.xlane.xlu0 %234 }
  0xb3   :  { %v3818_v40 = vpop.xlane.xlu1 %237  ;;  %3360 = vrsqrt.f32 %v3815_v39  ;;  %vm303_vm14 = vcmp.eq.f32.partialorder %v3815_v39, inf  ;;  %vm305_vm15 = vcmp.eq.f32.partialorder %v3815_v39, 0.0 }
  0xb4   :  { %3362 = vrsqrt.f32 %v3818_v40 }
  0xb5   :  { %v3349_v23 = vpop.eup %3348 }
  0xb6   :  { %v3821_v42 = vpop.xlane.xlu0 %240  ;;  %v3351_v28 = vpop.eup %3350  ;;  %v253_v51 = vmul.f32 %v3349_v23, %v3806_v35  ;;  %v299_v23 = vand.u32 2147483648, %v3810_v37 }
  0xb7   :  { %v3823_v43 = vpop.xlane.xlu1 %243  ;;  %3364 = vrsqrt.f32 %v3821_v42  ;;  %v3353_v57 = vpop.eup %3352  ;;  %v246_v60 = vmul.f32 %v3351_v28, %v3804_v34 }
  0xb8   :  { %3366 = vrsqrt.f32 %v3823_v43  ;;  %v3355_v1 = vpop.eup %3354  ;;  %v448_v10 = vmul.f32 %v3353_v57, %v3802_v33  ;;  %v255_v11 = vsel %vm254_vm5, %v3806_v35, %v253_v51  ;;  %v3993_v35 = vsel %vm277_vm2, %v278_v14, %v276_v4 }
  0xb9   :  { %3368 = vrcp.f32 %v1645_v49  ;;  %v3357_v9 = vpop.eup %3356  ;;  %v248_v22 = vsel %vm247_vm1, %v3804_v34, %v246_v60  ;;  %v288_v32 = vmul.f32 %v3355_v1, %v3808_v36  ;;  %v3974_v28 = vsel %vm256_vm6, %v257_v29, %v255_v11  ;;  %5034 = vst [vmem:[#allocation22_spill] sm:$0xff] %v3993_v35 }
  0xba   :  { %v3827_v46 = vpop.permute.xlu0 %1696  ;;  %v3359_v20 = vpop.eup %3358  ;;  %3370 = vrcp.f32 %v1646_v0  ;;  %v295_v25 = vmul.f32 %v3357_v9, %v3810_v37  ;;  %5032 = vst [vmem:[#allocation20_spill] sm:$0xff] %v3974_v28  ;;  %v450_v51 = vsel %vm449_vm3, %v3802_v33, %v448_v10  ;;  %v3987_v53 = vsel %vm249_vm4, %v250_v50, %v248_v22 }
  0xbb   :  { %5019 = vst [vmem:[#allocation7_spill] sm:$0xff] %v3827_v46  ;;  %v3830_v47 = vpop.permute.xlu1 %1700  ;;  %5033 = vst [vmem:[#allocation21_spill] sm:$0xff] %v3987_v53  ;;  %v455_v58 = vmul.f32 %v3359_v20, %v3812_v38  ;;  %v306_v60 = vand.u32 2147483648, %v3815_v39  ;;  %v290_v34 = vsel %vm289_vm7, %v3808_v36, %v288_v32  ;;  %vm310_vm1 = vcmp.eq.f32.partialorder %v3818_v40, inf }
  0xbc   :  { %5020 = vst [vmem:[#allocation8_spill] sm:$0xff] %v3830_v47  ;;  %v1632_v14 = vmul.f32 %v1568_v8, %v3974_v28  ;;  %v297_v29 = vsel %vm296_vm10, %v3810_v37, %v295_v25  ;;  %vm312_vm2 = vcmp.eq.f32.partialorder %v3818_v40, 0.0  ;;  %v1631_v4 = vmul.f32 %v1568_v8, %v3987_v53 }
  0xbd   :  { %v3361_v24 = vpop.eup %3360  ;;  %v313_v9 = vand.u32 2147483648, %v3818_v40  ;;  %v1648_v11 = vmax.f32 %v3978_v44, 1e-08  ;;  %v453_v19 = vsel %vm451_vm8, %v452_v41, %v450_v51  ;;  %v457_v22 = vsel %vm456_vm12, %v3812_v38, %v455_v58 }
  0xbe   :  { %v3837_v54 = vpop.permute.xlu0 %1685  ;;  %v3363_v12 = vpop.eup %3362  ;;  %v302_v59 = vmul.f32 %v3361_v24, %v3815_v39  ;;  %vm317_vm3 = vcmp.eq.f32.partialorder %v3821_v42, inf  ;;  %v4035_v32 = vsel %vm291_vm9, %v292_v6, %v290_v34  ;;  %vm319_vm4 = vcmp.eq.f32.partialorder %v3821_v42, 0.0 }
  0xbf   :  { %5022 = vst [vmem:[#allocation10_spill] sm:$0xff] %v3837_v54  ;;  %v3842_v56 = vpop.permute.xlu1 %1707  ;;  %v309_v50 = vmul.f32 %v3363_v12, %v3818_v40  ;;  %5038 = vst [vmem:[#allocation26_spill] sm:$0xff] %v4035_v32  ;;  %v1644_v25 = vmax.f32 %v1632_v14, 1e-08  ;;  %v4047_v44 = vsel %vm298_vm11, %v299_v23, %v297_v29  ;;  %v320_v36 = vand.u32 2147483648, %v3821_v42 }
  0xc0   :  { %v304_v8 = vsel %vm303_vm14, %v3815_v39, %v302_v59  ;;  %5041 = vst [vmem:[#allocation29_spill] sm:$0xff] %v4047_v44  ;;  %vm324_vm5 = vcmp.eq.f32.partialorder %v3823_v43, inf  ;;  %v1637_v37 = vmul.f32 %v1580_v45, %v4035_v32  ;;  %v460_v23 = vsel %vm458_vm13, %v459_v21, %v457_v22 }
  0xc1   :  { %v3365_v49 = vpop.eup %3364  ;;  %v311_v33 = vsel %vm310_vm1, %v3818_v40, %v309_v50  ;;  %v4064_v50 = vsel %vm305_vm15, %v306_v60, %v304_v8  ;;  %v327_v14 = vand.u32 2147483648, %v3823_v43  ;;  %v1638_v29 = vmul.f32 %v1580_v45, %v4047_v44 }
  0xc2   :  { %v3855_v3 = vpop.permute.xlu0 %1718  ;;  %v3367_v57 = vpop.eup %3366  ;;  %v316_v0 = vmul.f32 %v3365_v49, %v3821_v42  ;;  %5045 = vst [vmem:[#allocation33_spill] sm:$0xff] %v4064_v50  ;;  %vm326_vm6 = vcmp.eq.f32.partialorder %v3823_v43, 0.0  ;;  %3372 = vrcp.f32 %v1644_v25  ;;  %v1635_v39 = vmul.f32 %v3923_v55, %v3993_v35 }
  0xc3   :  { %5023 = vst [vmem:[#allocation11_spill] sm:$0xff] %v3855_v3  ;;  %v3862_v5 = vpop.permute.xlu1 %1711  ;;  %v323_v10 = vmul.f32 %v3367_v57, %v3823_v43  ;;  %v4022_v20 = vpop.eup %3368  ;;  %v1643_v57 = vmax.f32 %v1631_v4, 1e-08  ;;  %v1584_v4 = vrot.slane %v453_v19, %v3834_v52  ;;  %v1649_v55 = vmax.f32 %v1637_v37, 1e-08 }
  0xc4   :  { %5024 = vst [vmem:[#allocation12_spill] sm:$0xff] %v3862_v5  ;;  %v318_v49 = vsel %vm317_vm3, %v3821_v42, %v316_v0  ;;  %v3371_v58 = vpop.eup %3370  ;;  %v4070_v0 = vsel %vm312_vm2, %v313_v9, %v311_v33  ;;  %v1650_v8 = vmax.f32 %v1638_v29, 1e-08  ;;  %v1647_v25 = vmax.f32 %v1635_v39, 1e-08 }
  0xc5   :  { %v325_v59 = vsel %vm324_vm5, %v3823_v43, %v323_v10  ;;  %5046 = vst [vmem:[#allocation34_spill] sm:$0xff] %v4070_v0  ;;  %v4082_v21 = vsel %vm319_vm4, %v320_v36, %v318_v49  ;;  %3374 = vrcp.f32 %v1643_v57  ;;  %v1588_v43 = vrot.slane %v460_v23, %v3834_v52 }
  0xc6   :  { %v3878_v15 = vpop.permute.xlu0 %2151  ;;  %5049 = vst [vmem:[#allocation37_spill] sm:$0xff] %v4082_v21  ;;  %v4088_v60 = vsel %vm326_vm6, %v327_v14, %v325_v59  ;;  %v1639_v9 = vmul.f32 %v1584_v4, %v4064_v50  ;;  %v1640_v42 = vmul.f32 %v1584_v4, %v4070_v0  ;;  %3376 = vrcp.f32 %v1648_v11  ;;  %v4114_v4 = vld [vmem:[%s4953_s4] sm:$0x3f] }
  0xc7   :  { %5025 = vst [vmem:[#allocation13_spill] sm:$0xff] %v3878_v15  ;;  %v3887_v17 = vpop.permute.xlu1 %1689  ;;  %5052 = vst [vmem:[#allocation40_spill] sm:$0xff] %v4088_v60  ;;  %v1641_v33 = vmul.f32 %v1588_v43, %v4082_v21  ;;  %v1642_v49 = vmul.f32 %v1588_v43, %v4088_v60  ;;  %3378 = vrcp.f32 %v1649_v55  ;;  %vm1770_vm7 = vcmask 64512  }
  0xc8   :  { %5027 = vst [vmem:[#allocation15_spill] sm:$0xff] %v3887_v17  ;;  %v1651_v59 = vmax.f32 %v1639_v9, 1e-08  ;;  %v1652_v37 = vmax.f32 %v1640_v42, 1e-08  ;;  %3380 = vrcp.f32 %v1650_v8  ;;  %v4122_v8 = vrot.slane %v4114_v4, 1 }
  0xc9   :  { %v1653_v39 = vmax.f32 %v1641_v33, 1e-08  ;;  %3382 = vrcp.f32 %v1647_v25  ;;  %v1654_v11 = vmax.f32 %v1642_v49, 1e-08  ;;  %vm170_vm8 = vcmask 1041409  }
  0xca   :  { %v3908_v27 = vpop.permute.xlu0 %1729  ;;  %3384 = vrcp.f32 %v1651_v59  ;;  %v4130_v59 = vrot.slane %v4114_v4, 4  ;;  %vm1463_vm9 = vcmask 1042434   ;;  %vm1465_vm10 = vcmask 1043459  }
  0xcb   :  { %v3916_v48 = vpop.permute.xlu1 %1722  ;;  %3386 = vrcp.f32 %v1652_v37  ;;  %v4136_v37 = vrot.slane %v4114_v4, 5  ;;  %vm1467_vm11 = vcmask 1044484   ;;  %vm1469_vm12 = vcmask 1045509  }
  0xcc   :  { %5029 = vst [vmem:[#allocation17_spill] sm:$0xff] %v3916_v48  ;;  %v3373_v9 = vpop.eup %3372  ;;  %3388 = vrcp.f32 %v1653_v39  ;;  %vm1860_vm13 = vcmask 62464   ;;  %vm5000_vm14 = vcmask 21504   ;;  %vm5001_vm15 = vcmask 17408  }
  0xcd   :  { %3390 = vrcp.f32 %v1654_v11  ;;  %vm96_vm2 = vcmask 124928   ;;  %vm83_vm3 = vcmask 123904  }
  0xce   :  { %v3936_v63 = vpop.permute.xlu0 %2162 }
  0xcf   :  { %v3943_v7 = vpop.permute.xlu1 %2155  ;;  %v3375_v33 = vpop.eup %3374 }
  0xd0   :  { %5030 = vst [vmem:[#allocation18_spill] sm:$0xff] %v3943_v7 }
  0xd2   :  { %v3966_v30 = vpop.permute.xlu0 %1740 }
  0xd3   :  { %v3970_v26 = vpop.permute.xlu1 %1733 }
  0xd6   :  { %v4004_v31 = vpop.permute.xlu0 %2140 }
  0xd7   :  { %5035 = vst [vmem:[#allocation23_spill] sm:$0xff] %v4004_v31  ;;  %v4012_v1 = vpop.permute.xlu1 %2166 }
  0xd8   :  { %5036 = vst [vmem:[#allocation24_spill] sm:$0xff] %v4012_v1 }
  0xd9   :  { %v4031_v24 = vpop.f32.mrb[0].mxu0 }
  0xda   :  { %5037 = vst [vmem:[#allocation25_spill] sm:$0xff] %v4031_v24  ;;  %v4041_v41 = vpop.permute.xlu0 %2173  ;;  %v4043_v12 = vpop.f32.mrb[0].mxu1 }
  0xdb   :  { %5039 = vst [vmem:[#allocation27_spill] sm:$0xff] %v4041_v41  ;;  %5040 = vst [vmem:[#allocation28_spill] sm:$0xff] %v4043_v12  ;;  %v4052_v6 = vpop.permute.xlu1 %1744  ;;  %v4054_v51 = vpop.f32.mrb[1].mxu0 }
  0xdc   :  { %5042 = vst [vmem:[#allocation30_spill] sm:$0xff] %v4052_v6  ;;  %5043 = vst [vmem:[#allocation31_spill] sm:$0xff] %v4054_v51  ;;  %v4057_v34 = vpop.f32.mrb[1].mxu1 }
  0xdd   :  { %5044 = vst [vmem:[#allocation32_spill] sm:$0xff] %v4057_v34 }
  0xde   :  { %v4074_v10 = vpop.permute.xlu0 %2564  ;;  %v4076_v38 = vpop.f32.mrb[2].mxu0 }
  0xdf   :  { %5047 = vst [vmem:[#allocation35_spill] sm:$0xff] %v4074_v10  ;;  %5048 = vst [vmem:[#allocation36_spill] sm:$0xff] %v4076_v38  ;;  %v4084_v45 = vpop.permute.xlu1 %2144  ;;  %v4086_v40 = vpop.f32.mrb[2].mxu1 }
  0xe0   :  { %5050 = vst [vmem:[#allocation38_spill] sm:$0xff] %v4084_v45  ;;  %5051 = vst [vmem:[#allocation39_spill] sm:$0xff] %v4086_v40  ;;  %v4092_v19 = vpop.f32.mrb[3].mxu1  ;;  %v4094_v22 = vpop.f32.mrb[3].mxu0 }
  0xe1   :  { %5053 = vst [vmem:[#allocation41_spill] sm:$0xff] %v4092_v19  ;;  %5054 = vst [vmem:[#allocation42_spill] sm:$0xff] %v4094_v22 }
  0xe2   :  { %v4107_v61 = vpop.permute.xlu0 %2184 }
  0xe3   :  { %v4099_v36 = vpop.permute.xlu1 %2177  ;;  %v4101_v57 = vpop.f32.mrb[4].mxu0 }
  0xe4   :  { %5055 = vst [vmem:[#allocation43_spill] sm:$0xff] %v4099_v36  ;;  %5056 = vst [vmem:[#allocation44_spill] sm:$0xff] %v4101_v57  ;;  %v4103_v23 = vpop.f32.mrb[4].mxu1  ;;  %v4105_v14 = vpop.f32.mrb[5].mxu0 }
  0xe5   :  { %5057 = vst [vmem:[#allocation45_spill] sm:$0xff] %v4103_v23  ;;  %5058 = vst [vmem:[#allocation46_spill] sm:$0xff] %v4105_v14  ;;  %v4109_v29 = vpop.f32.mrb[5].mxu1  ;;  %v4119_v23 = vrot.slane %v4114_v4, 2 }
  0xe6   :  { %5059 = vst [vmem:[#allocation47_spill] sm:$0xff] %v4109_v29  ;;  %v4125_v29 = vrot.slane %v4114_v4, 3  ;;  %v4138_v57 = vpop.permute.xlu0 %2575 }
  0xe7   :  { %v4116_v43 = vpop.permute.xlu1 %2568  ;;  %5061 = vst [vmem:[#allocation49_spill] sm:$0xff] %v4138_v57 }
  0xe8   :  { %5060 = vst [vmem:[#allocation48_spill] sm:$0xff] %v4116_v43  ;;  %v3301_v55 = vpop.f32.mrb[6].mxu0  ;;  %v3306_v42 = vpop.f32.mrb[6].mxu1 }
  0xe9   :  { %v4127_v25 = vmul.f32 %v3373_v9, %v3301_v55  ;;  %v1662_v49 = vmul.f32 %v3371_v58, %v3306_v42  ;;  %v1112_v40 = vpop.f32.mrb[7].mxu1  ;;  %v1034_v19 = vpop.f32.mrb[7].mxu0 }
  0xea   :  { %v1660_v24 = vmul.f32 %v4022_v20, %v1112_v40  ;;  %v4133_v51 = vmul.f32 %v3375_v33, %v1034_v19  ;;  %v3377_v33 = vpop.eup %3376 }
  0xeb   :  { %v1759_v9 = vmul.f32 %v3887_v17, %v4127_v25  ;;  %v2214_v58 = vmul.f32 %v4084_v45, %v4127_v25  ;;  %v1761_v39 = vmul.f32 %v3830_v47, %v1662_v49  ;;  %v2216_v55 = vmul.f32 %v3943_v7, %v1662_v49  ;;  %v4150_v42 = vpop.permute.xlu1 %2188 }
  0xec   :  { %v2629_v20 = vmul.f32 %v4116_v43, %v1662_v49  ;;  %v1760_v40 = vmul.f32 %v3827_v46, %v1660_v24  ;;  %v2215_v19 = vmul.f32 %v3878_v15, %v1660_v24  ;;  %v2628_v11 = vmul.f32 %v4074_v10, %v1660_v24  ;;  %v3379_v49 = vpop.eup %3378 }
  0xed   :  { %v1865_v17 = vsel %vm1770_vm7, %v1759_v9, -inf  ;;  %v2306_v14 = vsel %vm1770_vm7, %v2214_v58, -inf  ;;  %v1874_v45 = vsel %vm1770_vm7, %v1761_v39, -inf  ;;  %v2315_v47 = vsel %vm1770_vm7, %v2216_v55, -inf  ;;  %v3311_v7 = vpop.f32.mrb[8].mxu0  ;;  %v3316_v38 = vpop.f32.mrb[8].mxu1 }
  0xee   :  { %v2728_v43 = vsel %vm1770_vm7, %v2629_v20, -inf  ;;  %v1873_v15 = vsel %vm1770_vm7, %v1760_v40, -inf  ;;  %v2314_v24 = vsel %vm1770_vm7, %v2215_v19, -inf  ;;  %v2727_v10 = vsel %vm1770_vm7, %v2628_v11, -inf  ;;  %v1268_v46 = vpop.f32.mrb[9].mxu1  ;;  %v3381_v22 = vpop.eup %3380 }
  0xef   :  { %v1875_v9 = vmax.f32 %v1873_v15, %v1874_v45  ;;  %v2316_v12 = vmax.f32 %v2314_v24, %v2315_v47  ;;  %v2729_v58 = vmax.f32 %v2727_v10, %v2728_v43  ;;  %v1758_v39 = vmul.f32 %v3837_v54, %v4133_v51  ;;  %v4162_v55 = vpop.f32.mrb[9].mxu0  ;;  %v4164_v60 = vpop.eup %3382 }
  0xf0   :  { %v2213_v20 = vmul.f32 %v4004_v31, %v4133_v51  ;;  %v4168_v40 = vmul.f32 %v3377_v33, %v3311_v7  ;;  %v4170_v19 = vmul.f32 %v3381_v22, %v3316_v38  ;;  %v4172_v11 = vmul.f32 %v3379_v49, %v1268_v46  ;;  %v4174_v21 = vpop.eup %3384  ;;  %v4176_v45 = vpop.permute.xlu0 %2195 }
  0xf1   :  { %v1876_v47 = vrot.slane %v1875_v9, 4  ;;  %v2317_v15 = vrot.slane %v2316_v12, 4  ;;  %v2730_v10 = vrot.slane %v2729_v58, 4  ;;  %v1864_v43 = vsel %vm1770_vm7, %v1758_v39, -inf  ;;  %v3387_v24 = vpop.eup %3386  ;;  %v4186_v28 = vpop.permute.xlu1 %2579 }
  0xf2   :  { %v1866_v54 = vmax.f32 %v1864_v43, %v1865_v17  ;;  %v2305_v34 = vsel %vm1770_vm7, %v2213_v20, -inf  ;;  %v1763_v7 = vmul.f32 %v3862_v5, %v4168_v40  ;;  %v2218_v46 = vmul.f32 %v4012_v1, %v4168_v40  ;;  %v3321_v38 = vpop.f32.mrb[10].mxu0  ;;  %v3326_v22 = vpop.f32.mrb[10].mxu1  ;;  %5062 = vst [vmem:[#allocation50_spill] sm:$0xff] %v4186_v28 }
  0xf3   :  { %v4184_v33 = vpop.eup %3388  ;;  %v1877_v49 = vmax.f32 %v1875_v9, %v1876_v47  ;;  %v2318_v31 = vmax.f32 %v2316_v12, %v2317_v15  ;;  %v2731_v44 = vmax.f32 %v2729_v58, %v2730_v10  ;;  %v2307_v32 = vmax.f32 %v2305_v34, %v2306_v14  ;;  %v4188_v39 = vpop.f32.mrb[11].mxu1 }
  0xf4   :  { %v3391_v17 = vpop.eup %3390  ;;  %v1867_v20 = vrot.slane %v1866_v54, 4  ;;  %v1883_v43 = vsel %vm1770_vm7, %v1763_v7, -inf  ;;  %v2324_v5 = vsel %vm1770_vm7, %v2218_v46, -inf  ;;  %v1765_v1 = vmul.f32 %v3916_v48, %v4170_v19  ;;  %v4194_v53 = vpop.f32.mrb[11].mxu0 }
  0xf5   :  { %v1878_v0 = vrot.slane %v1877_v49, 2  ;;  %v2319_v9 = vrot.slane %v2318_v31, 2  ;;  %v2732_v12 = vrot.slane %v2731_v44, 2  ;;  %v2308_v58 = vrot.slane %v2307_v32, 4  ;;  %v4201_v48 = vpop.permute.xlu0 %2553  ;;  %v4207_v52 = vpop.permute.xlu1 %2199 }
  0xf6   :  { %v1868_v34 = vmax.f32 %v1866_v54, %v1867_v20  ;;  %v1892_v14 = vsel %vm1770_vm7, %v1765_v1, -inf  ;;  %v2220_v47 = vmul.f32 %v4099_v36, %v4170_v19  ;;  %v1764_v15 = vmul.f32 %v3855_v3, %v4172_v11  ;;  %5063 = vst [vmem:[#allocation51_spill] sm:$0xff] %v4201_v48  ;;  %5064 = vst [vmem:[#allocation52_spill] sm:$0xff] %v4207_v52 }
  0xf7   :  { %v1879_v10 = vmax.f32 %v1877_v49, %v1878_v0  ;;  %v2320_v7 = vmax.f32 %v2318_v31, %v2319_v9  ;;  %v2733_v46 = vmax.f32 %v2731_v44, %v2732_v12  ;;  %v2309_v50 = vmax.f32 %v2307_v32, %v2308_v58 }
  0xf8   :  { %v1869_v13 = vrot.slane %v1868_v34, 2  ;;  %v2333_v35 = vsel %vm1770_vm7, %v2220_v47, -inf  ;;  %v1891_v18 = vsel %vm1770_vm7, %v1764_v15, -inf  ;;  %v2219_v54 = vmul.f32 %v4041_v41, %v4172_v11 }
  0xf9   :  { %v1880_v1 = vrot.slane %v1879_v10, 1  ;;  %v2321_v20 = vrot.slane %v2320_v7, 1  ;;  %v2734_v36 = vrot.slane %v2733_v46, 1  ;;  %v2310_v16 = vrot.slane %v2309_v50, 2 }
  0xfa   :  { %v1870_v0 = vmax.f32 %v1868_v34, %v1869_v13  ;;  %v1893_v31 = vmax.f32 %v1891_v18, %v1892_v14  ;;  %v2332_v32 = vsel %vm1770_vm7, %v2219_v54, -inf  ;;  %v2626_v44 = vmul.f32 %v4201_v48, %v4133_v51 }
  0xfb   :  { %v4212_v49 = vmax.f32 %v1879_v10, %v1880_v1  ;;  %v4214_v9 = vmax.f32 %v2320_v7, %v2321_v20  ;;  %v4216_v12 = vmax.f32 %v2733_v46, %v2734_v36  ;;  %v2311_v58 = vmax.f32 %v2309_v50, %v2310_v16  ;;  %v4246_v20 = vpop.permute.xlu0 %2586 }
  0xfc   :  { %v1871_v47 = vrot.slane %v1870_v0, 1  ;;  %v1894_v15 = vrot.slane %v1893_v31, 4  ;;  %v2334_v41 = vmax.f32 %v2332_v32, %v2333_v35  ;;  %v4219_v3 = vsel %vm1770_vm7, %v2626_v44, -inf  ;;  %5065 = vst [vmem:[#allocation53_spill] sm:$0xff] %v4246_v20 }
  0xfd   :  { %v2312_v13 = vrot.slane %v2311_v58, 1  ;;  %v1664_v18 = vmul.f32 %v4164_v60, %v4162_v55  ;;  %v2631_v51 = vmul.f32 %v4186_v28, %v4168_v40  ;;  %v4225_v34 = vmul.f32 %v3387_v24, %v3321_v38  ;;  %v4236_v60 = vpop.permute.xlu1 %2557 }
  0xfe   :  { %v4227_v14 = vmax.f32 %v1870_v0, %v1871_v47  ;;  %v1895_v36 = vmax.f32 %v1893_v31, %v1894_v15  ;;  %v2335_v10 = vrot.slane %v2334_v41, 4  ;;  %v4229_v16 = vmul.f32 %v3391_v17, %v3326_v22 }
  0xff   :  { %v4231_v50 = vmax.f32 %v2311_v58, %v2312_v13  ;;  %v1762_v35 = vmul.f32 %v3842_v56, %v1664_v18  ;;  %v2217_v7 = vmul.f32 %v3936_v63, %v1664_v18  ;;  %v2630_v46 = vmul.f32 %v4138_v57, %v1664_v18 }
 0x100   :  { %v1896_v55 = vrot.slane %v1895_v36, 2  ;;  %v2336_v40 = vmax.f32 %v2334_v41, %v2335_v10  ;;  %v2737_v24 = vsel %vm1770_vm7, %v2631_v51, -inf  ;;  %v1767_v38 = vmul.f32 %v3970_v26, %v4225_v34 }
 0x101   :  { %v1882_v22 = vsel %vm1770_vm7, %v1762_v35, -inf  ;;  %v2323_v17 = vsel %vm1770_vm7, %v2217_v7, -inf  ;;  %v2736_v54 = vsel %vm1770_vm7, %v2630_v46, -inf  ;;  %v2222_v1 = vmul.f32 %v4150_v42, %v4225_v34  ;;  %v4262_v7 = vpop.permute.xlu1 %2590 }
 0x102   :  { %v4248_v0 = vmax.f32 %v1895_v36, %v1896_v55  ;;  %v2337_v31 = vrot.slane %v2336_v40, 2  ;;  %v1884_v41 = vmax.f32 %v1882_v22, %v1883_v43  ;;  %v2325_v32 = vmax.f32 %v2323_v17, %v2324_v5 }
 0x103   :  { %v2738_v44 = vmax.f32 %v2736_v54, %v2737_v24  ;;  %v1901_v58 = vsel %vm1770_vm7, %v1767_v38, -inf  ;;  %v2342_v47 = vsel %vm1770_vm7, %v2222_v1, -inf  ;;  %v1769_v15 = vmul.f32 %v4052_v6, %v4229_v16 }
 0x104   :  { %v4255_v18 = vmax.f32 %v2336_v40, %v2337_v31  ;;  %v1885_v51 = vrot.slane %v1884_v41, 4  ;;  %v2326_v10 = vrot.slane %v2325_v32, 4  ;;  %v1676_v5 = vmul.f32 %v4184_v33, %v4188_v39  ;;  %v4270_v33 = vpop.permute.xlu0 %2597 }
 0x105   :  { %v2739_v35 = vrot.slane %v2738_v44, 4  ;;  %v1910_v36 = vsel %vm1770_vm7, %v1769_v15, -inf  ;;  %v2632_v43 = vmul.f32 %v4246_v20, %v4172_v11  ;;  %v1672_v40 = vmul.f32 %v4174_v21, %v4194_v53  ;;  %v4281_v20 = vpop.permute.xlu1 %2601 }
 0x106   :  { %v1886_v55 = vmax.f32 %v1884_v41, %v1885_v51  ;;  %v2327_v24 = vmax.f32 %v2325_v32, %v2326_v10  ;;  %v1768_v22 = vmul.f32 %v3966_v30, %v1676_v5  ;;  %v2223_v17 = vmul.f32 %v4176_v45, %v1676_v5 }
 0x107   :  { %v2740_v38 = vmax.f32 %v2738_v44, %v2739_v35  ;;  %v2745_v54 = vsel %vm1770_vm7, %v2632_v43, -inf  ;;  %v1766_v1 = vmul.f32 %v3908_v27, %v1672_v40  ;;  %v2221_v31 = vmul.f32 %v4107_v61, %v1672_v40 }
 0x108   :  { %v1887_v39 = vrot.slane %v1886_v55, 2  ;;  %v2328_v11 = vrot.slane %v2327_v24, 2  ;;  %v1909_v32 = vsel %vm1770_vm7, %v1768_v22, -inf  ;;  %v2350_v53 = vsel %vm1770_vm7, %v2223_v17, -inf }
 0x109   :  { %v2741_v41 = vrot.slane %v2740_v38, 2  ;;  %v2224_v21 = vmul.f32 %v4207_v52, %v4229_v16  ;;  %v1911_v51 = vmax.f32 %v1909_v32, %v1910_v36  ;;  %v1900_v10 = vsel %vm1770_vm7, %v1766_v1, -inf  ;;  %v4284_v36 = vpop.permute.xlu0 %2608 }
 0x10a   :  { %v1888_v44 = vmax.f32 %v1886_v55, %v1887_v39  ;;  %v2329_v15 = vmax.f32 %v2327_v24, %v2328_v11  ;;  %v1902_v43 = vmax.f32 %v1900_v10, %v1901_v58  ;;  %v2341_v46 = vsel %vm1770_vm7, %v2221_v31, -inf }
 0x10b   :  { %v2742_v35 = vmax.f32 %v2740_v38, %v2741_v41  ;;  %v2351_v13 = vsel %vm1770_vm7, %v2224_v21, -inf  ;;  %v1912_v57 = vrot.slane %v1911_v51, 4  ;;  %v2343_v17 = vmax.f32 %v2341_v46, %v2342_v47 }
 0x10c   :  { %v1889_v28 = vrot.slane %v1888_v44, 1  ;;  %v2330_v22 = vrot.slane %v2329_v15, 1  ;;  %v1903_v6 = vrot.slane %v1902_v43, 4  ;;  %v2352_v52 = vmax.f32 %v2350_v53, %v2351_v13 }
 0x10d   :  { %v2743_v48 = vrot.slane %v2742_v35, 1  ;;  %v2634_v55 = vmul.f32 %v4270_v33, %v1672_v40  ;;  %v1913_v58 = vmax.f32 %v1911_v51, %v1912_v57  ;;  %v2344_v39 = vrot.slane %v2343_v17, 4 }
 0x10e   :  { %v1890_v24 = vmax.f32 %v1888_v44, %v1889_v28  ;;  %v4286_v38 = vmax.f32 %v2329_v15, %v2330_v22  ;;  %v1904_v1 = vmax.f32 %v1902_v43, %v1903_v6  ;;  %v2353_v31 = vrot.slane %v2352_v52, 4 }
 0x10f   :  { %v2744_v11 = vmax.f32 %v2742_v35, %v2743_v48  ;;  %v2754_v41 = vsel %vm1770_vm7, %v2634_v55, -inf  ;;  %v1914_v32 = vrot.slane %v1913_v58, 2  ;;  %v2345_v21 = vmax.f32 %v2343_v17, %v2344_v39  ;;  %v4297_v48 = vpop.permute.xlu1 %2612 }
 0x110   :  { %v2627_v47 = vmul.f32 %v4236_v60, %v4127_v25  ;;  %v2636_v13 = vmul.f32 %v4284_v36, %v1676_v5  ;;  %v1905_v28 = vrot.slane %v1904_v1, 2  ;;  %v2354_v40 = vmax.f32 %v2352_v52, %v2353_v31 }
 0x111   :  { %v4293_v46 = vmul.f32 %v2744_v11, %v4119_v23  ;;  %v2633_v57 = vmul.f32 %v4262_v7, %v4170_v19  ;;  %v2346_v6 = vrot.slane %v2345_v21, 2  ;;  %v2635_v25 = vmul.f32 %v4281_v20, %v4225_v34 }
 0x112   :  { %v2719_v53 = vsel %vm1770_vm7, %v2627_v47, -inf  ;;  %v2763_v44 = vsel %vm1770_vm7, %v2636_v13, -inf  ;;  %v1906_v5 = vmax.f32 %v1904_v1, %v1905_v28  ;;  %v2355_v15 = vrot.slane %v2354_v40, 2 }
 0x113   :  { %v2720_v51 = vmax.f32 %v4219_v3, %v2719_v53  ;;  %v2746_v52 = vsel %vm1770_vm7, %v2633_v57, -inf  ;;  %v2347_v10 = vmax.f32 %v2345_v21, %v2346_v6  ;;  %v2755_v35 = vsel %vm1770_vm7, %v2635_v25, -inf }
 0x114   :  { %v2747_v19 = vmax.f32 %v2745_v54, %v2746_v52  ;;  %v2637_v43 = vmul.f32 %v4297_v48, %v4229_v16  ;;  %v2356_v22 = vmax.f32 %v2354_v40, %v2355_v15  ;;  %v2756_v55 = vmax.f32 %v2754_v41, %v2755_v35 }
 0x115   :  { %v2721_v17 = vrot.slane %v2720_v51, 4  ;;  %v5066_v34 = vrot.slane %v4248_v0, 1  ;;  %v1907_v1 = vrot.slane %v1906_v5, 1  ;;  %v1915_v54 = vmax.f32 %v1913_v58, %v1914_v32 }
 0x116   :  { %v2748_v3 = vrot.slane %v2747_v19, 4  ;;  %v2764_v11 = vsel %vm1770_vm7, %v2637_v43, -inf  ;;  %v2757_v21 = vrot.slane %v2756_v55, 4  ;;  %v1930_v16 = vmul.f32 %v4227_v14, %v4114_v4 }
 0x117   :  { %v1899_v39 = vmax.f32 %v4248_v0, %v5066_v34  ;;  %v2722_v31 = vmax.f32 %v2720_v51, %v2721_v17  ;;  %v2765_v47 = vmax.f32 %v2763_v44, %v2764_v11  ;;  %v1908_v41 = vmax.f32 %v1906_v5, %v1907_v1 }
 0x118   :  { %v2749_v13 = vmax.f32 %v2747_v19, %v2748_v3  ;;  %v1916_v28 = vrot.slane %v1915_v54, 1  ;;  %v1931_v40 = vmul.f32 %v4122_v8, %v4212_v49  ;;  %v2758_v57 = vmax.f32 %v2756_v55, %v2757_v21 }
 0x119   :  { %v2723_v0 = vrot.slane %v2722_v31, 2  ;;  %v2766_v6 = vrot.slane %v2765_v47, 4  ;;  %v1932_v53 = vmul.f32 %v4119_v23, %v1890_v24  ;;  %v1933_v32 = vmul.f32 %v4125_v29, %v1899_v39 }
 0x11a   :  { %v2750_v25 = vrot.slane %v2749_v13, 2  ;;  %v1917_v58 = vmax.f32 %v1915_v54, %v1916_v28  ;;  %v1934_v44 = vmul.f32 %v4130_v59, %v1908_v41  ;;  %v2759_v51 = vrot.slane %v2758_v57, 2 }
 0x11b   :  { %v2724_v15 = vmax.f32 %v2722_v31, %v2723_v0  ;;  %v2767_v14 = vmax.f32 %v2765_v47, %v2766_v6  ;;  %v1942_v52 = vrot.slane %v1931_v40, 7  ;;  %v1944_v35 = vrot.slane %v1932_v53, 6 }
 0x11c   :  { %v2751_v5 = vmax.f32 %v2749_v13, %v2750_v25  ;;  %v1935_v19 = vmul.f32 %v4136_v37, %v1917_v58  ;;  %v1946_v49 = vrot.slane %v1933_v32, 5  ;;  %v2760_v17 = vmax.f32 %v2758_v57, %v2759_v51 }
 0x11d   :  { %v2725_v43 = vrot.slane %v2724_v15, 1  ;;  %v2768_v55 = vrot.slane %v2767_v14, 2  ;;  %v1943_v24 = vsel %vm170_vm8, %v1942_v52, %v1930_v16  ;;  %v1948_v39 = vrot.slane %v1934_v44, 4 }
 0x11e   :  { %v2752_v34 = vrot.slane %v2751_v5, 1  ;;  %v1945_v3 = vsel %vm1463_vm9, %v1944_v35, %v1943_v24  ;;  %v1950_v11 = vrot.slane %v1935_v19, 3  ;;  %v2761_v54 = vrot.slane %v2760_v17, 1 }
 0x11f   :  { %v2726_v1 = vmax.f32 %v2724_v15, %v2725_v43  ;;  %v2769_v31 = vmax.f32 %v2767_v14, %v2768_v55  ;;  %v1947_v21 = vsel %vm1465_vm10, %v1946_v49, %v1945_v3  ;;  %v5067_v41 = vrot.slane %v4255_v18, 1 }
 0x120   :  { %v2753_v47 = vmax.f32 %v2751_v5, %v2752_v34  ;;  %v1949_v13 = vsel %vm1467_vm11, %v1948_v39, %v1947_v21  ;;  %v2348_v40 = vrot.slane %v2347_v10, 1  ;;  %v2357_v57 = vrot.slane %v2356_v22, 1 }
 0x121   :  { %v2340_v28 = vmax.f32 %v4255_v18, %v5067_v41  ;;  %v2772_v16 = vmul.f32 %v2726_v1, %v4114_v4  ;;  %v1951_v0 = vsel %vm1469_vm12, %v1950_v11, %v1949_v13  ;;  %v2359_v6 = vmul.f32 %v4231_v50, %v4114_v4  ;;  %v3470_v13 = vld [vmem:[%s4950_s1 + $0x8] sm:$0xff] }
 0x122   :  { %v1953_v53 = vsel %vm1860_vm13, %v1951_v0, 0.0  ;;  %v2349_v25 = vmax.f32 %v2347_v10, %v2348_v40  ;;  %v2360_v58 = vmul.f32 %v4214_v9, %v4122_v8  ;;  %v2361_v32 = vmul.f32 %v4286_v38, %v4119_v23  ;;  %v3472_v0 = vld [vmem:[%s4950_s1 + $0x20] sm:$0xff] }
 0x123   :  { %1954 = vadd.xlane.f32.xlu0 %v1953_v53  ;;  %v2358_v18 = vmax.f32 %v2356_v22, %v2357_v57  ;;  %v2362_v44 = vmul.f32 %v2340_v28, %v4125_v29  ;;  %v2762_v15 = vmax.f32 %v2760_v17, %v2761_v54  ;;  %v2770_v51 = vrot.slane %v2769_v31, 1  ;;  %v3471_v28 = vld [vmem:[%s4950_s1 + $0x10] sm:$0xff]  ;;  %v3473_v53 = vld [vmem:[%s4950_s1] sm:$0xff] }
 0x124   :  { %v2363_v14 = vmul.f32 %v2349_v25, %v4130_v59  ;;  %v2371_v52 = vrot.slane %v2360_v58, 7  ;;  %v2373_v5 = vrot.slane %v2361_v32, 6  ;;  %v2773_v4 = vmul.f32 %v4216_v12, %v4122_v8 }
 0x125   :  { %v2364_v50 = vmul.f32 %v2358_v18, %v4136_v37  ;;  %v2375_v10 = vrot.slane %v2362_v44, 5  ;;  %v2771_v9 = vmax.f32 %v2769_v31, %v2770_v51  ;;  %v2775_v19 = vmul.f32 %v2753_v47, %v4125_v29  ;;  %v71_v31 = vld [vmem:[%s4960_s11] sm:$0x3]  ;;  %v3474_v18 = vld [vmem:[%s4950_s1 + $0x18] sm:$0xff]  ;;  %v3475_v51 = vld [vmem:[%s4950_s1 + $0x28] sm:$0xff] }
 0x126   :  { %v2372_v23 = vsel %vm170_vm8, %v2371_v52, %v2359_v6  ;;  %v2377_v38 = vrot.slane %v2363_v14, 4  ;;  %v2776_v22 = vmul.f32 %v2762_v15, %v4130_v59  ;;  %v2784_v35 = vrot.slane %v2773_v4, 7  ;;  %v72_v4 = vld [vmem:[%s4961_s12] sm:$0x3f] }
 0x127   :  { %v2374_v49 = vsel %vm1463_vm9, %v2373_v5, %v2372_v23  ;;  %v2379_v43 = vrot.slane %v2364_v50, 3  ;;  %v2777_v17 = vmul.f32 %v2771_v9, %v4136_v37  ;;  %v2786_v55 = vrot.slane %v4293_v46, 6 }
 0x128   :  { %v2376_v8 = vsel %vm1465_vm10, %v2375_v10, %v2374_v49  ;;  %v2785_v12 = vsel %vm170_vm8, %v2784_v35, %v2772_v16  ;;  %v2788_v24 = vrot.slane %v2775_v19, 5  ;;  %v2790_v34 = vrot.slane %v2776_v22, 4 }
 0x129   :  { %v2378_v29 = vsel %vm1467_vm11, %v2377_v38, %v2376_v8  ;;  %v2787_v3 = vsel %vm1463_vm9, %v2786_v55, %v2785_v12  ;;  %v2792_v39 = vrot.slane %v2777_v17, 3  ;;  %v1967_v21 = vrot.slane %v71_v31, %v3764_v62  ;;  %v5113_v62 = vld [vmem:[#allocation17_spill] sm:$0xff] }
 0x12a   :  { %v2380_v59 = vsel %vm1469_vm12, %v2379_v43, %v2378_v29  ;;  %v2789_v11 = vsel %vm1465_vm10, %v2788_v24, %v2787_v3  ;;  %v1960_v47 = vrot.slane %v71_v31, %v3772_v2  ;;  %v330_v41 = vmul.f32 %v3470_v13, %v3470_v13  ;;  %v74_v13 = vld [vmem:[%s4956_s7] sm:$0x7] }
 0x12b   :  { %v2382_v1 = vsel %vm1860_vm13, %v2380_v59, 0.0  ;;  %v2791_v37 = vsel %vm1467_vm11, %v2790_v34, %v2789_v11  ;;  %v331_v40 = vmul.f32 %v3471_v28, %v3471_v28  ;;  %v333_v57 = vmul.f32 %v3472_v0, %v3472_v0 }
 0x12c   :  { %2383 = vadd.xlane.f32.xlu1 %v2382_v1  ;;  %v2793_v46 = vsel %vm1469_vm12, %v2792_v39, %v2791_v37  ;;  %v338_v16 = vsel %vm208_vm0, %v330_v41, 0.0  ;;  %v329_v25 = vmul.f32 %v3473_v53, %v3473_v53  ;;  %v332_v44 = vmul.f32 %v3474_v18, %v3474_v18 }
 0x12d   :  { %v2795_v54 = vsel %vm1860_vm13, %v2793_v46, 0.0  ;;  %v341_v6 = vsel %vm208_vm0, %v331_v40, 0.0  ;;  %v347_v58 = vsel %vm208_vm0, %v333_v57, 0.0  ;;  %v334_v14 = vmul.f32 %v3475_v51, %v3475_v51 }
 0x12e   :  { %2796 = vadd.xlane.f32.xlu0 %v2795_v54  ;;  %v335_v32 = vsel %vm208_vm0, %v329_v25, 0.0  ;;  %v344_v15 = vsel %vm208_vm0, %v332_v44, 0.0 }
 0x12f   :  { %v350_v52 = vsel %vm208_vm0, %v334_v14, 0.0  ;;  %vm76_vm0 = vcmp.ge.f32.partialorder %v74_v13, 0.0 }
 0x13d   :  { %1969 = vbcast.lane.b32.xlu1 %v1967_v21, 256 }
 0x144   :  { %1962 = vbcast.lane.b32.xlu0 %v1960_v47, 256 }
 0x161   :  { %339 = vadd.xlane.f32.xlu1 %v338_v16 }
 0x163   :  { %342 = vadd.xlane.f32.xlu0 %v341_v6 }
 0x165   :  { %348 = vadd.xlane.f32.xlu1 %v347_v58  ;;  %v78_v58 = vmul.f32 0.01, %v74_v13 }
 0x167   :  { %336 = vadd.xlane.f32.xlu0 %v335_v32  ;;  %v75_v32 = vld [vmem:[%s4956_s7 + $0x4] sm:$0x7] }
 0x168   :  { %vm77_vm1 = vcmp.ge.f32.partialorder %v75_v32, 0.0 }
 0x16b   :  { %345 = vadd.xlane.f32.xlu0 %v344_v15 }
 0x16f   :  { %351 = vadd.xlane.f32.xlu0 %v350_v52 }
 0x1b0   :  { %v1955_v5 = vpop.xlane.xlu0 %1954 }
 0x1b1   :  { %v1988_v9 = vmul.f32 %v1955_v5, %v72_v4 }
 0x1b9   :  { %v2384_v50 = vpop.xlane.xlu1 %2383 }
 0x1ba   :  { %v2402_v19 = vmul.f32 %v2384_v50, %v72_v4  ;;  %v79_v50 = vmul.f32 0.01, %v75_v32 }
 0x1bb   :  { %v2797_v10 = vpop.xlane.xlu0 %2796 }
 0x1bc   :  { %v2815_v23 = vmul.f32 %v2797_v10, %v72_v4 }
 0x1bd   :  { %v4389_v38 = vpop.permute.xlu1 %1969 }
 0x1be   :  { %5068 = vst [vmem:[#allocation54_spill] sm:$0xff] %v4389_v38  ;;  %v1990_v22 = vmul.f32 %v1988_v9, %v4389_v38  ;;  %v2404_v35 = vmul.f32 %v2402_v19, %v4389_v38  ;;  %v2817_v49 = vmul.f32 %v2815_v23, %v4389_v38 }
 0x1bf   :  { %v4394_v43 = vpop.permute.xlu0 %1962 }
 0x1c0   :  { %5069 = vst [vmem:[#allocation55_spill] sm:$0xff] %v4394_v43  ;;  %v2825_v17 = vsel %vm5000_vm14, %v2817_v49, 0.0  ;;  %v1989_v55 = vmul.f32 %v1988_v9, %v4394_v43  ;;  %v2403_v8 = vmul.f32 %v2402_v19, %v4394_v43  ;;  %v2816_v12 = vmul.f32 %v2815_v23, %v4394_v43 }
 0x1c1   :  { %v2826_v24 = vrot.slane %v2825_v17, 4  ;;  %v2412_v34 = vsel %vm5000_vm14, %v2404_v35, 0.0  ;;  %v1998_v29 = vsel %vm5000_vm14, %v1990_v22, 0.0  ;;  %v4411_v23 = vsel %vm76_vm0, %v74_v13, %v78_v58 }
 0x1c2   :  { %v2405_v3 = vsel %vm5000_vm14, %v2403_v8, 0.0  ;;  %v2413_v39 = vrot.slane %v2412_v34, 4  ;;  %v1991_v59 = vsel %vm5000_vm14, %v1989_v55, 0.0  ;;  %v1999_v11 = vrot.slane %v1998_v29, 4  ;;  %5070 = vst [vmem:[#allocation56_spill] sm:$0xff] %v4411_v23 }
 0x1c3   :  { %v2827_v1 = vadd.f32 %v2826_v24, %v2825_v17  ;;  %v2406_v37 = vrot.slane %v2405_v3, 4  ;;  %v1992_v46 = vrot.slane %v1991_v59, 4  ;;  %v2818_v54 = vsel %vm5000_vm14, %v2816_v12, 0.0 }
 0x1c4   :  { %v2414_v31 = vadd.f32 %v2413_v39, %v2412_v34  ;;  %v2000_v21 = vadd.f32 %v1999_v11, %v1998_v29  ;;  %v2819_v47 = vrot.slane %v2818_v54, 4  ;;  %v94_v12 = vmul.f32 %v4411_v23, %v4411_v23  ;;  %v4438_v39 = vld [vmem:[%s4955_s6] sm:$0x3] }
 0x1c5   :  { %v2828_v41 = vrot.slane %v2827_v1, 2  ;;  %v2407_v28 = vadd.f32 %v2406_v37, %v2405_v3  ;;  %v1993_v40 = vadd.f32 %v1992_v46, %v1991_v59  ;;  %v4433_v3 = vsel %vm77_vm1, %v75_v32, %v79_v50 }
 0x1c6   :  { %v2415_v16 = vrot.slane %v2414_v31, 2  ;;  %v2001_v0 = vrot.slane %v2000_v21, 2  ;;  %v2820_v57 = vadd.f32 %v2819_v47, %v2818_v54  ;;  %5077 = vst [vmem:[#allocation63_spill] sm:$0xff] %v4433_v3  ;;  %v97_v37 = vsel %vm96_vm2, %v94_v12, 0.0 }
 0x1c7   :  { %v2829_v6 = vadd.f32 %v2828_v41, %v2827_v1  ;;  %v2408_v53 = vrot.slane %v2407_v28, 2  ;;  %v1994_v25 = vrot.slane %v1993_v40, 2  ;;  %v95_v46 = vmul.f32 %v4433_v3, %v4433_v3 }
 0x1c8   :  { %v2416_v18 = vadd.f32 %v2415_v16, %v2414_v31  ;;  %v2002_v44 = vadd.f32 %v2001_v0, %v2000_v21  ;;  %v2821_v15 = vrot.slane %v2820_v57, 2  ;;  %v82_v54 = vmul.f32 %v4438_v39, %v4438_v39 }
 0x1c9   :  { %v2409_v51 = vadd.f32 %v2408_v53, %v2407_v28  ;;  %v1995_v14 = vadd.f32 %v1994_v25, %v1993_v40  ;;  %v2830_v19 = vrot.slane %v2829_v6, 1  ;;  %v100_v21 = vsel %vm96_vm2, %v95_v46, 0.0 }
 0x1ca   :  { %v2417_v52 = vrot.slane %v2416_v18, 1  ;;  %v2003_v5 = vrot.slane %v2002_v44, 1  ;;  %v2822_v4 = vadd.f32 %v2821_v15, %v2820_v57  ;;  %v84_v47 = vsel %vm83_vm3, %v82_v54, 0.0 }
 0x1cb   :  { %v2410_v10 = vrot.slane %v2409_v51, 1  ;;  %v1996_v9 = vrot.slane %v1995_v14, 1  ;;  %v4431_v29 = vadd.f32 %v2830_v19, %v2829_v6 }
 0x1cc   :  { %v2823_v22 = vrot.slane %v2822_v4, 1  ;;  %v4415_v49 = vadd.f32 %v2417_v52, %v2416_v18  ;;  %v4419_v55 = vadd.f32 %v2003_v5, %v2002_v44 }
 0x1cd   :  { %v4413_v35 = vadd.f32 %v2410_v10, %v2409_v51  ;;  %v4417_v17 = vadd.f32 %v1996_v9, %v1995_v14  ;;  %5076 = vst [vmem:[#allocation62_spill] sm:$0xff] %v4431_v29  ;;  %v5078_v14 = vld [vmem:[#allocation9_spill] sm:$0xff]  ;;  %v5079_v9 = vld [vmem:[#allocation14_spill] sm:$0xff] }
 0x1ce   :  { %5072 = vst [vmem:[#allocation58_spill] sm:$0xff] %v4415_v49  ;;  %5074 = vst [vmem:[#allocation60_spill] sm:$0xff] %v4419_v55  ;;  %v4421_v8 = vadd.f32 %v2823_v22, %v2822_v4  ;;  %v5080_v22 = vld [vmem:[#allocation16_spill] sm:$0xff] }
 0x1cf   :  { %5071 = vst [vmem:[#allocation57_spill] sm:$0xff] %v4413_v35  ;;  %5073 = vst [vmem:[#allocation59_spill] sm:$0xff] %v4417_v17  ;;  %v2421_v24 = vsel %vm170_vm8, %v4415_v49, %v4413_v35  ;;  %v2007_v34 = vsel %vm170_vm8, %v4419_v55, %v4417_v17 }
 0x1d0   :  { %5075 = vst [vmem:[#allocation61_spill] sm:$0xff] %v4421_v8  ;;  %v2423_v59 = vsel %vm5001_vm15, %v2421_v24, -inf  ;;  %v2010_v11 = vsel %vm5001_vm15, %v2007_v34, -inf  ;;  %v2834_v1 = vsel %vm170_vm8, %v4431_v29, %v4421_v8  ;;  %v5116_v29 = vld [vmem:[#allocation45_spill] sm:$0xff] }
 0x1d1   :  { %2424 = vmax.xlane.f32.xlu0 %v2423_v59  ;;  %2011 = vmax.xlane.f32.xlu1 %v2010_v11  ;;  %v2836_v31 = vsel %vm5001_vm15, %v2834_v1, -inf }
 0x1d5   :  { %2837 = vmax.xlane.f32.xlu1 %v2836_v31  ;;  %98 = vadd.xlane.f32.xlu0 %v97_v37  ;;  %v5081_v31 = vld [vmem:[#allocation22_spill] sm:$0xff] }
 0x1d9   :  { %101 = vadd.xlane.f32.xlu1 %v100_v21  ;;  %85 = vadd.xlane.f32.xlu0 %v84_v47 }
 0x1ee   :  { %v340_v13 = vpop.xlane.xlu1 %339 }
 0x1ef   :  { %3392 = vrsqrt.f32 %v340_v13  ;;  %vm362_vm4 = vcmp.eq.f32.partialorder %v340_v13, inf  ;;  %v365_v57 = vand.u32 2147483648, %v340_v13  ;;  %vm364_vm5 = vcmp.eq.f32.partialorder %v340_v13, 0.0 }
 0x1f0   :  { %v343_v41 = vpop.xlane.xlu0 %342 }
 0x1f1   :  { %3394 = vrsqrt.f32 %v343_v41  ;;  %vm369_vm6 = vcmp.eq.f32.partialorder %v343_v41, inf  ;;  %v372_v25 = vand.u32 2147483648, %v343_v41  ;;  %vm371_vm0 = vcmp.eq.f32.partialorder %v343_v41, 0.0 }
 0x1f2   :  { %v349_v28 = vpop.xlane.xlu1 %348 }
 0x1f3   :  { %3396 = vrsqrt.f32 %v349_v28  ;;  %vm383_vm1 = vcmp.eq.f32.partialorder %v349_v28, inf  ;;  %v386_v51 = vand.u32 2147483648, %v349_v28  ;;  %vm385_vm3 = vcmp.eq.f32.partialorder %v349_v28, 0.0 }
 0x1f4   :  { %v337_v40 = vpop.xlane.xlu0 %336 }
 0x1f5   :  { %3398 = vrsqrt.f32 %v337_v40  ;;  %vm355_vm14 = vcmp.eq.f32.partialorder %v337_v40, inf  ;;  %vm357_vm15 = vcmp.eq.f32.partialorder %v337_v40, 0.0  ;;  %v358_v1 = vand.u32 2147483648, %v337_v40 }
 0x1f8   :  { %v4452_v16 = vpop.xlane.xlu0 %345 }
 0x1f9   :  { %v3393_v0 = vpop.eup %3392  ;;  %3400 = vrsqrt.f32 %v4452_v16 }
 0x1fa   :  { %v361_v6 = vmul.f32 %v3393_v0, %v340_v13 }
 0x1fb   :  { %v3395_v53 = vpop.eup %3394 }
 0x1fc   :  { %v363_v58 = vsel %vm362_vm4, %v340_v13, %v361_v6  ;;  %v368_v32 = vmul.f32 %v3395_v53, %v343_v41  ;;  %v4455_v18 = vpop.xlane.xlu0 %351  ;;  %vm376_vm4 = vcmp.eq.f32.partialorder %v4452_v16, inf  ;;  %v5082_v13 = vld [vmem:[#allocation19_spill] sm:$0xff]  ;;  %v5084_v53 = vld [vmem:[#allocation34_spill] sm:$0xff] }
 0x1fd   :  { %v3397_v44 = vpop.eup %3396  ;;  %v366_v15 = vsel %vm364_vm5, %v365_v57, %v363_v58  ;;  %3402 = vrsqrt.f32 %v4455_v18  ;;  %vm378_vm5 = vcmp.eq.f32.partialorder %v4452_v16, 0.0  ;;  %v5083_v57 = vld [vmem:[#allocation33_spill] sm:$0xff] }
 0x1fe   :  { %v1446_v52 = vrot.slane %v366_v15, %v5078_v14  ;;  %v382_v5 = vmul.f32 %v3397_v44, %v349_v28  ;;  %v370_v4 = vsel %vm369_vm6, %v343_v41, %v368_v32 }
 0x1ff   :  { %v3399_v50 = vpop.eup %3398  ;;  %v373_v10 = vsel %vm371_vm0, %v372_v25, %v370_v4 }
 0x200   :  { %v1513_v19 = vmul.f32 %v1446_v52, %v5079_v9  ;;  %v1514_v12 = vmul.f32 %v1446_v52, %v5080_v22  ;;  %v384_v24 = vsel %vm383_vm1, %v349_v28, %v382_v5  ;;  %v1450_v34 = vrot.slane %v373_v10, %v5078_v14 }
 0x201   :  { %v387_v59 = vsel %vm385_vm3, %v386_v51, %v384_v24  ;;  %v354_v11 = vmul.f32 %v3399_v50, %v337_v40  ;;  %v379_v28 = vand.u32 2147483648, %v4452_v16  ;;  %v393_v10 = vand.u32 2147483648, %v4455_v18 }
 0x202   :  { %v1525_v37 = vmax.f32 %v1513_v19, 1e-08  ;;  %v1526_v46 = vmax.f32 %v1514_v12, 1e-08  ;;  %v1458_v54 = vrot.slane %v387_v59, %v5078_v14  ;;  %v1515_v21 = vmul.f32 %v1450_v34, %v5081_v31  ;;  %v5086_v19 = vld [vmem:[#allocation20_spill] sm:$0xff]  ;;  %v5088_v31 = vld [vmem:[#allocation29_spill] sm:$0xff] }
 0x203   :  { %v3401_v47 = vpop.eup %3400  ;;  %v1516_v41 = vmul.f32 %v1450_v34, %v5082_v13  ;;  %v356_v0 = vsel %vm355_vm14, %v337_v40, %v354_v11  ;;  %vm390_vm14 = vcmp.eq.f32.partialorder %v4455_v18, inf  ;;  %v5085_v40 = vld [vmem:[#allocation21_spill] sm:$0xff]  ;;  %vm5142_vm3 = vcmask 21504  }
 0x204   :  { %3404 = vrcp.f32 %v1525_v37  ;;  %v1519_v6 = vmul.f32 %v1458_v54, %v5083_v57  ;;  %v1520_v25 = vmul.f32 %v1458_v54, %v5084_v53  ;;  %v1527_v58 = vmax.f32 %v1515_v21, 1e-08 }
 0x205   :  { %3406 = vrcp.f32 %v1526_v46  ;;  %v1528_v32 = vmax.f32 %v1516_v41, 1e-08  ;;  %v359_v44 = vsel %vm357_vm15, %v358_v1, %v356_v0  ;;  %v375_v15 = vmul.f32 %v3401_v47, %v4452_v16  ;;  %v5087_v46 = vld [vmem:[#allocation26_spill] sm:$0xff]  ;;  %v4496_v47 = vld [vmem:[%s4952_s3] sm:$0x3f] }
 0x206   :  { %v1531_v51 = vmax.f32 %v1519_v6, 1e-08  ;;  %v1532_v52 = vmax.f32 %v1520_v25, 1e-08  ;;  %3408 = vrcp.f32 %v1527_v58  ;;  %v1442_v5 = vrot.slane %v359_v44, %v5078_v14  ;;  %v5110_v6 = vld [vmem:[#allocation39_spill] sm:$0xff] }
 0x207   :  { %v3403_v4 = vpop.eup %3402  ;;  %3410 = vrcp.f32 %v1528_v32  ;;  %v377_v50 = vsel %vm376_vm4, %v4452_v16, %v375_v15  ;;  %vm392_vm15 = vcmp.eq.f32.partialorder %v4455_v18, 0.0  ;;  %v3501_v1 = vmov 1966171168   ;;  %v5089_v32 = vld [vmem:[#allocation32_spill] sm:$0xff]  ;;  %v5090_v15 = vld [vmem:[#allocation37_spill] sm:$0xff] }
 0x208   :  { %3412 = vrcp.f32 %v1531_v51  ;;  %v1511_v9 = vmul.f32 %v1442_v5, %v5085_v40  ;;  %v1512_v22 = vmul.f32 %v1442_v5, %v5086_v19  ;;  %v380_v12 = vsel %vm378_vm5, %v379_v28, %v377_v50  ;;  %v5092_v50 = vld [vmem:[#allocation28_spill] sm:$0xff] }
 0x209   :  { %3414 = vrcp.f32 %v1532_v52  ;;  %v1454_v24 = vrot.slane %v380_v12, %v5078_v14  ;;  %v389_v34 = vmul.f32 %v3403_v4, %v4455_v18  ;;  %v4486_v37 = vunpack.c.l.s4 %v3501_v1  ;;  %v5091_v52 = vld [vmem:[#allocation40_spill] sm:$0xff] }
 0x20a   :  { %v1523_v59 = vmax.f32 %v1511_v9, 1e-08  ;;  %v1524_v11 = vmax.f32 %v1512_v22, 1e-08  ;;  %v4501_v53 = vrot.slane %v4496_v47, 1  ;;  %v4507_v25 = vrot.slane %v4496_v47, 4 }
 0x20b   :  { %v1517_v54 = vmul.f32 %v1454_v24, %v5087_v46  ;;  %v1518_v21 = vmul.f32 %v1454_v24, %v5088_v31  ;;  %v391_v16 = vsel %vm390_vm14, %v4455_v18, %v389_v34  ;;  %v4504_v18 = vrot.slane %v4496_v47, 2  ;;  %v5093_v24 = vld [vmem:[#allocation42_spill] sm:$0xff]  ;;  %v5095_v46 = vld [vmem:[#allocation36_spill] sm:$0xff] }
 0x20c   :  { %3416 = vrcp.f32 %v1523_v59  ;;  %v394_v13 = vsel %vm392_vm15, %v393_v10, %v391_v16  ;;  %v4518_v40 = vrot.slane %v4496_v47, 3  ;;  %v4521_v9 = vrot.slane %v4496_v47, 5  ;;  %v5094_v59 = vld [vmem:[#allocation7_spill] sm:$0xff]  ;;  %v5096_v31 = vld [vmem:[#allocation8_spill] sm:$0xff]  ;;  %v5097_v16 = vld [vmem:[#allocation13_spill] sm:$0xff] }
 0x20d   :  { %3418 = vrcp.f32 %v1524_v11  ;;  %v1529_v41 = vmax.f32 %v1517_v54, 1e-08  ;;  %v1530_v0 = vmax.f32 %v1518_v21, 1e-08  ;;  %v1462_v28 = vrot.slane %v394_v13, %v5078_v14 }
 0x20e   :  { %v3405_v57 = vpop.eup %3404 }
 0x20f   :  { %v3407_v58 = vpop.eup %3406  ;;  %v4510_v44 = vmul.f32 %v3405_v57, %v5089_v32  ;;  %3420 = vrcp.f32 %v1529_v41  ;;  %v1521_v51 = vmul.f32 %v1462_v28, %v5090_v15  ;;  %v1522_v5 = vmul.f32 %v1462_v28, %v5091_v52  ;;  %v5098_v41 = vld [vmem:[#allocation18_spill] sm:$0xff] }
 0x210   :  { %v3409_v4 = vpop.eup %3408  ;;  %v4515_v10 = vmul.f32 %v3407_v58, %v5092_v50  ;;  %3422 = vrcp.f32 %v1530_v0  ;;  %v5099_v57 = vld [vmem:[#allocation46_spill] sm:$0xff] }
 0x211   :  { %v3411_v19 = vpop.eup %3410  ;;  %v1533_v22 = vmax.f32 %v1521_v51, 1e-08  ;;  %v1534_v12 = vmax.f32 %v1522_v5, 1e-08  ;;  %v4524_v34 = vmul.f32 %v3409_v4, %v5093_v24  ;;  %v1748_v11 = vmul.f32 %v5094_v59, %v4510_v44  ;;  %v5100_v51 = vld [vmem:[#allocation44_spill] sm:$0xff] }
 0x212   :  { %v3413_v1 = vpop.eup %3412  ;;  %v4529_v54 = vmul.f32 %v3411_v19, %v5095_v46  ;;  %v1749_v21 = vmul.f32 %v5096_v31, %v4515_v10  ;;  %v2203_v13 = vmul.f32 %v5097_v16, %v4510_v44  ;;  %v4537_v0 = vmul.f32 %v5098_v41, %v4515_v10  ;;  %v5101_v5 = vld [vmem:[#allocation12_spill] sm:$0xff] }
 0x213   :  { %v3415_v28 = vpop.eup %3414  ;;  %3424 = vrcp.f32 %v1533_v22  ;;  %v4540_v58 = vmul.f32 %v3413_v1, %v5099_v57  ;;  %v1750_v32 = vmul.f32 %v3842_v56, %v4524_v34  ;;  %v1780_v15 = vsel %vm1770_vm7, %v1748_v11, -inf  ;;  %v5102_v1 = vld [vmem:[#allocation24_spill] sm:$0xff]  ;;  %v5104_v57 = vld [vmem:[#allocation25_spill] sm:$0xff] }
 0x214   :  { %3426 = vrcp.f32 %v1534_v12  ;;  %v4546_v52 = vmul.f32 %v3415_v28, %v5100_v51  ;;  %v1751_v4 = vmul.f32 %v5101_v5, %v4529_v54  ;;  %v1781_v50 = vsel %vm1770_vm7, %v1749_v21, -inf  ;;  %v5103_v21 = vld [vmem:[#allocation31_spill] sm:$0xff]  ;;  %v5105_v5 = vld [vmem:[#allocation10_spill] sm:$0xff] }
 0x215   :  { %v1754_v19 = vmul.f32 %v3908_v27, %v4540_v58  ;;  %v1782_v22 = vmax.f32 %v1780_v15, %v1781_v50  ;;  %v1789_v24 = vsel %vm1770_vm7, %v1750_v32, -inf  ;;  %v4556_v56 = vmul.f32 %v3936_v63, %v4524_v34 }
 0x216   :  { %v3417_v59 = vpop.eup %3416  ;;  %v1755_v12 = vmul.f32 %v3970_v26, %v4546_v52  ;;  %v1790_v11 = vsel %vm1770_vm7, %v1751_v4, -inf  ;;  %v4563_v46 = vmul.f32 %v5102_v1, %v4529_v54  ;;  %v4567_v27 = vmul.f32 %v4107_v61, %v4540_v58 }
 0x217   :  { %v3419_v31 = vpop.eup %3418  ;;  %v4570_v16 = vmul.f32 %v3417_v59, %v5103_v21  ;;  %v1783_v63 = vrot.slane %v1782_v22, 4  ;;  %v1791_v41 = vmax.f32 %v1789_v24, %v1790_v11  ;;  %v1807_v28 = vsel %vm1770_vm7, %v1754_v19, -inf  ;;  %v5106_v11 = vld [vmem:[#allocation41_spill] sm:$0xff] }
 0x218   :  { %v4574_v26 = vmul.f32 %v3419_v31, %v5104_v57  ;;  %v1808_v32 = vsel %vm1770_vm7, %v1755_v12, -inf  ;;  %v4579_v15 = vmul.f32 %v4150_v42, %v4546_v52  ;;  %v4582_v61 = vsel %vm1770_vm7, %v2203_v13, -inf  ;;  %v5107_v12 = vld [vmem:[#allocation15_spill] sm:$0xff]  ;;  %v5109_v13 = vld [vmem:[#allocation38_spill] sm:$0xff] }
 0x219   :  { %v3421_v51 = vpop.eup %3420  ;;  %v1746_v4 = vmul.f32 %v5105_v5, %v4570_v16  ;;  %v1784_v50 = vmax.f32 %v1782_v22, %v1783_v63  ;;  %v1792_v24 = vrot.slane %v1791_v41, 4  ;;  %v1809_v59 = vmax.f32 %v1807_v28, %v1808_v32  ;;  %v5108_v42 = vld [vmem:[#allocation23_spill] sm:$0xff] }
 0x21a   :  { %v3423_v19 = vpop.eup %3422  ;;  %v4587_v1 = vmul.f32 %v3421_v51, %v5106_v11  ;;  %v1747_v31 = vmul.f32 %v5107_v12, %v4574_v26  ;;  %v2201_v21 = vmul.f32 %v5108_v42, %v4570_v16  ;;  %v2202_v57 = vmul.f32 %v5109_v13, %v4574_v26  ;;  %v5111_v32 = vld [vmem:[#allocation11_spill] sm:$0xff] }
 0x21b   :  { %v4596_v38 = vmul.f32 %v3423_v19, %v5110_v6  ;;  %v1771_v22 = vsel %vm1770_vm7, %v1746_v4, -inf  ;;  %v1785_v63 = vrot.slane %v1784_v50, 2  ;;  %v1793_v28 = vmax.f32 %v1791_v41, %v1792_v24  ;;  %v5112_v12 = vld [vmem:[#allocation27_spill] sm:$0xff] }
 0x21c   :  { %v1752_v51 = vmul.f32 %v5111_v32, %v4587_v1  ;;  %v1772_v5 = vsel %vm1770_vm7, %v1747_v31, -inf  ;;  %v1810_v11 = vrot.slane %v1809_v59, 4  ;;  %v2207_v43 = vmul.f32 %v5112_v12, %v4587_v1  ;;  %v5114_v4 = vld [vmem:[#allocation47_spill] sm:$0xff] }
 0x21d   :  { %v3425_v42 = vpop.eup %3424  ;;  %v1753_v13 = vmul.f32 %v5113_v62, %v4596_v38  ;;  %v1773_v3 = vmax.f32 %v1771_v22, %v1772_v5  ;;  %v1786_v6 = vmax.f32 %v1784_v50, %v1785_v63  ;;  %v1794_v19 = vrot.slane %v1793_v28, 2  ;;  %v5115_v31 = vld [vmem:[#allocation43_spill] sm:$0xff] }
 0x21e   :  { %v3427_v14 = vpop.eup %3426  ;;  %v4607_v8 = vmul.f32 %v3425_v42, %v5114_v4  ;;  %v1798_v41 = vsel %vm1770_vm7, %v1752_v51, -inf  ;;  %v1811_v24 = vmax.f32 %v1809_v59, %v1810_v11  ;;  %v2208_v32 = vmul.f32 %v5115_v31, %v4596_v38  ;;  %v5117_v59 = vld [vmem:[#allocation30_spill] sm:$0xff] }
 0x21f   :  { %v4613_v55 = vmul.f32 %v3427_v14, %v5116_v29  ;;  %v1774_v12 = vrot.slane %v1773_v3, 4  ;;  %v1787_v49 = vrot.slane %v1786_v6, 1  ;;  %v1795_v17 = vmax.f32 %v1793_v28, %v1794_v19  ;;  %v5118_v19 = vld [vmem:[#allocation52_spill] sm:$0xff] }
 0x220   :  { %v1756_v62 = vmul.f32 %v3966_v30, %v4607_v8  ;;  %v1799_v50 = vsel %vm1770_vm7, %v1753_v13, -inf  ;;  %v1812_v22 = vrot.slane %v1811_v24, 2  ;;  %v4620_v63 = vmul.f32 %v4176_v45, %v4607_v8 }
 0x221   :  { %v1757_v51 = vmul.f32 %v5117_v59, %v4613_v55  ;;  %v1775_v5 = vmax.f32 %v1773_v3, %v1774_v12  ;;  %v1788_v11 = vmax.f32 %v1786_v6, %v1787_v49  ;;  %v1796_v29 = vrot.slane %v1795_v17, 1 }
 0x222   :  { %v1800_v14 = vmax.f32 %v1798_v41, %v1799_v50  ;;  %v1813_v42 = vmax.f32 %v1811_v24, %v1812_v22  ;;  %v1816_v28 = vsel %vm1770_vm7, %v1756_v62, -inf  ;;  %v4627_v30 = vmul.f32 %v5118_v19, %v4613_v55 }
 0x223   :  { %v1776_v13 = vrot.slane %v1775_v5, 2  ;;  %v1797_v4 = vmax.f32 %v1795_v17, %v1796_v29  ;;  %v1817_v31 = vsel %vm1770_vm7, %v1757_v51, -inf  ;;  %v1838_v45 = vmul.f32 %v4501_v53, %v1788_v11 }
 0x224   :  { %v1801_v35 = vrot.slane %v1800_v14, 4  ;;  %v1814_v23 = vrot.slane %v1813_v42, 1  ;;  %v1818_v59 = vmax.f32 %v1816_v28, %v1817_v31  ;;  %v2225_v49 = vsel %vm1770_vm7, %v2201_v21, -inf }
 0x225   :  { %v1777_v3 = vmax.f32 %v1775_v5, %v1776_v13  ;;  %v1839_v6 = vmul.f32 %v4504_v18, %v1797_v4  ;;  %v1849_v41 = vrot.slane %v1838_v45, 7  ;;  %v2226_v24 = vsel %vm1770_vm7, %v2202_v57, -inf }
 0x226   :  { %v1802_v12 = vmax.f32 %v1800_v14, %v1801_v35  ;;  %v1815_v62 = vmax.f32 %v1813_v42, %v1814_v23  ;;  %v1819_v50 = vrot.slane %v1818_v59, 4  ;;  %v2227_v22 = vmax.f32 %v2225_v49, %v2226_v24 }
 0x227   :  { %v1778_v17 = vrot.slane %v1777_v3, 1  ;;  %v1851_v29 = vrot.slane %v1839_v6, 6  ;;  %v2235_v51 = vsel %vm1770_vm7, %v4537_v0, -inf  ;;  %v2243_v11 = vsel %vm1770_vm7, %v4556_v56, -inf }
 0x228   :  { %v1803_v28 = vrot.slane %v1802_v12, 2  ;;  %v1820_v21 = vmax.f32 %v1818_v59, %v1819_v50  ;;  %v1841_v5 = vmul.f32 %v4507_v25, %v1815_v62  ;;  %v2228_v19 = vrot.slane %v2227_v22, 4 }
 0x229   :  { %v1779_v13 = vmax.f32 %v1777_v3, %v1778_v17  ;;  %v2236_v57 = vmax.f32 %v4582_v61, %v2235_v51  ;;  %v2244_v23 = vsel %vm1770_vm7, %v4563_v46, -inf  ;;  %v2252_v35 = vsel %vm1770_vm7, %v2207_v43, -inf }
 0x22a   :  { %v1804_v14 = vmax.f32 %v1802_v12, %v1803_v28  ;;  %v1821_v42 = vrot.slane %v1820_v21, 2  ;;  %v1855_v4 = vrot.slane %v1841_v5, 4  ;;  %v2229_v0 = vmax.f32 %v2227_v22, %v2228_v19 }
 0x22b   :  { %v1837_v31 = vmul.f32 %v1779_v13, %v4496_v47  ;;  %v2237_v56 = vrot.slane %v2236_v57, 4  ;;  %v2245_v45 = vmax.f32 %v2243_v11, %v2244_v23  ;;  %v2253_v59 = vsel %vm1770_vm7, %v2208_v32, -inf }
 0x22c   :  { %v1805_v49 = vrot.slane %v1804_v14, 1  ;;  %v1822_v6 = vmax.f32 %v1820_v21, %v1821_v42  ;;  %v2230_v3 = vrot.slane %v2229_v0, 2  ;;  %v2254_v24 = vmax.f32 %v2252_v35, %v2253_v59 }
 0x22d   :  { %v1850_v61 = vsel %vm170_vm8, %v1849_v41, %v1837_v31  ;;  %v2238_v62 = vmax.f32 %v2236_v57, %v2237_v56  ;;  %v2246_v46 = vrot.slane %v2245_v45, 4  ;;  %v2261_v43 = vsel %vm1770_vm7, %v4567_v27, -inf }
 0x22e   :  { %v1806_v12 = vmax.f32 %v1804_v14, %v1805_v49  ;;  %v1823_v50 = vrot.slane %v1822_v6, 1  ;;  %v1852_v22 = vsel %vm1463_vm9, %v1851_v29, %v1850_v61  ;;  %v2231_v17 = vmax.f32 %v2229_v0, %v2230_v3 }
 0x22f   :  { %v2239_v51 = vrot.slane %v2238_v62, 2  ;;  %v2247_v11 = vmax.f32 %v2245_v45, %v2246_v46  ;;  %v2255_v28 = vrot.slane %v2254_v24, 4  ;;  %v2262_v32 = vsel %vm1770_vm7, %v4579_v15, -inf }
 0x230   :  { %v1824_v21 = vmax.f32 %v1822_v6, %v1823_v50  ;;  %v1840_v5 = vmul.f32 %v4518_v40, %v1806_v12  ;;  %v2232_v41 = vrot.slane %v2231_v17, 1  ;;  %v2263_v19 = vmax.f32 %v2261_v43, %v2262_v32 }
 0x231   :  { %v2240_v13 = vmax.f32 %v2238_v62, %v2239_v51  ;;  %v2248_v57 = vrot.slane %v2247_v11, 2  ;;  %v2256_v23 = vmax.f32 %v2254_v24, %v2255_v28  ;;  %v2270_v27 = vsel %vm1770_vm7, %v4620_v63, -inf }
 0x232   :  { %v1842_v29 = vmul.f32 %v4521_v9, %v1824_v21  ;;  %v1853_v35 = vrot.slane %v1840_v5, 5  ;;  %v2233_v14 = vmax.f32 %v2231_v17, %v2232_v41  ;;  %v2264_v42 = vrot.slane %v2263_v19, 4 }
 0x233   :  { %v2241_v0 = vrot.slane %v2240_v13, 1  ;;  %v2249_v31 = vmax.f32 %v2247_v11, %v2248_v57  ;;  %v2257_v56 = vrot.slane %v2256_v23, 2  ;;  %v2271_v15 = vsel %vm1770_vm7, %v4627_v30, -inf }
 0x234   :  { %v1854_v45 = vsel %vm1465_vm10, %v1853_v35, %v1852_v22  ;;  %v1857_v59 = vrot.slane %v1842_v29, 3  ;;  %v2265_v49 = vmax.f32 %v2263_v19, %v2264_v42  ;;  %v2272_v6 = vmax.f32 %v2270_v27, %v2271_v15  ;;  %v5120_v19 = vld [vmem:[#allocation35_spill] sm:$0xff]  ;;  %v5121_v27 = vld [vmem:[#allocation48_spill] sm:$0xff]  ;;  %v5122_v35 = vld [vmem:[#allocation49_spill] sm:$0xff] }
 0x235   :  { %v1856_v3 = vsel %vm1467_vm11, %v1855_v4, %v1854_v45  ;;  %v2242_v24 = vmax.f32 %v2240_v13, %v2241_v0  ;;  %v2250_v63 = vrot.slane %v2249_v31, 1  ;;  %v2258_v61 = vmax.f32 %v2256_v23, %v2257_v56  ;;  %v5119_v4 = vld [vmem:[#allocation51_spill] sm:$0xff] }
 0x236   :  { %v1858_v62 = vsel %vm1469_vm12, %v1857_v59, %v1856_v3  ;;  %v2266_v46 = vrot.slane %v2265_v49, 2  ;;  %v2273_v43 = vrot.slane %v2272_v6, 4  ;;  %v2279_v12 = vmul.f32 %v2233_v14, %v4496_v47 }
 0x237   :  { %v1861_v50 = vsel %vm1860_vm13, %v1858_v62, 0.0  ;;  %v2251_v17 = vmax.f32 %v2249_v31, %v2250_v63  ;;  %v2259_v30 = vrot.slane %v2258_v61, 1  ;;  %v2280_v22 = vmul.f32 %v2242_v24, %v4501_v53 }
 0x238   :  { %1862 = vadd.xlane.f32.xlu1 %v1861_v50  ;;  %v2267_v51 = vmax.f32 %v2265_v49, %v2266_v46  ;;  %v2274_v11 = vmax.f32 %v2272_v6, %v2273_v43  ;;  %v2614_v28 = vmul.f32 %v5119_v4, %v4570_v16  ;;  %v2615_v32 = vmul.f32 %v4236_v60, %v4574_v26  ;;  %v5123_v26 = vld [vmem:[#allocation50_spill] sm:$0xff] }
 0x239   :  { %v2260_v21 = vmax.f32 %v2258_v61, %v2259_v30  ;;  %v2281_v5 = vmul.f32 %v2251_v17, %v4504_v18  ;;  %v2291_v41 = vrot.slane %v2280_v22, 7  ;;  %v2616_v13 = vmul.f32 %v5120_v19, %v4510_v44  ;;  %v5124_v44 = vld [vmem:[#allocation53_spill] sm:$0xff] }
 0x23a   :  { %v2268_v57 = vrot.slane %v2267_v51, 1  ;;  %v2275_v23 = vrot.slane %v2274_v11, 2  ;;  %v2617_v29 = vmul.f32 %v5121_v27, %v4515_v10  ;;  %v2618_v14 = vmul.f32 %v5122_v35, %v4524_v34 }
 0x23b   :  { %v2282_v16 = vmul.f32 %v2260_v21, %v4518_v40  ;;  %v2292_v42 = vsel %vm170_vm8, %v2291_v41, %v2279_v12  ;;  %v2293_v60 = vrot.slane %v2281_v5, 6  ;;  %v2619_v0 = vmul.f32 %v5123_v26, %v4529_v54 }
 0x23c   :  { %v2269_v31 = vmax.f32 %v2267_v51, %v2268_v57  ;;  %v2276_v56 = vmax.f32 %v2274_v11, %v2275_v23  ;;  %v2620_v15 = vmul.f32 %v5124_v44, %v4587_v1  ;;  %v2621_v45 = vmul.f32 %v4262_v7, %v4596_v38 }
 0x23d   :  { %v2294_v10 = vsel %vm1463_vm9, %v2293_v60, %v2292_v42  ;;  %v2295_v59 = vrot.slane %v2282_v16, 5  ;;  %v2622_v34 = vmul.f32 %v4270_v33, %v4540_v58  ;;  %v2623_v49 = vmul.f32 %v4281_v20, %v4546_v52 }
 0x23e   :  { %v2277_v6 = vrot.slane %v2276_v56, 1  ;;  %v2283_v54 = vmul.f32 %v2269_v31, %v4507_v25  ;;  %v2624_v3 = vmul.f32 %v4284_v36, %v4607_v8  ;;  %v2625_v1 = vmul.f32 %v4297_v48, %v4613_v55  ;;  %v5125_v31 = vld [vmem:[#allocation5_spill] sm:$0xff] }
 0x23f   :  { %v2296_v7 = vsel %vm1465_vm10, %v2295_v59, %v2294_v10  ;;  %v2638_v38 = vsel %vm1770_vm7, %v2614_v28, -inf  ;;  %v2639_v24 = vsel %vm1770_vm7, %v2615_v32, -inf  ;;  %v2647_v33 = vsel %vm1770_vm7, %v2616_v13, -inf }
 0x240   :  { %v2278_v58 = vmax.f32 %v2276_v56, %v2277_v6  ;;  %v2297_v63 = vrot.slane %v2283_v54, 4  ;;  %v2640_v20 = vmax.f32 %v2638_v38, %v2639_v24  ;;  %v2648_v52 = vsel %vm1770_vm7, %v2617_v29, -inf }
 0x241   :  { %v2649_v61 = vmax.f32 %v2647_v33, %v2648_v52  ;;  %v2656_v62 = vsel %vm1770_vm7, %v2618_v14, -inf  ;;  %v2657_v36 = vsel %vm1770_vm7, %v2619_v0, -inf  ;;  %v2665_v48 = vsel %vm1770_vm7, %v2620_v15, -inf }
 0x242   :  { %v2284_v55 = vmul.f32 %v2278_v58, %v4521_v9  ;;  %v2298_v8 = vsel %vm1467_vm11, %v2297_v63, %v2296_v7  ;;  %v2641_v46 = vrot.slane %v2640_v20, 4  ;;  %v2658_v43 = vmax.f32 %v2656_v62, %v2657_v36 }
 0x243   :  { %v2650_v12 = vrot.slane %v2649_v61, 4  ;;  %v2666_v50 = vsel %vm1770_vm7, %v2621_v45, -inf  ;;  %v2674_v17 = vsel %vm1770_vm7, %v2622_v34, -inf  ;;  %v2675_v30 = vsel %vm1770_vm7, %v2623_v49, -inf }
 0x244   :  { %v2299_v22 = vrot.slane %v2284_v55, 3  ;;  %v2642_v51 = vmax.f32 %v2640_v20, %v2641_v46  ;;  %v2659_v11 = vrot.slane %v2658_v43, 4  ;;  %v2667_v4 = vmax.f32 %v2665_v48, %v2666_v50 }
 0x245   :  { %v2651_v28 = vmax.f32 %v2649_v61, %v2650_v12  ;;  %v2676_v32 = vmax.f32 %v2674_v17, %v2675_v30  ;;  %v2683_v21 = vsel %vm1770_vm7, %v2624_v3, -inf  ;;  %v2684_v5 = vsel %vm1770_vm7, %v2625_v1, -inf }
 0x246   :  { %v2300_v41 = vsel %vm1469_vm12, %v2299_v22, %v2298_v8  ;;  %v2643_v19 = vrot.slane %v2642_v51, 2  ;;  %v2660_v13 = vmax.f32 %v2658_v43, %v2659_v11  ;;  %v2668_v57 = vrot.slane %v2667_v4, 4 }
 0x247   :  { %v2302_v23 = vsel %vm1860_vm13, %v2300_v41, 0.0  ;;  %v2652_v27 = vrot.slane %v2651_v28, 2  ;;  %v2677_v29 = vrot.slane %v2676_v32, 4  ;;  %v2685_v35 = vmax.f32 %v2683_v21, %v2684_v5 }
 0x248   :  { %2303 = vadd.xlane.f32.xlu1 %v2302_v23  ;;  %v2644_v14 = vmax.f32 %v2642_v51, %v2643_v19  ;;  %v2661_v16 = vrot.slane %v2660_v13, 2  ;;  %v2669_v42 = vmax.f32 %v2667_v4, %v2668_v57  ;;  %v5126_v56 = vunpack.c.0.s8 %v4486_v37  ;;  %v5128_v19 = vld [vmem:[#allocation57_spill] sm:$0xff]  ;;  %v5129_v57 = vld [vmem:[#allocation59_spill] sm:$0xff] }
 0x249   :  { %v2653_v60 = vmax.f32 %v2651_v28, %v2652_v27  ;;  %v2678_v26 = vmax.f32 %v2676_v32, %v2677_v29  ;;  %v2686_v0 = vrot.slane %v2685_v35, 4  ;;  %v5130_v27 = vld [vmem:[#allocation58_spill] sm:$0xff] }
 0x24a   :  { %v4712_v44 = vsub.s32 %v5126_v56, %v5125_v31  ;;  %v2645_v15 = vrot.slane %v2644_v14, 1  ;;  %v2662_v45 = vmax.f32 %v2660_v13, %v2661_v16  ;;  %v2670_v10 = vrot.slane %v2669_v42, 2 }
 0x24b   :  { %v2654_v59 = vrot.slane %v2653_v60, 1  ;;  %v2679_v34 = vrot.slane %v2678_v26, 2  ;;  %v2687_v49 = vmax.f32 %v2685_v35, %v2686_v0 }
 0x24c   :  { %v2646_v6 = vmax.f32 %v2644_v14, %v2645_v15  ;;  %v2663_v54 = vrot.slane %v2662_v45, 1  ;;  %v2671_v3 = vmax.f32 %v2669_v42, %v2670_v10  ;;  %v4716_v24 = vrot.slane %v4438_v39, %v4712_v44  ;;  %v5131_v14 = vld [vmem:[#allocation60_spill] sm:$0xff]  ;;  %v5132_v15 = vld [vmem:[#allocation62_spill] sm:$0xff]  ;;  %v5133_v10 = vld [vmem:[#allocation61_spill] sm:$0xff] }
 0x24d   :  { %v2655_v1 = vmax.f32 %v2653_v60, %v2654_v59  ;;  %v2680_v7 = vmax.f32 %v2678_v26, %v2679_v34  ;;  %v2688_v38 = vrot.slane %v2687_v49, 2 }
 0x24e   :  { %v2664_v33 = vmax.f32 %v2662_v45, %v2663_v54  ;;  %v2672_v37 = vrot.slane %v2671_v3, 1  ;;  %v2692_v20 = vmul.f32 %v2646_v6, %v4496_v47  ;;  %v132_v36 = vrot.slane %v4716_v24, %v4712_v44 }
 0x24f   :  { %v2681_v58 = vrot.slane %v2680_v7, 1  ;;  %v2689_v63 = vmax.f32 %v2687_v49, %v2688_v38  ;;  %v2693_v52 = vmul.f32 %v2655_v1, %v4501_v53  ;;  %v125_v1 = vcombine.high %v4716_v24, %v4716_v24 }
 0x250   :  { %v2673_v61 = vmax.f32 %v2671_v3, %v2672_v37  ;;  %v2694_v62 = vmul.f32 %v2664_v33, %v4504_v18  ;;  %v143_v17 = vrot.slane %v132_v36, %v3772_v2 }
 0x251   :  { %v2682_v48 = vmax.f32 %v2680_v7, %v2681_v58  ;;  %v2690_v55 = vrot.slane %v2689_v63, 1  ;;  %v2704_v8 = vrot.slane %v2693_v52, 7  ;;  %v139_v52 = vrot.slane %v125_v1, %v4712_v44 }
 0x252   :  { %v2695_v39 = vmul.f32 %v2673_v61, %v4518_v40  ;;  %v2706_v46 = vrot.slane %v2694_v62, 6  ;;  %v5127_v40 = vld [vmem:[#allocation56_spill] sm:$0xff] }
 0x253   :  { %v2691_v43 = vmax.f32 %v2689_v63, %v2690_v55  ;;  %v2696_v12 = vmul.f32 %v2682_v48, %v4507_v25  ;;  %v2705_v50 = vsel %vm170_vm8, %v2704_v8, %v2692_v20  ;;  %v150_v4 = vmul.f32 %v143_v17, %v5127_v40 }
 0x254   :  { %v2707_v47 = vsel %vm1463_vm9, %v2706_v46, %v2705_v50  ;;  %v2708_v53 = vrot.slane %v2695_v39, 5 }
 0x255   :  { %v2697_v18 = vmul.f32 %v2691_v43, %v4521_v9  ;;  %v2710_v30 = vrot.slane %v2696_v12, 4  ;;  %v152_v32 = vsel %vm96_vm2, %v150_v4, 0.0 }
 0x256   :  { %v2709_v22 = vsel %vm1465_vm10, %v2708_v53, %v2707_v47  ;;  %v147_v47 = vrot.slane %v139_v52, %v3772_v2 }
 0x257   :  { %v2711_v51 = vsel %vm1467_vm11, %v2710_v30, %v2709_v22  ;;  %v2712_v11 = vrot.slane %v2697_v18, 3  ;;  %v5135_v18 = vld [vmem:[#allocation9_spill] sm:$0xff] }
 0x259   :  { %v2713_v28 = vsel %vm1469_vm12, %v2712_v11, %v2711_v51  ;;  %vm5134_vm12 = vcmask 17408  }
 0x25a   :  { %v2715_v25 = vsel %vm1860_vm13, %v2713_v28, 0.0  ;;  %vm5136_vm0 = vmmov %vm5134_vm12 }
 0x25b   :  { %2716 = vadd.xlane.f32.xlu1 %v2715_v25  ;;  %vm5138_vm1 = vmmov %vm5136_vm0 }
 0x25e   :  { %v2425_v21 = vpop.xlane.xlu0 %2424  ;;  %v2012_v5 = vpop.xlane.xlu1 %2011 }
 0x25f   :  { %v2427_v41 = vrot.slane %v2425_v21, 1  ;;  %v2430_v9 = vsub.f32 %v5128_v19, %v2425_v21  ;;  %v2014_v13 = vrot.slane %v2012_v5, 1  ;;  %153 = vadd.xlane.f32.xlu1 %v152_v32  ;;  %v2017_v23 = vsub.f32 %v5129_v57, %v2012_v5  ;;  %v5137_v32 = vld [vmem:[#allocation63_spill] sm:$0xff] }
 0x260   :  { %v151_v21 = vmul.f32 %v147_v47, %v5137_v32 }
 0x261   :  { %v2431_v29 = vsub.f32 %v5130_v27, %v2427_v41  ;;  %v2432_v35 = vmul.f32 1.442695, %v2430_v9  ;;  %v2018_v16 = vsub.f32 %v5131_v14, %v2014_v13  ;;  %v2019_v56 = vmul.f32 1.442695, %v2017_v23  ;;  %v5139_v23 = vld [vmem:[#allocation6_spill] sm:$0xff] }
 0x262   :  { %v2838_v42 = vpop.xlane.xlu1 %2837  ;;  %v99_v60 = vpop.xlane.xlu0 %98  ;;  %v155_v9 = vsel %vm96_vm2, %v151_v21, 0.0  ;;  %vm5143_vm2 = vmmov %vm5142_vm3 }
 0x263   :  { %v2434_v26 = vmul.f32 1.442695, %v2431_v29  ;;  %v2021_v0 = vmul.f32 1.442695, %v2018_v16  ;;  %v2840_v31 = vrot.slane %v2838_v42, 1  ;;  %3428 = vpow2.f32 %v2432_v35  ;;  %v5140_v16 = vld [vmem:[#allocation55_spill] sm:$0xff]  ;;  %vm5144_vm4 = vmmov %vm5143_vm2 }
 0x264   :  { %v2843_v59 = vsub.f32 %v5133_v10, %v2838_v42  ;;  %vm105_vm7 = vcmp.eq.f32.partialorder %v99_v60, inf  ;;  %v108_v63 = vand.u32 2147483648, %v99_v60  ;;  %vm107_vm9 = vcmp.eq.f32.partialorder %v99_v60, 0.0  ;;  %v3476_v35 = vld [vmem:[%s4961_s12] sm:$0x3f]  ;;  %vm5145_vm5 = vmmov %vm5143_vm2 }
 0x265   :  { %3430 = vpow2.f32 %v2434_v26  ;;  %v2844_v45 = vsub.f32 %v5132_v15, %v2840_v31  ;;  %vm5146_vm14 = vmmov %vm5143_vm2 }
 0x266   :  { %3432 = vpow2.f32 %v2021_v0  ;;  %v102_v49 = vpop.xlane.xlu1 %101  ;;  %v86_v6 = vpop.xlane.xlu0 %85  ;;  %v2845_v54 = vmul.f32 1.442695, %v2843_v59  ;;  %vm5147_vm15 = vmmov %vm5143_vm2 }
 0x267   :  { %v2847_v34 = vmul.f32 1.442695, %v2844_v45  ;;  %3434 = vrsqrt.f32 %v99_v60  ;;  %vm112_vm10 = vcmp.eq.f32.partialorder %v102_v49, inf  ;;  %vm114_vm11 = vcmp.eq.f32.partialorder %v102_v49, 0.0 }
 0x268   :  { %3436 = vpow2.f32 %v2019_v56  ;;  %v115_v36 = vand.u32 2147483648, %v102_v49  ;;  %vm89_vm13 = vcmp.eq.f32.partialorder %v86_v6, inf  ;;  %v92_v39 = vand.u32 2147483648, %v86_v6 }
 0x269   :  { %3438 = vpow2.f32 %v2847_v34  ;;  %vm91_vm6 = vcmp.eq.f32.partialorder %v86_v6, 0.0 }
 0x26a   :  { %3440 = vrsqrt.f32 %v102_v49 }
 0x26b   :  { %3442 = vrsqrt.f32 %v86_v6 }
 0x26c   :  { %3444 = vpow2.f32 %v2845_v54 }
 0x26d   :  { %v4741_v3 = vpop.eup %3428 }
 0x26f   :  { %v4745_v7 = vpop.eup %3430 }
 0x270   :  { %v4747_v38 = vpop.eup %3432  ;;  %v2438_v58 = vrot.slane %v4745_v7, 7 }
 0x271   :  { %v3435_v33 = vpop.eup %3434  ;;  %v2025_v37 = vrot.slane %v4747_v38, 7 }
 0x272   :  { %v4751_v20 = vpop.eup %3436  ;;  %v104_v61 = vmul.f32 %v3435_v33, %v99_v60  ;;  %v2439_v44 = vsel %vm170_vm8, %v2438_v58, %v4741_v3 }
 0x273   :  { %v4754_v62 = vpop.eup %3438  ;;  %v2026_v24 = vsel %vm170_vm8, %v2025_v37, %v4751_v20  ;;  %v2441_v51 = vsel %vm5136_vm0, %v2439_v44, 0.0 }
 0x274   :  { %v3441_v48 = vpop.eup %3440  ;;  %v2028_v55 = vsel %vm5134_vm12, %v2026_v24, 0.0  ;;  %v106_v8 = vsel %vm105_vm7, %v99_v60, %v104_v61  ;;  %v2851_v43 = vrot.slane %v4754_v62, 7  ;;  %v5141_v60 = vld [vmem:[#allocation54_spill] sm:$0xff]  ;;  %vm2056_vm7 = vcmask 18432   ;;  %vm5148_vm12 = vmmov %vm5136_vm0 }
 0x275   :  { %v3443_v46 = vpop.eup %3442  ;;  %2029 = vadd.xlane.f32.xlu0 %v2028_v55  ;;  %v111_v12 = vmul.f32 %v3441_v48, %v102_v49  ;;  %v109_v50 = vsel %vm107_vm9, %v108_v63, %v106_v8  ;;  %vm2972_vm9 = vcmask 256000  }
 0x276   :  { %v88_v53 = vmul.f32 %v3443_v46, %v86_v6  ;;  %v165_v30 = vrot.slane %v109_v50, %v5135_v18  ;;  %v4766_v22 = vpop.eup %3444 }
 0x277   :  { %v113_v17 = vsel %vm112_vm10, %v102_v49, %v111_v12  ;;  %v2852_v4 = vsel %vm170_vm8, %v2851_v43, %v4766_v22 }
 0x278   :  { %v90_v11 = vsel %vm89_vm13, %v86_v6, %v88_v53  ;;  %v116_v40 = vsel %vm114_vm11, %v115_v36, %v113_v17  ;;  %v2854_v41 = vsel %vm5138_vm1, %v2852_v4, 0.0  ;;  %vm5149_vm13 = vmmov %vm5136_vm0 }
 0x279   :  { %2442 = vadd.xlane.f32.xlu0 %v2441_v51  ;;  %v93_v28 = vsel %vm91_vm6, %v92_v39, %v90_v11  ;;  %v169_v25 = vrot.slane %v116_v40, %v5135_v18  ;;  %vm5150_vm6 = vmmov %vm5136_vm0 }
 0x27b   :  { %v171_v5 = vsel %vm170_vm8, %v169_v25, %v165_v30 }
 0x27c   :  { %v173_v19 = vmul.f32 %v171_v5, %v93_v28 }
 0x27d   :  { %2855 = vadd.xlane.f32.xlu0 %v2854_v41 }
 0x27e   :  { %v174_v13 = vmax.f32 %v173_v19, 1e-08 }
 0x280   :  { %v179_v57 = vrot.slane %v174_v13, %v3772_v2  ;;  %v186_v27 = vrot.slane %v174_v13, %v5139_v23 }
 0x281   :  { %156 = vadd.xlane.f32.xlu0 %v155_v9 }
 0x282   :  { %181 = vbcast.lane.b32.xlu1 %v179_v57, 256 }
 0x297   :  { %188 = vbcast.lane.b32.xlu0 %v186_v27, 256 }
 0x2c5   :  { %v1863_v29 = vpop.xlane.xlu1 %1862 }
 0x2c6   :  { %v1956_v14 = vmul.f32 %v3476_v35, %v1863_v29 }
 0x2c8   :  { %v1971_v42 = vmul.f32 %v5140_v16, %v1956_v14  ;;  %v1972_v26 = vmul.f32 %v5141_v60, %v1956_v14  ;;  %v3502_v14 = vmov 0  }
 0x2c9   :  { %3330 = vset.pattern.permute.xlu1 %v3502_v14  ;;  %3331 = vset.pattern.permute.xlu0 %v3502_v14 }
 0x2ca   :  { %v1974_v0 = vsel %vm5142_vm3, %v1971_v42, 0.0  ;;  %v1981_v31 = vsel %vm5143_vm2, %v1972_v26, 0.0 }
 0x2cb   :  { %v1975_v56 = vrot.slane %v1974_v0, 4  ;;  %v1982_v15 = vrot.slane %v1981_v31, 4 }
 0x2cd   :  { %v1983_v45 = vadd.f32 %v1982_v15, %v1981_v31  ;;  %v1976_v10 = vadd.f32 %v1975_v56, %v1974_v0 }
 0x2cf   :  { %v1984_v59 = vrot.slane %v1983_v45, 2  ;;  %v1977_v34 = vrot.slane %v1976_v10, 2 }
 0x2d1   :  { %v1985_v49 = vadd.f32 %v1984_v59, %v1983_v45  ;;  %v1978_v6 = vadd.f32 %v1977_v34, %v1976_v10 }
 0x2d3   :  { %v1986_v54 = vrot.slane %v1985_v49, 1  ;;  %v1979_v1 = vrot.slane %v1978_v6, 1 }
 0x2d5   :  { %v2304_v33 = vpop.xlane.xlu1 %2303  ;;  %v4786_v37 = vadd.f32 %v1986_v54, %v1985_v49  ;;  %v4788_v58 = vadd.f32 %v1979_v1, %v1978_v6 }
 0x2d6   :  { %v2385_v63 = vmul.f32 %v3476_v35, %v2304_v33 }
 0x2d7   :  { %2077 = vbcast.lane.b32.xlu0 %v4786_v37, 256  ;;  %2074 = vbcast.lane.b32.xlu1 %v4788_v58, 256 }
 0x2d8   :  { %v2386_v52 = vmul.f32 %v2385_v63, %v5140_v16  ;;  %v2387_v61 = vmul.f32 %v2385_v63, %v5141_v60 }
 0x2da   :  { %v2388_v24 = vsel %vm5144_vm4, %v2386_v52, 0.0  ;;  %v2395_v36 = vsel %vm5145_vm5, %v2387_v61, 0.0 }
 0x2db   :  { %v2389_v48 = vrot.slane %v2388_v24, 4  ;;  %v2396_v55 = vrot.slane %v2395_v36, 4 }
 0x2dd   :  { %v2397_v8 = vadd.f32 %v2396_v55, %v2395_v36  ;;  %v2390_v39 = vadd.f32 %v2389_v48, %v2388_v24 }
 0x2df   :  { %v2398_v46 = vrot.slane %v2397_v8, 2  ;;  %v2391_v44 = vrot.slane %v2390_v39, 2 }
 0x2e1   :  { %v2399_v43 = vadd.f32 %v2398_v46, %v2397_v8  ;;  %v2392_v12 = vadd.f32 %v2391_v44, %v2390_v39 }
 0x2e3   :  { %v2400_v50 = vrot.slane %v2399_v43, 1  ;;  %v2393_v47 = vrot.slane %v2392_v12, 1 }
 0x2e5   :  { %v4796_v53 = vadd.f32 %v2400_v50, %v2399_v43  ;;  %v4798_v17 = vadd.f32 %v2393_v47, %v2392_v12 }
 0x2e7   :  { %2490 = vbcast.lane.b32.xlu0 %v4796_v53, 256  ;;  %2487 = vbcast.lane.b32.xlu1 %v4798_v17, 256 }
 0x2e8   :  { %v2717_v30 = vpop.xlane.xlu1 %2716 }
 0x2e9   :  { %v2798_v51 = vmul.f32 %v3476_v35, %v2717_v30 }
 0x2eb   :  { %v2799_v11 = vmul.f32 %v2798_v51, %v5140_v16  ;;  %v2800_v40 = vmul.f32 %v2798_v51, %v5141_v60 }
 0x2ec   :  { %v154_v61 = vpop.xlane.xlu1 %153 }
 0x2ed   :  { %v2801_v4 = vsel %vm5146_vm14, %v2799_v11, 0.0  ;;  %v2808_v28 = vsel %vm5147_vm15, %v2800_v40, 0.0  ;;  %v3218_v40 = vld [vmem:[%s4958_s9 + $0x4] sm:$0x7] }
 0x2ee   :  { %v2802_v25 = vrot.slane %v2801_v4, 4  ;;  %v2809_v32 = vrot.slane %v2808_v28, 4 }
 0x2f0   :  { %v2810_v21 = vadd.f32 %v2809_v32, %v2808_v28  ;;  %v2803_v5 = vadd.f32 %v2802_v25, %v2801_v4  ;;  %v3222_v25 = vld [vmem:[%s4958_s9 + $0x10] sm:$0x7] }
 0x2f2   :  { %v2811_v41 = vrot.slane %v2810_v21, 2  ;;  %v2804_v19 = vrot.slane %v2803_v5, 2 }
 0x2f4   :  { %v2812_v9 = vadd.f32 %v2811_v41, %v2810_v21  ;;  %v2805_v13 = vadd.f32 %v2804_v19, %v2803_v5 }
 0x2f6   :  { %v2813_v57 = vrot.slane %v2812_v9, 1  ;;  %v2806_v27 = vrot.slane %v2805_v13, 1 }
 0x2f8   :  { %v2814_v29 = vadd.f32 %v2813_v57, %v2812_v9  ;;  %v2807_v35 = vadd.f32 %v2806_v27, %v2805_v13 }
 0x2fa   :  { %2903 = vbcast.lane.b32.xlu0 %v2814_v29, 256  ;;  %2900 = vbcast.lane.b32.xlu1 %v2807_v35, 256 }
 0x302   :  { %v2030_v16 = vpop.xlane.xlu0 %2029 }
 0x303   :  { %3446 = vrcp.f32 %v2030_v16  ;;  %v2032_v42 = vrot.slane %v2030_v16, 1 }
 0x306   :  { %v2443_v60 = vpop.xlane.xlu0 %2442 }
 0x307   :  { %v2445_v26 = vrot.slane %v2443_v60, 1  ;;  %3448 = vrcp.f32 %v2443_v60 }
 0x308   :  { %3450 = vrcp.f32 %v2032_v42 }
 0x309   :  { %3452 = vrcp.f32 %v2445_v26 }
 0x30a   :  { %v2856_v0 = vpop.xlane.xlu0 %2855 }
 0x30b   :  { %v2858_v31 = vrot.slane %v2856_v0, 1  ;;  %3454 = vrcp.f32 %v2856_v0  ;;  %v2039_v0 = vld [vmem:[%s4958_s9] sm:$0x7] }
 0x30d   :  { %v3447_v56 = vpop.eup %3446  ;;  %3456 = vrcp.f32 %v2858_v31 }
 0x30e   :  { %v2036_v15 = vmul.f32 %v3447_v56, %v4751_v20  ;;  %v157_v1 = vpop.xlane.xlu0 %156 }
 0x310   :  { %v2043_v45 = vrot.slane %v2036_v15, %v3772_v2 }
 0x311   :  { %v3449_v10 = vpop.eup %3448 }
 0x312   :  { %v3451_v59 = vpop.eup %3450  ;;  %2045 = vbcast.lane.b32.xlu1 %v2043_v45, 256  ;;  %v2449_v34 = vmul.f32 %v3449_v10, %v4741_v3  ;;  %v189_v55 = vpop.permute.xlu0 %188 }
 0x313   :  { %v3453_v49 = vpop.eup %3452  ;;  %v2038_v20 = vmul.f32 %v3451_v59, %v4747_v38  ;;  %3458 = vrcp.f32 %v189_v55  ;;  %v182_v38 = vpop.permute.xlu1 %181 }
 0x314   :  { %v2457_v6 = vrot.slane %v2449_v34, %v3772_v2  ;;  %v2451_v54 = vmul.f32 %v3453_v49, %v4745_v7  ;;  %3460 = vrcp.f32 %v182_v38  ;;  %v2510_v44 = vmul.f32 %v2449_v34, %v4798_v17 }
 0x315   :  { %v3455_v33 = vpop.eup %3454  ;;  %v2098_v7 = vmul.f32 %v2038_v20, %v4786_v37  ;;  %v2050_v8 = vrot.slane %v2038_v20, %v3772_v2 }
 0x316   :  { %2459 = vbcast.lane.b32.xlu1 %v2457_v6, 256  ;;  %v2464_v63 = vrot.slane %v2451_v54, %v3772_v2  ;;  %v2862_v52 = vmul.f32 %v3455_v33, %v4766_v22  ;;  %v2097_v22 = vmul.f32 %v2036_v15, %v4788_v58  ;;  %v2511_v46 = vmul.f32 %v2451_v54, %v4796_v53  ;;  %v3221_v6 = vld [vmem:[%s4958_s9 + $0xc] sm:$0x7] }
 0x317   :  { %v3457_v24 = vpop.eup %3456  ;;  %v2111_v39 = vrot.slane %v2098_v7, %v3772_v2  ;;  %v2517_v58 = vrot.slane %v2510_v44, %v3772_v2 }
 0x318   :  { %2466 = vbcast.lane.b32.xlu0 %v2464_v63, 256  ;;  %v2870_v36 = vrot.slane %v2862_v52, %v3772_v2  ;;  %v2864_v3 = vmul.f32 %v3457_v24, %v4754_v62  ;;  %v2104_v62 = vrot.slane %v2097_v22, %v3772_v2  ;;  %v2524_v37 = vrot.slane %v2511_v46, %v3772_v2  ;;  %v3225_v22 = vld [vmem:[%s4958_s9 + $0x18] sm:$0x7] }
 0x319   :  { %v2923_v12 = vmul.f32 %v2862_v52, %v2807_v35  ;;  %v3226_v35 = vld [vmem:[%s4958_s9 + $0x1c] sm:$0x7] }
 0x31a   :  { %2872 = vbcast.lane.b32.xlu1 %v2870_v36, 256  ;;  %v2877_v48 = vrot.slane %v2864_v3, %v3772_v2  ;;  %v2924_v43 = vmul.f32 %v2864_v3, %v2814_v29 }
 0x31b   :  { %v2930_v53 = vrot.slane %v2923_v12, %v3772_v2 }
 0x31c   :  { %2879 = vbcast.lane.b32.xlu0 %v2877_v48, 256  ;;  %v2937_v47 = vrot.slane %v2924_v43, %v3772_v2 }
 0x31d   :  { %v3459_v50 = vpop.eup %3458 }
 0x31e   :  { %2052 = vbcast.lane.b32.xlu1 %v2050_v8, 256  ;;  %v3461_v30 = vpop.eup %3460  ;;  %v195_v51 = vmul.f32 %v3459_v50, %v157_v1 }
 0x31f   :  { %v193_v11 = vmul.f32 %v3461_v30, %v154_v61 }
 0x320   :  { %2113 = vbcast.lane.b32.xlu0 %v2111_v39, 256 }
 0x322   :  { %2106 = vbcast.lane.b32.xlu1 %v2104_v62, 256 }
 0x324   :  { %2526 = vbcast.lane.b32.xlu0 %v2524_v37, 256 }
 0x326   :  { %2519 = vbcast.lane.b32.xlu1 %v2517_v58, 256 }
 0x328   :  { %2939 = vbcast.lane.b32.xlu0 %v2937_v47, 256 }
 0x32a   :  { %2932 = vbcast.lane.b32.xlu1 %v2930_v53, 256 }
 0x32c   :  { %2967 = vperm.xlu0 %3331, %v195_v51  }
 0x32e   :  { %2962 = vperm.xlu1 %3330, %v193_v11  }
 0x349   :  { %v2075_v17 = vpop.permute.xlu1 %2074  ;;  %v2078_v4 = vpop.permute.xlu0 %2077 }
 0x34a   :  { %v2080_v28 = vmul.f32 %v3218_v40, %v2078_v4  ;;  %v2079_v21 = vmul.f32 %v3218_v40, %v2075_v17 }
 0x34c   :  { %v2088_v5 = vsel %vm2056_vm7, %v2080_v28, 0.0  ;;  %v2081_v9 = vsel %vm2056_vm7, %v2079_v21, 0.0 }
 0x34d   :  { %v2089_v13 = vrot.slane %v2088_v5, 4  ;;  %v2082_v29 = vrot.slane %v2081_v9, 4 }
 0x34f   :  { %v2090_v42 = vadd.f32 %v2089_v13, %v2088_v5  ;;  %v2083_v31 = vadd.f32 %v2082_v29, %v2081_v9 }
 0x351   :  { %v2091_v59 = vrot.slane %v2090_v42, 2  ;;  %v2084_v54 = vrot.slane %v2083_v31, 2 }
 0x353   :  { %v2092_v24 = vadd.f32 %v2091_v59, %v2090_v42  ;;  %v2085_v38 = vadd.f32 %v2084_v54, %v2083_v31 }
 0x355   :  { %v2093_v12 = vrot.slane %v2092_v24, 1  ;;  %v2086_v40 = vrot.slane %v2085_v38, 1 }
 0x357   :  { %v4861_v9 = vadd.f32 %v2093_v12, %v2092_v24  ;;  %v2087_v42 = vadd.f32 %v2086_v40, %v2085_v38  ;;  %v3227_v38 = vld [vmem:[%s4958_s9 + $0x20] sm:$0x7] }
 0x359   :  { %v2488_v32 = vpop.permute.xlu1 %2487  ;;  %v2491_v41 = vpop.permute.xlu0 %2490 }
 0x35a   :  { %v2492_v19 = vmul.f32 %v3222_v25, %v2488_v32  ;;  %v2493_v57 = vmul.f32 %v3222_v25, %v2491_v41 }
 0x35c   :  { %v2494_v27 = vsel %vm2056_vm7, %v2492_v19, 0.0  ;;  %v2501_v60 = vsel %vm2056_vm7, %v2493_v57, 0.0  ;;  %v3219_v19 = vld [vmem:[%s4958_s9 + $0x8] sm:$0x7] }
 0x35d   :  { %v2495_v26 = vrot.slane %v2494_v27, 4  ;;  %v2502_v45 = vrot.slane %v2501_v60, 4 }
 0x35f   :  { %v2496_v34 = vadd.f32 %v2495_v26, %v2494_v27  ;;  %v2503_v52 = vadd.f32 %v2502_v45, %v2501_v60 }
 0x361   :  { %v2497_v36 = vrot.slane %v2496_v34, 2  ;;  %v2504_v62 = vrot.slane %v2503_v52, 2 }
 0x363   :  { %v2498_v58 = vadd.f32 %v2497_v36, %v2496_v34  ;;  %v4856_v32 = vadd.f32 %v2504_v62, %v2503_v52 }
 0x365   :  { %v2499_v13 = vrot.slane %v2498_v58, 1 }
 0x367   :  { %v4869_v34 = vadd.f32 %v2499_v13, %v2498_v58 }
 0x36c   :  { %v2904_v14 = vpop.permute.xlu0 %2903  ;;  %v2901_v16 = vpop.permute.xlu1 %2900 }
 0x36d   :  { %v2906_v56 = vmul.f32 %v3226_v35, %v2904_v14  ;;  %v2905_v15 = vmul.f32 %v3226_v35, %v2901_v16 }
 0x36f   :  { %v2914_v1 = vsel %vm2056_vm7, %v2906_v56, 0.0  ;;  %v2907_v33 = vsel %vm2056_vm7, %v2905_v15, 0.0  ;;  %v2506_v56 = vrot.slane %v4856_v32, 1 }
 0x370   :  { %v2915_v48 = vrot.slane %v2914_v1, 4  ;;  %v2908_v7 = vrot.slane %v2907_v33, 4 }
 0x372   :  { %v2916_v30 = vadd.f32 %v2915_v48, %v2914_v1  ;;  %v2909_v53 = vadd.f32 %v2908_v7, %v2907_v33 }
 0x374   :  { %v2917_v27 = vrot.slane %v2916_v30, 2  ;;  %v2910_v29 = vrot.slane %v2909_v53, 2 }
 0x376   :  { %v4872_v1 = vadd.f32 %v2917_v27, %v2916_v30  ;;  %v4874_v33 = vadd.f32 %v2910_v29, %v2909_v53 }
 0x384   :  { %v2046_v10 = vpop.permute.xlu1 %2045 }
 0x385   :  { %v2054_v49 = vmul.f32 %v2046_v10, %v2039_v0 }
 0x387   :  { %v2057_v63 = vsel %vm2056_vm7, %v2054_v49, 0.0 }
 0x388   :  { %v2058_v20 = vrot.slane %v2057_v63, 4  ;;  %v2460_v61 = vpop.permute.xlu1 %2459 }
 0x389   :  { %v2468_v3 = vmul.f32 %v3221_v6, %v2460_v61 }
 0x38a   :  { %v2059_v55 = vadd.f32 %v2058_v20, %v2057_v63  ;;  %v2467_v8 = vpop.permute.xlu0 %2466 }
 0x38b   :  { %v2470_v39 = vsel %vm2056_vm7, %v2468_v3, 0.0  ;;  %v2469_v46 = vmul.f32 %v3221_v6, %v2467_v8 }
 0x38c   :  { %v2060_v44 = vrot.slane %v2059_v55, 2  ;;  %v2471_v37 = vrot.slane %v2470_v39, 4  ;;  %v2873_v43 = vpop.permute.xlu1 %2872 }
 0x38d   :  { %v2477_v50 = vsel %vm2056_vm7, %v2469_v46, 0.0  ;;  %v2881_v47 = vmul.f32 %v3225_v22, %v2873_v43 }
 0x38e   :  { %v2472_v51 = vadd.f32 %v2471_v37, %v2470_v39  ;;  %v2478_v11 = vrot.slane %v2477_v50, 4  ;;  %v2880_v17 = vpop.permute.xlu0 %2879  ;;  %v2061_v4 = vadd.f32 %v2060_v44, %v2059_v55 }
 0x38f   :  { %v2883_v28 = vsel %vm2056_vm7, %v2881_v47, 0.0  ;;  %v2882_v25 = vmul.f32 %v3225_v22, %v2880_v17 }
 0x390   :  { %v2473_v21 = vrot.slane %v2472_v51, 2  ;;  %v2479_v5 = vadd.f32 %v2478_v11, %v2477_v50  ;;  %v2053_v41 = vpop.permute.xlu1 %2052  ;;  %v2884_v35 = vrot.slane %v2883_v28, 4  ;;  %v2062_v60 = vrot.slane %v2061_v4, 1 }
 0x391   :  { %v2055_v57 = vmul.f32 %v2053_v41, %v2039_v0  ;;  %v2890_v14 = vsel %vm2056_vm7, %v2882_v25, 0.0  ;;  %v3223_v0 = vld [vmem:[%s4958_s9 + $0x14] sm:$0x7] }
 0x392   :  { %v2114_v16 = vpop.permute.xlu0 %2113  ;;  %v2474_v15 = vadd.f32 %v2473_v21, %v2472_v51  ;;  %v2480_v45 = vrot.slane %v2479_v5, 2  ;;  %v2891_v49 = vrot.slane %v2890_v14, 4  ;;  %v2885_v63 = vadd.f32 %v2884_v35, %v2883_v28 }
 0x393   :  { %v2064_v26 = vsel %vm2056_vm7, %v2055_v57, 0.0  ;;  %v2116_v31 = vmul.f32 %v3219_v19, %v2114_v16  ;;  %v2063_v61 = vadd.f32 %v2062_v60, %v2061_v4 }
 0x394   :  { %v2065_v10 = vrot.slane %v2064_v26, 4  ;;  %v2107_v59 = vpop.permute.xlu1 %2106  ;;  %v2475_v48 = vrot.slane %v2474_v15, 1  ;;  %v2481_v7 = vadd.f32 %v2480_v45, %v2479_v5  ;;  %v2892_v39 = vadd.f32 %v2891_v49, %v2890_v14 }
 0x395   :  { %v2124_v6 = vsel %vm2056_vm7, %v2116_v31, 0.0  ;;  %v2115_v54 = vmul.f32 %v3219_v19, %v2107_v59  ;;  %v2886_v37 = vrot.slane %v2885_v63, 2  ;;  %v2095_v51 = vadd.f32 %v2087_v42, %v2063_v61 }
 0x396   :  { %v2066_v52 = vadd.f32 %v2065_v10, %v2064_v26  ;;  %v2527_v20 = vpop.permute.xlu0 %2526  ;;  %v2125_v24 = vrot.slane %v2124_v6, 4  ;;  %v2893_v25 = vrot.slane %v2892_v39, 2  ;;  %v2476_v45 = vadd.f32 %v2475_v48, %v2474_v15 }
 0x397   :  { %v2117_v36 = vsel %vm2056_vm7, %v2115_v54, 0.0  ;;  %v2529_v3 = vmul.f32 %v3223_v0, %v2527_v20  ;;  %v2887_v19 = vadd.f32 %v2886_v37, %v2885_v63  ;;  %v2482_v10 = vrot.slane %v2481_v7, 1 }
 0x398   :  { %v2067_v55 = vrot.slane %v2066_v52, 2  ;;  %v2118_v8 = vrot.slane %v2117_v36, 4  ;;  %v2520_v22 = vpop.permute.xlu1 %2519  ;;  %v2126_v46 = vadd.f32 %v2125_v24, %v2124_v6  ;;  %v2894_v59 = vadd.f32 %v2893_v25, %v2892_v39 }
 0x399   :  { %v2537_v62 = vsel %vm2056_vm7, %v2529_v3, 0.0  ;;  %v2528_v44 = vmul.f32 %v3223_v0, %v2520_v22  ;;  %v2888_v49 = vrot.slane %v2887_v19, 1  ;;  %v2483_v22 = vadd.f32 %v2482_v10, %v2481_v7 }
 0x39a   :  { %v2068_v43 = vadd.f32 %v2067_v55, %v2066_v52  ;;  %v2119_v12 = vadd.f32 %v2118_v8, %v2117_v36  ;;  %v2538_v58 = vrot.slane %v2537_v62, 4  ;;  %v2940_v50 = vpop.permute.xlu0 %2939  ;;  %v2127_v47 = vrot.slane %v2126_v46, 2 }
 0x39b   :  { %v2530_v30 = vsel %vm2056_vm7, %v2528_v44, 0.0  ;;  %v2942_v53 = vmul.f32 %v3227_v38, %v2940_v50  ;;  %v2912_v52 = vrot.slane %v4874_v33, 1  ;;  %v2889_v48 = vadd.f32 %v2888_v49, %v2887_v19 }
 0x39c   :  { %v2069_v11 = vrot.slane %v2068_v43, 1  ;;  %v2120_v17 = vrot.slane %v2119_v12, 2  ;;  %v2539_v40 = vadd.f32 %v2538_v58, %v2537_v62  ;;  %v2531_v4 = vrot.slane %v2530_v30, 4  ;;  %v2933_v28 = vpop.permute.xlu1 %2932 }
 0x39d   :  { %v2128_v21 = vadd.f32 %v2127_v47, %v2126_v46  ;;  %v2950_v5 = vsel %vm2056_vm7, %v2942_v53, 0.0  ;;  %v2941_v41 = vmul.f32 %v3227_v38, %v2933_v28  ;;  %v2895_v38 = vrot.slane %v2894_v59, 1 }
 0x39e   :  { %v2121_v13 = vadd.f32 %v2120_v17, %v2119_v12  ;;  %v2540_v57 = vrot.slane %v2539_v40, 2  ;;  %v2532_v27 = vadd.f32 %v2531_v4, %v2530_v30  ;;  %v2070_v29 = vadd.f32 %v2069_v11, %v2068_v43 }
 0x39f   :  { %v2129_v35 = vrot.slane %v2128_v21, 1  ;;  %v2951_v14 = vrot.slane %v2950_v5, 4  ;;  %v2943_v16 = vsel %vm2056_vm7, %v2941_v41, 0.0  ;;  %v2508_v46 = vadd.f32 %v4869_v34, %v2476_v45  ;;  %v3228_v41 = vld [vmem:[%s4959_s10 + $0x4] sm:$0x7] }
 0x3a0   :  { %v2122_v42 = vrot.slane %v2121_v13, 1  ;;  %v2541_v60 = vadd.f32 %v2540_v57, %v2539_v40  ;;  %v2533_v26 = vrot.slane %v2532_v27, 2  ;;  %v2944_v31 = vrot.slane %v2943_v16, 4  ;;  %v2959_v40 = vld [vmem:[%s4959_s10] sm:$0x7] }
 0x3a1   :  { %v2952_v0 = vadd.f32 %v2951_v14, %v2950_v5  ;;  %v2096_v61 = vadd.f32 %v4861_v9, %v2070_v29  ;;  %v2130_v24 = vadd.f32 %v2129_v35, %v2128_v21  ;;  %v2507_v44 = vadd.f32 %v2506_v56, %v4856_v32  ;;  %v3229_v29 = vld [vmem:[%s4959_s10 + $0x8] sm:$0x7] }
 0x3a2   :  { %v2534_v6 = vadd.f32 %v2533_v26, %v2532_v27  ;;  %v2945_v54 = vadd.f32 %v2944_v31, %v2943_v16  ;;  %v2123_v63 = vadd.f32 %v2122_v42, %v2121_v13  ;;  %v2542_v36 = vrot.slane %v2541_v60, 1 }
 0x3a3   :  { %v2953_v20 = vrot.slane %v2952_v0, 2  ;;  %v2919_v9 = vrot.slane %v4872_v1, 1  ;;  %v2913_v37 = vadd.f32 %v2912_v52, %v4874_v33  ;;  %v2132_v43 = vadd.f32 %v2130_v24, %v2096_v61 }
 0x3a4   :  { %v2535_v3 = vrot.slane %v2534_v6, 1  ;;  %v2946_v55 = vrot.slane %v2945_v54, 2  ;;  %v2131_v8 = vadd.f32 %v2123_v63, %v2095_v51  ;;  %v2543_v50 = vadd.f32 %v2542_v36, %v2541_v60 }
 0x3a5   :  { %v2954_v15 = vadd.f32 %v2953_v20, %v2952_v0  ;;  %v2896_v47 = vadd.f32 %v2895_v38, %v2894_v59  ;;  %v2509_v30 = vadd.f32 %v2507_v44, %v2483_v22  ;;  %v2921_v53 = vadd.f32 %v2913_v37, %v2889_v48  ;;  %v3230_v59 = vld [vmem:[%s4959_s10 + $0xc] sm:$0x7] }
 0x3a6   :  { %v2947_v39 = vadd.f32 %v2946_v55, %v2945_v54  ;;  %2990 = vbcast.lane.b32.xlu1 %v2131_v8, 256  ;;  %v2536_v62 = vadd.f32 %v2535_v3, %v2534_v6  ;;  %v2920_v51 = vadd.f32 %v2919_v9, %v4872_v1 }
 0x3a7   :  { %v2955_v12 = vrot.slane %v2954_v15, 1  ;;  %v2545_v11 = vadd.f32 %v2543_v50, %v2509_v30 }
 0x3a8   :  { %v2948_v58 = vrot.slane %v2947_v39, 1  ;;  %v2544_v7 = vadd.f32 %v2536_v62, %v2508_v46  ;;  %v2922_v56 = vadd.f32 %v2920_v51, %v2896_v47 }
 0x3a9   :  { %v2956_v32 = vadd.f32 %v2955_v12, %v2954_v15 }
 0x3aa   :  { %2993 = vbcast.lane.b32.xlu1 %v2132_v43, 256  ;;  %3016 = vbcast.lane.b32.xlu0 %v2544_v7, 256  ;;  %v2949_v34 = vadd.f32 %v2948_v58, %v2947_v39 }
 0x3ab   :  { %v2958_v33 = vadd.f32 %v2956_v32, %v2922_v56  ;;  %v2968_v25 = vpop.permute.xlu0 %2967 }
 0x3ac   :  { %v2957_v17 = vadd.f32 %v2949_v34, %v2921_v53  ;;  %v2971_v5 = vmul.f32 %v2968_v25, %v2959_v40 }
 0x3ad   :  { %v2963_v4 = vpop.permute.xlu1 %2962 }
 0x3ae   :  { %3019 = vbcast.lane.b32.xlu1 %v2545_v11, 256  ;;  %3042 = vbcast.lane.b32.xlu0 %v2957_v17, 256  ;;  %v2970_v28 = vmul.f32 %v2963_v4, %v2959_v40  ;;  %v2980_v19 = vsel %vm2972_vm9, %v2971_v5, 0.0 }
 0x3af   :  { %v2981_v35 = vrot.slane %v2980_v19, 4 }
 0x3b0   :  { %v2973_v21 = vsel %vm2972_vm9, %v2970_v28, 0.0 }
 0x3b1   :  { %v2974_v1 = vrot.slane %v2973_v21, 4  ;;  %v2982_v0 = vadd.f32 %v2981_v35, %v2980_v19 }
 0x3b2   :  { %3045 = vbcast.lane.b32.xlu1 %v2958_v33, 256 }
 0x3b3   :  { %v2975_v27 = vadd.f32 %v2974_v1, %v2973_v21  ;;  %v2983_v38 = vrot.slane %v2982_v0, 2 }
 0x3b5   :  { %v2976_v45 = vrot.slane %v2975_v27, 2  ;;  %v2984_v47 = vadd.f32 %v2983_v38, %v2982_v0 }
 0x3b7   :  { %v2977_v3 = vadd.f32 %v2976_v45, %v2975_v27  ;;  %v2985_v28 = vrot.slane %v2984_v47, 1 }
 0x3b9   :  { %v2978_v12 = vrot.slane %v2977_v3, 1 }
 0x3bb   :  { %v2979_v33 = vadd.f32 %v2978_v12, %v2977_v3 }
 0x418   :  { %v2991_v13 = vpop.permute.xlu1 %2990 }
 0x419   :  { %v2995_v57 = vmul.f32 %v3228_v41, %v2991_v13 }
 0x41b   :  { %v2997_v14 = vsel %vm2972_vm9, %v2995_v57, 0.0 }
 0x41c   :  { %v2998_v16 = vrot.slane %v2997_v14, 4  ;;  %v3017_v42 = vpop.permute.xlu0 %3016  ;;  %v2994_v60 = vpop.permute.xlu1 %2993 }
 0x41d   :  { %v3021_v26 = vmul.f32 %v3229_v29, %v3017_v42  ;;  %v2996_v31 = vmul.f32 %v3228_v41, %v2994_v60 }
 0x41e   :  { %v2999_v10 = vadd.f32 %v2998_v16, %v2997_v14 }
 0x41f   :  { %v3023_v49 = vsel %vm2972_vm9, %v3021_v26, 0.0  ;;  %v3004_v6 = vsel %vm2972_vm9, %v2996_v31, 0.0  ;;  %v3071_v31 = vld [vmem:[%s4957_s8] sm:$0x7] }
 0x420   :  { %v3000_v54 = vrot.slane %v2999_v10, 2  ;;  %v3024_v63 = vrot.slane %v3023_v49, 4  ;;  %v3005_v52 = vrot.slane %v3004_v6, 4  ;;  %v3043_v20 = vpop.permute.xlu0 %3042  ;;  %v3020_v61 = vpop.permute.xlu1 %3019 }
 0x421   :  { %v3047_v24 = vmul.f32 %v3230_v59, %v3043_v20  ;;  %v3022_v36 = vmul.f32 %v3229_v29, %v3020_v61  ;;  %v2986_v29 = vadd.f32 %v2985_v28, %v2984_v47 }
 0x422   :  { %v3001_v55 = vadd.f32 %v3000_v54, %v2999_v10  ;;  %v3025_v8 = vadd.f32 %v3024_v63, %v3023_v49  ;;  %v3006_v22 = vadd.f32 %v3005_v52, %v3004_v6  ;;  %v3072_v63 = vld [vmem:[%s4957_s8 + $0x4] sm:$0x7]  ;;  %s3503_s8 = smov [#allocation2]  }
 0x423   :  { %v3049_v15 = vsel %vm2972_vm9, %v3047_v24, 0.0  ;;  %v3030_v48 = vsel %vm2972_vm9, %v3022_v36, 0.0  ;;  %s3174_s4 = sshll.u32 %s3503_s8, 4  ;;  %s3175_s4 = int_to_ptr.vmem [resolvable:$true] %s3174_s4 }
 0x424   :  { %v3002_v39 = vrot.slane %v3001_v55, 1  ;;  %v3026_v46 = vrot.slane %v3025_v8, 2  ;;  %v3007_v62 = vrot.slane %v3006_v22, 2  ;;  %v3050_v44 = vrot.slane %v3049_v15, 4  ;;  %v3046_v9 = vpop.permute.xlu1 %3045  ;;  %s3477_s27 = scalar_lea.vmem %s3175_s4, 32  ;;  %p3482_p1 = scmp.lt.s32.totalorder %s3175_s4, %s3175_s4 }
 0x425   :  { %v3031_v37 = vrot.slane %v3030_v48, 4  ;;  %v3048_v43 = vmul.f32 %v3230_v59, %v3046_v9  ;;  %p3478_p0 = scmp.ne.s32.totalorder %s3175_s4, %s3477_s27  ;;  %p3483_p2 = scmp.lt.s32.totalorder %s3477_s27, %s3477_s27 }
 0x426   :  { %v3027_v58 = vadd.f32 %v3026_v46, %v3025_v8  ;;  %v3008_v7 = vadd.f32 %v3007_v62, %v3006_v22  ;;  %v3051_v50 = vadd.f32 %v3050_v44, %v3049_v15  ;;  %v3003_v34 = vadd.f32 %v3002_v39, %v3001_v55 }
 0x427   :  { %v3032_v30 = vadd.f32 %v3031_v37, %v3030_v48  ;;  %v3056_v53 = vsel %vm2972_vm9, %v3048_v43, 0.0  ;;  %p3484_p3 = por %p3483_p2, %p3482_p1 }
 0x428   :  { %v3028_v51 = vrot.slane %v3027_v58, 1  ;;  %v3052_v11 = vrot.slane %v3051_v50, 2  ;;  %v3009_v17 = vrot.slane %v3008_v7, 1  ;;  %v3057_v56 = vrot.slane %v3056_v53, 4 }
 0x429   :  { %v3033_v32 = vrot.slane %v3032_v30, 2  ;;  %v3011_v5 = vadd.f32 %v3003_v34, %v2979_v33  ;;  %p3485_p4 = pnand %p3484_p3, %p3478_p0 }
 0x42a   :  { %v3029_v40 = vadd.f32 %v3028_v51, %v3027_v58  ;;  %v3053_v4 = vadd.f32 %v3052_v11, %v3051_v50  ;;  %v3058_v21 = vadd.f32 %v3057_v56, %v3056_v53  ;;  %v3010_v41 = vadd.f32 %v3009_v17, %v3008_v7 }
 0x42b   :  { %v3034_v25 = vadd.f32 %v3033_v32, %v3032_v30 }
 0x42c   :  { %v3054_v1 = vrot.slane %v3053_v4, 1  ;;  %v3059_v13 = vrot.slane %v3058_v21, 2  ;;  %v3037_v57 = vadd.f32 %v3029_v40, %v3011_v5  ;;  %v3012_v42 = vadd.f32 %v3010_v41, %v2986_v29 }
 0x42d   :  { %v3035_v19 = vrot.slane %v3034_v25, 1 }
 0x42e   :  { %v3055_v27 = vadd.f32 %v3054_v1, %v3053_v4  ;;  %v3060_v14 = vadd.f32 %v3059_v13, %v3058_v21 }
 0x42f   :  { %v3036_v35 = vadd.f32 %v3035_v19, %v3034_v25 }
 0x430   :  { %v3063_v16 = vadd.f32 %v3055_v27, %v3037_v57  ;;  %v3061_v60 = vrot.slane %v3060_v14, 1 }
 0x431   :  { %v3038_v45 = vadd.f32 %v3036_v35, %v3012_v42 }
 0x432   :  { %vm3065_vm10 = vcmp.ge.f32.partialorder %v3063_v16, 0.0  ;;  %v3067_v26 = vmul.f32 0.01, %v3063_v16  ;;  %v3062_v10 = vadd.f32 %v3061_v60, %v3060_v14 }
 0x434   :  { %v3069_v59 = vsel %vm3065_vm10, %v3063_v16, %v3067_v26  ;;  %v3064_v49 = vadd.f32 %v3062_v10, %v3038_v45 }
 0x435   :  { %v3073_v0 = vmul.f32 %v3071_v31, %v3069_v59 }
 0x436   :  { %vm3066_vm11 = vcmp.ge.f32.partialorder %v3064_v49, 0.0  ;;  %v3068_v54 = vmul.f32 0.01, %v3064_v49 }
 0x437   :  { %v3075_v6 = vsel %vm2972_vm9, %v3073_v0, 0.0 }
 0x438   :  { %3076 = vadd.xlane.f32.xlu0 %v3075_v6  ;;  %v3070_v52 = vsel %vm3066_vm11, %v3064_v49, %v3068_v54 }
 0x439   :  { %v3074_v20 = vmul.f32 %v3072_v63, %v3070_v52 }
 0x43b   :  { %v3078_v61 = vsel %vm2972_vm9, %v3074_v20, 0.0 }
 0x43c   :  { %3079 = vadd.xlane.f32.xlu1 %v3078_v61 }
 0x4c5   :  { %v3077_v24 = vpop.xlane.xlu0 %3076 }
 0x4c6   :  { %v3086_v3 = vrot.slane %v3077_v24, %v5135_v18 }
 0x4c9   :  { %v3080_v36 = vpop.xlane.xlu1 %3079 }
 0x4ca   :  { %v3090_v55 = vrot.slane %v3080_v36, %v5135_v18 }
 0x4cc   :  { %v3091_v8 = vsel %vm170_vm8, %v3090_v55, %v3086_v3 }
 0x4cd   :  { %v3093_v22 = vsel %vm5148_vm12, %v3091_v8, -inf }
 0x4ce   :  { %3094 = vmax.xlane.f32.xlu0 %v3093_v22 }
 0x55b   :  { %v3095_v38 = vpop.xlane.xlu0 %3094 }
 0x55c   :  { %v3100_v15 = vrot.slane %v3095_v38, %v3772_v2  ;;  %v3104_v48 = vrot.slane %v3095_v38, %v5139_v23 }
 0x55e   :  { %v3107_v39 = vsub.f32 %v3077_v24, %v3100_v15  ;;  %v3108_v46 = vsub.f32 %v3080_v36, %v3104_v48 }
 0x560   :  { %v3109_v62 = vmul.f32 1.442695, %v3107_v39  ;;  %v3111_v44 = vmul.f32 1.442695, %v3108_v46 }
 0x562   :  { %3462 = vpow2.f32 %v3109_v62 }
 0x563   :  { %3464 = vpow2.f32 %v3111_v44 }
 0x56c   :  { %v3463_v9 = vpop.eup %3462 }
 0x56d   :  { %v3465_v37 = vpop.eup %3464  ;;  %3116 = vperm.xlu0 %3331, %v3463_v9  }
 0x56e   :  { %3119 = vperm.xlu1 %3330, %v3465_v37  }
 0x5ec   :  { %v3117_v43 = vpop.permute.xlu0 %3116 }
 0x5ed   :  { %v3120_v12 = vpop.permute.xlu1 %3119  ;;  %v3124_v58 = vrot.slane %v3117_v43, %v5135_v18 }
 0x5ee   :  { %v3128_v7 = vrot.slane %v3120_v12, %v5135_v18 }
 0x5f0   :  { %v3129_v50 = vsel %vm170_vm8, %v3128_v7, %v3124_v58 }
 0x5f1   :  { %v3131_v47 = vsel %vm5149_vm13, %v3129_v50, 0.0 }
 0x5f2   :  { %3132 = vadd.xlane.f32.xlu1 %v3131_v47 }
 0x67f   :  { %v3133_v30 = vpop.xlane.xlu1 %3132 }
 0x680   :  { %v3138_v53 = vrot.slane %v3133_v30, %v3772_v2  ;;  %v3142_v34 = vrot.slane %v3133_v30, %v5139_v23 }
 0x682   :  { %3466 = vrcp.f32 %v3138_v53 }
 0x683   :  { %3468 = vrcp.f32 %v3142_v34 }
 0x68c   :  { %v3467_v51 = vpop.eup %3466 }
 0x68d   :  { %v3146_v11 = vmul.f32 %v3467_v51, %v3463_v9  ;;  %v3469_v17 = vpop.eup %3468 }
 0x68e   :  { %v3148_v32 = vmul.f32 %v3469_v17, %v3465_v37 }
 0x68f   :  { %3152 = vperm.xlu0 %3331, %v3146_v11  }
 0x693   :  { %3155 = vperm.xlu0 %3331, %v3148_v32  }
 0x70e   :  { %v3153_v56 = vpop.permute.xlu0 %3152 }
 0x70f   :  { %v3160_v40 = vrot.slane %v3153_v56, %v5135_v18 }
 0x712   :  { %v3156_v33 = vpop.permute.xlu0 %3155 }
 0x713   :  { %v3164_v4 = vrot.slane %v3156_v33, %v5135_v18 }
 0x715   :  { %v3165_v2 = vsel %vm170_vm8, %v3164_v4, %v3160_v40 }
 0x716   :  { %3167 = vst.msk [vmem:[#allocation2] sm:$0x3] %vm5150_vm6, %v3165_v2 }
 0x717   :  { %3488 = shalt.err (!%p3485_p4)
}
 0x718   :  { %s3489_s30 = scalar_lea.hbm %s4962_s13, 32 }
 0x719   :  { %p3490_p5 = scmp.ne.s32.totalorder %s4962_s13, %s3489_s30  ;;  %p3493_p6 = scmp.lt.u32.totalorder %s3489_s30, %s4962_s13 }
 0x71b   :  { %p3495_p7 = pnand %p3493_p6, %p3490_p5 }
 0x71d   :  { %3498 = shalt.err (!%p3495_p7)
}
 0x71e   :  { %3177 = dma.vmem_to_hbm [thread:$0]  %s3175_s4, 32, %s4962_s13, [#allocation3]  }
 0x71f   :  { %3499 = dma.done.wait [#allocation3], 32  }
 0x720   :  { %3500 = vsyncadd [#allocation3], 4294967264 }
 0x721   :  { %3181 = vsyncpa [#allocation3], 1 }

</bundles_post_ra>
